<compile_context>
chip_gen: v7x
topology: tpu7x:2x2x1
jax: 0.10.0
libtpu: 0.0.40
codegen_flags: <defaults>
</compile_context>

<pallas_src>
import functools

import jax
import jax.numpy as jnp
from jax.experimental import pallas as pl
from jax.experimental.pallas import tpu as pltpu

BN_EPS = 1e-5
_PAD_W0 = 8   # 8-aligned sublane offset of the data interior inside the padded
              # VMEM scratch; the left halo column sits at col _PAD_W0 - 1.


# ---------------------------------------------------------------------------
# Fused kernel body
# ---------------------------------------------------------------------------
def _fused_wide_block_kernel(*refs, stride, hin, win, ho, wo, cin, planes,
                             has_shortcut):
    if has_shortcut:
        (x_ref, r1_ref, a1_ref, b1_ref, r2_ref, a2_ref,
         rsc_ref, asc_ref, bsc_ref,
         w1_ref, w2_ref, wsc_ref,
         out_ref, xpad_sc, hpad_sc) = refs
    else:
        (x_ref, r1_ref, a1_ref, b1_ref, r2_ref, a2_ref,
         asc_ref, bsc_ref,
         w1_ref, w2_ref,
         out_ref, xpad_sc, hpad_sc) = refs
        rsc_ref = wsc_ref = None

    spb = x_ref.shape[0]
    m1 = spb * hin * win
    m2 = spb * ho * wo

    # Fresh zero halo every step: grid steps are fully independent, so the
    # batch axis is safe to shard across TensorCores ("parallel").
    xpad_sc[...] = jnp.zeros_like(xpad_sc)
    hpad_sc[...] = jnp.zeros_like(hpad_sc)

    x = x_ref[...].astype(jnp.float32)                        # (S, H, W, Cin)

    # ---- conv1 (3x3, stride 1, pad 1): BatchEnsemble R folded into the
    #      padded operand; S1 * bn1_scale / bn1_shift applied post-matmul. ----
    xpad_sc[:, 1:hin + 1, _PAD_W0:_PAD_W0 + win, :] = (
        x * r1_ref[...][:, None, :, :])
    xp = xpad_sc[...]
    acc1 = jnp.zeros((m1, planes), jnp.float32)
    for dy in range(3):
        for dx in range(3):
            c0 = _PAD_W0 - 1 + dx
            winv = xp[:, dy:dy + hin, c0:c0 + win, :]
            acc1 = acc1 + jnp.dot(
                winv.reshape(m1, cin).astype(jnp.bfloat16),    # bf16 -> MXU
                w1_ref[dy * 3 + dx],
                preferred_element_type=jnp.float32)

    h = acc1.reshape(spb, hin * win, planes)
    h = jnp.maximum(h * a1_ref[...] + b1_ref[...], 0.0)        # bn1+relu (dropout=id)
    h = h * r2_ref[...]                                        # conv2's R factor
    hpad_sc[:, 1:hin + 1, _PAD_W0:_PAD_W0 + win, :] = (
        h.reshape(spb, hin, win, planes))

    # ---- conv2 (3x3, stride, pad 1) -----------------------------------------
    hp = hpad_sc[...]
    acc2 = jnp.zeros((m2, planes), jnp.float32)
    for dy in range(3):
        for dx in range(3):
            c0 = _PAD_W0 - 1 + dx
            if stride == 1:
                w2in = hp[:, dy:dy + ho, c0:c0 + wo, :]
            else:
                w2in = jax.lax.slice(
                    hp, (0, dy, c0, 0),
                    (spb, dy + (ho - 1) * stride + 1,
                     c0 + (wo - 1) * stride + 1, planes),
                    (1, stride, stride, 1))
            acc2 = acc2 + jnp.dot(
                w2in.reshape(m2, planes).astype(jnp.bfloat16),
                w2_ref[dy * 3 + dx],
                preferred_element_type=jnp.float32)
    y = acc2.reshape(spb, ho * wo, planes) * a2_ref[...]       # s2 * bn2_scale

    # ---- shortcut ------------------------------------------------------------
    if has_shortcut:
        xs = x * rsc_ref[...][:, None, :, :]
        if stride > 1:
            xs = jax.lax.slice(
                xs, (0, 0, 0, 0),
                (spb, (ho - 1) * stride + 1, (wo - 1) * stride + 1, cin),
                (1, stride, stride, 1))
        sc = jnp.dot(xs.reshape(m2, cin).astype(jnp.bfloat16), wsc_ref[...],
                     preferred_element_type=jnp.float32)
        sc = sc.reshape(spb, ho * wo, planes)
    else:
        sc = x.reshape(spb, ho * wo, planes)                   # identity
    y = y + sc * asc_ref[...] + bsc_ref[...]                   # + bn2 shift/bias

    out_ref[...] = jnp.maximum(y, 0.0).reshape(spb, ho, wo, planes)


# ---------------------------------------------------------------------------
# Helpers
# ---------------------------------------------------------------------------
def _fold_bn(gamma, beta, mean, var):
    scale = gamma * jax.lax.rsqrt(var + BN_EPS)
    shift = beta - mean * scale
    return scale, shift


def _pick_samples_per_block(n, out_pixels, requested=None):
    """Pick samples/grid-step so the matmul M dim is ~512 (MXU-friendly)."""
    if requested is not None:
        assert n % requested == 0
        return requested
    target = max(1, 512 // max(1, out_pixels))
    spb = max(1, min(target, n))
    while n % spb:
        spb -= 1
    return spb


# ---------------------------------------------------------------------------
# Module
# ---------------------------------------------------------------------------
class WideBasicBlockPallas:
    def __init__(self, in_planes, planes, dropout_rate, stride=1,
                 num_estimators=4, groups=1, *, key):
        assert groups == 1  # TODO(synk): groups > 1 not implemented
        self.in_planes = in_planes
        self.planes = planes
        self.stride = stride
        self.num_estimators = num_estimators
        self.dropout_rate = dropout_rate  # identity in eval mode
        self.has_shortcut = (stride != 1) or (in_planes != planes)

        ks = iter(jax.random.split(key, 24))
        nrm = lambda shape, scale=0.1: scale * jax.random.normal(next(ks), shape, jnp.float32)
        uni = lambda shape, lo, hi: jax.random.uniform(next(ks), shape, jnp.float32, lo, hi)

        E = num_estimators
        # conv1: BatchConv2d(in_planes, planes, 3, padding=1, bias=False)
        self.w1 = nrm((planes, in_planes, 3, 3))            # OIHW (torch layout)
        self.r1 = 1.0 + nrm((E, in_planes))
        self.s1 = 1.0 + nrm((E, planes))
        # bn1
        self.bn1_g = uni((planes,), 0.8, 1.2)
        self.bn1_b = nrm((planes,))
        self.bn1_m = nrm((planes,))
        self.bn1_v = uni((planes,), 0.5, 1.5)
        # conv2: BatchConv2d(planes, planes, 3, stride, padding=1, bias=False)
        self.w2 = nrm((planes, planes, 3, 3))
        self.r2 = 1.0 + nrm((E, planes))
        self.s2 = 1.0 + nrm((E, planes))
        # shortcut: BatchConv2d(in_planes, planes, 1, stride, bias=True)
        if self.has_shortcut:
            self.w_sc = nrm((planes, in_planes, 1, 1))
            self.r_sc = 1.0 + nrm((E, in_planes))
            self.s_sc = 1.0 + nrm((E, planes))
            self.b_sc = nrm((E, planes))
        # bn2
        self.bn2_g = uni((planes,), 0.8, 1.2)
        self.bn2_b = nrm((planes,))
        self.bn2_m = nrm((planes,))
        self.bn2_v = uni((planes,), 0.5, 1.5)

    # --- helpers -----------------------------------------------------------
    def _expand(self, g, n):
        """(E, C) ensemble factors -> (N, 1, C) rows (repeat_interleave + tail cat)."""
        reps = n // self.num_estimators
        extra = n % self.num_estimators
        out = jnp.repeat(g, reps, axis=0)
        if extra:
            out = jnp.concatenate([out, out[:extra]], axis=0)
        return out[:, None, :]

    # --- forward ------------------------------------------------------------
    def forward_nhwc(self, x_nhwc, samples_per_block=None):
        """NHWC in / NHWC out (use this to chain blocks without transposes)."""
        n, h_in, w_in, cin = x_nhwc.shape
        assert cin == self.in_planes
        planes, stride = self.planes, self.stride
        ho = (h_in - 1) // stride + 1
        wo = (w_in - 1) // stride + 1
        spb = _pick_samples_per_block(n, ho * wo, samples_per_block)

        x = x_nhwc.astype(jnp.float32)

        bn1_sc, bn1_sh = _fold_bn(self.bn1_g, self.bn1_b, self.bn1_m, self.bn1_v)
        bn2_sc, bn2_sh = _fold_bn(self.bn2_g, self.bn2_b, self.bn2_m, self.bn2_v)

        # Per-sample folded affine factors (BatchEnsemble S folded into BN).
        r1e = self._expand(self.r1, n)                                   # (N,1,Cin)
        a1e = self._expand(self.s1, n) * bn1_sc[None, None, :]           # (N,1,P)
        b1e = jnp.broadcast_to(bn1_sh[None, None, :], (n, 1, planes))
        r2e = self._expand(self.r2, n)
        a2e = self._expand(self.s2, n) * bn2_sc[None, None, :]
        if self.has_shortcut:
            rsce = self._expand(self.r_sc, n)
            asce = self._expand(self.s_sc, n) * bn2_sc[None, None, :]
            bsce = (self._expand(self.b_sc, n) * bn2_sc[None, None, :]
                    + bn2_sh[None, None, :])
        else:
            asce = jnp.broadcast_to(bn2_sc[None, None, :], (n, 1, planes))
            bsce = jnp.broadcast_to(bn2_sh[None, None, :], (n, 1, planes))

        # Weights, bf16 (tap-major for the 3x3 convs).
        w1_9 = jnp.transpose(self.w1, (2, 3, 1, 0)).reshape(
            9, cin, planes).astype(jnp.bfloat16)
        w2_9 = jnp.transpose(self.w2, (2, 3, 1, 0)).reshape(
            9, planes, planes).astype(jnp.bfloat16)

        def vspec(c):
            return pl.BlockSpec((spb, 1, c), lambda i: (i, 0, 0))

        inputs = [x, r1e, a1e, b1e, r2e, a2e]
        specs = [pl.BlockSpec((spb, h_in, w_in, cin), lambda i: (i, 0, 0, 0)),
                 vspec(cin), vspec(planes), vspec(planes), vspec(planes),
                 vspec(planes)]
        if self.has_shortcut:
            inputs.append(rsce)
            specs.append(vspec(cin))
        inputs += [asce, bsce]
        specs += [vspec(planes), vspec(planes)]
        inputs += [w1_9, w2_9]
        specs += [pl.BlockSpec((9, cin, planes), lambda i: (0, 0, 0)),
                  pl.BlockSpec((9, planes, planes), lambda i: (0, 0, 0))]
        if self.has_shortcut:
            wsc2d = jnp.transpose(self.w_sc[:, :, 0, 0], (1, 0)).astype(jnp.bfloat16)
            inputs.append(wsc2d)
            specs.append(pl.BlockSpec((cin, planes), lambda i: (0, 0)))

        kernel = functools.partial(
            _fused_wide_block_kernel, stride=stride, hin=h_in, win=w_in,
            ho=ho, wo=wo, cin=cin, planes=planes,
            has_shortcut=self.has_shortcut)

        flops = 2 * n * (h_in * w_in * 9 * cin * planes
                         + ho * wo * 9 * planes * planes
                         + (ho * wo * cin * planes if self.has_shortcut else 0))
        bytes_accessed = (int(x.size) + n * ho * wo * planes) * 4 \
            + 2 * (int(w1_9.size) + int(w2_9.size)) \
            + 4 * n * (cin + 6 * planes)

        out = pl.pallas_call(
            kernel,
            out_shape=jax.ShapeDtypeStruct((n, ho, wo, planes), jnp.float32),
            grid=(n // spb,),
            in_specs=specs,
            out_specs=pl.BlockSpec((spb, ho, wo, planes),
                                   lambda i: (i, 0, 0, 0)),
            scratch_shapes=[
                pltpu.VMEM((spb, h_in + 2, w_in + 9, cin), jnp.float32),
                pltpu.VMEM((spb, h_in + 2, w_in + 9, planes), jnp.float32),
            ],
            compiler_params=pltpu.CompilerParams(
                dimension_semantics=("parallel",),
                vmem_limit_bytes=48 * 1024 * 1024),
            cost_estimate=pl.CostEstimate(
                flops=flops, transcendentals=0, bytes_accessed=bytes_accessed),
        )(*inputs)
        return out

    def __call__(self, x_nchw, samples_per_block=None):
        # PyTorch-style NCHW boundary; prefer forward_nhwc when chaining blocks.
        x = jnp.transpose(x_nchw, (0, 2, 3, 1))
        out = self.forward_nhwc(x, samples_per_block)
        return jnp.transpose(out, (0, 3, 1, 2))


# ---------------------------------------------------------------------------
# Pure-JAX reference (NCHW, lax.conv, f32 HIGHEST) for correctness checking
# ---------------------------------------------------------------------------
def reference_forward(blk, x_nchw):
    n = x_nchw.shape[0]

    def expand(g):
        reps = n // blk.num_estimators
        extra = n % blk.num_estimators
        out = jnp.repeat(g, reps, axis=0)
        if extra:
            out = jnp.concatenate([out, out[:extra]], axis=0)
        return out

    def be_conv(x, w, r_g, s_g, b_g, stride, padding):
        r = expand(r_g)[:, :, None, None]
        s = expand(s_g)[:, :, None, None]
        y = jax.lax.conv_general_dilated(
            x * r, w, (stride, stride), [(padding, padding)] * 2,
            dimension_numbers=("NCHW", "OIHW", "NCHW"),
            precision=jax.lax.Precision.HIGHEST)
        y = y * s
        if b_g is not None:
            y = y + expand(b_g)[:, :, None, None]
        return y

    def bn(x, g, b, m, v):
        sc = (g / jnp.sqrt(v + BN_EPS))[None, :, None, None]
        return (x - m[None, :, None, None]) * sc + b[None, :, None, None]

    out = jax.nn.relu(bn(be_conv(x_nchw, blk.w1, blk.r1, blk.s1, None, 1, 1),
                         blk.bn1_g, blk.bn1_b, blk.bn1_m, blk.bn1_v))
    out = be_conv(out, blk.w2, blk.r2, blk.s2, None, blk.stride, 1)
    if blk.has_shortcut:
        sc = be_conv(x_nchw, blk.w_sc, blk.r_sc, blk.s_sc, blk.b_sc, blk.stride, 0)
    else:
        sc = x_nchw
    out = out + sc
    return jax.nn.relu(bn(out, blk.bn2_g, blk.bn2_b, blk.bn2_m, blk.bn2_v))


# ---------------------------------------------------------------------------
if __name__ == "__main__":
    key = jax.random.PRNGKey(0)
    k1, k2, kx1, kx2 = jax.random.split(key, 4)

    # Config A: projection shortcut (in_planes != planes), stride 1.
    blk_a = WideBasicBlockPallas(8, 16, dropout_rate=0.0, stride=1,
                                 num_estimators=4, key=k1)
    xa = jax.random.normal(kx1, (8, 8, 16, 16), jnp.float32)     # NCHW
    out_a = jax.block_until_ready(blk_a(xa))
    ref_a = jax.block_until_ready(reference_forward(blk_a, xa))
    assert out_a.shape == (8, 16, 16, 16), out_a.shape
    assert bool(jnp.all(jnp.isfinite(out_a)))
    err_a = float(jnp.max(jnp.abs(out_a - ref_a)))
    # bf16 matmul operands (f32 accumulation) -> tolerance loosened vs pure f32.
    assert jnp.allclose(out_a, ref_a, rtol=5e-2, atol=5e-2), f"max_err={err_a}"

    # Config B: identity shortcut (in_planes == planes), stride 1, ragged batch
    # (N % num_estimators != 0 exercises the repeat_interleave + tail-cat path).
    blk_b = WideBasicBlockPallas(16, 16, dropout_rate=0.0, stride=1,
                                 num_estimators=4, key=k2)
    xb = jax.random.normal(kx2, (6, 16, 16, 16), jnp.float32)    # NCHW
    out_b = jax.block_until_ready(blk_b(xb))
    ref_b = jax.block_until_ready(reference_forward(blk_b, xb))
    assert out_b.shape == (6, 16, 16, 16), out_b.shape
    assert bool(jnp.all(jnp.isfinite(out_b)))
    err_b = float(jnp.max(jnp.abs(out_b - ref_b)))
    assert jnp.allclose(out_b, ref_b, rtol=5e-2, atol=5e-2), f"max_err={err_b}"

    print("KERNEL_OK")
</pallas_src>

<mosaic_0001>
module attributes {stable_mosaic.version = 11 : i64} {
  func.func @_fused_wide_block_kernel(%arg0: i32, %arg1: memref<2x16x16x8xf32, #tpu.memory_space<vmem>>, %arg2: memref<2x1x8xf32, #tpu.memory_space<vmem>>, %arg3: memref<2x1x16xf32, #tpu.memory_space<vmem>>, %arg4: memref<2x1x16xf32, #tpu.memory_space<vmem>>, %arg5: memref<2x1x16xf32, #tpu.memory_space<vmem>>, %arg6: memref<2x1x16xf32, #tpu.memory_space<vmem>>, %arg7: memref<2x1x8xf32, #tpu.memory_space<vmem>>, %arg8: memref<2x1x16xf32, #tpu.memory_space<vmem>>, %arg9: memref<2x1x16xf32, #tpu.memory_space<vmem>>, %arg10: memref<9x8x16xbf16, #tpu.memory_space<vmem>>, %arg11: memref<9x16x16xbf16, #tpu.memory_space<vmem>>, %arg12: memref<8x16xbf16, #tpu.memory_space<vmem>>, %arg13: memref<2x16x16x16xf32, #tpu.memory_space<vmem>>, %arg14: memref<2x18x25x8xf32, #tpu.memory_space<vmem>>, %arg15: memref<2x18x25x16xf32, #tpu.memory_space<vmem>>) attributes {dimension_semantics = [#tpu.dimension_semantics<parallel>], iteration_bounds = array<i64: 4>, scalar_prefetch = 0 : i64, scratch_operands = 2 : i64, tpu.core_type = #tpu.core_type<tc>, window_params = [{transform_indices = @transform_0, window_bounds = array<i64: 2, 16, 16, 8>}, {transform_indices = @transform_1, window_bounds = array<i64: 2, 1, 8>}, {transform_indices = @transform_2, window_bounds = array<i64: 2, 1, 16>}, {transform_indices = @transform_3, window_bounds = array<i64: 2, 1, 16>}, {transform_indices = @transform_4, window_bounds = array<i64: 2, 1, 16>}, {transform_indices = @transform_5, window_bounds = array<i64: 2, 1, 16>}, {transform_indices = @transform_6, window_bounds = array<i64: 2, 1, 8>}, {transform_indices = @transform_7, window_bounds = array<i64: 2, 1, 16>}, {transform_indices = @transform_8, window_bounds = array<i64: 2, 1, 16>}, {pipeline_mode = #tpu.pipeline_mode<synchronous>, transform_indices = @transform_9, window_bounds = array<i64: 9, 8, 16>}, {pipeline_mode = #tpu.pipeline_mode<synchronous>, transform_indices = @transform_10, window_bounds = array<i64: 9, 16, 16>}, {pipeline_mode = #tpu.pipeline_mode<synchronous>, transform_indices = @transform_11, window_bounds = array<i64: 8, 16>}, {transform_indices = @transform_12, window_bounds = array<i64: 2, 16, 16, 16>}]} {
    %cst = arith.constant 0.000000e+00 : f32
    %0 = vector.broadcast %cst : f32 to vector<2x18x25x8xf32>
    %c0 = arith.constant 0 : index
    %c0_0 = arith.constant 0 : index
    %c0_1 = arith.constant 0 : index
    %c0_2 = arith.constant 0 : index
    %1 = vector.load %arg14[%c0, %c0_0, %c0_1, %c0_2] : memref<2x18x25x8xf32, #tpu.memory_space<vmem>>, vector<2x18x25x8xf32>
    tpu.vector_store %arg14[%c0, %c0_0, %c0_1, %c0_2], %0 {strides = array<i32>} : memref<2x18x25x8xf32, #tpu.memory_space<vmem>>, vector<2x18x25x8xf32>,
    %cst_3 = arith.constant 0.000000e+00 : f32
    %2 = vector.broadcast %cst_3 : f32 to vector<2x18x25x16xf32>
    %c0_4 = arith.constant 0 : index
    %c0_5 = arith.constant 0 : index
    %c0_6 = arith.constant 0 : index
    %c0_7 = arith.constant 0 : index
    %3 = vector.load %arg15[%c0_4, %c0_5, %c0_6, %c0_7] : memref<2x18x25x16xf32, #tpu.memory_space<vmem>>, vector<2x18x25x16xf32>
    tpu.vector_store %arg15[%c0_4, %c0_5, %c0_6, %c0_7], %2 {strides = array<i32>} : memref<2x18x25x16xf32, #tpu.memory_space<vmem>>, vector<2x18x25x16xf32>,
    %c0_8 = arith.constant 0 : index
    %c0_9 = arith.constant 0 : index
    %c0_10 = arith.constant 0 : index
    %c0_11 = arith.constant 0 : index
    %4 = vector.load %arg1[%c0_8, %c0_9, %c0_10, %c0_11] : memref<2x16x16x8xf32, #tpu.memory_space<vmem>>, vector<2x16x16x8xf32>
    %c0_12 = arith.constant 0 : index
    %c0_13 = arith.constant 0 : index
    %c0_14 = arith.constant 0 : index
    %5 = vector.load %arg2[%c0_12, %c0_13, %c0_14] : memref<2x1x8xf32, #tpu.memory_space<vmem>>, vector<2x1x8xf32>
    %6 = vector.shape_cast %5 : vector<2x1x8xf32> to vector<2x1x1x8xf32>
    %7 = vector.broadcast %6 : vector<2x1x1x8xf32> to vector<2x16x16x8xf32>
    %8 = arith.mulf %4, %7 : vector<2x16x16x8xf32>
    %c0_15 = arith.constant 0 : index
    %c1 = arith.constant 1 : index
    %c8 = arith.constant 8 : index
    %c0_16 = arith.constant 0 : index
    %9 = vector.load %arg14[%c0_15, %c1, %c8, %c0_16] : memref<2x18x25x8xf32, #tpu.memory_space<vmem>>, vector<2x16x16x8xf32>
    tpu.vector_store %arg14[%c0_15, %c1, %c8, %c0_16], %8 {strides = array<i32>} : memref<2x18x25x8xf32, #tpu.memory_space<vmem>>, vector<2x16x16x8xf32>,
    %c0_17 = arith.constant 0 : index
    %c0_18 = arith.constant 0 : index
    %c0_19 = arith.constant 0 : index
    %c0_20 = arith.constant 0 : index
    %10 = vector.load %arg14[%c0_17, %c0_18, %c0_19, %c0_20] : memref<2x18x25x8xf32, #tpu.memory_space<vmem>>, vector<2x18x25x8xf32>
    %cst_21 = arith.constant 0.000000e+00 : f32
    %11 = vector.broadcast %cst_21 : f32 to vector<512x16xf32>
    %12 = vector.extract_strided_slice %10 {offsets = [0, 0, 7, 0], sizes = [2, 16, 16, 8], strides = [1, 1, 1, 1]} : vector<2x18x25x8xf32> to vector<2x16x16x8xf32>
    %13 = vector.shape_cast %12 : vector<2x16x16x8xf32> to vector<512x8xf32>
    %14 = arith.truncf %13 : vector<512x8xf32> to vector<512x8xbf16>
    %c0_22 = arith.constant 0 : index
    %c0_23 = arith.constant 0 : index
    %c0_24 = arith.constant 0 : index
    %15 = vector.load %arg10[%c0_22, %c0_23, %c0_24] : memref<9x8x16xbf16, #tpu.memory_space<vmem>>, vector<1x8x16xbf16>
    %16 = vector.shape_cast %15 : vector<1x8x16xbf16> to vector<8x16xbf16>
    %cst_25 = arith.constant dense<0.000000e+00> : vector<512x16xf32>
    %17 = tpu.matmul %14, %16, %cst_25 {dimension_numbers = #tpu.dot_dimension_numbers<[1], [0], [0], [1], [0, 0, 1, 1], [], []>} : vector<512x8xbf16>, vector<8x16xbf16>, vector<512x16xf32> -> vector<512x16xf32>
    %18 = arith.addf %11, %17 : vector<512x16xf32>
    %19 = vector.extract_strided_slice %10 {offsets = [0, 0, 8, 0], sizes = [2, 16, 16, 8], strides = [1, 1, 1, 1]} : vector<2x18x25x8xf32> to vector<2x16x16x8xf32>
    %20 = vector.shape_cast %19 : vector<2x16x16x8xf32> to vector<512x8xf32>
    %21 = arith.truncf %20 : vector<512x8xf32> to vector<512x8xbf16>
    %c1_26 = arith.constant 1 : index
    %c0_27 = arith.constant 0 : index
    %c0_28 = arith.constant 0 : index
    %22 = vector.load %arg10[%c1_26, %c0_27, %c0_28] : memref<9x8x16xbf16, #tpu.memory_space<vmem>>, vector<1x8x16xbf16>
    %23 = vector.shape_cast %22 : vector<1x8x16xbf16> to vector<8x16xbf16>
    %cst_29 = arith.constant dense<0.000000e+00> : vector<512x16xf32>
    %24 = tpu.matmul %21, %23, %cst_29 {dimension_numbers = #tpu.dot_dimension_numbers<[1], [0], [0], [1], [0, 0, 1, 1], [], []>} : vector<512x8xbf16>, vector<8x16xbf16>, vector<512x16xf32> -> vector<512x16xf32>
    %25 = arith.addf %18, %24 : vector<512x16xf32>
    %26 = vector.extract_strided_slice %10 {offsets = [0, 0, 9, 0], sizes = [2, 16, 16, 8], strides = [1, 1, 1, 1]} : vector<2x18x25x8xf32> to vector<2x16x16x8xf32>
    %27 = vector.shape_cast %26 : vector<2x16x16x8xf32> to vector<512x8xf32>
    %28 = arith.truncf %27 : vector<512x8xf32> to vector<512x8xbf16>
    %c2 = arith.constant 2 : index
    %c0_30 = arith.constant 0 : index
    %c0_31 = arith.constant 0 : index
    %29 = vector.load %arg10[%c2, %c0_30, %c0_31] : memref<9x8x16xbf16, #tpu.memory_space<vmem>>, vector<1x8x16xbf16>
    %30 = vector.shape_cast %29 : vector<1x8x16xbf16> to vector<8x16xbf16>
    %cst_32 = arith.constant dense<0.000000e+00> : vector<512x16xf32>
    %31 = tpu.matmul %28, %30, %cst_32 {dimension_numbers = #tpu.dot_dimension_numbers<[1], [0], [0], [1], [0, 0, 1, 1], [], []>} : vector<512x8xbf16>, vector<8x16xbf16>, vector<512x16xf32> -> vector<512x16xf32>
    %32 = arith.addf %25, %31 : vector<512x16xf32>
    %33 = vector.extract_strided_slice %10 {offsets = [0, 1, 7, 0], sizes = [2, 16, 16, 8], strides = [1, 1, 1, 1]} : vector<2x18x25x8xf32> to vector<2x16x16x8xf32>
    %34 = vector.shape_cast %33 : vector<2x16x16x8xf32> to vector<512x8xf32>
    %35 = arith.truncf %34 : vector<512x8xf32> to vector<512x8xbf16>
    %c3 = arith.constant 3 : index
    %c0_33 = arith.constant 0 : index
    %c0_34 = arith.constant 0 : index
    %36 = vector.load %arg10[%c3, %c0_33, %c0_34] : memref<9x8x16xbf16, #tpu.memory_space<vmem>>, vector<1x8x16xbf16>
    %37 = vector.shape_cast %36 : vector<1x8x16xbf16> to vector<8x16xbf16>
    %cst_35 = arith.constant dense<0.000000e+00> : vector<512x16xf32>
    %38 = tpu.matmul %35, %37, %cst_35 {dimension_numbers = #tpu.dot_dimension_numbers<[1], [0], [0], [1], [0, 0, 1, 1], [], []>} : vector<512x8xbf16>, vector<8x16xbf16>, vector<512x16xf32> -> vector<512x16xf32>
    %39 = arith.addf %32, %38 : vector<512x16xf32>
    %40 = vector.extract_strided_slice %10 {offsets = [0, 1, 8, 0], sizes = [2, 16, 16, 8], strides = [1, 1, 1, 1]} : vector<2x18x25x8xf32> to vector<2x16x16x8xf32>
    %41 = vector.shape_cast %40 : vector<2x16x16x8xf32> to vector<512x8xf32>
    %42 = arith.truncf %41 : vector<512x8xf32> to vector<512x8xbf16>
    %c4 = arith.constant 4 : index
    %c0_36 = arith.constant 0 : index
    %c0_37 = arith.constant 0 : index
    %43 = vector.load %arg10[%c4, %c0_36, %c0_37] : memref<9x8x16xbf16, #tpu.memory_space<vmem>>, vector<1x8x16xbf16>
    %44 = vector.shape_cast %43 : vector<1x8x16xbf16> to vector<8x16xbf16>
    %cst_38 = arith.constant dense<0.000000e+00> : vector<512x16xf32>
    %45 = tpu.matmul %42, %44, %cst_38 {dimension_numbers = #tpu.dot_dimension_numbers<[1], [0], [0], [1], [0, 0, 1, 1], [], []>} : vector<512x8xbf16>, vector<8x16xbf16>, vector<512x16xf32> -> vector<512x16xf32>
    %46 = arith.addf %39, %45 : vector<512x16xf32>
    %47 = vector.extract_strided_slice %10 {offsets = [0, 1, 9, 0], sizes = [2, 16, 16, 8], strides = [1, 1, 1, 1]} : vector<2x18x25x8xf32> to vector<2x16x16x8xf32>
    %48 = vector.shape_cast %47 : vector<2x16x16x8xf32> to vector<512x8xf32>
    %49 = arith.truncf %48 : vector<512x8xf32> to vector<512x8xbf16>
    %c5 = arith.constant 5 : index
    %c0_39 = arith.constant 0 : index
    %c0_40 = arith.constant 0 : index
    %50 = vector.load %arg10[%c5, %c0_39, %c0_40] : memref<9x8x16xbf16, #tpu.memory_space<vmem>>, vector<1x8x16xbf16>
    %51 = vector.shape_cast %50 : vector<1x8x16xbf16> to vector<8x16xbf16>
    %cst_41 = arith.constant dense<0.000000e+00> : vector<512x16xf32>
    %52 = tpu.matmul %49, %51, %cst_41 {dimension_numbers = #tpu.dot_dimension_numbers<[1], [0], [0], [1], [0, 0, 1, 1], [], []>} : vector<512x8xbf16>, vector<8x16xbf16>, vector<512x16xf32> -> vector<512x16xf32>
    %53 = arith.addf %46, %52 : vector<512x16xf32>
    %54 = vector.extract_strided_slice %10 {offsets = [0, 2, 7, 0], sizes = [2, 16, 16, 8], strides = [1, 1, 1, 1]} : vector<2x18x25x8xf32> to vector<2x16x16x8xf32>
    %55 = vector.shape_cast %54 : vector<2x16x16x8xf32> to vector<512x8xf32>
    %56 = arith.truncf %55 : vector<512x8xf32> to vector<512x8xbf16>
    %c6 = arith.constant 6 : index
    %c0_42 = arith.constant 0 : index
    %c0_43 = arith.constant 0 : index
    %57 = vector.load %arg10[%c6, %c0_42, %c0_43] : memref<9x8x16xbf16, #tpu.memory_space<vmem>>, vector<1x8x16xbf16>
    %58 = vector.shape_cast %57 : vector<1x8x16xbf16> to vector<8x16xbf16>
    %cst_44 = arith.constant dense<0.000000e+00> : vector<512x16xf32>
    %59 = tpu.matmul %56, %58, %cst_44 {dimension_numbers = #tpu.dot_dimension_numbers<[1], [0], [0], [1], [0, 0, 1, 1], [], []>} : vector<512x8xbf16>, vector<8x16xbf16>, vector<512x16xf32> -> vector<512x16xf32>
    %60 = arith.addf %53, %59 : vector<512x16xf32>
    %61 = vector.extract_strided_slice %10 {offsets = [0, 2, 8, 0], sizes = [2, 16, 16, 8], strides = [1, 1, 1, 1]} : vector<2x18x25x8xf32> to vector<2x16x16x8xf32>
    %62 = vector.shape_cast %61 : vector<2x16x16x8xf32> to vector<512x8xf32>
    %63 = arith.truncf %62 : vector<512x8xf32> to vector<512x8xbf16>
    %c7 = arith.constant 7 : index
    %c0_45 = arith.constant 0 : index
    %c0_46 = arith.constant 0 : index
    %64 = vector.load %arg10[%c7, %c0_45, %c0_46] : memref<9x8x16xbf16, #tpu.memory_space<vmem>>, vector<1x8x16xbf16>
    %65 = vector.shape_cast %64 : vector<1x8x16xbf16> to vector<8x16xbf16>
    %cst_47 = arith.constant dense<0.000000e+00> : vector<512x16xf32>
    %66 = tpu.matmul %63, %65, %cst_47 {dimension_numbers = #tpu.dot_dimension_numbers<[1], [0], [0], [1], [0, 0, 1, 1], [], []>} : vector<512x8xbf16>, vector<8x16xbf16>, vector<512x16xf32> -> vector<512x16xf32>
    %67 = arith.addf %60, %66 : vector<512x16xf32>
    %68 = vector.extract_strided_slice %10 {offsets = [0, 2, 9, 0], sizes = [2, 16, 16, 8], strides = [1, 1, 1, 1]} : vector<2x18x25x8xf32> to vector<2x16x16x8xf32>
    %69 = vector.shape_cast %68 : vector<2x16x16x8xf32> to vector<512x8xf32>
    %70 = arith.truncf %69 : vector<512x8xf32> to vector<512x8xbf16>
    %c8_48 = arith.constant 8 : index
    %c0_49 = arith.constant 0 : index
    %c0_50 = arith.constant 0 : index
    %71 = vector.load %arg10[%c8_48, %c0_49, %c0_50] : memref<9x8x16xbf16, #tpu.memory_space<vmem>>, vector<1x8x16xbf16>
    %72 = vector.shape_cast %71 : vector<1x8x16xbf16> to vector<8x16xbf16>
    %cst_51 = arith.constant dense<0.000000e+00> : vector<512x16xf32>
    %73 = tpu.matmul %70, %72, %cst_51 {dimension_numbers = #tpu.dot_dimension_numbers<[1], [0], [0], [1], [0, 0, 1, 1], [], []>} : vector<512x8xbf16>, vector<8x16xbf16>, vector<512x16xf32> -> vector<512x16xf32>
    %74 = arith.addf %67, %73 : vector<512x16xf32>
    %75 = vector.shape_cast %74 : vector<512x16xf32> to vector<2x256x16xf32>
    %c0_52 = arith.constant 0 : index
    %c0_53 = arith.constant 0 : index
    %c0_54 = arith.constant 0 : index
    %76 = vector.load %arg3[%c0_52, %c0_53, %c0_54] : memref<2x1x16xf32, #tpu.memory_space<vmem>>, vector<2x1x16xf32>
    %77 = vector.broadcast %76 : vector<2x1x16xf32> to vector<2x256x16xf32>
    %78 = arith.mulf %75, %77 : vector<2x256x16xf32>
    %c0_55 = arith.constant 0 : index
    %c0_56 = arith.constant 0 : index
    %c0_57 = arith.constant 0 : index
    %79 = vector.load %arg4[%c0_55, %c0_56, %c0_57] : memref<2x1x16xf32, #tpu.memory_space<vmem>>, vector<2x1x16xf32>
    %80 = vector.broadcast %79 : vector<2x1x16xf32> to vector<2x256x16xf32>
    %81 = arith.addf %78, %80 : vector<2x256x16xf32>
    %cst_58 = arith.constant 0.000000e+00 : f32
    %82 = vector.broadcast %cst_58 : f32 to vector<2x256x16xf32>
    %83 = arith.maximumf %81, %82 : vector<2x256x16xf32>
    %c0_59 = arith.constant 0 : index
    %c0_60 = arith.constant 0 : index
    %c0_61 = arith.constant 0 : index
    %84 = vector.load %arg5[%c0_59, %c0_60, %c0_61] : memref<2x1x16xf32, #tpu.memory_space<vmem>>, vector<2x1x16xf32>
    %85 = vector.broadcast %84 : vector<2x1x16xf32> to vector<2x256x16xf32>
    %86 = arith.mulf %83, %85 : vector<2x256x16xf32>
    %87 = vector.shape_cast %86 : vector<2x256x16xf32> to vector<2x16x16x16xf32>
    %c0_62 = arith.constant 0 : index
    %c1_63 = arith.constant 1 : index
    %c8_64 = arith.constant 8 : index
    %c0_65 = arith.constant 0 : index
    %88 = vector.load %arg15[%c0_62, %c1_63, %c8_64, %c0_65] : memref<2x18x25x16xf32, #tpu.memory_space<vmem>>, vector<2x16x16x16xf32>
    tpu.vector_store %arg15[%c0_62, %c1_63, %c8_64, %c0_65], %87 {strides = array<i32>} : memref<2x18x25x16xf32, #tpu.memory_space<vmem>>, vector<2x16x16x16xf32>,
    %c0_66 = arith.constant 0 : index
    %c0_67 = arith.constant 0 : index
    %c0_68 = arith.constant 0 : index
    %c0_69 = arith.constant 0 : index
    %89 = vector.load %arg15[%c0_66, %c0_67, %c0_68, %c0_69] : memref<2x18x25x16xf32, #tpu.memory_space<vmem>>, vector<2x18x25x16xf32>
    %cst_70 = arith.constant 0.000000e+00 : f32
    %90 = vector.broadcast %cst_70 : f32 to vector<512x16xf32>
    %91 = vector.extract_strided_slice %89 {offsets = [0, 0, 7, 0], sizes = [2, 16, 16, 16], strides = [1, 1, 1, 1]} : vector<2x18x25x16xf32> to vector<2x16x16x16xf32>
    %92 = vector.shape_cast %91 : vector<2x16x16x16xf32> to vector<512x16xf32>
    %93 = arith.truncf %92 : vector<512x16xf32> to vector<512x16xbf16>
    %c0_71 = arith.constant 0 : index
    %c0_72 = arith.constant 0 : index
    %c0_73 = arith.constant 0 : index
    %94 = vector.load %arg11[%c0_71, %c0_72, %c0_73] : memref<9x16x16xbf16, #tpu.memory_space<vmem>>, vector<1x16x16xbf16>
    %95 = vector.shape_cast %94 : vector<1x16x16xbf16> to vector<16x16xbf16>
    %cst_74 = arith.constant dense<0.000000e+00> : vector<512x16xf32>
    %96 = tpu.matmul %93, %95, %cst_74 {dimension_numbers = #tpu.dot_dimension_numbers<[1], [0], [0], [1], [0, 0, 1, 1], [], []>} : vector<512x16xbf16>, vector<16x16xbf16>, vector<512x16xf32> -> vector<512x16xf32>
    %97 = arith.addf %90, %96 : vector<512x16xf32>
    %98 = vector.extract_strided_slice %89 {offsets = [0, 0, 8, 0], sizes = [2, 16, 16, 16], strides = [1, 1, 1, 1]} : vector<2x18x25x16xf32> to vector<2x16x16x16xf32>
    %99 = vector.shape_cast %98 : vector<2x16x16x16xf32> to vector<512x16xf32>
    %100 = arith.truncf %99 : vector<512x16xf32> to vector<512x16xbf16>
    %c1_75 = arith.constant 1 : index
    %c0_76 = arith.constant 0 : index
    %c0_77 = arith.constant 0 : index
    %101 = vector.load %arg11[%c1_75, %c0_76, %c0_77] : memref<9x16x16xbf16, #tpu.memory_space<vmem>>, vector<1x16x16xbf16>
    %102 = vector.shape_cast %101 : vector<1x16x16xbf16> to vector<16x16xbf16>
    %cst_78 = arith.constant dense<0.000000e+00> : vector<512x16xf32>
    %103 = tpu.matmul %100, %102, %cst_78 {dimension_numbers = #tpu.dot_dimension_numbers<[1], [0], [0], [1], [0, 0, 1, 1], [], []>} : vector<512x16xbf16>, vector<16x16xbf16>, vector<512x16xf32> -> vector<512x16xf32>
    %104 = arith.addf %97, %103 : vector<512x16xf32>
    %105 = vector.extract_strided_slice %89 {offsets = [0, 0, 9, 0], sizes = [2, 16, 16, 16], strides = [1, 1, 1, 1]} : vector<2x18x25x16xf32> to vector<2x16x16x16xf32>
    %106 = vector.shape_cast %105 : vector<2x16x16x16xf32> to vector<512x16xf32>
    %107 = arith.truncf %106 : vector<512x16xf32> to vector<512x16xbf16>
    %c2_79 = arith.constant 2 : index
    %c0_80 = arith.constant 0 : index
    %c0_81 = arith.constant 0 : index
    %108 = vector.load %arg11[%c2_79, %c0_80, %c0_81] : memref<9x16x16xbf16, #tpu.memory_space<vmem>>, vector<1x16x16xbf16>
    %109 = vector.shape_cast %108 : vector<1x16x16xbf16> to vector<16x16xbf16>
    %cst_82 = arith.constant dense<0.000000e+00> : vector<512x16xf32>
    %110 = tpu.matmul %107, %109, %cst_82 {dimension_numbers = #tpu.dot_dimension_numbers<[1], [0], [0], [1], [0, 0, 1, 1], [], []>} : vector<512x16xbf16>, vector<16x16xbf16>, vector<512x16xf32> -> vector<512x16xf32>
    %111 = arith.addf %104, %110 : vector<512x16xf32>
    %112 = vector.extract_strided_slice %89 {offsets = [0, 1, 7, 0], sizes = [2, 16, 16, 16], strides = [1, 1, 1, 1]} : vector<2x18x25x16xf32> to vector<2x16x16x16xf32>
    %113 = vector.shape_cast %112 : vector<2x16x16x16xf32> to vector<512x16xf32>
    %114 = arith.truncf %113 : vector<512x16xf32> to vector<512x16xbf16>
    %c3_83 = arith.constant 3 : index
    %c0_84 = arith.constant 0 : index
    %c0_85 = arith.constant 0 : index
    %115 = vector.load %arg11[%c3_83, %c0_84, %c0_85] : memref<9x16x16xbf16, #tpu.memory_space<vmem>>, vector<1x16x16xbf16>
    %116 = vector.shape_cast %115 : vector<1x16x16xbf16> to vector<16x16xbf16>
    %cst_86 = arith.constant dense<0.000000e+00> : vector<512x16xf32>
    %117 = tpu.matmul %114, %116, %cst_86 {dimension_numbers = #tpu.dot_dimension_numbers<[1], [0], [0], [1], [0, 0, 1, 1], [], []>} : vector<512x16xbf16>, vector<16x16xbf16>, vector<512x16xf32> -> vector<512x16xf32>
    %118 = arith.addf %111, %117 : vector<512x16xf32>
    %119 = vector.extract_strided_slice %89 {offsets = [0, 1, 8, 0], sizes = [2, 16, 16, 16], strides = [1, 1, 1, 1]} : vector<2x18x25x16xf32> to vector<2x16x16x16xf32>
    %120 = vector.shape_cast %119 : vector<2x16x16x16xf32> to vector<512x16xf32>
    %121 = arith.truncf %120 : vector<512x16xf32> to vector<512x16xbf16>
    %c4_87 = arith.constant 4 : index
    %c0_88 = arith.constant 0 : index
    %c0_89 = arith.constant 0 : index
    %122 = vector.load %arg11[%c4_87, %c0_88, %c0_89] : memref<9x16x16xbf16, #tpu.memory_space<vmem>>, vector<1x16x16xbf16>
    %123 = vector.shape_cast %122 : vector<1x16x16xbf16> to vector<16x16xbf16>
    %cst_90 = arith.constant dense<0.000000e+00> : vector<512x16xf32>
    %124 = tpu.matmul %121, %123, %cst_90 {dimension_numbers = #tpu.dot_dimension_numbers<[1], [0], [0], [1], [0, 0, 1, 1], [], []>} : vector<512x16xbf16>, vector<16x16xbf16>, vector<512x16xf32> -> vector<512x16xf32>
    %125 = arith.addf %118, %124 : vector<512x16xf32>
    %126 = vector.extract_strided_slice %89 {offsets = [0, 1, 9, 0], sizes = [2, 16, 16, 16], strides = [1, 1, 1, 1]} : vector<2x18x25x16xf32> to vector<2x16x16x16xf32>
    %127 = vector.shape_cast %126 : vector<2x16x16x16xf32> to vector<512x16xf32>
    %128 = arith.truncf %127 : vector<512x16xf32> to vector<512x16xbf16>
    %c5_91 = arith.constant 5 : index
    %c0_92 = arith.constant 0 : index
    %c0_93 = arith.constant 0 : index
    %129 = vector.load %arg11[%c5_91, %c0_92, %c0_93] : memref<9x16x16xbf16, #tpu.memory_space<vmem>>, vector<1x16x16xbf16>
    %130 = vector.shape_cast %129 : vector<1x16x16xbf16> to vector<16x16xbf16>
    %cst_94 = arith.constant dense<0.000000e+00> : vector<512x16xf32>
    %131 = tpu.matmul %128, %130, %cst_94 {dimension_numbers = #tpu.dot_dimension_numbers<[1], [0], [0], [1], [0, 0, 1, 1], [], []>} : vector<512x16xbf16>, vector<16x16xbf16>, vector<512x16xf32> -> vector<512x16xf32>
    %132 = arith.addf %125, %131 : vector<512x16xf32>
    %133 = vector.extract_strided_slice %89 {offsets = [0, 2, 7, 0], sizes = [2, 16, 16, 16], strides = [1, 1, 1, 1]} : vector<2x18x25x16xf32> to vector<2x16x16x16xf32>
    %134 = vector.shape_cast %133 : vector<2x16x16x16xf32> to vector<512x16xf32>
    %135 = arith.truncf %134 : vector<512x16xf32> to vector<512x16xbf16>
    %c6_95 = arith.constant 6 : index
    %c0_96 = arith.constant 0 : index
    %c0_97 = arith.constant 0 : index
    %136 = vector.load %arg11[%c6_95, %c0_96, %c0_97] : memref<9x16x16xbf16, #tpu.memory_space<vmem>>, vector<1x16x16xbf16>
    %137 = vector.shape_cast %136 : vector<1x16x16xbf16> to vector<16x16xbf16>
    %cst_98 = arith.constant dense<0.000000e+00> : vector<512x16xf32>
    %138 = tpu.matmul %135, %137, %cst_98 {dimension_numbers = #tpu.dot_dimension_numbers<[1], [0], [0], [1], [0, 0, 1, 1], [], []>} : vector<512x16xbf16>, vector<16x16xbf16>, vector<512x16xf32> -> vector<512x16xf32>
    %139 = arith.addf %132, %138 : vector<512x16xf32>
    %140 = vector.extract_strided_slice %89 {offsets = [0, 2, 8, 0], sizes = [2, 16, 16, 16], strides = [1, 1, 1, 1]} : vector<2x18x25x16xf32> to vector<2x16x16x16xf32>
    %141 = vector.shape_cast %140 : vector<2x16x16x16xf32> to vector<512x16xf32>
    %142 = arith.truncf %141 : vector<512x16xf32> to vector<512x16xbf16>
    %c7_99 = arith.constant 7 : index
    %c0_100 = arith.constant 0 : index
    %c0_101 = arith.constant 0 : index
    %143 = vector.load %arg11[%c7_99, %c0_100, %c0_101] : memref<9x16x16xbf16, #tpu.memory_space<vmem>>, vector<1x16x16xbf16>
    %144 = vector.shape_cast %143 : vector<1x16x16xbf16> to vector<16x16xbf16>
    %cst_102 = arith.constant dense<0.000000e+00> : vector<512x16xf32>
    %145 = tpu.matmul %142, %144, %cst_102 {dimension_numbers = #tpu.dot_dimension_numbers<[1], [0], [0], [1], [0, 0, 1, 1], [], []>} : vector<512x16xbf16>, vector<16x16xbf16>, vector<512x16xf32> -> vector<512x16xf32>
    %146 = arith.addf %139, %145 : vector<512x16xf32>
    %147 = vector.extract_strided_slice %89 {offsets = [0, 2, 9, 0], sizes = [2, 16, 16, 16], strides = [1, 1, 1, 1]} : vector<2x18x25x16xf32> to vector<2x16x16x16xf32>
    %148 = vector.shape_cast %147 : vector<2x16x16x16xf32> to vector<512x16xf32>
    %149 = arith.truncf %148 : vector<512x16xf32> to vector<512x16xbf16>
    %c8_103 = arith.constant 8 : index
    %c0_104 = arith.constant 0 : index
    %c0_105 = arith.constant 0 : index
    %150 = vector.load %arg11[%c8_103, %c0_104, %c0_105] : memref<9x16x16xbf16, #tpu.memory_space<vmem>>, vector<1x16x16xbf16>
    %151 = vector.shape_cast %150 : vector<1x16x16xbf16> to vector<16x16xbf16>
    %cst_106 = arith.constant dense<0.000000e+00> : vector<512x16xf32>
    %152 = tpu.matmul %149, %151, %cst_106 {dimension_numbers = #tpu.dot_dimension_numbers<[1], [0], [0], [1], [0, 0, 1, 1], [], []>} : vector<512x16xbf16>, vector<16x16xbf16>, vector<512x16xf32> -> vector<512x16xf32>
    %153 = arith.addf %146, %152 : vector<512x16xf32>
    %154 = vector.shape_cast %153 : vector<512x16xf32> to vector<2x256x16xf32>
    %c0_107 = arith.constant 0 : index
    %c0_108 = arith.constant 0 : index
    %c0_109 = arith.constant 0 : index
    %155 = vector.load %arg6[%c0_107, %c0_108, %c0_109] : memref<2x1x16xf32, #tpu.memory_space<vmem>>, vector<2x1x16xf32>
    %156 = vector.broadcast %155 : vector<2x1x16xf32> to vector<2x256x16xf32>
    %157 = arith.mulf %154, %156 : vector<2x256x16xf32>
    %c0_110 = arith.constant 0 : index
    %c0_111 = arith.constant 0 : index
    %c0_112 = arith.constant 0 : index
    %158 = vector.load %arg7[%c0_110, %c0_111, %c0_112] : memref<2x1x8xf32, #tpu.memory_space<vmem>>, vector<2x1x8xf32>
    %159 = vector.shape_cast %158 : vector<2x1x8xf32> to vector<2x1x1x8xf32>
    %160 = vector.broadcast %159 : vector<2x1x1x8xf32> to vector<2x16x16x8xf32>
    %161 = arith.mulf %4, %160 : vector<2x16x16x8xf32>
    %162 = vector.shape_cast %161 : vector<2x16x16x8xf32> to vector<512x8xf32>
    %163 = arith.truncf %162 : vector<512x8xf32> to vector<512x8xbf16>
    %c0_113 = arith.constant 0 : index
    %c0_114 = arith.constant 0 : index
    %164 = vector.load %arg12[%c0_113, %c0_114] : memref<8x16xbf16, #tpu.memory_space<vmem>>, vector<8x16xbf16>
    %cst_115 = arith.constant dense<0.000000e+00> : vector<512x16xf32>
    %165 = tpu.matmul %163, %164, %cst_115 {dimension_numbers = #tpu.dot_dimension_numbers<[1], [0], [0], [1], [0, 0, 1, 1], [], []>} : vector<512x8xbf16>, vector<8x16xbf16>, vector<512x16xf32> -> vector<512x16xf32>
    %166 = vector.shape_cast %165 : vector<512x16xf32> to vector<2x256x16xf32>
    %c0_116 = arith.constant 0 : index
    %c0_117 = arith.constant 0 : index
    %c0_118 = arith.constant 0 : index
    %167 = vector.load %arg8[%c0_116, %c0_117, %c0_118] : memref<2x1x16xf32, #tpu.memory_space<vmem>>, vector<2x1x16xf32>
    %168 = vector.broadcast %167 : vector<2x1x16xf32> to vector<2x256x16xf32>
    %169 = arith.mulf %166, %168 : vector<2x256x16xf32>
    %170 = arith.addf %157, %169 : vector<2x256x16xf32>
    %c0_119 = arith.constant 0 : index
    %c0_120 = arith.constant 0 : index
    %c0_121 = arith.constant 0 : index
    %171 = vector.load %arg9[%c0_119, %c0_120, %c0_121] : memref<2x1x16xf32, #tpu.memory_space<vmem>>, vector<2x1x16xf32>
    %172 = vector.broadcast %171 : vector<2x1x16xf32> to vector<2x256x16xf32>
    %173 = arith.addf %170, %172 : vector<2x256x16xf32>
    %cst_122 = arith.constant 0.000000e+00 : f32
    %174 = vector.broadcast %cst_122 : f32 to vector<2x256x16xf32>
    %175 = arith.maximumf %173, %174 : vector<2x256x16xf32>
    %176 = vector.shape_cast %175 : vector<2x256x16xf32> to vector<2x16x16x16xf32>
    %c0_123 = arith.constant 0 : index
    %c0_124 = arith.constant 0 : index
    %c0_125 = arith.constant 0 : index
    %c0_126 = arith.constant 0 : index
    %177 = vector.load %arg13[%c0_123, %c0_124, %c0_125, %c0_126] : memref<2x16x16x16xf32, #tpu.memory_space<vmem>>, vector<2x16x16x16xf32>
    tpu.vector_store %arg13[%c0_123, %c0_124, %c0_125, %c0_126], %176 {strides = array<i32>} : memref<2x16x16x16xf32, #tpu.memory_space<vmem>>, vector<2x16x16x16xf32>,
    return
  }
  func.func @transform_0(%arg0: i32) -> (i32, i32, i32, i32) {
    %c0_i32 = arith.constant 0 : i32
    %c0_i32_0 = arith.constant 0 : i32
    %c0_i32_1 = arith.constant 0 : i32
    %c0_i32_2 = arith.constant 0 : i32
    return %arg0, %c0_i32, %c0_i32_0, %c0_i32_1 : i32, i32, i32, i32
  }
  func.func @transform_1(%arg0: i32) -> (i32, i32, i32) {
    %c0_i32 = arith.constant 0 : i32
    %c0_i32_0 = arith.constant 0 : i32
    %c0_i32_1 = arith.constant 0 : i32
    return %arg0, %c0_i32, %c0_i32_0 : i32, i32, i32
  }
  func.func @transform_2(%arg0: i32) -> (i32, i32, i32) {
    %c0_i32 = arith.constant 0 : i32
    %c0_i32_0 = arith.constant 0 : i32
    %c0_i32_1 = arith.constant 0 : i32
    return %arg0, %c0_i32, %c0_i32_0 : i32, i32, i32
  }
  func.func @transform_3(%arg0: i32) -> (i32, i32, i32) {
    %c0_i32 = arith.constant 0 : i32
    %c0_i32_0 = arith.constant 0 : i32
    %c0_i32_1 = arith.constant 0 : i32
    return %arg0, %c0_i32, %c0_i32_0 : i32, i32, i32
  }
  func.func @transform_4(%arg0: i32) -> (i32, i32, i32) {
    %c0_i32 = arith.constant 0 : i32
    %c0_i32_0 = arith.constant 0 : i32
    %c0_i32_1 = arith.constant 0 : i32
    return %arg0, %c0_i32, %c0_i32_0 : i32, i32, i32
  }
  func.func @transform_5(%arg0: i32) -> (i32, i32, i32) {
    %c0_i32 = arith.constant 0 : i32
    %c0_i32_0 = arith.constant 0 : i32
    %c0_i32_1 = arith.constant 0 : i32
    return %arg0, %c0_i32, %c0_i32_0 : i32, i32, i32
  }
  func.func @transform_6(%arg0: i32) -> (i32, i32, i32) {
    %c0_i32 = arith.constant 0 : i32
    %c0_i32_0 = arith.constant 0 : i32
    %c0_i32_1 = arith.constant 0 : i32
    return %arg0, %c0_i32, %c0_i32_0 : i32, i32, i32
  }
  func.func @transform_7(%arg0: i32) -> (i32, i32, i32) {
    %c0_i32 = arith.constant 0 : i32
    %c0_i32_0 = arith.constant 0 : i32
    %c0_i32_1 = arith.constant 0 : i32
    return %arg0, %c0_i32, %c0_i32_0 : i32, i32, i32
  }
  func.func @transform_8(%arg0: i32) -> (i32, i32, i32) {
    %c0_i32 = arith.constant 0 : i32
    %c0_i32_0 = arith.constant 0 : i32
    %c0_i32_1 = arith.constant 0 : i32
    return %arg0, %c0_i32, %c0_i32_0 : i32, i32, i32
  }
  func.func @transform_9(%arg0: i32) -> (i32, i32, i32) {
    %c0_i32 = arith.constant 0 : i32
    %c0_i32_0 = arith.constant 0 : i32
    %c0_i32_1 = arith.constant 0 : i32
    %c0_i32_2 = arith.constant 0 : i32
    return %c0_i32, %c0_i32_0, %c0_i32_1 : i32, i32, i32
  }
  func.func @transform_10(%arg0: i32) -> (i32, i32, i32) {
    %c0_i32 = arith.constant 0 : i32
    %c0_i32_0 = arith.constant 0 : i32
    %c0_i32_1 = arith.constant 0 : i32
    %c0_i32_2 = arith.constant 0 : i32
    return %c0_i32, %c0_i32_0, %c0_i32_1 : i32, i32, i32
  }
  func.func @transform_11(%arg0: i32) -> (i32, i32) {
    %c0_i32 = arith.constant 0 : i32
    %c0_i32_0 = arith.constant 0 : i32
    %c0_i32_1 = arith.constant 0 : i32
    return %c0_i32, %c0_i32_0 : i32, i32
  }
  func.func @transform_12(%arg0: i32) -> (i32, i32, i32, i32) {
    %c0_i32 = arith.constant 0 : i32
    %c0_i32_0 = arith.constant 0 : i32
    %c0_i32_1 = arith.constant 0 : i32
    %c0_i32_2 = arith.constant 0 : i32
    return %arg0, %c0_i32, %c0_i32_0, %c0_i32_1 : i32, i32, i32, i32
  }
}

</mosaic_0001>

<bundles_post_ra>
// kernel: tpu_custom_call.1
= control target key start
LH: loop header
LB: loop body
LE: loop exit
PB: predicated region body
PF: predicated region fallthrough
CT: control target
= control target key end

     0   :  { %s20165_s0 = inlined_call_operand.vmem [shape: f32[8,16,16,8], index: 0, kind: input, shape index: {}]   ;;  %s20166_s1 = inlined_call_operand.vmem [shape: f32[8,1,8], index: 1, kind: input, shape index: {}]   ;;  %s20167_s2 = inlined_call_operand.vmem [shape: f32[8,1,16], index: 2, kind: input, shape index: {}]   ;;  %s20168_s3 = inlined_call_operand.vmem [shape: f32[8,1,16], index: 3, kind: input, shape index: {}]   ;;  %s20169_s4 = inlined_call_operand.vmem [shape: f32[8,1,16], index: 4, kind: input, shape index: {}]   ;;  %s20170_s5 = inlined_call_operand.vmem [shape: f32[8,1,16], index: 5, kind: input, shape index: {}]   ;;  %s20171_s6 = inlined_call_operand.vmem [shape: f32[8,1,8], index: 6, kind: input, shape index: {}]   ;;  %s20172_s7 = inlined_call_operand.vmem [shape: f32[8,1,16], index: 7, kind: input, shape index: {}]   ;;  %s20173_s8 = inlined_call_operand.vmem [shape: f32[8,1,16], index: 8, kind: input, shape index: {}]   ;;  %s20174_s9 = inlined_call_operand.vmem [shape: bf16[9,8,16], index: 9, kind: input, shape index: {}]   ;;  %s20175_s10 = inlined_call_operand.vmem [shape: bf16[9,16,16], index: 10, kind: input, shape index: {}]   ;;  %s20176_s11 = inlined_call_operand.vmem [shape: bf16[8,16], index: 11, kind: input, shape index: {}]   ;;  %s20177_s12 = inlined_call_operand.hbm [shape: f32[8,16,16,16], index: 12, kind: output, shape index: {}]  }
   0x1   :  { %20443 = sst [smem:[#allocation93_spill]] %s20165_s0 }
   0x2   :  { %17 = vsyncpa [#allocation5], 0 }
   0x3   :  { %19 = vsyncpa [#allocation5 + $0x1], 0  ;;  %s15035_s21 = smov 0   ;;  %s15037_s22 = smov 0  }
   0x4   :  { %s15039_s23 = smov 0   ;;  %s15041_s24 = smov 0  }
   0x5 LB: > { %s15056_s25 = sadd.s32 4294967295, %s14964_s24   ;;  %s11180_s26 = sadd.s32 4294967294, %s14964_s24   ;;  %s14964_s24 = sphi %s15041_s24, %s21098_s24   ;;  %s14960_s23 = sphi %s15039_s23, %s21097_s23   ;;  %s14956_s22 = sphi %s15037_s22, %s21096_s22   ;;  %s14952_s21 = sphi %s15035_s21, %s21095_s21  }
   0x6   : > { %s15060_s27 = sadd.s32 1, %s14964_s24   ;;  %s329_s28 = sadd.s32 1, %s14960_s23 }
   0x7   : > { %s326_s29 = ssub.s32 %s14964_s24, %s15060_s27  ;;  %p339_p0 = scmp.ne.s32.totalorder %s14960_s23, %s14956_s22 }
   0x8   : > { %p327_p1 = scmp.eq.s32.totalorder %s326_s29, 0  ;;  %p340_p2 = scmp.eq.s32.totalorder %s15056_s25, 3 }
   0x9   : > { %p345_p3 = scmp.ne.s32.totalorder %s14956_s22, %s14952_s21  ;;  %p346_p4 = scmp.eq.s32.totalorder %s11180_s26, 3 }
   0xa   : > { %s15071_s30 = scalar_select %p327_p1, %s14960_s23, %s329_s28  }
   0xb   : > { %p15073_p5 = por %p340_p2, %p339_p0  ;;  %p15077_p6 = por %p346_p4, %p345_p3 }
   0xc   : > { %p11183_p7 = scmp.ge.s32.totalorder %s14964_s24, 1  ;;  %p447_p8 = scmp.lt.s32.totalorder %s14964_s24, 5 }
   0xe   : > { %p448_p9 = pnand %p11183_p7, %p447_p8 }
  0x10   : > { %451 = sbr.rel (%p448_p9) target bundleno = 2709 (0xa95), region = 68 }
  0x17   : > { %v15086_v0 = vld [vmem:[%s20174_s9 + $0x4] sm:$0xf]  ;;  %vm1698_vm0 = vcmask 1043456   ;;  %vm571_vm1 = vcmask 64512   ;;  %s11185_s17 = sshll.u32 %s15056_s25, 1  ;;  %v20178_v2 = vmov 0.0  }
  0x18   : > { %14769 = vmatprep.subr.msk.bf16.mxu0 %vm1698_vm0, %v15086_v0  ;;  %v15093_v1 = vsel %vm1698_vm0, %v15086_v0, 0  ;;  %573 = vst.msk [vmem:[#allocation2 + $0x8] sm:$0xff] %vm571_vm1, %v20178_v2  ;;  %574 = vst.msk [vmem:[#allocation2 + $0x10] sm:$0xff] %vm571_vm1, %v20178_v2  ;;  %v15314_v3 = vld [vmem:[%s20174_s9] sm:$0xf]  ;;  %p15318_p10 = scmp.lt.s32.totalorder %s11185_s17, 7  ;;  %14770 = vmatprep.subr.msk.bf16.mxu1 %vm1698_vm0, %v15086_v0 }
  0x19   : > { %572 = vst.msk [vmem:[#allocation2] sm:$0xff] %vm571_vm1, %v20178_v2  ;;  %577 = vst.msk [vmem:[#allocation2 + $0x20] sm:$0xff] %vm571_vm1, %v20178_v2  ;;  %vm575_vm2 = vcmask 57344   ;;  %12490 = vmatpush3.bf16.msra.mxu0 %v15093_v1  ;;  %13744 = vmatpush3.bf16.msra.mxu1 %v15093_v1  ;;  %s20447_s0 = sld [smem:[#allocation93_spill]]  ;;  %vm2411_vm3 = vcmask 1046528   ;;  %v2088_v63 = vsel %vm1698_vm0, %v15314_v3, 0 }
  0x1a   : > { %578 = vst.msk [vmem:[#allocation2 + $0x28] sm:$0xff] %vm571_vm1, %v20178_v2  ;;  %579 = vst.msk [vmem:[#allocation2 + $0x30] sm:$0xff] %vm571_vm1, %v20178_v2  ;;  %14771 = vmatprep.subr.msk.bf16.mxu0 %vm1698_vm0, %v15314_v3  ;;  %s21100_s17 = smov (!%p15318_p10, %s11185_s17), 7  ;;  %v15524_v3 = vld [vmem:[%s20174_s9 + $0x8] sm:$0xf]  ;;  %vm1310_vm4 = vcmask 1040384  }
  0x1b   : > { %581 = vst.msk [vmem:[#allocation2 + $0x40] sm:$0xff] %vm571_vm1, %v20178_v2  ;;  %582 = vst.msk [vmem:[#allocation2 + $0x48] sm:$0xff] %vm571_vm1, %v20178_v2  ;;  %s11859_s26 = sshll.u32 %s21100_s17, 8  ;;  %s15411_s15 = scalar_lea.vmem %s20166_s1, %s21100_s17  ;;  %vm717_vm5 = vcmask 130048   ;;  %vm721_vm6 = vcmask 122880  }
  0x1c   : > { %583 = vst.msk [vmem:[#allocation2 + $0x50] sm:$0xff] %vm571_vm1, %v20178_v2  ;;  %585 = vst.msk [vmem:[#allocation2 + $0x60] sm:$0xff] %vm571_vm1, %v20178_v2  ;;  %v15419_v4 = vld [vmem:[%s15411_s15] ss:$0 sm:$0xff]  ;;  %s17317_s28 = scalar_lea.vmem %s20168_s3, %s21100_s17  ;;  %s17337_s18 = scalar_lea.vmem %s20169_s4, %s21100_s17 }
  0x1d   : > { %586 = vst.msk [vmem:[#allocation2 + $0x68] sm:$0xff] %vm571_vm1, %v20178_v2  ;;  %587 = vst.msk [vmem:[#allocation2 + $0x70] sm:$0xff] %vm571_vm1, %v20178_v2  ;;  %s19721_s29 = scalar_lea.vmem %s20170_s5, %s21100_s17  ;;  %s519_s20 = sand.u32 1, %s14956_s22  }
  0x1e   : > { %589 = vst.msk [vmem:[#allocation2 + $0x80] sm:$0xff] %vm571_vm1, %v20178_v2  ;;  %590 = vst.msk [vmem:[#allocation2 + $0x88] sm:$0xff] %vm571_vm1, %v20178_v2 }
  0x1f   : > { %591 = vst.msk [vmem:[#allocation2 + $0x90] sm:$0xff] %vm571_vm1, %v20178_v2  ;;  %593 = vst.msk [vmem:[#allocation2 + $0xa0] sm:$0xff] %vm571_vm1, %v20178_v2  ;;  %s15416_s19 = scalar_lea.vmem %s20447_s0, %s11859_s26  ;;  %v15424_v8 = vld [vmem:[#allocation2 + $0x8] sm:$0xff]  ;;  %v15426_v9 = vld [vmem:[#allocation2 + $0x10] sm:$0xff]  ;;  %s19628_s26 = scalar_lea.vmem %s20172_s7, %s21100_s17 }
  0x20   : > { %594 = vst.msk [vmem:[#allocation2 + $0xa8] sm:$0xff] %vm571_vm1, %v20178_v2  ;;  %595 = vst.msk [vmem:[#allocation2 + $0xb0] sm:$0xff] %vm571_vm1, %v20178_v2  ;;  %v863_v5 = vld [vmem:[%s15416_s19] sm:$0xff]  ;;  %v864_v6 = vld [vmem:[%s15416_s19 + $0x8] sm:$0xff]  ;;  %v1568_v13 = vpack.c.bf16 %v15426_v9, %v15424_v8 }
  0x21   : > { %597 = vst.msk [vmem:[#allocation2 + $0xc0] sm:$0xff] %vm571_vm1, %v20178_v2  ;;  %598 = vst.msk [vmem:[#allocation2 + $0xc8] sm:$0xff] %vm571_vm1, %v20178_v2  ;;  %v865_v7 = vld [vmem:[%s15416_s19 + $0x10] sm:$0xff]  ;;  %v941_v10 = vmul.f32 %v15419_v4, %v863_v5  ;;  %v942_v11 = vmul.f32 %v15419_v4, %v864_v6  ;;  %v866_v14 = vld [vmem:[%s15416_s19 + $0x18] sm:$0xff] }
  0x22   : > { %599 = vst.msk [vmem:[#allocation2 + $0xd0] sm:$0xff] %vm571_vm1, %v20178_v2  ;;  %601 = vst.msk [vmem:[#allocation2 + $0xe0] sm:$0xff] %vm571_vm1, %v20178_v2  ;;  %v943_v12 = vmul.f32 %v15419_v4, %v865_v7  ;;  %v944_v15 = vmul.f32 %v15419_v4, %v866_v14  ;;  %v867_v16 = vld [vmem:[%s15416_s19 + $0x20] sm:$0xff]  ;;  %v868_v17 = vld [vmem:[%s15416_s19 + $0x28] sm:$0xff]  ;;  %12491 = vmatprep.mubr.msk.bf16.mxu0 %vm571_vm1, %v1568_v13 }
  0x23   : > { %602 = vst.msk [vmem:[#allocation2 + $0xe8] sm:$0xff] %vm571_vm1, %v20178_v2  ;;  %603 = vst.msk [vmem:[#allocation2 + $0xf0] sm:$0xff] %vm571_vm1, %v20178_v2  ;;  %v869_v18 = vld [vmem:[%s15416_s19 + $0x30] sm:$0xff]  ;;  %v945_v19 = vmul.f32 %v15419_v4, %v867_v16  ;;  %v946_v20 = vmul.f32 %v15419_v4, %v868_v17  ;;  %v870_v21 = vld [vmem:[%s15416_s19 + $0x38] sm:$0xff] }
  0x24   : > { %605 = vst.msk [vmem:[#allocation2 + $0x100] sm:$0xff] %vm571_vm1, %v20178_v2  ;;  %606 = vst.msk [vmem:[#allocation2 + $0x108] sm:$0xff] %vm571_vm1, %v20178_v2  ;;  %v947_v22 = vmul.f32 %v15419_v4, %v869_v18  ;;  %v871_v23 = vld [vmem:[%s15416_s19 + $0x40] sm:$0xff]  ;;  %v872_v24 = vld [vmem:[%s15416_s19 + $0x48] sm:$0xff]  ;;  %v948_v25 = vmul.f32 %v15419_v4, %v870_v21 }
  0x25   : > { %607 = vst.msk [vmem:[#allocation2 + $0x110] sm:$0xff] %vm571_vm1, %v20178_v2  ;;  %609 = vst.msk [vmem:[#allocation2 + $0x120] sm:$0xff] %vm571_vm1, %v20178_v2  ;;  %v949_v26 = vmul.f32 %v15419_v4, %v871_v23  ;;  %v950_v27 = vmul.f32 %v15419_v4, %v872_v24  ;;  %v873_v28 = vld [vmem:[%s15416_s19 + $0x50] sm:$0xff]  ;;  %v874_v29 = vld [vmem:[%s15416_s19 + $0x58] sm:$0xff] }
  0x26   : > { %610 = vst.msk [vmem:[#allocation2 + $0x128] sm:$0xff] %vm571_vm1, %v20178_v2  ;;  %611 = vst.msk [vmem:[#allocation2 + $0x130] sm:$0xff] %vm571_vm1, %v20178_v2  ;;  %v875_v30 = vld [vmem:[%s15416_s19 + $0x60] sm:$0xff]  ;;  %v951_v31 = vmul.f32 %v15419_v4, %v873_v28  ;;  %v952_v32 = vmul.f32 %v15419_v4, %v874_v29  ;;  %v876_v33 = vld [vmem:[%s15416_s19 + $0x68] sm:$0xff] }
  0x27   : > { %613 = vst.msk [vmem:[#allocation2 + $0x140] sm:$0xff] %vm571_vm1, %v20178_v2  ;;  %614 = vst.msk [vmem:[#allocation2 + $0x148] sm:$0xff] %vm571_vm1, %v20178_v2  ;;  %v953_v34 = vmul.f32 %v15419_v4, %v875_v30  ;;  %v877_v35 = vld [vmem:[%s15416_s19 + $0x70] sm:$0xff]  ;;  %v878_v36 = vld [vmem:[%s15416_s19 + $0x78] sm:$0xff]  ;;  %v954_v37 = vmul.f32 %v15419_v4, %v876_v33 }
  0x28   : > { %615 = vst.msk [vmem:[#allocation2 + $0x150] sm:$0xff] %vm571_vm1, %v20178_v2  ;;  %617 = vst.msk [vmem:[#allocation2 + $0x160] sm:$0xff] %vm571_vm1, %v20178_v2  ;;  %v955_v38 = vmul.f32 %v15419_v4, %v877_v35  ;;  %v956_v39 = vmul.f32 %v15419_v4, %v878_v36  ;;  %v879_v40 = vld [vmem:[%s15416_s19 + $0x80] sm:$0xff]  ;;  %v880_v41 = vld [vmem:[%s15416_s19 + $0x88] sm:$0xff] }
  0x29   : > { %618 = vst.msk [vmem:[#allocation2 + $0x168] sm:$0xff] %vm571_vm1, %v20178_v2  ;;  %619 = vst.msk [vmem:[#allocation2 + $0x170] sm:$0xff] %vm571_vm1, %v20178_v2  ;;  %v881_v42 = vld [vmem:[%s15416_s19 + $0x90] sm:$0xff]  ;;  %v957_v43 = vmul.f32 %v15419_v4, %v879_v40  ;;  %v958_v44 = vmul.f32 %v15419_v4, %v880_v41  ;;  %v882_v45 = vld [vmem:[%s15416_s19 + $0x98] sm:$0xff] }
  0x2a   : > { %621 = vst.msk [vmem:[#allocation2 + $0x180] sm:$0xff] %vm571_vm1, %v20178_v2  ;;  %622 = vst.msk [vmem:[#allocation2 + $0x188] sm:$0xff] %vm571_vm1, %v20178_v2  ;;  %v959_v46 = vmul.f32 %v15419_v4, %v881_v42  ;;  %v883_v47 = vld [vmem:[%s15416_s19 + $0xa0] sm:$0xff]  ;;  %v884_v48 = vld [vmem:[%s15416_s19 + $0xa8] sm:$0xff]  ;;  %v960_v49 = vmul.f32 %v15419_v4, %v882_v45 }
  0x2b   : > { %623 = vst.msk [vmem:[#allocation2 + $0x190] sm:$0xff] %vm571_vm1, %v20178_v2  ;;  %625 = vst.msk [vmem:[#allocation2 + $0x1a0] sm:$0xff] %vm571_vm1, %v20178_v2  ;;  %v961_v50 = vmul.f32 %v15419_v4, %v883_v47  ;;  %v962_v51 = vmul.f32 %v15419_v4, %v884_v48  ;;  %v885_v52 = vld [vmem:[%s15416_s19 + $0xb0] sm:$0xff]  ;;  %v886_v53 = vld [vmem:[%s15416_s19 + $0xb8] sm:$0xff] }
  0x2c   : > { %626 = vst.msk [vmem:[#allocation2 + $0x1a8] sm:$0xff] %vm571_vm1, %v20178_v2  ;;  %627 = vst.msk [vmem:[#allocation2 + $0x1b0] sm:$0xff] %vm571_vm1, %v20178_v2  ;;  %v887_v54 = vld [vmem:[%s15416_s19 + $0xc0] sm:$0xff]  ;;  %v963_v58 = vmul.f32 %v15419_v4, %v885_v52  ;;  %v964_v59 = vmul.f32 %v15419_v4, %v886_v53  ;;  %v888_v0 = vld [vmem:[%s15416_s19 + $0xc8] sm:$0xff] }
  0x2d   : > { %629 = vst.msk [vmem:[#allocation2 + $0x1c0] sm:$0xff] %vm571_vm1, %v20178_v2  ;;  %630 = vst.msk [vmem:[#allocation2 + $0x1c8] sm:$0xff] %vm571_vm1, %v20178_v2  ;;  %v965_v60 = vmul.f32 %v15419_v4, %v887_v54  ;;  %v966_v6 = vmul.f32 %v15419_v4, %v888_v0  ;;  %v890_v23 = vld [vmem:[%s15416_s19 + $0xd8] sm:$0xff]  ;;  %v15631_v42 = vld [vmem:[%s15411_s15 + $0x1] ss:$0 sm:$0xff] }
  0x2e   : > { %631 = vst.msk [vmem:[#allocation2 + $0x1d0] sm:$0xff] %vm571_vm1, %v20178_v2  ;;  %633 = vst.msk [vmem:[#allocation2 + $0x1e0] sm:$0xff] %vm571_vm1, %v20178_v2  ;;  %v968_v28 = vmul.f32 %v15419_v4, %v890_v23  ;;  %v896_v45 = vld [vmem:[%s15416_s19 + $0x108] sm:$0xff]  ;;  %v898_v47 = vld [vmem:[%s15416_s19 + $0x118] sm:$0xff] }
  0x2f   : > { %634 = vst.msk [vmem:[#allocation2 + $0x1e8] sm:$0xff] %vm571_vm1, %v20178_v2  ;;  %635 = vst.msk [vmem:[#allocation2 + $0x1f0] sm:$0xff] %vm571_vm1, %v20178_v2  ;;  %v900_v53 = vld [vmem:[%s15416_s19 + $0x128] sm:$0xff]  ;;  %v901_v54 = vld [vmem:[%s15416_s19 + $0x130] sm:$0xff] }
  0x30   : > { %637 = vst.msk [vmem:[#allocation2 + $0x200] sm:$0xff] %vm571_vm1, %v20178_v2  ;;  %638 = vst.msk [vmem:[#allocation2 + $0x208] sm:$0xff] %vm571_vm1, %v20178_v2  ;;  %v904_v0 = vld [vmem:[%s15416_s19 + $0x148] sm:$0xff]  ;;  %v905_v23 = vld [vmem:[%s15416_s19 + $0x150] sm:$0xff] }
  0x31   : > { %639 = vst.msk [vmem:[#allocation2 + $0x210] sm:$0xff] %vm571_vm1, %v20178_v2  ;;  %641 = vst.msk [vmem:[#allocation2 + $0x220] sm:$0xff] %vm571_vm1, %v20178_v2 }
  0x32   : > { %642 = vst.msk [vmem:[#allocation2 + $0x228] sm:$0xff] %vm571_vm1, %v20178_v2  ;;  %643 = vst.msk [vmem:[#allocation2 + $0x230] sm:$0xff] %vm571_vm1, %v20178_v2 }
  0x33   : > { %645 = vst.msk [vmem:[#allocation2 + $0x240] sm:$0xff] %vm571_vm1, %v20178_v2  ;;  %646 = vst.msk [vmem:[#allocation2 + $0x248] sm:$0xff] %vm571_vm1, %v20178_v2 }
  0x34   : > { %647 = vst.msk [vmem:[#allocation2 + $0x250] sm:$0xff] %vm571_vm1, %v20178_v2  ;;  %649 = vst.msk [vmem:[#allocation2 + $0x260] sm:$0xff] %vm571_vm1, %v20178_v2 }
  0x35   : > { %650 = vst.msk [vmem:[#allocation2 + $0x268] sm:$0xff] %vm571_vm1, %v20178_v2  ;;  %651 = vst.msk [vmem:[#allocation2 + $0x270] sm:$0xff] %vm571_vm1, %v20178_v2 }
  0x36   : > { %653 = vst.msk [vmem:[#allocation2 + $0x280] sm:$0xff] %vm571_vm1, %v20178_v2  ;;  %654 = vst.msk [vmem:[#allocation2 + $0x288] sm:$0xff] %vm571_vm1, %v20178_v2 }
  0x37   : > { %655 = vst.msk [vmem:[#allocation2 + $0x290] sm:$0xff] %vm571_vm1, %v20178_v2  ;;  %657 = vst.msk [vmem:[#allocation2 + $0x2a0] sm:$0xff] %vm571_vm1, %v20178_v2 }
  0x38   : > { %658 = vst.msk [vmem:[#allocation2 + $0x2a8] sm:$0xff] %vm571_vm1, %v20178_v2  ;;  %659 = vst.msk [vmem:[#allocation2 + $0x2b0] sm:$0xff] %vm571_vm1, %v20178_v2 }
  0x39   : > { %661 = vst.msk [vmem:[#allocation2 + $0x2c0] sm:$0xff] %vm571_vm1, %v20178_v2  ;;  %662 = vst.msk [vmem:[#allocation2 + $0x2c8] sm:$0xff] %vm571_vm1, %v20178_v2 }
  0x3a   : > { %663 = vst.msk [vmem:[#allocation2 + $0x2d0] sm:$0xff] %vm571_vm1, %v20178_v2  ;;  %665 = vst.msk [vmem:[#allocation2 + $0x2e0] sm:$0xff] %vm571_vm1, %v20178_v2 }
  0x3b   : > { %666 = vst.msk [vmem:[#allocation2 + $0x2e8] sm:$0xff] %vm571_vm1, %v20178_v2  ;;  %667 = vst.msk [vmem:[#allocation2 + $0x2f0] sm:$0xff] %vm571_vm1, %v20178_v2 }
  0x3c   : > { %669 = vst.msk [vmem:[#allocation2 + $0x300] sm:$0xff] %vm571_vm1, %v20178_v2  ;;  %670 = vst.msk [vmem:[#allocation2 + $0x308] sm:$0xff] %vm571_vm1, %v20178_v2 }
  0x3d   : > { %671 = vst.msk [vmem:[#allocation2 + $0x310] sm:$0xff] %vm571_vm1, %v20178_v2  ;;  %673 = vst.msk [vmem:[#allocation2 + $0x320] sm:$0xff] %vm571_vm1, %v20178_v2 }
  0x3e   : > { %674 = vst.msk [vmem:[#allocation2 + $0x328] sm:$0xff] %vm571_vm1, %v20178_v2  ;;  %675 = vst.msk [vmem:[#allocation2 + $0x330] sm:$0xff] %vm571_vm1, %v20178_v2 }
  0x3f   : > { %677 = vst.msk [vmem:[#allocation2 + $0x340] sm:$0xff] %vm571_vm1, %v20178_v2  ;;  %678 = vst.msk [vmem:[#allocation2 + $0x348] sm:$0xff] %vm571_vm1, %v20178_v2 }
  0x40   : > { %679 = vst.msk [vmem:[#allocation2 + $0x350] sm:$0xff] %vm571_vm1, %v20178_v2  ;;  %681 = vst.msk [vmem:[#allocation2 + $0x360] sm:$0xff] %vm571_vm1, %v20178_v2 }
  0x41   : > { %682 = vst.msk [vmem:[#allocation2 + $0x368] sm:$0xff] %vm571_vm1, %v20178_v2  ;;  %683 = vst.msk [vmem:[#allocation2 + $0x370] sm:$0xff] %vm571_vm1, %v20178_v2 }
  0x42   : > { %685 = vst.msk [vmem:[#allocation2 + $0x380] sm:$0xff] %vm571_vm1, %v20178_v2  ;;  %686 = vst.msk [vmem:[#allocation2 + $0x388] sm:$0xff] %vm571_vm1, %v20178_v2 }
  0x43   : > { %687 = vst.msk [vmem:[#allocation2 + $0x390] sm:$0xff] %vm571_vm1, %v20178_v2  ;;  %689 = vst.msk [vmem:[#allocation2 + $0x3a0] sm:$0xff] %vm571_vm1, %v20178_v2 }
  0x44   : > { %690 = vst.msk [vmem:[#allocation2 + $0x3a8] sm:$0xff] %vm571_vm1, %v20178_v2  ;;  %691 = vst.msk [vmem:[#allocation2 + $0x3b0] sm:$0xff] %vm571_vm1, %v20178_v2 }
  0x45   : > { %693 = vst.msk [vmem:[#allocation2 + $0x3c0] sm:$0xff] %vm571_vm1, %v20178_v2  ;;  %694 = vst.msk [vmem:[#allocation2 + $0x3c8] sm:$0xff] %vm571_vm1, %v20178_v2 }
  0x46   : > { %695 = vst.msk [vmem:[#allocation2 + $0x3d0] sm:$0xff] %vm571_vm1, %v20178_v2  ;;  %697 = vst.msk [vmem:[#allocation2 + $0x3e0] sm:$0xff] %vm571_vm1, %v20178_v2 }
  0x47   : > { %698 = vst.msk [vmem:[#allocation2 + $0x3e8] sm:$0xff] %vm571_vm1, %v20178_v2  ;;  %699 = vst.msk [vmem:[#allocation2 + $0x3f0] sm:$0xff] %vm571_vm1, %v20178_v2 }
  0x48   : > { %701 = vst.msk [vmem:[#allocation2 + $0x400] sm:$0xff] %vm571_vm1, %v20178_v2  ;;  %702 = vst.msk [vmem:[#allocation2 + $0x408] sm:$0xff] %vm571_vm1, %v20178_v2 }
  0x49   : > { %703 = vst.msk [vmem:[#allocation2 + $0x410] sm:$0xff] %vm571_vm1, %v20178_v2  ;;  %705 = vst.msk [vmem:[#allocation2 + $0x420] sm:$0xff] %vm571_vm1, %v20178_v2 }
  0x4a   : > { %706 = vst.msk [vmem:[#allocation2 + $0x428] sm:$0xff] %vm571_vm1, %v20178_v2  ;;  %707 = vst.msk [vmem:[#allocation2 + $0x430] sm:$0xff] %vm571_vm1, %v20178_v2 }
  0x4b   : > { %709 = vst.msk [vmem:[#allocation2 + $0x440] sm:$0xff] %vm571_vm1, %v20178_v2  ;;  %710 = vst.msk [vmem:[#allocation2 + $0x448] sm:$0xff] %vm571_vm1, %v20178_v2 }
  0x4c   : > { %711 = vst.msk [vmem:[#allocation2 + $0x450] sm:$0xff] %vm571_vm1, %v20178_v2  ;;  %713 = vst.msk [vmem:[#allocation2 + $0x460] sm:$0xff] %vm571_vm1, %v20178_v2 }
  0x4d   : > { %714 = vst.msk [vmem:[#allocation2 + $0x468] sm:$0xff] %vm571_vm1, %v20178_v2  ;;  %715 = vst.msk [vmem:[#allocation2 + $0x470] sm:$0xff] %vm571_vm1, %v20178_v2 }
  0x4e   : > { %580 = vst.msk [vmem:[#allocation2 + $0x38] sm:$0x1] %vm575_vm2, %v20178_v2  ;;  %576 = vst.msk [vmem:[#allocation2 + $0x18] sm:$0x1] %vm575_vm2, %v20178_v2 }
  0x4f   : > { %584 = vst.msk [vmem:[#allocation2 + $0x58] sm:$0x1] %vm575_vm2, %v20178_v2  ;;  %588 = vst.msk [vmem:[#allocation2 + $0x78] sm:$0x1] %vm575_vm2, %v20178_v2 }
  0x50   : > { %592 = vst.msk [vmem:[#allocation2 + $0x98] sm:$0x1] %vm575_vm2, %v20178_v2  ;;  %596 = vst.msk [vmem:[#allocation2 + $0xb8] sm:$0x1] %vm575_vm2, %v20178_v2 }
  0x51   : > { %600 = vst.msk [vmem:[#allocation2 + $0xd8] sm:$0x1] %vm575_vm2, %v20178_v2  ;;  %604 = vst.msk [vmem:[#allocation2 + $0xf8] sm:$0x1] %vm575_vm2, %v20178_v2 }
  0x52   : > { %608 = vst.msk [vmem:[#allocation2 + $0x118] sm:$0x1] %vm575_vm2, %v20178_v2  ;;  %612 = vst.msk [vmem:[#allocation2 + $0x138] sm:$0x1] %vm575_vm2, %v20178_v2 }
  0x53   : > { %616 = vst.msk [vmem:[#allocation2 + $0x158] sm:$0x1] %vm575_vm2, %v20178_v2  ;;  %620 = vst.msk [vmem:[#allocation2 + $0x178] sm:$0x1] %vm575_vm2, %v20178_v2 }
  0x54   : > { %624 = vst.msk [vmem:[#allocation2 + $0x198] sm:$0x1] %vm575_vm2, %v20178_v2  ;;  %628 = vst.msk [vmem:[#allocation2 + $0x1b8] sm:$0x1] %vm575_vm2, %v20178_v2 }
  0x55   : > { %632 = vst.msk [vmem:[#allocation2 + $0x1d8] sm:$0x1] %vm575_vm2, %v20178_v2  ;;  %636 = vst.msk [vmem:[#allocation2 + $0x1f8] sm:$0x1] %vm575_vm2, %v20178_v2 }
  0x56   : > { %640 = vst.msk [vmem:[#allocation2 + $0x218] sm:$0x1] %vm575_vm2, %v20178_v2  ;;  %644 = vst.msk [vmem:[#allocation2 + $0x238] sm:$0x1] %vm575_vm2, %v20178_v2 }
  0x57   : > { %648 = vst.msk [vmem:[#allocation2 + $0x258] sm:$0x1] %vm575_vm2, %v20178_v2  ;;  %652 = vst.msk [vmem:[#allocation2 + $0x278] sm:$0x1] %vm575_vm2, %v20178_v2 }
  0x58   : > { %656 = vst.msk [vmem:[#allocation2 + $0x298] sm:$0x1] %vm575_vm2, %v20178_v2  ;;  %660 = vst.msk [vmem:[#allocation2 + $0x2b8] sm:$0x1] %vm575_vm2, %v20178_v2 }
  0x59   : > { %664 = vst.msk [vmem:[#allocation2 + $0x2d8] sm:$0x1] %vm575_vm2, %v20178_v2  ;;  %668 = vst.msk [vmem:[#allocation2 + $0x2f8] sm:$0x1] %vm575_vm2, %v20178_v2 }
  0x5a   : > { %672 = vst.msk [vmem:[#allocation2 + $0x318] sm:$0x1] %vm575_vm2, %v20178_v2  ;;  %676 = vst.msk [vmem:[#allocation2 + $0x338] sm:$0x1] %vm575_vm2, %v20178_v2 }
  0x5b   : > { %680 = vst.msk [vmem:[#allocation2 + $0x358] sm:$0x1] %vm575_vm2, %v20178_v2  ;;  %684 = vst.msk [vmem:[#allocation2 + $0x378] sm:$0x1] %vm575_vm2, %v20178_v2 }
  0x5c   : > { %688 = vst.msk [vmem:[#allocation2 + $0x398] sm:$0x1] %vm575_vm2, %v20178_v2  ;;  %692 = vst.msk [vmem:[#allocation2 + $0x3b8] sm:$0x1] %vm575_vm2, %v20178_v2 }
  0x5d   : > { %696 = vst.msk [vmem:[#allocation2 + $0x3d8] sm:$0x1] %vm575_vm2, %v20178_v2  ;;  %700 = vst.msk [vmem:[#allocation2 + $0x3f8] sm:$0x1] %vm575_vm2, %v20178_v2 }
  0x5e   : > { %704 = vst.msk [vmem:[#allocation2 + $0x418] sm:$0x1] %vm575_vm2, %v20178_v2  ;;  %708 = vst.msk [vmem:[#allocation2 + $0x438] sm:$0x1] %vm575_vm2, %v20178_v2 }
  0x5f   : > { %712 = vst.msk [vmem:[#allocation2 + $0x458] sm:$0x1] %vm575_vm2, %v20178_v2  ;;  %716 = vst.msk [vmem:[#allocation2 + $0x478] sm:$0x1] %vm575_vm2, %v20178_v2 }
  0x60   : > { %1006 = vst.msk [vmem:[#allocation2 + $0x28] sm:$0xff] %vm571_vm1, %v941_v10  ;;  %1007 = vst.msk [vmem:[#allocation2 + $0x30] sm:$0xff] %vm571_vm1, %v942_v11 }
  0x61   : > { %1008 = vst.msk [vmem:[#allocation2 + $0x48] sm:$0xff] %vm571_vm1, %v943_v12  ;;  %1009 = vst.msk [vmem:[#allocation2 + $0x50] sm:$0xff] %vm571_vm1, %v944_v15 }
  0x62   : > { %1010 = vst.msk [vmem:[#allocation2 + $0x68] sm:$0xff] %vm571_vm1, %v945_v19  ;;  %1011 = vst.msk [vmem:[#allocation2 + $0x70] sm:$0xff] %vm571_vm1, %v946_v20 }
  0x63   : > { %1012 = vst.msk [vmem:[#allocation2 + $0x88] sm:$0xff] %vm571_vm1, %v947_v22  ;;  %1013 = vst.msk [vmem:[#allocation2 + $0x90] sm:$0xff] %vm571_vm1, %v948_v25  ;;  %v889_v22 = vld [vmem:[%s15416_s19 + $0xd0] sm:$0xff]  ;;  %v891_v25 = vld [vmem:[%s15416_s19 + $0xe0] sm:$0xff] }
  0x64   : > { %1014 = vst.msk [vmem:[#allocation2 + $0xa8] sm:$0xff] %vm571_vm1, %v949_v26  ;;  %1015 = vst.msk [vmem:[#allocation2 + $0xb0] sm:$0xff] %vm571_vm1, %v950_v27  ;;  %v892_v26 = vld [vmem:[%s15416_s19 + $0xe8] sm:$0xff]  ;;  %v967_v27 = vmul.f32 %v15419_v4, %v889_v22  ;;  %v969_v29 = vmul.f32 %v15419_v4, %v891_v25  ;;  %v906_v25 = vld [vmem:[%s15416_s19 + $0x158] sm:$0xff] }
  0x65   : > { %1016 = vst.msk [vmem:[#allocation2 + $0xc8] sm:$0xff] %vm571_vm1, %v951_v31  ;;  %1017 = vst.msk [vmem:[#allocation2 + $0xd0] sm:$0xff] %vm571_vm1, %v952_v32  ;;  %v970_v30 = vmul.f32 %v15419_v4, %v892_v26 }
  0x66   : > { %1018 = vst.msk [vmem:[#allocation2 + $0xe8] sm:$0xff] %vm571_vm1, %v953_v34  ;;  %1019 = vst.msk [vmem:[#allocation2 + $0xf0] sm:$0xff] %vm571_vm1, %v954_v37 }
  0x67   : > { %1020 = vst.msk [vmem:[#allocation2 + $0x108] sm:$0xff] %vm571_vm1, %v955_v38  ;;  %1021 = vst.msk [vmem:[#allocation2 + $0x110] sm:$0xff] %vm571_vm1, %v956_v39  ;;  %v15491_v55 = vld [vmem:[#allocation2 + $0x28] sm:$0xff]  ;;  %v15493_v56 = vld [vmem:[#allocation2 + $0x30] sm:$0xff] }
  0x68   : > { %v15495_v57 = vld [vmem:[#allocation2 + $0x48] sm:$0xff]  ;;  %1022 = vst.msk [vmem:[#allocation2 + $0x128] sm:$0xff] %vm571_vm1, %v957_v43  ;;  %1023 = vst.msk [vmem:[#allocation2 + $0x130] sm:$0xff] %vm571_vm1, %v958_v44  ;;  %v15505_v61 = vpack.c.bf16 %v15493_v56, %v15491_v55  ;;  %v2417_v62 = vrot.slane %v15491_v55, 1  ;;  %v20180_v1 = vrot.slane %v15493_v56, 1  ;;  %v15515_v5 = vld [vmem:[#allocation2 + $0x50] sm:$0xff] }
  0x69   : > { %1024 = vst.msk [vmem:[#allocation2 + $0x148] sm:$0xff] %vm571_vm1, %v959_v46  ;;  %1025 = vst.msk [vmem:[#allocation2 + $0x150] sm:$0xff] %vm571_vm1, %v960_v49  ;;  %v15530_v7 = vpack.c.bf16 %v15515_v5, %v15495_v57  ;;  %v15537_v11 = vld [vmem:[#allocation2 + $0x68] sm:$0xff]  ;;  %v15539_v12 = vld [vmem:[#allocation2 + $0x70] sm:$0xff] }
  0x6a   : > { %20448 = vst [vmem:[#allocation7_spill] sm:$0xff] %v15505_v61  ;;  %1026 = vst.msk [vmem:[#allocation2 + $0x168] sm:$0xff] %vm571_vm1, %v961_v50  ;;  %12492 = vmatmul.mubr.msk.bf16.vlgmr.msra.gmra.mrb[0].mxu0 %vm571_vm1, %v15505_v61  ;;  %v15535_v10 = vsel %vm2411_vm3, %v2417_v62, %v20180_v1  ;;  %v15544_v13 = vld [vmem:[#allocation2 + $0x88] sm:$0xff]  ;;  %v15546_v14 = vld [vmem:[#allocation2 + $0x90] sm:$0xff]  ;;  %v15552_v15 = vpack.c.bf16 %v15539_v12, %v15537_v11 }
  0x6b   : > { %1027 = vst.msk [vmem:[#allocation2 + $0x170] sm:$0xff] %vm571_vm1, %v962_v51  ;;  %1028 = vst.msk [vmem:[#allocation2 + $0x188] sm:$0xff] %vm571_vm1, %v963_v58  ;;  %12556 = vmatpush3.bf16.msra.mxu0 %v2088_v63  ;;  %12495 = vmatprep.mubr.msk.bf16.mxu0 %vm571_vm1, %v15530_v7  ;;  %v15556_v16 = vpack.c.bf16 %v15546_v14, %v15544_v13  ;;  %v15562_v17 = vld [vmem:[#allocation2 + $0xa8] sm:$0xff]  ;;  %v15564_v18 = vld [vmem:[#allocation2 + $0xb0] sm:$0xff]  ;;  %v974_v58 = vmul.f32 %v15631_v42, %v896_v45 }
  0x6c   : > { %1029 = vst.msk [vmem:[#allocation2 + $0x190] sm:$0xff] %vm571_vm1, %v964_v59  ;;  %1030 = vst.msk [vmem:[#allocation2 + $0x1a8] sm:$0xff] %vm571_vm1, %v965_v60  ;;  %14772 = vmatprep.subr.msk.bf16.mxu0 %vm1698_vm0, %v15524_v3  ;;  %v15566_v19 = vld [vmem:[#allocation2 + $0xc8] sm:$0xff]  ;;  %v15568_v20 = vld [vmem:[#allocation2 + $0xd0] sm:$0xff]  ;;  %v15572_v21 = vpack.c.bf16 %v15564_v18, %v15562_v17  ;;  %v976_v60 = vmul.f32 %v15631_v42, %v898_v47  ;;  %v982_v47 = vmul.f32 %v15631_v42, %v904_v0 }
  0x6d   : > { %20449 = vst [vmem:[#allocation8_spill] sm:$0xff] %v15530_v7  ;;  %1031 = vst.msk [vmem:[#allocation2 + $0x1b0] sm:$0xff] %vm571_vm1, %v966_v6  ;;  %v15578_v24 = vpack.c.bf16 %v15568_v20, %v15566_v19  ;;  %v15590_v31 = vld [vmem:[#allocation2 + $0xe8] sm:$0xff]  ;;  %v15592_v32 = vld [vmem:[#allocation2 + $0xf0] sm:$0xff] }
  0x6e   : > { %20450 = vst [vmem:[#allocation9_spill] sm:$0xff] %v15552_v15  ;;  %20451 = vst [vmem:[#allocation10_spill] sm:$0xff] %v15556_v16  ;;  %v15596_v33 = vld [vmem:[#allocation2 + $0x108] sm:$0xff]  ;;  %v15598_v34 = vld [vmem:[#allocation2 + $0x110] sm:$0xff]  ;;  %v15604_v4 = vpack.c.bf16 %v15592_v32, %v15590_v31 }
  0x6f   : > { %20452 = vst [vmem:[#allocation11_spill] sm:$0xff] %v15572_v21  ;;  %20453 = vst [vmem:[#allocation12_spill] sm:$0xff] %v15578_v24  ;;  %v15608_v35 = vpack.c.bf16 %v15598_v34, %v15596_v33  ;;  %v15614_v36 = vld [vmem:[#allocation2 + $0x128] sm:$0xff]  ;;  %v15616_v37 = vld [vmem:[#allocation2 + $0x130] sm:$0xff] }
  0x70   : > { %1032 = vst.msk [vmem:[#allocation2 + $0x1c8] sm:$0xff] %vm571_vm1, %v967_v27  ;;  %1033 = vst.msk [vmem:[#allocation2 + $0x1d0] sm:$0xff] %vm571_vm1, %v968_v28  ;;  %v15618_v38 = vld [vmem:[#allocation2 + $0x148] sm:$0xff]  ;;  %v15620_v39 = vld [vmem:[#allocation2 + $0x150] sm:$0xff]  ;;  %v15624_v40 = vpack.c.bf16 %v15616_v37, %v15614_v36  ;;  %v978_v27 = vmul.f32 %v15631_v42, %v900_v53  ;;  %v979_v28 = vmul.f32 %v15631_v42, %v901_v54 }
  0x71   : > { %1034 = vst.msk [vmem:[#allocation2 + $0x1e8] sm:$0xff] %vm571_vm1, %v969_v29  ;;  %1035 = vst.msk [vmem:[#allocation2 + $0x1f0] sm:$0xff] %vm571_vm1, %v970_v30  ;;  %v15628_v41 = vpack.c.bf16 %v15620_v39, %v15618_v38  ;;  %v15633_v43 = vld [vmem:[#allocation2 + $0x168] sm:$0xff]  ;;  %v895_v44 = vld [vmem:[%s15416_s19 + $0x100] sm:$0xff]  ;;  %v983_v54 = vmul.f32 %v15631_v42, %v905_v23 }
  0x72   : > { %12496 = vmatmul.mubr.msk.bf16.gmra.mrb[4].mxu0 %vm571_vm1, %v15552_v15  ;;  %20454 = vst [vmem:[#allocation13_spill] sm:$0xff] %v15604_v4  ;;  %20455 = vst [vmem:[#allocation14_spill] sm:$0xff] %v15608_v35  ;;  %v897_v46 = vld [vmem:[%s15416_s19 + $0x110] sm:$0xff]  ;;  %v15645_v49 = vld [vmem:[#allocation2 + $0x188] sm:$0xff]  ;;  %v973_v52 = vmul.f32 %v15631_v42, %v895_v44 }
  0x73   : > { %12499 = vmatprep.mubr.msk.bf16.mxu0 %vm571_vm1, %v15556_v16  ;;  %20456 = vst [vmem:[#allocation15_spill] sm:$0xff] %v15624_v40  ;;  %20457 = vst [vmem:[#allocation16_spill] sm:$0xff] %v15628_v41  ;;  %v15643_v48 = vld [vmem:[#allocation2 + $0x170] sm:$0xff]  ;;  %v899_v50 = vld [vmem:[%s15416_s19 + $0x120] sm:$0xff]  ;;  %v975_v59 = vmul.f32 %v15631_v42, %v897_v46 }
  0x74   : > { %v15648_v51 = vld [vmem:[#allocation2 + $0x190] sm:$0xff]  ;;  %v902_v62 = vld [vmem:[%s15416_s19 + $0x138] sm:$0xff]  ;;  %v903_v63 = vld [vmem:[%s15416_s19 + $0x140] sm:$0xff]  ;;  %v15661_v6 = vpack.c.bf16 %v15643_v48, %v15633_v43  ;;  %1038 = vst.msk [vmem:[#allocation2 + $0x268] sm:$0xff] %vm571_vm1, %v973_v52  ;;  %v977_v22 = vmul.f32 %v15631_v42, %v899_v50 }
  0x75   : > { %v15669_v26 = vpack.c.bf16 %v15648_v51, %v15645_v49  ;;  %1039 = vst.msk [vmem:[#allocation2 + $0x270] sm:$0xff] %vm571_vm1, %v974_v58  ;;  %1040 = vst.msk [vmem:[#allocation2 + $0x288] sm:$0xff] %vm571_vm1, %v975_v59  ;;  %v907_v29 = vld [vmem:[%s15416_s19 + $0x160] sm:$0xff]  ;;  %v908_v30 = vld [vmem:[%s15416_s19 + $0x168] sm:$0xff]  ;;  %v980_v45 = vmul.f32 %v15631_v42, %v902_v62  ;;  %v981_v46 = vmul.f32 %v15631_v42, %v903_v63 }
  0x76   : > { %20458 = vst [vmem:[#allocation17_spill] sm:$0xff] %v15661_v6  ;;  %1041 = vst.msk [vmem:[#allocation2 + $0x290] sm:$0xff] %vm571_vm1, %v976_v60  ;;  %v909_v44 = vld [vmem:[%s15416_s19 + $0x170] sm:$0xff]  ;;  %v910_v50 = vld [vmem:[%s15416_s19 + $0x178] sm:$0xff]  ;;  %v984_v59 = vmul.f32 %v15631_v42, %v906_v25  ;;  %v985_v63 = vmul.f32 %v15631_v42, %v907_v29  ;;  %v986_v0 = vmul.f32 %v15631_v42, %v908_v30 }
  0x77   : > { %20459 = vst [vmem:[#allocation18_spill] sm:$0xff] %v15669_v26  ;;  %1042 = vst.msk [vmem:[#allocation2 + $0x2a8] sm:$0xff] %vm571_vm1, %v977_v22  ;;  %v911_v52 = vld [vmem:[%s15416_s19 + $0x180] sm:$0xff]  ;;  %v912_v58 = vld [vmem:[%s15416_s19 + $0x188] sm:$0xff]  ;;  %v987_v22 = vmul.f32 %v15631_v42, %v909_v44 }
  0x78   : > { %v15686_v53 = vld [vmem:[#allocation2 + $0x1a8] sm:$0xff]  ;;  %1043 = vst.msk [vmem:[#allocation2 + $0x2b0] sm:$0xff] %vm571_vm1, %v978_v27  ;;  %1044 = vst.msk [vmem:[#allocation2 + $0x2c8] sm:$0xff] %vm571_vm1, %v979_v28  ;;  %v913_v60 = vld [vmem:[%s15416_s19 + $0x190] sm:$0xff]  ;;  %v989_v29 = vmul.f32 %v15631_v42, %v911_v52  ;;  %v990_v30 = vmul.f32 %v15631_v42, %v912_v58 }
  0x79   : > { %v914_v62 = vld [vmem:[%s15416_s19 + $0x198] sm:$0xff]  ;;  %1045 = vst.msk [vmem:[#allocation2 + $0x2d0] sm:$0xff] %vm571_vm1, %v980_v45  ;;  %1046 = vst.msk [vmem:[#allocation2 + $0x2e8] sm:$0xff] %vm571_vm1, %v981_v46  ;;  %v915_v23 = vld [vmem:[%s15416_s19 + $0x1a0] sm:$0xff]  ;;  %v988_v45 = vmul.f32 %v15631_v42, %v910_v50 }
  0x7a   : > { %12500 = vmatmul.mubr.msk.bf16.gmra.mrb[8].mxu0 %vm571_vm1, %v15572_v21  ;;  %1047 = vst.msk [vmem:[#allocation2 + $0x2f0] sm:$0xff] %vm571_vm1, %v982_v47  ;;  %v916_v25 = vld [vmem:[%s15416_s19 + $0x1a8] sm:$0xff]  ;;  %v917_v27 = vld [vmem:[%s15416_s19 + $0x1b0] sm:$0xff]  ;;  %1048 = vst.msk [vmem:[#allocation2 + $0x308] sm:$0xff] %vm571_vm1, %v983_v54  ;;  %v991_v54 = vmul.f32 %v15631_v42, %v913_v60  ;;  %v992_v50 = vmul.f32 %v15631_v42, %v914_v62  ;;  %v993_v58 = vmul.f32 %v15631_v42, %v915_v23 }
  0x7b   : > { %12503 = vmatprep.mubr.msk.bf16.mxu0 %vm571_vm1, %v15578_v24  ;;  %v15707_v28 = vld [vmem:[#allocation2 + $0x1b0] sm:$0xff]  ;;  %1049 = vst.msk [vmem:[#allocation2 + $0x310] sm:$0xff] %vm571_vm1, %v984_v59  ;;  %v918_v44 = vld [vmem:[%s15416_s19 + $0x1b8] sm:$0xff]  ;;  %v919_v46 = vld [vmem:[%s15416_s19 + $0x1c0] sm:$0xff] }
  0x7c   : > { %v15716_v47 = vld [vmem:[#allocation2 + $0x1c8] sm:$0xff]  ;;  %v15718_v2 = vld [vmem:[#allocation2 + $0x1d0] sm:$0xff]  ;;  %1050 = vst.msk [vmem:[#allocation2 + $0x328] sm:$0xff] %vm571_vm1, %v985_v63  ;;  %1051 = vst.msk [vmem:[#allocation2 + $0x330] sm:$0xff] %vm571_vm1, %v986_v0  ;;  %v994_v63 = vmul.f32 %v15631_v42, %v916_v25  ;;  %v995_v0 = vmul.f32 %v15631_v42, %v917_v27  ;;  %v15735_v60 = vpack.c.bf16 %v15707_v28, %v15686_v53  ;;  %v1312_v27 = vrot.slane %v15424_v8, 7 }
  0x7d   : > { %1052 = vst.msk [vmem:[#allocation2 + $0x348] sm:$0xff] %vm571_vm1, %v987_v22  ;;  %v920_v52 = vld [vmem:[%s15416_s19 + $0x1c8] sm:$0xff]  ;;  %v1070_v59 = vld [vmem:[#allocation2] sm:$0xff]  ;;  %1053 = vst.msk [vmem:[#allocation2 + $0x350] sm:$0xff] %vm571_vm1, %v988_v45  ;;  %v996_v62 = vmul.f32 %v15631_v42, %v918_v44  ;;  %v997_v22 = vmul.f32 %v15631_v42, %v919_v46  ;;  %v15743_v23 = vpack.c.bf16 %v15718_v2, %v15716_v47  ;;  %v1314_v45 = vrot.slane %v15426_v9, 7 }
  0x7e   : > { %1054 = vst.msk [vmem:[#allocation2 + $0x368] sm:$0xff] %vm571_vm1, %v989_v29  ;;  %1055 = vst.msk [vmem:[#allocation2 + $0x370] sm:$0xff] %vm571_vm1, %v990_v30  ;;  %v921_v1 = vld [vmem:[%s15416_s19 + $0x1d0] sm:$0xff]  ;;  %v998_v25 = vmul.f32 %v15631_v42, %v920_v52  ;;  %v1311_v29 = vrot.slane %v1070_v59, 7  ;;  %v15760_v44 = vld [vmem:[#allocation2 + $0x1e8] sm:$0xff] }
  0x7f   : > { %20460 = vst [vmem:[#allocation19_spill] sm:$0xff] %v15735_v60  ;;  %1056 = vst.msk [vmem:[#allocation2 + $0x388] sm:$0xff] %vm571_vm1, %v991_v54  ;;  %v999_v30 = vmul.f32 %v15631_v42, %v921_v1  ;;  %v15762_v46 = vld [vmem:[#allocation2 + $0x1f0] sm:$0xff]  ;;  %v1074_v54 = vld [vmem:[#allocation2 + $0x20] sm:$0xff]  ;;  %v1315_v1 = vsel %vm1310_vm4, %v1312_v27, %v1314_v45  ;;  %v2412_v45 = vrot.slane %v15424_v8, 1 }
  0x80   : > { %1057 = vst.msk [vmem:[#allocation2 + $0x390] sm:$0xff] %vm571_vm1, %v992_v50  ;;  %20461 = vst [vmem:[#allocation20_spill] sm:$0xff] %v15743_v23  ;;  %v1313_v50 = vsel %vm1310_vm4, %v1311_v29, %v1312_v27  ;;  %v1078_v52 = vld [vmem:[#allocation2 + $0x40] sm:$0xff]  ;;  %v1077_v59 = vld [vmem:[#allocation2 + $0x38] sm:$0x1] }
  0x81   : > { %1058 = vst.msk [vmem:[#allocation2 + $0x3a8] sm:$0xff] %vm571_vm1, %v993_v58  ;;  %1059 = vst.msk [vmem:[#allocation2 + $0x3b0] sm:$0xff] %vm571_vm1, %v994_v63  ;;  %v15768_v58 = vpack.c.bf16 %v15762_v46, %v15760_v44  ;;  %v1316_v63 = vrot.slane %v1074_v54, 7  ;;  %v2420_v29 = vrot.slane %v1077_v59, 1  ;;  %v922_v27 = vld [vmem:[%s15416_s19 + $0x1d8] sm:$0xff] }
  0x82   : > { %12504 = vmatmul.mubr.msk.bf16.gmra.mrb[12].mxu0 %vm571_vm1, %v15604_v4  ;;  %1060 = vst.msk [vmem:[#allocation2 + $0x3c8] sm:$0xff] %vm571_vm1, %v995_v0  ;;  %1061 = vst.msk [vmem:[#allocation2 + $0x3d0] sm:$0xff] %vm571_vm1, %v996_v62  ;;  %v1317_v0 = vrot.slane %v15491_v55, 7  ;;  %v1319_v62 = vrot.slane %v15493_v56, 7  ;;  %v16066_v16 = vld [vmem:[#allocation2 + $0x310] sm:$0xff] }
  0x83   : > { %12507 = vmatprep.mubr.msk.bf16.mxu0 %vm571_vm1, %v15608_v35  ;;  %1062 = vst.msk [vmem:[#allocation2 + $0x3e8] sm:$0xff] %vm571_vm1, %v997_v22  ;;  %1063 = vst.msk [vmem:[#allocation2 + $0x3f0] sm:$0xff] %vm571_vm1, %v998_v25  ;;  %v1535_v22 = vpack.c.bf16 %v1315_v1, %v1313_v50  ;;  %v1322_v25 = vrot.slane %v15495_v57, 7  ;;  %v1082_v50 = vld [vmem:[#allocation2 + $0x60] sm:$0xff]  ;;  %v2413_v1 = vrot.slane %v15426_v9, 1  ;;  %v1332_v9 = vrot.slane %v15544_v13, 7 }
  0x84   : > { %1064 = vst.msk [vmem:[#allocation2 + $0x408] sm:$0xff] %vm571_vm1, %v999_v30  ;;  %20462 = vst [vmem:[#allocation21_spill] sm:$0xff] %v15768_v58  ;;  %v1324_v30 = vrot.slane %v15515_v5, 7  ;;  %v1318_v54 = vsel %vm1310_vm4, %v1316_v63, %v1317_v0  ;;  %v1320_v55 = vsel %vm1310_vm4, %v1317_v0, %v1319_v62  ;;  %v1327_v63 = vrot.slane %v15537_v11, 7  ;;  %v1086_v62 = vld [vmem:[#allocation2 + $0x80] sm:$0xff]  ;;  %v16086_v61 = vld [vmem:[#allocation2 + $0x330] sm:$0xff] }
  0x85   : > { %v1329_v0 = vrot.slane %v15539_v12, 7 }
  0x8a   : > { %12508 = vmatmul.mubr.msk.bf16.gmra.mrb[16].mxu0 %vm571_vm1, %v15624_v40  ;;  %v1331_v40 = vrot.slane %v1086_v62, 7 }
  0x8b   : > { %12511 = vmatprep.mubr.msk.bf16.mxu0 %vm571_vm1, %v15628_v41 }
  0x92   : > { %12512 = vmatmul.mubr.msk.bf16.gmra.mrb[20].mxu0 %vm571_vm1, %v15661_v6  ;;  %v15794_v6 = vpack.c.bf16 %v1320_v55, %v1318_v54 }
  0x93   : > { %12515 = vmatprep.mubr.msk.bf16.mxu0 %vm571_vm1, %v15669_v26  ;;  %v923_v26 = vld [vmem:[%s15416_s19 + $0x1e0] sm:$0xff] }
  0x94   : > { %20464 = vst [vmem:[#allocation22_spill] sm:$0xff] %v15794_v6  ;;  %v1001_v54 = vmul.f32 %v15631_v42, %v923_v26 }
  0x96   : > { %1066 = vst.msk [vmem:[#allocation2 + $0x428] sm:$0xff] %vm571_vm1, %v1001_v54 }
  0x9a   : > { %12516 = vmatmul.mubr.msk.bf16.gmra.mrb[24].mxu0 %vm571_vm1, %v15735_v60  ;;  %v20463_v60 = vrot.slane %v15493_v56, 1  ;;  %v2423_v56 = vrot.slane %v15515_v5, 1 }
  0x9b   : > { %12519 = vmatprep.mubr.msk.bf16.mxu0 %vm571_vm1, %v15743_v23  ;;  %v1321_v23 = vrot.slane %v1078_v52, 7  ;;  %v2422_v52 = vrot.slane %v15495_v57, 1  ;;  %v1334_v57 = vrot.slane %v15546_v14, 7 }
  0x9c   : > { %v2421_v8 = vsel %vm2411_vm3, %v20463_v60, %v2420_v29  ;;  %v2427_v60 = vrot.slane %v15537_v11, 1  ;;  %v2428_v29 = vrot.slane %v15539_v12, 1  ;;  %v15813_v11 = vld [vmem:[%s20174_s9 + $0xc] sm:$0xf] }
  0x9d   : > { %v1323_v59 = vsel %vm1310_vm4, %v1321_v23, %v1322_v25  ;;  %v1326_v23 = vrot.slane %v1082_v50, 7  ;;  %v15808_v50 = vsel %vm2411_vm3, %v2412_v45, %v2413_v1  ;;  %v1335_v26 = vsel %vm1310_vm4, %v1332_v9, %v1334_v57 }
  0x9e   : > { %v2429_v62 = vsel %vm2411_vm3, %v2427_v60, %v2428_v29 }
  0x9f   : > { %v1328_v12 = vsel %vm1310_vm4, %v1326_v23, %v1327_v63  ;;  %v1337_v23 = vrot.slane %v15562_v17, 7 }
  0xa2   : > { %12520 = vmatmul.mubr.msk.bf16.gmra.mrb[28].mxu0 %vm571_vm1, %v15768_v58  ;;  %v1325_v58 = vsel %vm1310_vm4, %v1322_v25, %v1324_v30  ;;  %v924_v25 = vld [vmem:[%s15416_s19 + $0x1e8] sm:$0xff]  ;;  %v1073_v30 = vld [vmem:[#allocation2 + $0x18] sm:$0x1] }
  0xa3   : > { %12557 = vmatprep.mubr.msk.bf16.mxu0 %vm571_vm1, %v1535_v22  ;;  %v1000_v22 = vmul.f32 %v15631_v42, %v922_v27  ;;  %v15800_v41 = vpack.c.bf16 %v1325_v58, %v1323_v59  ;;  %v2767_v27 = vsel %vm1698_vm0, %v15524_v3, 0  ;;  %v1002_v55 = vmul.f32 %v15631_v42, %v924_v25  ;;  %v1081_v59 = vld [vmem:[#allocation2 + $0x58] sm:$0x1] }
  0xa4   : > { %v2415_v5 = vrot.slane %v1073_v30, 1  ;;  %v1330_v3 = vsel %vm1310_vm4, %v1327_v63, %v1329_v0  ;;  %v15822_v42 = vpack.c.bf16 %v2421_v8, %v15535_v10  ;;  %v2432_v58 = vrot.slane %v15544_v13, 1  ;;  %v1085_v0 = vld [vmem:[#allocation2 + $0x78] sm:$0x1]  ;;  %v1090_v8 = vld [vmem:[#allocation2 + $0xa0] sm:$0xff] }
  0xa5   : > { %20465 = vst [vmem:[#allocation23_spill] sm:$0xff] %v15800_v41  ;;  %1065 = vst.msk [vmem:[#allocation2 + $0x410] sm:$0xff] %vm571_vm1, %v1000_v22  ;;  %v2424_v63 = vsel %vm2411_vm3, %v2422_v52, %v2423_v56  ;;  %v1333_v10 = vsel %vm1310_vm4, %v1331_v40, %v1332_v9  ;;  %v2425_v22 = vrot.slane %v1081_v59, 1  ;;  %v2430_v57 = vrot.slane %v1085_v0, 1  ;;  %v1094_v30 = vld [vmem:[#allocation2 + $0xc0] sm:$0xff] }
  0xa6   : > { %1067 = vst.msk [vmem:[#allocation2 + $0x430] sm:$0xff] %vm571_vm1, %v1002_v55  ;;  %v15829_v45 = vsel %vm2411_vm3, %v2413_v1, %v2415_v5  ;;  %v2433_v1 = vrot.slane %v15546_v14, 1  ;;  %v1339_v52 = vrot.slane %v15564_v18, 7  ;;  %v2437_v25 = vrot.slane %v15562_v17, 1 }
  0xa7   : > { %v2438_v40 = vrot.slane %v15564_v18, 1  ;;  %v15843_v9 = vpack.c.bf16 %v1330_v3, %v1328_v12  ;;  %v2426_v60 = vsel %vm2411_vm3, %v2423_v56, %v2425_v22  ;;  %v15847_v54 = vpack.c.bf16 %v1335_v26, %v1333_v10  ;;  %v1089_v18 = vld [vmem:[#allocation2 + $0x98] sm:$0x1]  ;;  %v1098_v22 = vld [vmem:[#allocation2 + $0xe0] sm:$0xff] }
  0xa8   : > { %v1336_v55 = vrot.slane %v1090_v8, 7  ;;  %v15849_v5 = vpack.c.bf16 %v2426_v60, %v2424_v63  ;;  %v1342_v59 = vrot.slane %v15566_v19, 7  ;;  %v1344_v17 = vrot.slane %v15568_v20, 7  ;;  %v1093_v26 = vld [vmem:[#allocation2 + $0xb8] sm:$0x1] }
  0xa9   : > { %20466 = vst [vmem:[#allocation24_spill] sm:$0xff] %v15843_v9  ;;  %20467 = vst [vmem:[#allocation25_spill] sm:$0xff] %v15847_v54  ;;  %v1341_v0 = vrot.slane %v1094_v30, 7  ;;  %v2434_v56 = vsel %vm2411_vm3, %v2432_v58, %v2433_v1  ;;  %v1340_v12 = vsel %vm1310_vm4, %v1337_v23, %v1339_v52  ;;  %v2435_v3 = vrot.slane %v1089_v18, 1 }
  0xaa   : > { %12558 = vmatmul.mubr.msk.bf16.vlgmr.msra.gmra.mrb[0].mxu0 %vm571_vm1, %v15794_v6  ;;  %v2439_v63 = vsel %vm2411_vm3, %v2437_v25, %v2438_v40  ;;  %v1345_v8 = vsel %vm1310_vm4, %v1342_v59, %v1344_v17  ;;  %v2443_v58 = vrot.slane %v15568_v20, 1  ;;  %v1347_v30 = vrot.slane %v15590_v31, 7 }
  0xab   : > { %12622 = vmatpush3.bf16.msra.mxu0 %v2767_v27  ;;  %12561 = vmatprep.mubr.msk.bf16.mxu0 %vm571_vm1, %v15800_v41  ;;  %v2431_v27 = vsel %vm2411_vm3, %v2428_v29, %v2430_v57  ;;  %v1338_v29 = vsel %vm1310_vm4, %v1336_v55, %v1337_v23  ;;  %v1343_v10 = vsel %vm1310_vm4, %v1341_v0, %v1342_v59  ;;  %v2440_v57 = vrot.slane %v1093_v26, 1 }
  0xac   : > { %14773 = vmatprep.subr.msk.bf16.mxu0 %vm1698_vm0, %v15813_v11  ;;  %v15851_v14 = vpack.c.bf16 %v2431_v27, %v2429_v62  ;;  %v2442_v62 = vrot.slane %v15566_v19, 1  ;;  %v1349_v60 = vrot.slane %v15592_v32, 7  ;;  %v1102_v27 = vld [vmem:[#allocation2 + $0x100] sm:$0xff]  ;;  %v2436_v23 = vsel %vm2411_vm3, %v2433_v1, %v2435_v3 }
  0xad   : > { %v2447_v52 = vrot.slane %v15590_v31, 1  ;;  %v15871_v25 = vpack.c.bf16 %v1340_v12, %v1338_v29  ;;  %v15873_v19 = vpack.c.bf16 %v2436_v23, %v2434_v56  ;;  %v2441_v55 = vsel %vm2411_vm3, %v2438_v40, %v2440_v57  ;;  %v1097_v31 = vld [vmem:[#allocation2 + $0xd8] sm:$0x1]  ;;  %v16182_v41 = vld [vmem:[#allocation2 + $0x430] sm:$0xff] }
  0xae   : > { %v2448_v59 = vrot.slane %v15592_v32, 1  ;;  %v15877_v17 = vpack.c.bf16 %v1345_v8, %v1343_v10  ;;  %v1346_v20 = vrot.slane %v1098_v22, 7  ;;  %v15879_v0 = vpack.c.bf16 %v2441_v55, %v2439_v63  ;;  %v1101_v12 = vld [vmem:[#allocation2 + $0xf8] sm:$0x1]  ;;  %v1106_v22 = vld [vmem:[#allocation2 + $0x120] sm:$0xff] }
  0xaf   : > { %20468 = vst [vmem:[#allocation26_spill] sm:$0xff] %v15871_v25  ;;  %v1352_v18 = vrot.slane %v15596_v33, 7  ;;  %v1354_v26 = vrot.slane %v15598_v34, 7  ;;  %v1351_v1 = vrot.slane %v1102_v27, 7  ;;  %v2444_v56 = vsel %vm2411_vm3, %v2442_v62, %v2443_v58  ;;  %v1110_v55 = vld [vmem:[#allocation2 + $0x140] sm:$0xff] }
  0xb0   : > { %20469 = vst [vmem:[#allocation27_spill] sm:$0xff] %v15877_v17  ;;  %v1348_v32 = vsel %vm1310_vm4, %v1346_v20, %v1347_v30  ;;  %v1350_v40 = vsel %vm1310_vm4, %v1347_v30, %v1349_v60  ;;  %v2445_v29 = vrot.slane %v1097_v31, 1  ;;  %v2449_v3 = vsel %vm2411_vm3, %v2447_v52, %v2448_v59 }
  0xb1   : > { %v2452_v63 = vrot.slane %v15596_v33, 1  ;;  %v1353_v10 = vsel %vm1310_vm4, %v1351_v1, %v1352_v18  ;;  %v1355_v8 = vsel %vm1310_vm4, %v1352_v18, %v1354_v26  ;;  %v2450_v57 = vrot.slane %v1101_v12, 1 }
  0xb2   : > { %12562 = vmatmul.mubr.msk.bf16.gmra.mrb[4].mxu0 %vm571_vm1, %v15843_v9  ;;  %v2453_v62 = vrot.slane %v15598_v34, 1  ;;  %v1357_v27 = vrot.slane %v15614_v36, 7  ;;  %v1359_v23 = vrot.slane %v15616_v37, 7  ;;  %v2446_v30 = vsel %vm2411_vm3, %v2443_v58, %v2445_v29 }
  0xb3   : > { %12565 = vmatprep.mubr.msk.bf16.mxu0 %vm571_vm1, %v15847_v54  ;;  %v2457_v60 = vrot.slane %v15614_v36, 1  ;;  %v15899_v52 = vpack.c.bf16 %v1350_v40, %v1348_v32  ;;  %v15901_v33 = vpack.c.bf16 %v2446_v30, %v2444_v56  ;;  %v2451_v20 = vsel %vm2411_vm3, %v2448_v59, %v2450_v57  ;;  %v1105_v36 = vld [vmem:[#allocation2 + $0x118] sm:$0x1]  ;;  %v16160_v54 = vld [vmem:[#allocation2 + $0x408] sm:$0xff] }
  0xb4   : > { %v2458_v18 = vrot.slane %v15616_v37, 1  ;;  %v15905_v26 = vpack.c.bf16 %v1355_v8, %v1353_v10  ;;  %v1356_v34 = vrot.slane %v1106_v22, 7  ;;  %v15907_v1 = vpack.c.bf16 %v2451_v20, %v2449_v3  ;;  %v1109_v40 = vld [vmem:[#allocation2 + $0x138] sm:$0x1]  ;;  %v1114_v22 = vld [vmem:[#allocation2 + $0x160] sm:$0xff] }
  0xb5   : > { %20470 = vst [vmem:[#allocation28_spill] sm:$0xff] %v15899_v52  ;;  %v1362_v31 = vrot.slane %v15618_v38, 7  ;;  %v1364_v12 = vrot.slane %v15620_v39, 7  ;;  %v1361_v58 = vrot.slane %v1110_v55, 7  ;;  %v2454_v56 = vsel %vm2411_vm3, %v2452_v63, %v2453_v62  ;;  %v1118_v20 = vld [vmem:[#allocation2 + $0x180] sm:$0xff] }
  0xb6   : > { %20471 = vst [vmem:[#allocation29_spill] sm:$0xff] %v15905_v26  ;;  %v1358_v37 = vsel %vm1310_vm4, %v1356_v34, %v1357_v27  ;;  %v1360_v59 = vsel %vm1310_vm4, %v1357_v27, %v1359_v23  ;;  %v2455_v32 = vrot.slane %v1105_v36, 1  ;;  %v2459_v29 = vsel %vm2411_vm3, %v2457_v60, %v2458_v18 }
  0xb7   : > { %v2462_v3 = vrot.slane %v15618_v38, 1  ;;  %v1363_v10 = vsel %vm1310_vm4, %v1361_v58, %v1362_v31  ;;  %v1365_v8 = vsel %vm1310_vm4, %v1362_v31, %v1364_v12  ;;  %v2460_v57 = vrot.slane %v1109_v40, 1 }
  0xb8   : > { %v2463_v63 = vrot.slane %v15620_v39, 1  ;;  %v1367_v55 = vrot.slane %v15633_v43, 7  ;;  %v1369_v30 = vrot.slane %v15643_v48, 7  ;;  %v2456_v27 = vsel %vm2411_vm3, %v2453_v62, %v2455_v32 }
  0xb9   : > { %v2467_v23 = vrot.slane %v15633_v43, 1  ;;  %v15927_v60 = vpack.c.bf16 %v1360_v59, %v1358_v37  ;;  %v15929_v38 = vpack.c.bf16 %v2456_v27, %v2454_v56  ;;  %v2461_v34 = vsel %vm2411_vm3, %v2458_v18, %v2460_v57  ;;  %v1113_v43 = vld [vmem:[#allocation2 + $0x158] sm:$0x1] }
  0xba   : > { %12566 = vmatmul.mubr.msk.bf16.gmra.mrb[8].mxu0 %vm571_vm1, %v15871_v25  ;;  %v2468_v31 = vrot.slane %v15643_v48, 1  ;;  %v15933_v12 = vpack.c.bf16 %v1365_v8, %v1363_v10  ;;  %v1366_v39 = vrot.slane %v1114_v22, 7  ;;  %v15935_v58 = vpack.c.bf16 %v2461_v34, %v2459_v29  ;;  %v1117_v59 = vld [vmem:[#allocation2 + $0x178] sm:$0x1]  ;;  %v1122_v22 = vld [vmem:[#allocation2 + $0x1a0] sm:$0xff] }
  0xbb   : > { %12569 = vmatprep.mubr.msk.bf16.mxu0 %vm571_vm1, %v15877_v17  ;;  %20472 = vst [vmem:[#allocation30_spill] sm:$0xff] %v15927_v60  ;;  %v1372_v36 = vrot.slane %v15645_v49, 7  ;;  %v1374_v40 = vrot.slane %v15648_v51, 7  ;;  %v1371_v62 = vrot.slane %v1118_v20, 7  ;;  %v2464_v56 = vsel %vm2411_vm3, %v2462_v3, %v2463_v63  ;;  %v1126_v34 = vld [vmem:[#allocation2 + $0x1c0] sm:$0xff]  ;;  %v16158_v17 = vld [vmem:[#allocation2 + $0x3f0] sm:$0xff] }
  0xbc   : > { %20473 = vst [vmem:[#allocation31_spill] sm:$0xff] %v15933_v12  ;;  %v1368_v48 = vsel %vm1310_vm4, %v1366_v39, %v1367_v55  ;;  %v1370_v18 = vsel %vm1310_vm4, %v1367_v55, %v1369_v30  ;;  %v2465_v37 = vrot.slane %v1113_v43, 1  ;;  %v2469_v32 = vsel %vm2411_vm3, %v2467_v23, %v2468_v31  ;;  %v1198_v25 = vld [vmem:[#allocation2 + $0x400] sm:$0xff] }
  0xbd   : > { %v2472_v29 = vrot.slane %v15645_v49, 1  ;;  %v1373_v10 = vsel %vm1310_vm4, %v1371_v62, %v1372_v36  ;;  %v1375_v8 = vsel %vm1310_vm4, %v1372_v36, %v1374_v40  ;;  %v2470_v57 = vrot.slane %v1117_v59, 1 }
  0xbe   : > { %v2473_v3 = vrot.slane %v15648_v51, 1  ;;  %v1377_v20 = vrot.slane %v15686_v53, 7  ;;  %v1379_v27 = vrot.slane %v15707_v28, 7  ;;  %v2466_v55 = vsel %vm2411_vm3, %v2463_v63, %v2465_v37 }
  0xbf   : > { %v2477_v30 = vrot.slane %v15686_v53, 1  ;;  %v15955_v23 = vpack.c.bf16 %v1370_v18, %v1368_v48  ;;  %v15957_v49 = vpack.c.bf16 %v2466_v55, %v2464_v56  ;;  %v2471_v39 = vsel %vm2411_vm3, %v2468_v31, %v2470_v57  ;;  %v1121_v53 = vld [vmem:[#allocation2 + $0x198] sm:$0x1] }
  0xc0   : > { %v2478_v36 = vrot.slane %v15707_v28, 1  ;;  %v15961_v40 = vpack.c.bf16 %v1375_v8, %v1373_v10  ;;  %v1376_v51 = vrot.slane %v1122_v22, 7  ;;  %v15963_v62 = vpack.c.bf16 %v2471_v39, %v2469_v32  ;;  %v1125_v18 = vld [vmem:[#allocation2 + $0x1b8] sm:$0x1]  ;;  %v1130_v22 = vld [vmem:[#allocation2 + $0x1e0] sm:$0xff] }
  0xc1   : > { %20474 = vst [vmem:[#allocation32_spill] sm:$0xff] %v15955_v23  ;;  %v1382_v43 = vrot.slane %v15716_v47, 7  ;;  %v1384_v59 = vrot.slane %v15718_v2, 7  ;;  %v1381_v63 = vrot.slane %v1126_v34, 7  ;;  %v2474_v56 = vsel %vm2411_vm3, %v2472_v29, %v2473_v3  ;;  %v1142_v39 = vld [vmem:[#allocation2 + $0x240] sm:$0xff] }
  0xc2   : > { %12570 = vmatmul.mubr.msk.bf16.gmra.mrb[12].mxu0 %vm571_vm1, %v15899_v52  ;;  %20475 = vst [vmem:[#allocation33_spill] sm:$0xff] %v15961_v40  ;;  %v1378_v28 = vsel %vm1310_vm4, %v1376_v51, %v1377_v20  ;;  %v1380_v31 = vsel %vm1310_vm4, %v1377_v20, %v1379_v27  ;;  %v2475_v48 = vrot.slane %v1121_v53, 1  ;;  %v2479_v37 = vsel %vm2411_vm3, %v2477_v30, %v2478_v36  ;;  %v15981_v20 = vld [vmem:[#allocation2 + $0x248] sm:$0xff]  ;;  %v15983_v27 = vld [vmem:[#allocation2 + $0x250] sm:$0xff] }
  0xc3   : > { %12573 = vmatprep.mubr.msk.bf16.mxu0 %vm571_vm1, %v15905_v26  ;;  %v2482_v32 = vrot.slane %v15716_v47, 1  ;;  %v1383_v10 = vsel %vm1310_vm4, %v1381_v63, %v1382_v43  ;;  %v1385_v8 = vsel %vm1310_vm4, %v1382_v43, %v1384_v59  ;;  %v2480_v57 = vrot.slane %v1125_v18, 1  ;;  %v16136_v26 = vld [vmem:[#allocation2 + $0x3c8] sm:$0xff] }
  0xc4   : > { %v2483_v29 = vrot.slane %v15718_v2, 1  ;;  %v1387_v34 = vrot.slane %v15760_v44, 7  ;;  %v1389_v55 = vrot.slane %v15762_v46, 7  ;;  %v2476_v30 = vsel %vm2411_vm3, %v2473_v3, %v2475_v48  ;;  %v1133_v48 = vld [vmem:[#allocation2 + $0x1f8] sm:$0x1] }
  0xc5   : > { %v2487_v47 = vrot.slane %v15760_v44, 1  ;;  %v15987_v51 = vpack.c.bf16 %v1380_v31, %v1378_v28  ;;  %v15989_v43 = vpack.c.bf16 %v2476_v30, %v2474_v56  ;;  %v2481_v59 = vsel %vm2411_vm3, %v2478_v36, %v2480_v57  ;;  %v1129_v44 = vld [vmem:[#allocation2 + $0x1d8] sm:$0x1]  ;;  %v1146_v28 = vld [vmem:[#allocation2 + $0x260] sm:$0xff]  ;;  %v16011_v57 = vld [vmem:[#allocation2 + $0x270] sm:$0xff] }
  0xc6   : > { %v2488_v2 = vrot.slane %v15762_v46, 1  ;;  %v15993_v63 = vpack.c.bf16 %v1385_v8, %v1383_v10  ;;  %v1386_v53 = vrot.slane %v1130_v22, 7  ;;  %v15995_v18 = vpack.c.bf16 %v2481_v59, %v2479_v37  ;;  %v16009_v22 = vld [vmem:[#allocation2 + $0x268] sm:$0xff]  ;;  %v16015_v59 = vld [vmem:[#allocation2 + $0x290] sm:$0xff] }
  0xc7   : > { %20476 = vst [vmem:[#allocation34_spill] sm:$0xff] %v15987_v51  ;;  %20477 = vst [vmem:[#allocation35_spill] sm:$0xff] %v15989_v43  ;;  %v1391_v13 = vrot.slane %v1142_v39, 7  ;;  %v1392_v35 = vrot.slane %v15981_v20, 7  ;;  %v1394_v3 = vrot.slane %v15983_v27, 7  ;;  %v2484_v56 = vsel %vm2411_vm3, %v2482_v32, %v2483_v29  ;;  %v1150_v39 = vld [vmem:[#allocation2 + $0x280] sm:$0xff] }
  0xc8   : > { %20478 = vst [vmem:[#allocation36_spill] sm:$0xff] %v15993_v63  ;;  %20479 = vst [vmem:[#allocation37_spill] sm:$0xff] %v15995_v18  ;;  %v1388_v46 = vsel %vm1310_vm4, %v1386_v53, %v1387_v34  ;;  %v1390_v36 = vsel %vm1310_vm4, %v1387_v34, %v1389_v55  ;;  %v2485_v31 = vrot.slane %v1129_v44, 1  ;;  %v2489_v37 = vsel %vm2411_vm3, %v2487_v47, %v2488_v2  ;;  %v16013_v30 = vld [vmem:[#allocation2 + $0x288] sm:$0xff] }
  0xc9   : > { %v1393_v10 = vsel %vm1310_vm4, %v1391_v13, %v1392_v35  ;;  %v1395_v8 = vsel %vm1310_vm4, %v1392_v35, %v1394_v3  ;;  %v2490_v32 = vrot.slane %v1133_v48, 1  ;;  %v16018_v55 = vpack.c.bf16 %v1390_v36, %v1388_v46  ;;  %v1154_v36 = vld [vmem:[#allocation2 + $0x2a0] sm:$0xff] }
  0xca   : > { %12574 = vmatmul.mubr.msk.bf16.gmra.mrb[16].mxu0 %vm571_vm1, %v15927_v60  ;;  %v2486_v34 = vsel %vm2411_vm3, %v2483_v29, %v2485_v31  ;;  %v1396_v53 = vrot.slane %v1146_v28, 7  ;;  %v1551_v35 = vpack.c.bf16 %v1395_v8, %v1393_v10  ;;  %v1397_v3 = vrot.slane %v16009_v22, 7  ;;  %v16036_v28 = vld [vmem:[#allocation2 + $0x2a8] sm:$0xff]  ;;  %v16038_v31 = vld [vmem:[#allocation2 + $0x2b0] sm:$0xff]  ;;  %v1190_v60 = vld [vmem:[#allocation2 + $0x3c0] sm:$0xff] }
  0xcb   : > { %12577 = vmatprep.mubr.msk.bf16.mxu0 %vm571_vm1, %v15933_v12  ;;  %20480 = vst [vmem:[#allocation38_spill] sm:$0xff] %v16018_v55  ;;  %v16020_v47 = vpack.c.bf16 %v2486_v34, %v2484_v56  ;;  %v2491_v13 = vsel %vm2411_vm3, %v2488_v2, %v2490_v32  ;;  %v1399_v44 = vrot.slane %v16011_v57, 7  ;;  %v1401_v4 = vrot.slane %v1150_v39, 7  ;;  %v16040_v10 = vld [vmem:[#allocation2 + $0x2c8] sm:$0xff]  ;;  %v16042_v8 = vld [vmem:[#allocation2 + $0x2d0] sm:$0xff] }
  0xcc   : > { %v16025_v48 = vpack.c.bf16 %v2491_v13, %v2489_v37  ;;  %v1402_v24 = vrot.slane %v16013_v30, 7  ;;  %v1404_v21 = vrot.slane %v16015_v59, 7  ;;  %v1398_v29 = vsel %vm1310_vm4, %v1396_v53, %v1397_v3  ;;  %v1158_v37 = vld [vmem:[#allocation2 + $0x2c0] sm:$0xff]  ;;  %v16134_v12 = vld [vmem:[#allocation2 + $0x3b0] sm:$0xff] }
  0xcd   : > { %20481 = vst [vmem:[#allocation39_spill] sm:$0xff] %v16020_v47  ;;  %v1400_v2 = vsel %vm1310_vm4, %v1397_v3, %v1399_v44  ;;  %v1406_v34 = vrot.slane %v1154_v36, 7  ;;  %v1407_v53 = vrot.slane %v16036_v28, 7  ;;  %v1414_v13 = vrot.slane %v16042_v8, 7  ;;  %v1166_v36 = vld [vmem:[#allocation2 + $0x300] sm:$0xff] }
  0xce   : > { %20482 = vst [vmem:[#allocation40_spill] sm:$0xff] %v16025_v48  ;;  %v1403_v56 = vsel %vm1310_vm4, %v1401_v4, %v1402_v24  ;;  %v1405_v46 = vsel %vm1310_vm4, %v1402_v24, %v1404_v21  ;;  %v16044_v32 = vpack.c.bf16 %v1400_v2, %v1398_v29  ;;  %v1409_v4 = vrot.slane %v16038_v31, 7  ;;  %v1162_v2 = vld [vmem:[#allocation2 + $0x2e0] sm:$0xff] }
  0xcf   : > { %v16046_v39 = vpack.c.bf16 %v1405_v46, %v1403_v56  ;;  %v1411_v21 = vrot.slane %v1158_v37, 7  ;;  %v1412_v24 = vrot.slane %v16040_v10, 7  ;;  %v16060_v56 = vld [vmem:[#allocation2 + $0x2e8] sm:$0xff]  ;;  %v16062_v46 = vld [vmem:[#allocation2 + $0x2f0] sm:$0xff] }
  0xd0   : > { %20483 = vst [vmem:[#allocation41_spill] sm:$0xff] %v16044_v32  ;;  %v1410_v3 = vsel %vm1310_vm4, %v1407_v53, %v1409_v4  ;;  %v16064_v37 = vld [vmem:[#allocation2 + $0x308] sm:$0xff]  ;;  %v1419_v4 = vrot.slane %v16062_v46, 7 }
  0xd1   : > { %20484 = vst [vmem:[#allocation42_spill] sm:$0xff] %v16046_v39  ;;  %v1413_v44 = vsel %vm1310_vm4, %v1411_v21, %v1412_v24  ;;  %v1415_v29 = vsel %vm1310_vm4, %v1412_v24, %v1414_v13  ;;  %v1421_v21 = vrot.slane %v1166_v36, 7  ;;  %v1422_v24 = vrot.slane %v16064_v37, 7  ;;  %v16084_v36 = vld [vmem:[#allocation2 + $0x328] sm:$0xff] }
  0xd2   : > { %12578 = vmatmul.mubr.msk.bf16.gmra.mrb[20].mxu0 %vm571_vm1, %v15955_v23  ;;  %v16070_v7 = vpack.c.bf16 %v1415_v29, %v1413_v44  ;;  %v1424_v13 = vrot.slane %v16066_v16, 7 }
  0xd3   : > { %12581 = vmatprep.mubr.msk.bf16.mxu0 %vm571_vm1, %v15961_v40  ;;  %v1423_v44 = vsel %vm1310_vm4, %v1421_v21, %v1422_v24  ;;  %v16112_v40 = vld [vmem:[#allocation2 + $0x388] sm:$0xff] }
  0xd4   : > { %20486 = vst [vmem:[#allocation44_spill] sm:$0xff] %v16070_v7  ;;  %v1425_v29 = vsel %vm1310_vm4, %v1422_v24, %v1424_v13 }
  0xda   : > { %12582 = vmatmul.mubr.msk.bf16.gmra.mrb[24].mxu0 %vm571_vm1, %v15987_v51  ;;  %v1182_v51 = vld [vmem:[#allocation2 + $0x380] sm:$0xff] }
  0xdb   : > { %12585 = vmatprep.mubr.msk.bf16.mxu0 %vm571_vm1, %v15993_v63  ;;  %v16110_v63 = vld [vmem:[#allocation2 + $0x370] sm:$0xff] }
  0xe2   : > { %12586 = vmatmul.mubr.msk.bf16.gmra.mrb[28].mxu0 %vm571_vm1, %v16018_v55 }
  0xe3   : > { %12589 = vmatprep.mubr.msk.bf16.mxu0 %vm571_vm1, %v1551_v35  ;;  %v1408_v35 = vsel %vm1310_vm4, %v1406_v34, %v1407_v53  ;;  %v1416_v34 = vrot.slane %v1162_v2, 7  ;;  %v1417_v53 = vrot.slane %v16060_v56, 7  ;;  %v1170_v2 = vld [vmem:[#allocation2 + $0x320] sm:$0xff] }
  0xe4   : > { %v16068_v15 = vpack.c.bf16 %v1410_v3, %v1408_v35 }
  0xe5   : > { %v1418_v35 = vsel %vm1310_vm4, %v1416_v34, %v1417_v53  ;;  %v1420_v3 = vsel %vm1310_vm4, %v1417_v53, %v1419_v4  ;;  %v1426_v34 = vrot.slane %v1170_v2, 7  ;;  %v1427_v53 = vrot.slane %v16084_v36, 7  ;;  %v1178_v2 = vld [vmem:[#allocation2 + $0x360] sm:$0xff] }
  0xe6   : > { %20485 = vst [vmem:[#allocation43_spill] sm:$0xff] %v16068_v15  ;;  %v16092_v55 = vpack.c.bf16 %v1420_v3, %v1418_v35  ;;  %v1429_v4 = vrot.slane %v16086_v61, 7 }
  0xe7   : > { %v1428_v35 = vsel %vm1310_vm4, %v1426_v34, %v1427_v53  ;;  %v1436_v34 = vrot.slane %v1178_v2, 7  ;;  %v1186_v2 = vld [vmem:[#allocation2 + $0x3a0] sm:$0xff] }
  0xe8   : > { %20487 = vst [vmem:[#allocation45_spill] sm:$0xff] %v16092_v55  ;;  %v1430_v3 = vsel %vm1310_vm4, %v1427_v53, %v1429_v4  ;;  %v1439_v4 = vrot.slane %v16110_v63, 7 }
  0xe9   : > { %v16116_v23 = vpack.c.bf16 %v1430_v3, %v1428_v35 }
  0xea   : > { %12590 = vmatmul.mubr.msk.bf16.gmra.mrb[32].mxu0 %vm571_vm1, %v16044_v32  ;;  %v16088_v32 = vld [vmem:[#allocation2 + $0x348] sm:$0xff] }
  0xeb   : > { %12593 = vmatprep.mubr.msk.bf16.mxu0 %vm571_vm1, %v16046_v39  ;;  %v1174_v39 = vld [vmem:[#allocation2 + $0x340] sm:$0xff]  ;;  %v1432_v24 = vrot.slane %v16088_v32, 7  ;;  %20489 = vst [vmem:[#allocation47_spill] sm:$0xff] %v16116_v23 }
  0xec   : > { %v1431_v21 = vrot.slane %v1174_v39, 7  ;;  %v16108_v39 = vld [vmem:[#allocation2 + $0x368] sm:$0xff] }
  0xed   : > { %v1437_v53 = vrot.slane %v16108_v39, 7 }
  0xef   : > { %v1438_v35 = vsel %vm1310_vm4, %v1436_v34, %v1437_v53  ;;  %v1440_v3 = vsel %vm1310_vm4, %v1437_v53, %v1439_v4  ;;  %v1446_v34 = vrot.slane %v1186_v2, 7  ;;  %v1449_v4 = vrot.slane %v16134_v12, 7  ;;  %v1194_v2 = vld [vmem:[#allocation2 + $0x3e0] sm:$0xff] }
  0xf0   : > { %v16140_v52 = vpack.c.bf16 %v1440_v3, %v1438_v35 }
  0xf2   : > { %12594 = vmatmul.mubr.msk.bf16.gmra.mrb[36].mxu0 %vm571_vm1, %v16068_v15  ;;  %v16090_v15 = vld [vmem:[#allocation2 + $0x350] sm:$0xff]  ;;  %20491 = vst [vmem:[#allocation49_spill] sm:$0xff] %v16140_v52 }
  0xf3   : > { %12597 = vmatprep.mubr.msk.bf16.mxu0 %vm571_vm1, %v16070_v7  ;;  %v16094_v7 = vpack.c.bf16 %v1425_v29, %v1423_v44  ;;  %v1434_v13 = vrot.slane %v16090_v15, 7  ;;  %v1433_v44 = vsel %vm1310_vm4, %v1431_v21, %v1432_v24  ;;  %v1441_v21 = vrot.slane %v1182_v51, 7  ;;  %v16132_v51 = vld [vmem:[#allocation2 + $0x3a8] sm:$0xff] }
  0xf4   : > { %v1447_v53 = vrot.slane %v16132_v51, 7 }
  0xf5   : > { %20488 = vst [vmem:[#allocation46_spill] sm:$0xff] %v16094_v7  ;;  %v1435_v29 = vsel %vm1310_vm4, %v1432_v24, %v1434_v13  ;;  %v1442_v24 = vrot.slane %v16112_v40, 7 }
  0xf6   : > { %v1448_v35 = vsel %vm1310_vm4, %v1446_v34, %v1447_v53  ;;  %v1450_v3 = vsel %vm1310_vm4, %v1447_v53, %v1449_v4  ;;  %v1456_v34 = vrot.slane %v1194_v2, 7  ;;  %v1459_v4 = vrot.slane %v16158_v17, 7  ;;  %v1202_v2 = vld [vmem:[#allocation2 + $0x420] sm:$0xff] }
  0xf7   : > { %v16164_v9 = vpack.c.bf16 %v1450_v3, %v1448_v35 }
  0xf9   : > { %20494 = vst [vmem:[#allocation52_spill] sm:$0xff] %v16164_v9 }
  0xfa   : > { %12598 = vmatmul.mubr.msk.bf16.gmra.mrb[40].mxu0 %vm571_vm1, %v16092_v55  ;;  %v16114_v55 = vld [vmem:[#allocation2 + $0x390] sm:$0xff] }
  0xfb   : > { %12601 = vmatprep.mubr.msk.bf16.mxu0 %vm571_vm1, %v16094_v7  ;;  %v16118_v7 = vpack.c.bf16 %v1435_v29, %v1433_v44  ;;  %v1444_v13 = vrot.slane %v16114_v55, 7  ;;  %v1443_v44 = vsel %vm1310_vm4, %v1441_v21, %v1442_v24  ;;  %v1451_v21 = vrot.slane %v1190_v60, 7  ;;  %v16156_v60 = vld [vmem:[#allocation2 + $0x3e8] sm:$0xff] }
  0xfc   : > { %v1457_v53 = vrot.slane %v16156_v60, 7 }
  0xfd   : > { %20490 = vst [vmem:[#allocation48_spill] sm:$0xff] %v16118_v7  ;;  %v1445_v29 = vsel %vm1310_vm4, %v1442_v24, %v1444_v13  ;;  %v1452_v24 = vrot.slane %v16136_v26, 7 }
  0xfe   : > { %v1458_v35 = vsel %vm1310_vm4, %v1456_v34, %v1457_v53  ;;  %v1460_v3 = vsel %vm1310_vm4, %v1457_v53, %v1459_v4  ;;  %v1469_v34 = vrot.slane %v16182_v41, 7 }
  0xff   : > { %v16184_v6 = vpack.c.bf16 %v1460_v3, %v1458_v35  ;;  %v1145_v3 = vld [vmem:[#allocation2 + $0x258] sm:$0x1] }
 0x101   : > { %20496 = vst [vmem:[#allocation54_spill] sm:$0xff] %v16184_v6 }
 0x102   : > { %12602 = vmatmul.mubr.msk.bf16.gmra.mrb[44].mxu0 %vm571_vm1, %v16116_v23  ;;  %v16138_v23 = vld [vmem:[#allocation2 + $0x3d0] sm:$0xff] }
 0x103   : > { %12605 = vmatprep.mubr.msk.bf16.mxu0 %vm571_vm1, %v16118_v7  ;;  %v16142_v7 = vpack.c.bf16 %v1445_v29, %v1443_v44  ;;  %v1454_v13 = vrot.slane %v16138_v23, 7  ;;  %v1453_v44 = vsel %vm1310_vm4, %v1451_v21, %v1452_v24  ;;  %v1461_v21 = vrot.slane %v1198_v25, 7  ;;  %v16180_v25 = vld [vmem:[#allocation2 + $0x428] sm:$0xff] }
 0x105   : > { %20492 = vst [vmem:[#allocation50_spill] sm:$0xff] %v16142_v7  ;;  %v1455_v29 = vsel %vm1310_vm4, %v1452_v24, %v1454_v13  ;;  %v1462_v24 = vrot.slane %v16160_v54, 7 }
 0x10a   : > { %12606 = vmatmul.mubr.msk.bf16.gmra.mrb[48].mxu0 %vm571_vm1, %v16140_v52  ;;  %v16162_v52 = vld [vmem:[#allocation2 + $0x410] sm:$0xff] }
 0x10b   : > { %12609 = vmatprep.mubr.msk.bf16.mxu0 %vm571_vm1, %v16142_v7  ;;  %20493 = vst [vmem:[#allocation51_spill] sm:$0xff] %v16162_v52  ;;  %v16166_v7 = vpack.c.bf16 %v1455_v29, %v1453_v44  ;;  %v1464_v13 = vrot.slane %v16162_v52, 7  ;;  %v1463_v44 = vsel %vm1310_vm4, %v1461_v21, %v1462_v24 }
 0x10d   : > { %20495 = vst [vmem:[#allocation53_spill] sm:$0xff] %v16166_v7  ;;  %v1465_v29 = vsel %vm1310_vm4, %v1462_v24, %v1464_v13  ;;  %v20498_v24 = vpack.c.bf16 %v15829_v45, %v15808_v50  ;;  %v3153_v13 = vsel %vm1698_vm0, %v15813_v11, 0  ;;  %v894_v50 = vld [vmem:[%s15416_s19 + $0xf8] sm:$0xff]  ;;  %v14831_v11 = vld [vmem:[%s15411_s15] ss:$0 sm:$0xff] }
 0x10e   : > { %v16186_v52 = vpack.c.bf16 %v1465_v29, %v1463_v44  ;;  %v972_v35 = vmul.f32 %v14831_v11, %v894_v50  ;;  %v2492_v44 = vrot.slane %v15981_v20, 1  ;;  %v2493_v29 = vrot.slane %v15983_v27, 1 }
 0x10f   : > { %v2498_v20 = vrot.slane %v16011_v57, 1  ;;  %v2502_v27 = vrot.slane %v16013_v30, 1 }
 0x110   : > { %20497 = vst [vmem:[#allocation55_spill] sm:$0xff] %v16186_v52  ;;  %1037 = vst.msk [vmem:[#allocation2 + $0x210] sm:$0xff] %vm571_vm1, %v972_v35 }
 0x112   : > { %12610 = vmatmul.mubr.msk.bf16.gmra.mrb[52].mxu0 %vm571_vm1, %v16164_v9  ;;  %v1466_v9 = vrot.slane %v1202_v2, 7  ;;  %v2495_v2 = vrot.slane %v1145_v3, 1 }
 0x113   : > { %12613 = vmatprep.mubr.msk.bf16.mxu0 %vm571_vm1, %v16166_v7  ;;  %v1467_v7 = vrot.slane %v16180_v25, 7 }
 0x115   : > { %v1468_v53 = vsel %vm1310_vm4, %v1466_v9, %v1467_v7  ;;  %v1470_v4 = vsel %vm1310_vm4, %v1467_v7, %v1469_v34  ;;  %v16209_v9 = vld [vmem:[%s20174_s9 + $0x10] sm:$0xf]  ;;  %v2494_v34 = vsel %vm2411_vm3, %v2492_v44, %v2493_v29 }
 0x116   : > { %v16196_v21 = vpack.c.bf16 %v1470_v4, %v1468_v53  ;;  %v893_v7 = vld [vmem:[%s15416_s19 + $0xf0] sm:$0xff]  ;;  %v2496_v53 = vsel %vm2411_vm3, %v2493_v29, %v2495_v2  ;;  %v1149_v4 = vld [vmem:[#allocation2 + $0x278] sm:$0x1] }
 0x117   : > { %v971_v45 = vmul.f32 %v14831_v11, %v893_v7  ;;  %v2497_v7 = vrot.slane %v16009_v22, 1  ;;  %v2500_v50 = vrot.slane %v1149_v4, 1  ;;  %v2503_v11 = vrot.slane %v16015_v59, 1  ;;  %v1157_v2 = vld [vmem:[#allocation2 + $0x2b8] sm:$0x1] }
 0x119   : > { %1036 = vst.msk [vmem:[#allocation2 + $0x208] sm:$0xff] %vm571_vm1, %v971_v45  ;;  %v2499_v35 = vsel %vm2411_vm3, %v2497_v7, %v2498_v20  ;;  %v2501_v3 = vsel %vm2411_vm3, %v2498_v20, %v2500_v50  ;;  %v2504_v44 = vsel %vm2411_vm3, %v2502_v27, %v2503_v11  ;;  %v2513_v7 = vrot.slane %v16042_v8, 1 }
 0x11a   : > { %12614 = vmatmul.mubr.msk.bf16.gmra.mrb[56].mxu0 %vm571_vm1, %v16184_v6 }
 0x11b   : > { %12617 = vmatprep.mubr.msk.bf16.mxu0 %vm571_vm1, %v16186_v52 }
 0x122   : > { %12618 = vmatmul.mubr.msk.bf16.gmra.mrb[60].mxu0 %vm571_vm1, %v16196_v21 }
 0x123   : > { %12623 = vmatprep.mubr.msk.bf16.mxu0 %vm571_vm1, %v20498_v24  ;;  %v1153_v24 = vld [vmem:[#allocation2 + $0x298] sm:$0x1] }
 0x124   : > { %v2505_v45 = vrot.slane %v1153_v24, 1  ;;  %v2507_v24 = vrot.slane %v16036_v28, 1 }
 0x126   : > { %v2506_v29 = vsel %vm2411_vm3, %v2503_v11, %v2505_v45 }
 0x127   : > { %v16263_v4 = vpack.c.bf16 %v2506_v29, %v2504_v44 }
 0x129   : > { %20500 = vst [vmem:[#allocation57_spill] sm:$0xff] %v16263_v4 }
 0x12a   : > { %12624 = vmatmul.mubr.msk.bf16.vlgmr.msra.gmra.mrb[0].mxu0 %vm571_vm1, %v15822_v42 }
 0x12b   : > { %12688 = vmatpush3.bf16.msra.mxu0 %v3153_v13  ;;  %12627 = vmatprep.mubr.msk.bf16.mxu0 %vm571_vm1, %v15849_v5  ;;  %v2652_v13 = vpack.c.bf16 %v2496_v53, %v2494_v34  ;;  %v1161_v34 = vld [vmem:[#allocation2 + $0x2d8] sm:$0x1]  ;;  %v16261_v53 = vpack.c.bf16 %v2501_v3, %v2499_v35 }
 0x12c   : > { %14774 = vmatprep.subr.msk.bf16.mxu0 %vm1698_vm0, %v16209_v9  ;;  %v2515_v20 = vrot.slane %v1161_v34, 1  ;;  %v1165_v35 = vld [vmem:[#allocation2 + $0x2f8] sm:$0x1]  ;;  %v2518_v34 = vrot.slane %v16062_v46, 1 }
 0x12d   : > { %20499 = vst [vmem:[#allocation56_spill] sm:$0xff] %v16261_v53  ;;  %v1169_v3 = vld [vmem:[#allocation2 + $0x318] sm:$0x1] }
 0x12e   : > { %v2516_v45 = vsel %vm2411_vm3, %v2513_v7, %v2515_v20 }
 0x132   : > { %12628 = vmatmul.mubr.msk.bf16.gmra.mrb[4].mxu0 %vm571_vm1, %v15851_v14 }
 0x133   : > { %12631 = vmatprep.mubr.msk.bf16.mxu0 %vm571_vm1, %v15873_v19 }
 0x13a   : > { %12632 = vmatmul.mubr.msk.bf16.gmra.mrb[8].mxu0 %vm571_vm1, %v15879_v0 }
 0x13b   : > { %12635 = vmatprep.mubr.msk.bf16.mxu0 %vm571_vm1, %v15901_v33 }
 0x142   : > { %12636 = vmatmul.mubr.msk.bf16.gmra.mrb[12].mxu0 %vm571_vm1, %v15907_v1 }
 0x143   : > { %12639 = vmatprep.mubr.msk.bf16.mxu0 %vm571_vm1, %v15929_v38 }
 0x14a   : > { %12640 = vmatmul.mubr.msk.bf16.gmra.mrb[16].mxu0 %vm571_vm1, %v15935_v58 }
 0x14b   : > { %12643 = vmatprep.mubr.msk.bf16.mxu0 %vm571_vm1, %v15957_v49 }
 0x152   : > { %12644 = vmatmul.mubr.msk.bf16.gmra.mrb[20].mxu0 %vm571_vm1, %v15963_v62 }
 0x153   : > { %12647 = vmatprep.mubr.msk.bf16.mxu0 %vm571_vm1, %v15989_v43 }
 0x15a   : > { %12648 = vmatmul.mubr.msk.bf16.gmra.mrb[24].mxu0 %vm571_vm1, %v15995_v18 }
 0x15b   : > { %12651 = vmatprep.mubr.msk.bf16.mxu0 %vm571_vm1, %v16020_v47  ;;  %v2510_v47 = vrot.slane %v1157_v2, 1  ;;  %v2517_v2 = vrot.slane %v16060_v56, 1 }
 0x162   : > { %12652 = vmatmul.mubr.msk.bf16.gmra.mrb[28].mxu0 %vm571_vm1, %v16025_v48  ;;  %v2508_v48 = vrot.slane %v16038_v31, 1 }
 0x163   : > { %12655 = vmatprep.mubr.msk.bf16.mxu0 %vm571_vm1, %v2652_v13  ;;  %v2512_v13 = vrot.slane %v16040_v10, 1 }
 0x164   : > { %v2509_v50 = vsel %vm2411_vm3, %v2507_v24, %v2508_v48  ;;  %v2511_v27 = vsel %vm2411_vm3, %v2508_v48, %v2510_v47  ;;  %v2523_v24 = vrot.slane %v16066_v16, 1  ;;  %v2525_v47 = vrot.slane %v1169_v3, 1 }
 0x165   : > { %v2514_v11 = vsel %vm2411_vm3, %v2512_v13, %v2513_v7  ;;  %v16277_v44 = vpack.c.bf16 %v2511_v27, %v2509_v50  ;;  %v2519_v48 = vsel %vm2411_vm3, %v2517_v2, %v2518_v34  ;;  %v1173_v50 = vld [vmem:[#allocation2 + $0x338] sm:$0x1]  ;;  %v2528_v3 = vrot.slane %v16086_v61, 1 }
 0x166   : > { %v16279_v29 = vpack.c.bf16 %v2516_v45, %v2514_v11  ;;  %v2526_v20 = vsel %vm2411_vm3, %v2523_v24, %v2525_v47  ;;  %v1177_v27 = vld [vmem:[#allocation2 + $0x358] sm:$0x1]  ;;  %v2533_v2 = vrot.slane %v16090_v15, 1 }
 0x167   : > { %20501 = vst [vmem:[#allocation58_spill] sm:$0xff] %v16277_v44 }
 0x168   : > { %20502 = vst [vmem:[#allocation59_spill] sm:$0xff] %v16279_v29 }
 0x16a   : > { %12656 = vmatmul.mubr.msk.bf16.gmra.mrb[32].mxu0 %vm571_vm1, %v16261_v53  ;;  %v2520_v53 = vrot.slane %v1165_v35, 1  ;;  %v2527_v35 = vrot.slane %v16084_v36, 1 }
 0x16b   : > { %12659 = vmatprep.mubr.msk.bf16.mxu0 %vm571_vm1, %v16263_v4  ;;  %v2522_v4 = vrot.slane %v16064_v37, 1 }
 0x16c   : > { %v2521_v13 = vsel %vm2411_vm3, %v2518_v34, %v2520_v53  ;;  %v2535_v53 = vrot.slane %v1177_v27, 1  ;;  %v2538_v27 = vrot.slane %v16110_v63, 1 }
 0x16d   : > { %v2524_v7 = vsel %vm2411_vm3, %v2522_v4, %v2523_v24  ;;  %v16293_v11 = vpack.c.bf16 %v2521_v13, %v2519_v48  ;;  %v2529_v4 = vsel %vm2411_vm3, %v2527_v35, %v2528_v3  ;;  %v1181_v48 = vld [vmem:[#allocation2 + $0x378] sm:$0x1]  ;;  %v2543_v35 = vrot.slane %v16114_v55, 1 }
 0x16e   : > { %v16295_v45 = vpack.c.bf16 %v2526_v20, %v2524_v7  ;;  %v2536_v47 = vsel %vm2411_vm3, %v2533_v2, %v2535_v53  ;;  %v1185_v13 = vld [vmem:[#allocation2 + $0x398] sm:$0x1] }
 0x16f   : > { %20503 = vst [vmem:[#allocation60_spill] sm:$0xff] %v16293_v11 }
 0x170   : > { %20504 = vst [vmem:[#allocation61_spill] sm:$0xff] %v16295_v45 }
 0x172   : > { %12660 = vmatmul.mubr.msk.bf16.gmra.mrb[36].mxu0 %vm571_vm1, %v16277_v44  ;;  %v2530_v44 = vrot.slane %v1173_v50, 1  ;;  %v2537_v50 = vrot.slane %v16108_v39, 1 }
 0x173   : > { %12663 = vmatprep.mubr.msk.bf16.mxu0 %vm571_vm1, %v16279_v29  ;;  %v2532_v29 = vrot.slane %v16088_v32, 1 }
 0x174   : > { %v2531_v34 = vsel %vm2411_vm3, %v2528_v3, %v2530_v44  ;;  %v2545_v44 = vrot.slane %v1185_v13, 1  ;;  %v2548_v13 = vrot.slane %v16134_v12, 1 }
 0x175   : > { %v2534_v24 = vsel %vm2411_vm3, %v2532_v29, %v2533_v2  ;;  %v16309_v7 = vpack.c.bf16 %v2531_v34, %v2529_v4  ;;  %v2539_v29 = vsel %vm2411_vm3, %v2537_v50, %v2538_v27  ;;  %v1189_v4 = vld [vmem:[#allocation2 + $0x3b8] sm:$0x1]  ;;  %v2553_v50 = vrot.slane %v16138_v23, 1 }
 0x176   : > { %v16311_v20 = vpack.c.bf16 %v2536_v47, %v2534_v24  ;;  %v2546_v53 = vsel %vm2411_vm3, %v2543_v35, %v2545_v44  ;;  %v1193_v34 = vld [vmem:[#allocation2 + $0x3d8] sm:$0x1] }
 0x177   : > { %20505 = vst [vmem:[#allocation62_spill] sm:$0xff] %v16309_v7 }
 0x178   : > { %20506 = vst [vmem:[#allocation63_spill] sm:$0xff] %v16311_v20 }
 0x17a   : > { %12664 = vmatmul.mubr.msk.bf16.gmra.mrb[40].mxu0 %vm571_vm1, %v16293_v11  ;;  %v2540_v11 = vrot.slane %v1181_v48, 1  ;;  %v2547_v48 = vrot.slane %v16132_v51, 1 }
 0x17b   : > { %12667 = vmatprep.mubr.msk.bf16.mxu0 %vm571_vm1, %v16295_v45  ;;  %v2542_v45 = vrot.slane %v16112_v40, 1 }
 0x17c   : > { %v2541_v3 = vsel %vm2411_vm3, %v2538_v27, %v2540_v11  ;;  %v2555_v11 = vrot.slane %v1193_v34, 1  ;;  %v2558_v34 = vrot.slane %v16158_v17, 1 }
 0x17d   : > { %v2544_v2 = vsel %vm2411_vm3, %v2542_v45, %v2543_v35  ;;  %v16325_v24 = vpack.c.bf16 %v2541_v3, %v2539_v29  ;;  %v2549_v45 = vsel %vm2411_vm3, %v2547_v48, %v2548_v13  ;;  %v1197_v29 = vld [vmem:[#allocation2 + $0x3f8] sm:$0x1]  ;;  %v2562_v48 = vrot.slane %v16160_v54, 1 }
 0x17e   : > { %v16327_v47 = vpack.c.bf16 %v2546_v53, %v2544_v2  ;;  %v2556_v44 = vsel %vm2411_vm3, %v2553_v50, %v2555_v11  ;;  %v1201_v3 = vld [vmem:[#allocation2 + $0x418] sm:$0x1] }
 0x17f   : > { %20507 = vst [vmem:[#allocation64_spill] sm:$0xff] %v16325_v24 }
 0x180   : > { %20508 = vst [vmem:[#allocation65_spill] sm:$0xff] %v16327_v47 }
 0x182   : > { %12668 = vmatmul.mubr.msk.bf16.gmra.mrb[44].mxu0 %vm571_vm1, %v16309_v7  ;;  %v2550_v7 = vrot.slane %v1189_v4, 1  ;;  %v2557_v4 = vrot.slane %v16156_v60, 1 }
 0x183   : > { %12671 = vmatprep.mubr.msk.bf16.mxu0 %vm571_vm1, %v16311_v20  ;;  %v2552_v20 = vrot.slane %v16136_v26, 1 }
 0x184   : > { %v2551_v27 = vsel %vm2411_vm3, %v2548_v13, %v2550_v7  ;;  %v2565_v13 = vrot.slane %v1201_v3, 1  ;;  %v2559_v11 = vsel %vm2411_vm3, %v2557_v4, %v2558_v34  ;;  %v1205_v3 = vld [vmem:[#allocation2 + $0x438] sm:$0x1]  ;;  %v2567_v4 = vrot.slane %v16180_v25, 1 }
 0x185   : > { %v2554_v35 = vsel %vm2411_vm3, %v2552_v20, %v2553_v50  ;;  %v16341_v2 = vpack.c.bf16 %v2551_v27, %v2549_v45  ;;  %v925_v20 = vld [vmem:[%s15416_s19 + $0x1f0] sm:$0xff]  ;;  %v926_v50 = vld [vmem:[%s15416_s19 + $0x1f8] sm:$0xff]  ;;  %v14832_v27 = vld [vmem:[%s15411_s15 + $0x1] ss:$0 sm:$0xff]  ;;  %s17307_s15 = scalar_lea.vmem %s20167_s2, %s21100_s17 }
 0x186   : > { %v16343_v53 = vpack.c.bf16 %v2556_v44, %v2554_v35  ;;  %v1003_v35 = vmul.f32 %v14832_v27, %v925_v20  ;;  %v1004_v44 = vmul.f32 %v14832_v27, %v926_v50  ;;  %v3519_v20 = vsel %vm1698_vm0, %v16209_v9, 0  ;;  %v11362_v50 = vld [vmem:[%s20174_s9 + $0x14] sm:$0xf]  ;;  %v20518_v9 = vld [vmem:[#allocation27_spill] sm:$0xff] }
 0x187   : > { %20509 = vst [vmem:[#allocation66_spill] sm:$0xff] %v16341_v2  ;;  %v20516_v27 = vld [vmem:[#allocation25_spill] sm:$0xff] }
 0x188   : > { %20510 = vst [vmem:[#allocation67_spill] sm:$0xff] %v16343_v53  ;;  %1068 = vst.msk [vmem:[#allocation2 + $0x448] sm:$0xff] %vm571_vm1, %v1003_v35  ;;  %v20517_v35 = vld [vmem:[#allocation26_spill] sm:$0xff] }
 0x189   : > { %1069 = vst.msk [vmem:[#allocation2 + $0x450] sm:$0xff] %vm571_vm1, %v1004_v44  ;;  %v20519_v44 = vld [vmem:[#allocation28_spill] sm:$0xff] }
 0x18a   : > { %12672 = vmatmul.mubr.msk.bf16.gmra.mrb[48].mxu0 %vm571_vm1, %v16325_v24  ;;  %v20511_v24 = vld [vmem:[#allocation51_spill] sm:$0xff] }
 0x18b   : > { %12675 = vmatprep.mubr.msk.bf16.mxu0 %vm571_vm1, %v16327_v47  ;;  %v2560_v47 = vrot.slane %v1197_v29, 1  ;;  %v2563_v7 = vrot.slane %v20511_v24, 1 }
 0x18d   : > { %v2561_v45 = vsel %vm2411_vm3, %v2558_v34, %v2560_v47  ;;  %v2564_v29 = vsel %vm2411_vm3, %v2562_v48, %v2563_v7  ;;  %v2566_v18 = vsel %vm2411_vm3, %v2563_v7, %v2565_v13  ;;  %v2568_v47 = vrot.slane %v16182_v41, 1 }
 0x18e   : > { %v16364_v43 = vpack.c.bf16 %v2566_v18, %v2564_v29  ;;  %v2570_v34 = vrot.slane %v1205_v3, 1  ;;  %v20513_v18 = vld [vmem:[#allocation22_spill] sm:$0xff]  ;;  %v20520_v29 = vld [vmem:[#allocation29_spill] sm:$0xff] }
 0x18f   : > { %v2569_v48 = vsel %vm2411_vm3, %v2567_v4, %v2568_v47  ;;  %v20521_v3 = vld [vmem:[#allocation30_spill] sm:$0xff]  ;;  %v20522_v4 = vld [vmem:[#allocation31_spill] sm:$0xff] }
 0x190   : > { %v2571_v7 = vsel %vm2411_vm3, %v2568_v47, %v2570_v34  ;;  %v20523_v47 = vld [vmem:[#allocation32_spill] sm:$0xff]  ;;  %v20524_v34 = vld [vmem:[#allocation33_spill] sm:$0xff] }
 0x191   : > { %v16374_v13 = vpack.c.bf16 %v2571_v7, %v2569_v48  ;;  %v20525_v48 = vld [vmem:[#allocation34_spill] sm:$0xff]  ;;  %v1134_v7 = vld [vmem:[#allocation2 + $0x200] sm:$0xff] }
 0x192   : > { %12676 = vmatmul.mubr.msk.bf16.gmra.mrb[52].mxu0 %vm571_vm1, %v16341_v2  ;;  %v16362_v2 = vpack.c.bf16 %v2561_v45, %v2559_v11  ;;  %v20514_v11 = vld [vmem:[#allocation23_spill] sm:$0xff]  ;;  %v20515_v45 = vld [vmem:[#allocation24_spill] sm:$0xff] }
 0x193   : > { %12679 = vmatprep.mubr.msk.bf16.mxu0 %vm571_vm1, %v16343_v53  ;;  %20512 = vst [vmem:[#allocation51_spill] sm:$0xff] %v16374_v13 }
 0x19a   : > { %12680 = vmatmul.mubr.msk.bf16.gmra.mrb[56].mxu0 %vm571_vm1, %v16362_v2 }
 0x19b   : > { %12683 = vmatprep.mubr.msk.bf16.mxu0 %vm571_vm1, %v16364_v43 }
 0x1a2   : > { %12684 = vmatmul.mubr.msk.bf16.gmra.mrb[60].mxu0 %vm571_vm1, %v16374_v13 }
 0x1a3   : > { %12689 = vmatprep.mubr.msk.bf16.mxu0 %vm571_vm1, %v20513_v18  ;;  %v16410_v18 = vld [vmem:[#allocation2 + $0x208] sm:$0xff] }
 0x1aa   : > { %12690 = vmatmul.mubr.msk.bf16.vlgmr.msra.gmra.mrb[0].mxu0 %vm571_vm1, %v20514_v11 }
 0x1ab   : > { %12754 = vmatpush3.bf16.msra.mxu0 %v3519_v20  ;;  %12693 = vmatprep.mubr.msk.bf16.mxu0 %vm571_vm1, %v20515_v45  ;;  %v16412_v20 = vld [vmem:[#allocation2 + $0x210] sm:$0xff] }
 0x1ac   : > { %14775 = vmatprep.subr.msk.bf16.mxu0 %vm1698_vm0, %v11362_v50 }
 0x1b2   : > { %12694 = vmatmul.mubr.msk.bf16.gmra.mrb[4].mxu0 %vm571_vm1, %v20516_v27  ;;  %v20531_v27 = vld [vmem:[#allocation43_spill] sm:$0xff] }
 0x1b3   : > { %12697 = vmatprep.mubr.msk.bf16.mxu0 %vm571_vm1, %v20517_v35  ;;  %v20530_v35 = vld [vmem:[#allocation42_spill] sm:$0xff] }
 0x1ba   : > { %12698 = vmatmul.mubr.msk.bf16.gmra.mrb[8].mxu0 %vm571_vm1, %v20518_v9 }
 0x1bb   : > { %12701 = vmatprep.mubr.msk.bf16.mxu0 %vm571_vm1, %v20519_v44  ;;  %v3131_v44 = vrot.slane %v16412_v20, 7 }
 0x1c2   : > { %12702 = vmatmul.mubr.msk.bf16.gmra.mrb[12].mxu0 %vm571_vm1, %v20520_v29  ;;  %v3128_v29 = vrot.slane %v1134_v7, 7  ;;  %v20529_v7 = vld [vmem:[#allocation41_spill] sm:$0xff] }
 0x1c3   : > { %12705 = vmatprep.mubr.msk.bf16.mxu0 %vm571_vm1, %v20521_v3  ;;  %v3129_v3 = vrot.slane %v16410_v18, 7 }
 0x1ca   : > { %12706 = vmatmul.mubr.msk.bf16.gmra.mrb[16].mxu0 %vm571_vm1, %v20522_v4  ;;  %v20526_v4 = vld [vmem:[#allocation36_spill] sm:$0xff] }
 0x1cb   : > { %12709 = vmatprep.mubr.msk.bf16.mxu0 %vm571_vm1, %v20523_v47  ;;  %v20527_v47 = vld [vmem:[#allocation38_spill] sm:$0xff] }
 0x1d2   : > { %12710 = vmatmul.mubr.msk.bf16.gmra.mrb[20].mxu0 %vm571_vm1, %v20524_v34  ;;  %v3130_v34 = vsel %vm1310_vm4, %v3128_v29, %v3129_v3  ;;  %v20533_v29 = vld [vmem:[#allocation45_spill] sm:$0xff] }
 0x1d3   : > { %12713 = vmatprep.mubr.msk.bf16.mxu0 %vm571_vm1, %v20525_v48  ;;  %v3132_v48 = vsel %vm1310_vm4, %v3129_v3, %v3131_v44  ;;  %v20534_v44 = vld [vmem:[#allocation46_spill] sm:$0xff]  ;;  %v20535_v3 = vld [vmem:[#allocation47_spill] sm:$0xff] }
 0x1d4   : > { %v16422_v9 = vpack.c.bf16 %v3132_v48, %v3130_v34  ;;  %v20536_v34 = vld [vmem:[#allocation48_spill] sm:$0xff]  ;;  %v20537_v48 = vld [vmem:[#allocation49_spill] sm:$0xff] }
 0x1d6   : > { %20528 = vst [vmem:[#allocation22_spill] sm:$0xff] %v16422_v9 }
 0x1da   : > { %12714 = vmatmul.mubr.msk.bf16.gmra.mrb[24].mxu0 %vm571_vm1, %v20526_v4  ;;  %v20532_v4 = vld [vmem:[#allocation44_spill] sm:$0xff] }
 0x1db   : > { %12717 = vmatprep.mubr.msk.bf16.mxu0 %vm571_vm1, %v20527_v47 }
 0x1e2   : > { %12718 = vmatmul.mubr.msk.bf16.gmra.mrb[28].mxu0 %vm571_vm1, %v16422_v9  ;;  %v20542_v9 = vld [vmem:[#allocation8_spill] sm:$0xff] }
 0x1e3   : > { %12721 = vmatprep.mubr.msk.bf16.mxu0 %vm571_vm1, %v20529_v7  ;;  %v20538_v7 = vld [vmem:[#allocation50_spill] sm:$0xff] }
 0x1ea   : > { %12722 = vmatmul.mubr.msk.bf16.gmra.mrb[32].mxu0 %vm571_vm1, %v20530_v35 }
 0x1eb   : > { %12725 = vmatprep.mubr.msk.bf16.mxu0 %vm571_vm1, %v20531_v27  ;;  %v20539_v27 = vld [vmem:[#allocation52_spill] sm:$0xff] }
 0x1f2   : > { %12726 = vmatmul.mubr.msk.bf16.gmra.mrb[36].mxu0 %vm571_vm1, %v20532_v4  ;;  %v20540_v4 = vld [vmem:[#allocation53_spill] sm:$0xff] }
 0x1f3   : > { %12729 = vmatprep.mubr.msk.bf16.mxu0 %vm571_vm1, %v20533_v29  ;;  %v16454_v29 = vld [vmem:[#allocation2 + $0x450] sm:$0xff] }
 0x1f4   : > { %v3136_v35 = vrot.slane %v16454_v29, 7 }
 0x1fa   : > { %12730 = vmatmul.mubr.msk.bf16.gmra.mrb[40].mxu0 %vm571_vm1, %v20534_v44  ;;  %v1206_v44 = vld [vmem:[#allocation2 + $0x440] sm:$0xff] }
 0x1fb   : > { %12733 = vmatprep.mubr.msk.bf16.mxu0 %vm571_vm1, %v20535_v3  ;;  %v16452_v3 = vld [vmem:[#allocation2 + $0x448] sm:$0xff] }
 0x202   : > { %12734 = vmatmul.mubr.msk.bf16.gmra.mrb[44].mxu0 %vm571_vm1, %v20536_v34  ;;  %v3133_v34 = vrot.slane %v1206_v44, 7  ;;  %v20541_v44 = vld [vmem:[#allocation7_spill] sm:$0xff] }
 0x203   : > { %12737 = vmatprep.mubr.msk.bf16.mxu0 %vm571_vm1, %v20537_v48  ;;  %v3134_v48 = vrot.slane %v16452_v3, 7 }
 0x20a   : > { %12738 = vmatmul.mubr.msk.bf16.gmra.mrb[48].mxu0 %vm571_vm1, %v20538_v7  ;;  %v3901_v7 = vsel %vm1698_vm0, %v11362_v50, 0  ;;  %v20546_v50 = vld [vmem:[#allocation12_spill] sm:$0xff] }
 0x20b   : > { %12741 = vmatprep.mubr.msk.bf16.mxu0 %vm571_vm1, %v20539_v27 }
 0x212   : > { %12742 = vmatmul.mubr.msk.bf16.gmra.mrb[52].mxu0 %vm571_vm1, %v20540_v4  ;;  %v3135_v4 = vsel %vm1310_vm4, %v3133_v34, %v3134_v48  ;;  %v20543_v34 = vld [vmem:[#allocation9_spill] sm:$0xff] }
 0x213   : > { %12745 = vmatprep.mubr.msk.bf16.mxu0 %vm571_vm1, %v16184_v6  ;;  %v3137_v6 = vsel %vm1310_vm4, %v3134_v48, %v3136_v35  ;;  %v20545_v35 = vld [vmem:[#allocation11_spill] sm:$0xff]  ;;  %v20548_v48 = vld [vmem:[#allocation14_spill] sm:$0xff] }
 0x214   : > { %v16464_v27 = vpack.c.bf16 %v3137_v6, %v3135_v4  ;;  %v20544_v6 = vld [vmem:[#allocation10_spill] sm:$0xff]  ;;  %v20547_v4 = vld [vmem:[#allocation13_spill] sm:$0xff] }
 0x21a   : > { %12746 = vmatmul.mubr.msk.bf16.gmra.mrb[56].mxu0 %vm571_vm1, %v16186_v52  ;;  %v11395_v52 = vld [vmem:[%s20174_s9 + $0x18] sm:$0xf] }
 0x21b   : > { %12749 = vmatprep.mubr.msk.bf16.mxu0 %vm571_vm1, %v16196_v21 }
 0x222   : > { %12750 = vmatmul.mubr.msk.bf16.gmra.mrb[60].mxu0 %vm571_vm1, %v16464_v27 }
 0x223   : > { %12755 = vmatprep.mubr.msk.bf16.mxu0 %vm571_vm1, %v20541_v44  ;;  %v20550_v44 = vld [vmem:[#allocation16_spill] sm:$0xff] }
 0x22a   : > { %12756 = vmatmul.mubr.msk.bf16.vlgmr.msra.gmra.mrb[0].mxu0 %vm571_vm1, %v20542_v9 }
 0x22b   : > { %12820 = vmatpush3.bf16.msra.mxu0 %v3901_v7  ;;  %12759 = vmatprep.mubr.msk.bf16.mxu0 %vm571_vm1, %v20543_v34  ;;  %v20549_v7 = vld [vmem:[#allocation15_spill] sm:$0xff]  ;;  %v20551_v34 = vld [vmem:[#allocation17_spill] sm:$0xff] }
 0x22c   : > { %14776 = vmatprep.subr.msk.bf16.mxu0 %vm1698_vm0, %v11395_v52 }
 0x232   : > { %12760 = vmatmul.mubr.msk.bf16.gmra.mrb[4].mxu0 %vm571_vm1, %v20544_v6  ;;  %v20552_v6 = vld [vmem:[#allocation18_spill] sm:$0xff] }
 0x233   : > { %12763 = vmatprep.mubr.msk.bf16.mxu0 %vm571_vm1, %v20545_v35  ;;  %v20553_v35 = vld [vmem:[#allocation19_spill] sm:$0xff] }
 0x23a   : > { %12764 = vmatmul.mubr.msk.bf16.gmra.mrb[8].mxu0 %vm571_vm1, %v20546_v50  ;;  %v20554_v50 = vld [vmem:[#allocation20_spill] sm:$0xff] }
 0x23b   : > { %12767 = vmatprep.mubr.msk.bf16.mxu0 %vm571_vm1, %v20547_v4  ;;  %v20555_v4 = vld [vmem:[#allocation21_spill] sm:$0xff] }
 0x242   : > { %12768 = vmatmul.mubr.msk.bf16.gmra.mrb[12].mxu0 %vm571_vm1, %v20548_v48 }
 0x243   : > { %12771 = vmatprep.mubr.msk.bf16.mxu0 %vm571_vm1, %v20549_v7  ;;  %v16505_v7 = vpack.c.bf16 %v16412_v20, %v16410_v18 }
 0x24a   : > { %12772 = vmatmul.mubr.msk.bf16.gmra.mrb[16].mxu0 %vm571_vm1, %v20550_v44  ;;  %v16509_v44 = vpack.c.bf16 %v16011_v57, %v16009_v22  ;;  %v16529_v22 = vpack.c.bf16 %v16042_v8, %v16040_v10  ;;  %v16533_v57 = vpack.c.bf16 %v16062_v46, %v16060_v56  ;;  %v20558_v8 = vld [vmem:[#allocation39_spill] sm:$0xff] }
 0x24b   : > { %12775 = vmatprep.mubr.msk.bf16.mxu0 %vm571_vm1, %v20551_v34 }
 0x252   : > { %12776 = vmatmul.mubr.msk.bf16.gmra.mrb[20].mxu0 %vm571_vm1, %v20552_v6 }
 0x253   : > { %12779 = vmatprep.mubr.msk.bf16.mxu0 %vm571_vm1, %v20553_v35 }
 0x25a   : > { %12780 = vmatmul.mubr.msk.bf16.gmra.mrb[24].mxu0 %vm571_vm1, %v20554_v50  ;;  %v16517_v50 = vpack.c.bf16 %v16015_v59, %v16013_v30  ;;  %v16541_v30 = vpack.c.bf16 %v16066_v16, %v16064_v37  ;;  %v16545_v59 = vpack.c.bf16 %v16086_v61, %v16084_v36  ;;  %v16565_v61 = vpack.c.bf16 %v16114_v55, %v16112_v40  ;;  %v20560_v36 = vld [vmem:[#allocation56_spill] sm:$0xff] }
 0x25b   : > { %12783 = vmatprep.mubr.msk.bf16.mxu0 %vm571_vm1, %v20555_v4  ;;  %v16521_v4 = vpack.c.bf16 %v16038_v31, %v16036_v28  ;;  %v16553_v28 = vpack.c.bf16 %v16090_v15, %v16088_v32  ;;  %v16557_v31 = vpack.c.bf16 %v16110_v63, %v16108_v39  ;;  %v16569_v16 = vpack.c.bf16 %v16134_v12, %v16132_v51  ;;  %v20559_v32 = vld [vmem:[#allocation40_spill] sm:$0xff]  ;;  %v20561_v39 = vld [vmem:[#allocation57_spill] sm:$0xff]  ;;  %v20562_v51 = vld [vmem:[#allocation58_spill] sm:$0xff] }
 0x25c   : > { %v16577_v15 = vpack.c.bf16 %v16138_v23, %v16136_v26  ;;  %v16581_v63 = vpack.c.bf16 %v16158_v17, %v16156_v60  ;;  %v16589_v12 = vpack.c.bf16 %v20511_v24, %v16160_v54  ;;  %v16593_v40 = vpack.c.bf16 %v16182_v41, %v16180_v25  ;;  %v11428_v41 = vld [vmem:[%s20174_s9 + $0x1c] sm:$0xf]  ;;  %v1137_v26 = vld [vmem:[#allocation2 + $0x218] sm:$0x1]  ;;  %v20563_v60 = vld [vmem:[#allocation59_spill] sm:$0xff] }
 0x25d   : > { %v16601_v17 = vpack.c.bf16 %v16454_v29, %v16452_v3  ;;  %v4287_v54 = vsel %vm1698_vm0, %v11395_v52, 0  ;;  %v20557_v52 = vld [vmem:[#allocation37_spill] sm:$0xff]  ;;  %v3876_v23 = vrot.slane %v16410_v18, 1  ;;  %v3877_v55 = vrot.slane %v16412_v20, 1  ;;  %v20564_v25 = vld [vmem:[#allocation60_spill] sm:$0xff]  ;;  %v20566_v18 = vld [vmem:[#allocation62_spill] sm:$0xff] }
 0x25e   : > { %v3879_v10 = vrot.slane %v1137_v26, 1  ;;  %v20565_v24 = vld [vmem:[#allocation61_spill] sm:$0xff]  ;;  %v20567_v20 = vld [vmem:[#allocation63_spill] sm:$0xff] }
 0x25f   : > { %v3878_v56 = vsel %vm2411_vm3, %v3876_v23, %v3877_v55  ;;  %v20569_v26 = vld [vmem:[#allocation65_spill] sm:$0xff]  ;;  %v20570_v23 = vld [vmem:[#allocation66_spill] sm:$0xff] }
 0x260   : > { %v3880_v46 = vsel %vm2411_vm3, %v3877_v55, %v3879_v10  ;;  %v1209_v55 = vld [vmem:[#allocation2 + $0x458] sm:$0x1]  ;;  %v3881_v10 = vrot.slane %v16452_v3, 1  ;;  %v11461_v3 = vld [vmem:[%s20174_s9 + $0x20] sm:$0xf] }
 0x261   : > { %v16644_v37 = vpack.c.bf16 %v3880_v46, %v3878_v56  ;;  %v3882_v56 = vrot.slane %v16454_v29, 1  ;;  %v3884_v46 = vrot.slane %v1209_v55, 1  ;;  %v4653_v29 = vsel %vm1698_vm0, %v11428_v41, 0  ;;  %v20572_v55 = vld [vmem:[#allocation25_spill] sm:$0xff] }
 0x262   : > { %12784 = vmatmul.mubr.msk.bf16.gmra.mrb[28].mxu0 %vm571_vm1, %v16505_v7 }
 0x263   : > { %12787 = vmatprep.mubr.msk.bf16.mxu0 %vm571_vm1, %v16509_v44 }
 0x26a   : > { %12788 = vmatmul.mubr.msk.bf16.gmra.mrb[32].mxu0 %vm571_vm1, %v16517_v50 }
 0x26b   : > { %12791 = vmatprep.mubr.msk.bf16.mxu0 %vm571_vm1, %v16521_v4 }
 0x272   : > { %12792 = vmatmul.mubr.msk.bf16.gmra.mrb[36].mxu0 %vm571_vm1, %v16529_v22 }
 0x273   : > { %12795 = vmatprep.mubr.msk.bf16.mxu0 %vm571_vm1, %v16533_v57 }
 0x27a   : > { %12796 = vmatmul.mubr.msk.bf16.gmra.mrb[40].mxu0 %vm571_vm1, %v16541_v30 }
 0x27b   : > { %12799 = vmatprep.mubr.msk.bf16.mxu0 %vm571_vm1, %v16545_v59 }
 0x282   : > { %12800 = vmatmul.mubr.msk.bf16.gmra.mrb[44].mxu0 %vm571_vm1, %v16553_v28 }
 0x283   : > { %12803 = vmatprep.mubr.msk.bf16.mxu0 %vm571_vm1, %v16557_v31 }
 0x28a   : > { %12804 = vmatmul.mubr.msk.bf16.gmra.mrb[48].mxu0 %vm571_vm1, %v16565_v61 }
 0x28b   : > { %12807 = vmatprep.mubr.msk.bf16.mxu0 %vm571_vm1, %v16569_v16 }
 0x292   : > { %12808 = vmatmul.mubr.msk.bf16.gmra.mrb[52].mxu0 %vm571_vm1, %v16577_v15 }
 0x293   : > { %12811 = vmatprep.mubr.msk.bf16.mxu0 %vm571_vm1, %v16581_v63 }
 0x29a   : > { %12812 = vmatmul.mubr.msk.bf16.gmra.mrb[56].mxu0 %vm571_vm1, %v16589_v12 }
 0x29b   : > { %12815 = vmatprep.mubr.msk.bf16.mxu0 %vm571_vm1, %v16593_v40 }
 0x2a2   : > { %12816 = vmatmul.mubr.msk.bf16.gmra.mrb[60].mxu0 %vm571_vm1, %v16601_v17 }
 0x2a3   : > { %12821 = vmatprep.mubr.msk.bf16.mxu0 %vm571_vm1, %v15822_v42  ;;  %v20556_v42 = vld [vmem:[#allocation35_spill] sm:$0xff] }
 0x2aa   : > { %12822 = vmatmul.mubr.msk.bf16.vlgmr.msra.gmra.mrb[0].mxu0 %vm571_vm1, %v15849_v5 }
 0x2ab   : > { %12886 = vmatpush3.bf16.msra.mxu0 %v4287_v54  ;;  %12825 = vmatprep.mubr.msk.bf16.mxu0 %vm571_vm1, %v15851_v14  ;;  %v20568_v54 = vld [vmem:[#allocation64_spill] sm:$0xff] }
 0x2ac   : > { %14777 = vmatprep.subr.msk.bf16.mxu0 %vm1698_vm0, %v11428_v41  ;;  %v20576_v41 = vld [vmem:[#allocation29_spill] sm:$0xff] }
 0x2b2   : > { %12826 = vmatmul.mubr.msk.bf16.gmra.mrb[4].mxu0 %vm571_vm1, %v15873_v19 }
 0x2b3   : > { %12829 = vmatprep.mubr.msk.bf16.mxu0 %vm571_vm1, %v15879_v0 }
 0x2ba   : > { %12830 = vmatmul.mubr.msk.bf16.gmra.mrb[8].mxu0 %vm571_vm1, %v15901_v33 }
 0x2bb   : > { %12833 = vmatprep.mubr.msk.bf16.mxu0 %vm571_vm1, %v15907_v1 }
 0x2c2   : > { %12834 = vmatmul.mubr.msk.bf16.gmra.mrb[12].mxu0 %vm571_vm1, %v15929_v38 }
 0x2c3   : > { %12837 = vmatprep.mubr.msk.bf16.mxu0 %vm571_vm1, %v15935_v58 }
 0x2ca   : > { %12838 = vmatmul.mubr.msk.bf16.gmra.mrb[16].mxu0 %vm571_vm1, %v15957_v49 }
 0x2cb   : > { %12841 = vmatprep.mubr.msk.bf16.mxu0 %vm571_vm1, %v15963_v62 }
 0x2d2   : > { %12842 = vmatmul.mubr.msk.bf16.gmra.mrb[20].mxu0 %vm571_vm1, %v20556_v42 }
 0x2d3   : > { %12845 = vmatprep.mubr.msk.bf16.mxu0 %vm571_vm1, %v20557_v52 }
 0x2da   : > { %12846 = vmatmul.mubr.msk.bf16.gmra.mrb[24].mxu0 %vm571_vm1, %v20558_v8 }
 0x2db   : > { %12849 = vmatprep.mubr.msk.bf16.mxu0 %vm571_vm1, %v20559_v32 }
 0x2e2   : > { %12850 = vmatmul.mubr.msk.bf16.gmra.mrb[28].mxu0 %vm571_vm1, %v16644_v37 }
 0x2e3   : > { %12853 = vmatprep.mubr.msk.bf16.mxu0 %vm571_vm1, %v20560_v36  ;;  %v3883_v36 = vsel %vm2411_vm3, %v3881_v10, %v3882_v56  ;;  %v20574_v10 = vld [vmem:[#allocation27_spill] sm:$0xff] }
 0x2ea   : > { %12854 = vmatmul.mubr.msk.bf16.gmra.mrb[32].mxu0 %vm571_vm1, %v20561_v39 }
 0x2eb   : > { %12857 = vmatprep.mubr.msk.bf16.mxu0 %vm571_vm1, %v20562_v51 }
 0x2f2   : > { %12858 = vmatmul.mubr.msk.bf16.gmra.mrb[36].mxu0 %vm571_vm1, %v20563_v60 }
 0x2f3   : > { %12861 = vmatprep.mubr.msk.bf16.mxu0 %vm571_vm1, %v20564_v25 }
 0x2fa   : > { %12862 = vmatmul.mubr.msk.bf16.gmra.mrb[40].mxu0 %vm571_vm1, %v20565_v24 }
 0x2fb   : > { %12865 = vmatprep.mubr.msk.bf16.mxu0 %vm571_vm1, %v20566_v18 }
 0x302   : > { %12866 = vmatmul.mubr.msk.bf16.gmra.mrb[44].mxu0 %vm571_vm1, %v20567_v20 }
 0x303   : > { %12869 = vmatprep.mubr.msk.bf16.mxu0 %vm571_vm1, %v20568_v54 }
 0x30a   : > { %12870 = vmatmul.mubr.msk.bf16.gmra.mrb[48].mxu0 %vm571_vm1, %v20569_v26 }
 0x30b   : > { %12873 = vmatprep.mubr.msk.bf16.mxu0 %vm571_vm1, %v20570_v23  ;;  %v3885_v23 = vsel %vm2411_vm3, %v3882_v56, %v3884_v46  ;;  %v20577_v56 = vld [vmem:[#allocation30_spill] sm:$0xff]  ;;  %v20579_v46 = vld [vmem:[#allocation32_spill] sm:$0xff] }
 0x312   : > { %12874 = vmatmul.mubr.msk.bf16.gmra.mrb[52].mxu0 %vm571_vm1, %v16343_v53  ;;  %v16682_v53 = vpack.c.bf16 %v3885_v23, %v3883_v36  ;;  %v20573_v23 = vld [vmem:[#allocation26_spill] sm:$0xff]  ;;  %v20580_v36 = vld [vmem:[#allocation33_spill] sm:$0xff] }
 0x313   : > { %12877 = vmatprep.mubr.msk.bf16.mxu0 %vm571_vm1, %v16362_v2 }
 0x314   : > { %20571 = vst [vmem:[#allocation23_spill] sm:$0xff] %v16682_v53 }
 0x31a   : > { %12878 = vmatmul.mubr.msk.bf16.gmra.mrb[56].mxu0 %vm571_vm1, %v16364_v43 }
 0x31b   : > { %12881 = vmatprep.mubr.msk.bf16.mxu0 %vm571_vm1, %v16374_v13  ;;  %v20586_v13 = vld [vmem:[#allocation44_spill] sm:$0xff] }
 0x322   : > { %12882 = vmatmul.mubr.msk.bf16.gmra.mrb[60].mxu0 %vm571_vm1, %v16682_v53  ;;  %v20584_v53 = vld [vmem:[#allocation42_spill] sm:$0xff] }
 0x323   : > { %12887 = vmatprep.mubr.msk.bf16.mxu0 %vm571_vm1, %v20514_v11  ;;  %v20575_v11 = vld [vmem:[#allocation28_spill] sm:$0xff] }
 0x32a   : > { %12888 = vmatmul.mubr.msk.bf16.vlgmr.msra.gmra.mrb[0].mxu0 %vm571_vm1, %v20515_v45  ;;  %v20578_v45 = vld [vmem:[#allocation31_spill] sm:$0xff] }
 0x32b   : > { %12952 = vmatpush3.bf16.msra.mxu0 %v4653_v29  ;;  %12891 = vmatprep.mubr.msk.bf16.mxu0 %vm571_vm1, %v20572_v55  ;;  %v20581_v29 = vld [vmem:[#allocation34_spill] sm:$0xff]  ;;  %v20582_v55 = vld [vmem:[#allocation36_spill] sm:$0xff] }
 0x32c   : > { %14778 = vmatprep.subr.msk.bf16.mxu0 %vm1698_vm0, %v11461_v3 }
 0x332   : > { %12892 = vmatmul.mubr.msk.bf16.gmra.mrb[4].mxu0 %vm571_vm1, %v20573_v23  ;;  %v1138_v23 = vld [vmem:[#allocation2 + $0x220] sm:$0xff] }
 0x333   : > { %12895 = vmatprep.mubr.msk.bf16.mxu0 %vm571_vm1, %v20574_v10  ;;  %v16717_v10 = vld [vmem:[#allocation2 + $0x228] sm:$0xff] }
 0x33a   : > { %12896 = vmatmul.mubr.msk.bf16.gmra.mrb[8].mxu0 %vm571_vm1, %v20575_v11  ;;  %v16719_v11 = vld [vmem:[#allocation2 + $0x230] sm:$0xff] }
 0x33b   : > { %12899 = vmatprep.mubr.msk.bf16.mxu0 %vm571_vm1, %v20576_v41  ;;  %v4262_v41 = vrot.slane %v1138_v23, 7  ;;  %v20585_v23 = vld [vmem:[#allocation43_spill] sm:$0xff] }
 0x342   : > { %12900 = vmatmul.mubr.msk.bf16.gmra.mrb[12].mxu0 %vm571_vm1, %v20577_v56  ;;  %v4263_v56 = vrot.slane %v16717_v10, 7 }
 0x343   : > { %12903 = vmatprep.mubr.msk.bf16.mxu0 %vm571_vm1, %v20578_v45  ;;  %v4265_v45 = vrot.slane %v16719_v11, 7 }
 0x34a   : > { %12904 = vmatmul.mubr.msk.bf16.gmra.mrb[16].mxu0 %vm571_vm1, %v20579_v46  ;;  %v20583_v46 = vld [vmem:[#allocation22_spill] sm:$0xff] }
 0x34b   : > { %12907 = vmatprep.mubr.msk.bf16.mxu0 %vm571_vm1, %v20580_v36  ;;  %v4264_v36 = vsel %vm1310_vm4, %v4262_v41, %v4263_v56  ;;  %v20589_v41 = vld [vmem:[#allocation47_spill] sm:$0xff] }
 0x352   : > { %12908 = vmatmul.mubr.msk.bf16.gmra.mrb[20].mxu0 %vm571_vm1, %v20581_v29  ;;  %v4266_v29 = vsel %vm1310_vm4, %v4263_v56, %v4265_v45  ;;  %v20590_v56 = vld [vmem:[#allocation48_spill] sm:$0xff]  ;;  %v20591_v45 = vld [vmem:[#allocation49_spill] sm:$0xff] }
 0x353   : > { %12911 = vmatprep.mubr.msk.bf16.mxu0 %vm571_vm1, %v20582_v55  ;;  %v4276_v55 = vpack.c.bf16 %v4266_v29, %v4264_v36  ;;  %v20593_v36 = vld [vmem:[#allocation52_spill] sm:$0xff]  ;;  %v20595_v29 = vld [vmem:[#allocation54_spill] sm:$0xff] }
 0x35a   : > { %12912 = vmatmul.mubr.msk.bf16.gmra.mrb[24].mxu0 %vm571_vm1, %v20527_v47  ;;  %v20587_v47 = vld [vmem:[#allocation45_spill] sm:$0xff] }
 0x35b   : > { %12915 = vmatprep.mubr.msk.bf16.mxu0 %vm571_vm1, %v20583_v46  ;;  %v20588_v46 = vld [vmem:[#allocation46_spill] sm:$0xff] }
 0x362   : > { %12916 = vmatmul.mubr.msk.bf16.gmra.mrb[28].mxu0 %vm571_vm1, %v4276_v55  ;;  %v20596_v55 = vld [vmem:[#allocation55_spill] sm:$0xff] }
 0x363   : > { %12919 = vmatprep.mubr.msk.bf16.mxu0 %vm571_vm1, %v20584_v53  ;;  %v20592_v53 = vld [vmem:[#allocation50_spill] sm:$0xff] }
 0x36a   : > { %12920 = vmatmul.mubr.msk.bf16.gmra.mrb[32].mxu0 %vm571_vm1, %v20585_v23  ;;  %v1210_v23 = vld [vmem:[#allocation2 + $0x460] sm:$0xff] }
 0x36b   : > { %12923 = vmatprep.mubr.msk.bf16.mxu0 %vm571_vm1, %v20586_v13  ;;  %v20594_v13 = vld [vmem:[#allocation53_spill] sm:$0xff] }
 0x372   : > { %12924 = vmatmul.mubr.msk.bf16.gmra.mrb[36].mxu0 %vm571_vm1, %v20587_v47  ;;  %v16756_v47 = vld [vmem:[#allocation2 + $0x468] sm:$0xff] }
 0x373   : > { %12927 = vmatprep.mubr.msk.bf16.mxu0 %vm571_vm1, %v20588_v46  ;;  %v16758_v46 = vld [vmem:[#allocation2 + $0x470] sm:$0xff] }
 0x37a   : > { %12928 = vmatmul.mubr.msk.bf16.gmra.mrb[40].mxu0 %vm571_vm1, %v20589_v41  ;;  %v4267_v41 = vrot.slane %v1210_v23, 7  ;;  %v20600_v23 = vld [vmem:[#allocation12_spill] sm:$0xff] }
 0x37b   : > { %12931 = vmatprep.mubr.msk.bf16.mxu0 %vm571_vm1, %v20590_v56  ;;  %v4268_v56 = vrot.slane %v16756_v47, 7 }
 0x382   : > { %12932 = vmatmul.mubr.msk.bf16.gmra.mrb[44].mxu0 %vm571_vm1, %v20591_v45  ;;  %v4270_v45 = vrot.slane %v16758_v46, 7 }
 0x383   : > { %12935 = vmatprep.mubr.msk.bf16.mxu0 %vm571_vm1, %v20592_v53  ;;  %v4269_v53 = vsel %vm1310_vm4, %v4267_v41, %v4268_v56  ;;  %v20601_v41 = vld [vmem:[#allocation13_spill] sm:$0xff] }
 0x38a   : > { %12936 = vmatmul.mubr.msk.bf16.gmra.mrb[48].mxu0 %vm571_vm1, %v20593_v36  ;;  %v4271_v36 = vsel %vm1310_vm4, %v4268_v56, %v4270_v45  ;;  %v20604_v56 = vld [vmem:[#allocation20_spill] sm:$0xff]  ;;  %v20605_v45 = vld [vmem:[#allocation21_spill] sm:$0xff] }
 0x38b   : > { %12939 = vmatprep.mubr.msk.bf16.mxu0 %vm571_vm1, %v20594_v13  ;;  %v4277_v13 = vpack.c.bf16 %v4271_v36, %v4269_v53  ;;  %v14834_v53 = vld [vmem:[#allocation2 + $0x250] sm:$0xff] }
 0x392   : > { %12940 = vmatmul.mubr.msk.bf16.gmra.mrb[52].mxu0 %vm571_vm1, %v20595_v29  ;;  %v5035_v29 = vsel %vm1698_vm0, %v11461_v3, 0  ;;  %v20603_v3 = vld [vmem:[#allocation16_spill] sm:$0xff] }
 0x393   : > { %12943 = vmatprep.mubr.msk.bf16.mxu0 %vm571_vm1, %v20596_v55  ;;  %v20597_v55 = vld [vmem:[#allocation9_spill] sm:$0xff] }
 0x39a   : > { %12944 = vmatmul.mubr.msk.bf16.gmra.mrb[56].mxu0 %vm571_vm1, %v16196_v21  ;;  %v20598_v21 = vld [vmem:[#allocation10_spill] sm:$0xff] }
 0x39b   : > { %12947 = vmatprep.mubr.msk.bf16.mxu0 %vm571_vm1, %v16464_v27  ;;  %v20599_v27 = vld [vmem:[#allocation11_spill] sm:$0xff] }
 0x3a2   : > { %12948 = vmatmul.mubr.msk.bf16.gmra.mrb[60].mxu0 %vm571_vm1, %v4277_v13 }
 0x3a3   : > { %12953 = vmatprep.mubr.msk.bf16.mxu0 %vm571_vm1, %v20542_v9  ;;  %v20602_v9 = vld [vmem:[#allocation15_spill] sm:$0xff] }
 0x3aa   : > { %12954 = vmatmul.mubr.msk.bf16.vlgmr.msra.gmra.mrb[0].mxu0 %vm571_vm1, %v20597_v55 }
 0x3ab   : > { %13018 = vmatpush3.bf16.msra.mxu0 %v5035_v29  ;;  %12957 = vmatprep.mubr.msk.bf16.mxu0 %vm571_vm1, %v20598_v21 }
 0x3b2   : > { %12958 = vmatmul.mubr.msk.bf16.gmra.mrb[4].mxu0 %vm571_vm1, %v20599_v27 }
 0x3b3   : > { %12961 = vmatprep.mubr.msk.bf16.mxu0 %vm571_vm1, %v20600_v23 }
 0x3ba   : > { %12962 = vmatmul.mubr.msk.bf16.gmra.mrb[8].mxu0 %vm571_vm1, %v20601_v41 }
 0x3bb   : > { %12965 = vmatprep.mubr.msk.bf16.mxu0 %vm571_vm1, %v20548_v48  ;;  %v4642_v48 = vpack.c.bf16 %v16719_v11, %v16717_v10 }
 0x3c2   : > { %12966 = vmatmul.mubr.msk.bf16.gmra.mrb[12].mxu0 %vm571_vm1, %v20602_v9 }
 0x3c3   : > { %12969 = vmatprep.mubr.msk.bf16.mxu0 %vm571_vm1, %v20603_v3  ;;  %v17322_v3 = vld [vmem:[%s17307_s15] ss:$0 sm:$0xff] }
 0x3ca   : > { %12970 = vmatmul.mubr.msk.bf16.gmra.mrb[16].mxu0 %vm571_vm1, %v20551_v34  ;;  %v14833_v34 = vld [vmem:[#allocation2 + $0x248] sm:$0xff] }
 0x3cb   : > { %12973 = vmatprep.mubr.msk.bf16.mxu0 %vm571_vm1, %v20552_v6  ;;  %v1584_v6 = vpack.c.bf16 %v14834_v53, %v14833_v34  ;;  %v17329_v34 = vld [vmem:[%s17317_s28] ss:$0 sm:$0xff] }
 0x3cd   : > { %12523 = vmatprep.mubr.msk.bf16.mxu1 %vm571_vm1, %v1584_v6 }
 0x3ce   : > { %12524 = vmatmul.mubr.msk.bf16.vlgmr.msra.gmra.mrb[0].mxu1 %vm571_vm1, %v16509_v44 }
 0x3cf   : > { %12527 = vmatprep.mubr.msk.bf16.mxu1 %vm571_vm1, %v16517_v50 }
 0x3d2   : > { %12974 = vmatmul.mubr.msk.bf16.gmra.mrb[20].mxu0 %vm571_vm1, %v20553_v35  ;;  %v4643_v35 = vpack.c.bf16 %v16758_v46, %v16756_v47 }
 0x3d3   : > { %12977 = vmatprep.mubr.msk.bf16.mxu0 %vm571_vm1, %v20604_v56 }
 0x3d6   : > { %12528 = vmatmul.mubr.msk.bf16.gmra.mrb[4].mxu1 %vm571_vm1, %v16521_v4 }
 0x3d7   : > { %12531 = vmatprep.mubr.msk.bf16.mxu1 %vm571_vm1, %v16529_v22 }
 0x3da   : > { %12978 = vmatmul.mubr.msk.bf16.gmra.mrb[24].mxu0 %vm571_vm1, %v20605_v45 }
 0x3db   : > { %12981 = vmatprep.mubr.msk.bf16.mxu0 %vm571_vm1, %v16505_v7 }
 0x3de   : > { %12532 = vmatmul.mubr.msk.bf16.gmra.mrb[8].mxu1 %vm571_vm1, %v16533_v57 }
 0x3df   : > { %12535 = vmatprep.mubr.msk.bf16.mxu1 %vm571_vm1, %v16541_v30 }
 0x3e2   : > { %12982 = vmatmul.mubr.msk.bf16.gmra.mrb[28].mxu0 %vm571_vm1, %v4642_v48 }
 0x3e3   : > { %12985 = vmatprep.mubr.msk.bf16.mxu0 %vm571_vm1, %v16517_v50  ;;  %v16870_v50 = vld [vmem:[%s20175_s10 + $0x8] sm:$0xff]  }
 0x3e4   : > { %13083 = vmatprep.subr.bf16.mxu1 %v16870_v50 }
 0x3e5   : > { %13084 = vmatpush3.bf16.msra.mxu1 %v16870_v50 }
 0x3e6   : > { %12536 = vmatmul.mubr.msk.bf16.gmra.mrb[12].mxu1 %vm571_vm1, %v16545_v59 }
 0x3e7   : > { %12539 = vmatprep.mubr.msk.bf16.mxu1 %vm571_vm1, %v16553_v28 }
 0x3ea   : > { %12986 = vmatmul.mubr.msk.bf16.gmra.mrb[32].mxu0 %vm571_vm1, %v16521_v4  ;;  %v20606_v4 = vmov 0.0  }
 0x3eb   : > { %12989 = vmatprep.mubr.msk.bf16.mxu0 %vm571_vm1, %v16529_v22  ;;  %728 = vst.msk [vmem:[#allocation3 + $0x48] sm:$0xff] %vm717_vm5, %v20606_v4  ;;  %718 = vst.msk [vmem:[#allocation3] sm:$0xff] %vm717_vm5, %v20606_v4  ;;  %v1213_v22 = vld [vmem:[#allocation2 + $0x478] sm:$0x1] }
 0x3ec   : > { %719 = vst.msk [vmem:[#allocation3 + $0x8] sm:$0xff] %vm717_vm5, %v20606_v4  ;;  %720 = vst.msk [vmem:[#allocation3 + $0x10] sm:$0xff] %vm717_vm5, %v20606_v4 }
 0x3ed   : > { %723 = vst.msk [vmem:[#allocation3 + $0x20] sm:$0xff] %vm717_vm5, %v20606_v4  ;;  %724 = vst.msk [vmem:[#allocation3 + $0x28] sm:$0xff] %vm717_vm5, %v20606_v4 }
 0x3ee   : > { %12540 = vmatmul.mubr.msk.bf16.gmra.mrb[16].mxu1 %vm571_vm1, %v16557_v31  ;;  %725 = vst.msk [vmem:[#allocation3 + $0x30] sm:$0xff] %vm717_vm5, %v20606_v4  ;;  %727 = vst.msk [vmem:[#allocation3 + $0x40] sm:$0xff] %vm717_vm5, %v20606_v4 }
 0x3ef   : > { %12543 = vmatprep.mubr.msk.bf16.mxu1 %vm571_vm1, %v16565_v61  ;;  %729 = vst.msk [vmem:[#allocation3 + $0x50] sm:$0xff] %vm717_vm5, %v20606_v4  ;;  %731 = vst.msk [vmem:[#allocation3 + $0x60] sm:$0xff] %vm717_vm5, %v20606_v4 }
 0x3f0   : > { %732 = vst.msk [vmem:[#allocation3 + $0x68] sm:$0xff] %vm717_vm5, %v20606_v4  ;;  %733 = vst.msk [vmem:[#allocation3 + $0x70] sm:$0xff] %vm717_vm5, %v20606_v4 }
 0x3f1   : > { %735 = vst.msk [vmem:[#allocation3 + $0x80] sm:$0xff] %vm717_vm5, %v20606_v4  ;;  %736 = vst.msk [vmem:[#allocation3 + $0x88] sm:$0xff] %vm717_vm5, %v20606_v4 }
 0x3f2   : > { %12990 = vmatmul.mubr.msk.bf16.gmra.mrb[36].mxu0 %vm571_vm1, %v16533_v57  ;;  %737 = vst.msk [vmem:[#allocation3 + $0x90] sm:$0xff] %vm717_vm5, %v20606_v4  ;;  %739 = vst.msk [vmem:[#allocation3 + $0xa0] sm:$0xff] %vm717_vm5, %v20606_v4  ;;  %v5015_v57 = vrot.slane %v16756_v47, 1 }
 0x3f3   : > { %12993 = vmatprep.mubr.msk.bf16.mxu0 %vm571_vm1, %v16541_v30  ;;  %740 = vst.msk [vmem:[#allocation3 + $0xa8] sm:$0xff] %vm717_vm5, %v20606_v4  ;;  %741 = vst.msk [vmem:[#allocation3 + $0xb0] sm:$0xff] %vm717_vm5, %v20606_v4  ;;  %v17149_v7 = vld [vmem:[#allocation3 + $0x10] sm:$0xff]  ;;  %v5016_v30 = vrot.slane %v16758_v46, 1 }
 0x3f4   : > { %743 = vst.msk [vmem:[#allocation3 + $0xc0] sm:$0xff] %vm717_vm5, %v20606_v4  ;;  %744 = vst.msk [vmem:[#allocation3 + $0xc8] sm:$0xff] %vm717_vm5, %v20606_v4  ;;  %v17324_v56 = vld [vmem:[#allocation3 + $0x20] sm:$0xff] }
 0x3f5   : > { %745 = vst.msk [vmem:[#allocation3 + $0xd0] sm:$0xff] %vm717_vm5, %v20606_v4  ;;  %747 = vst.msk [vmem:[#allocation3 + $0xe0] sm:$0xff] %vm717_vm5, %v20606_v4  ;;  %v17326_v45 = vld [vmem:[#allocation3 + $0x40] sm:$0xff] }
 0x3f6   : > { %12544 = vmatmul.mubr.msk.bf16.gmra.mrb[20].mxu1 %vm571_vm1, %v16569_v16  ;;  %748 = vst.msk [vmem:[#allocation3 + $0xe8] sm:$0xff] %vm717_vm5, %v20606_v4  ;;  %749 = vst.msk [vmem:[#allocation3 + $0xf0] sm:$0xff] %vm717_vm5, %v20606_v4 }
 0x3f7   : > { %12547 = vmatprep.mubr.msk.bf16.mxu1 %vm571_vm1, %v16577_v15  ;;  %751 = vst.msk [vmem:[#allocation3 + $0x100] sm:$0xff] %vm717_vm5, %v20606_v4  ;;  %752 = vst.msk [vmem:[#allocation3 + $0x108] sm:$0xff] %vm717_vm5, %v20606_v4 }
 0x3f8   : > { %753 = vst.msk [vmem:[#allocation3 + $0x110] sm:$0xff] %vm717_vm5, %v20606_v4  ;;  %755 = vst.msk [vmem:[#allocation3 + $0x120] sm:$0xff] %vm717_vm5, %v20606_v4  ;;  %v17331_v53 = vld [vmem:[#allocation3 + $0x80] sm:$0xff] }
 0x3f9   : > { %756 = vst.msk [vmem:[#allocation3 + $0x128] sm:$0xff] %vm717_vm5, %v20606_v4  ;;  %757 = vst.msk [vmem:[#allocation3 + $0x130] sm:$0xff] %vm717_vm5, %v20606_v4 }
 0x3fa   : > { %12994 = vmatmul.mubr.msk.bf16.gmra.mrb[40].mxu0 %vm571_vm1, %v16545_v59  ;;  %759 = vst.msk [vmem:[#allocation3 + $0x140] sm:$0xff] %vm717_vm5, %v20606_v4  ;;  %760 = vst.msk [vmem:[#allocation3 + $0x148] sm:$0xff] %vm717_vm5, %v20606_v4  ;;  %v5018_v59 = vrot.slane %v1213_v22, 1 }
 0x3fb   : > { %12997 = vmatprep.mubr.msk.bf16.mxu0 %vm571_vm1, %v16553_v28  ;;  %761 = vst.msk [vmem:[#allocation3 + $0x150] sm:$0xff] %vm717_vm5, %v20606_v4  ;;  %763 = vst.msk [vmem:[#allocation3 + $0x160] sm:$0xff] %vm717_vm5, %v20606_v4  ;;  %v17163_v28 = vld [vmem:[%s20175_s10] sm:$0xff]  }
 0x3fc   : > { %764 = vst.msk [vmem:[#allocation3 + $0x168] sm:$0xff] %vm717_vm5, %v20606_v4  ;;  %765 = vst.msk [vmem:[#allocation3 + $0x170] sm:$0xff] %vm717_vm5, %v20606_v4  ;;  %13149 = vmatprep.subr.bf16.mxu1 %v17163_v28 }
 0x3fd   : > { %767 = vst.msk [vmem:[#allocation3 + $0x180] sm:$0xff] %vm717_vm5, %v20606_v4  ;;  %768 = vst.msk [vmem:[#allocation3 + $0x188] sm:$0xff] %vm717_vm5, %v20606_v4 }
 0x3fe   : > { %12548 = vmatmul.mubr.msk.bf16.gmra.mrb[24].mxu1 %vm571_vm1, %v16581_v63  ;;  %769 = vst.msk [vmem:[#allocation3 + $0x190] sm:$0xff] %vm717_vm5, %v20606_v4  ;;  %771 = vst.msk [vmem:[#allocation3 + $0x1a0] sm:$0xff] %vm717_vm5, %v20606_v4 }
 0x3ff   : > { %12551 = vmatprep.mubr.msk.bf16.mxu1 %vm571_vm1, %v16589_v12  ;;  %772 = vst.msk [vmem:[#allocation3 + $0x1a8] sm:$0xff] %vm717_vm5, %v20606_v4  ;;  %773 = vst.msk [vmem:[#allocation3 + $0x1b0] sm:$0xff] %vm717_vm5, %v20606_v4 }
 0x400   : > { %775 = vst.msk [vmem:[#allocation3 + $0x1c0] sm:$0xff] %vm717_vm5, %v20606_v4  ;;  %776 = vst.msk [vmem:[#allocation3 + $0x1c8] sm:$0xff] %vm717_vm5, %v20606_v4 }
 0x401   : > { %777 = vst.msk [vmem:[#allocation3 + $0x1d0] sm:$0xff] %vm717_vm5, %v20606_v4  ;;  %779 = vst.msk [vmem:[#allocation3 + $0x1e0] sm:$0xff] %vm717_vm5, %v20606_v4 }
 0x402   : > { %12998 = vmatmul.mubr.msk.bf16.gmra.mrb[44].mxu0 %vm571_vm1, %v16557_v31  ;;  %780 = vst.msk [vmem:[#allocation3 + $0x1e8] sm:$0xff] %vm717_vm5, %v20606_v4  ;;  %781 = vst.msk [vmem:[#allocation3 + $0x1f0] sm:$0xff] %vm717_vm5, %v20606_v4  ;;  %v20610_v31 = vld [vmem:[#allocation51_spill] sm:$0xff] }
 0x403   : > { %13001 = vmatprep.mubr.msk.bf16.mxu0 %vm571_vm1, %v16565_v61  ;;  %783 = vst.msk [vmem:[#allocation3 + $0x200] sm:$0xff] %vm717_vm5, %v20606_v4  ;;  %784 = vst.msk [vmem:[#allocation3 + $0x208] sm:$0xff] %vm717_vm5, %v20606_v4  ;;  %v5017_v61 = vsel %vm2411_vm3, %v5015_v57, %v5016_v30  ;;  %v17376_v50 = vld [vmem:[#allocation3 + $0x160] sm:$0xff] }
 0x404   : > { %785 = vst.msk [vmem:[#allocation3 + $0x210] sm:$0xff] %vm717_vm5, %v20606_v4  ;;  %787 = vst.msk [vmem:[#allocation3 + $0x220] sm:$0xff] %vm717_vm5, %v20606_v4 }
 0x405   : > { %788 = vst.msk [vmem:[#allocation3 + $0x228] sm:$0xff] %vm717_vm5, %v20606_v4  ;;  %789 = vst.msk [vmem:[#allocation3 + $0x230] sm:$0xff] %vm717_vm5, %v20606_v4 }
 0x406   : > { %12552 = vmatmul.mubr.msk.bf16.gmra.mrb[28].mxu1 %vm571_vm1, %v16593_v40  ;;  %791 = vst.msk [vmem:[#allocation3 + $0x240] sm:$0xff] %vm717_vm5, %v20606_v4  ;;  %792 = vst.msk [vmem:[#allocation3 + $0x248] sm:$0xff] %vm717_vm5, %v20606_v4 }
 0x407   : > { %793 = vst.msk [vmem:[#allocation3 + $0x250] sm:$0xff] %vm717_vm5, %v20606_v4  ;;  %795 = vst.msk [vmem:[#allocation3 + $0x260] sm:$0xff] %vm717_vm5, %v20606_v4 }
 0x408   : > { %796 = vst.msk [vmem:[#allocation3 + $0x268] sm:$0xff] %vm717_vm5, %v20606_v4  ;;  %797 = vst.msk [vmem:[#allocation3 + $0x270] sm:$0xff] %vm717_vm5, %v20606_v4 }
 0x409   : > { %799 = vst.msk [vmem:[#allocation3 + $0x280] sm:$0xff] %vm717_vm5, %v20606_v4  ;;  %800 = vst.msk [vmem:[#allocation3 + $0x288] sm:$0xff] %vm717_vm5, %v20606_v4 }
 0x40a   : > { %13002 = vmatmul.mubr.msk.bf16.gmra.mrb[48].mxu0 %vm571_vm1, %v16569_v16  ;;  %801 = vst.msk [vmem:[#allocation3 + $0x290] sm:$0xff] %vm717_vm5, %v20606_v4  ;;  %803 = vst.msk [vmem:[#allocation3 + $0x2a0] sm:$0xff] %vm717_vm5, %v20606_v4 }
 0x40b   : > { %13005 = vmatprep.mubr.msk.bf16.mxu0 %vm571_vm1, %v16577_v15  ;;  %804 = vst.msk [vmem:[#allocation3 + $0x2a8] sm:$0xff] %vm717_vm5, %v20606_v4  ;;  %805 = vst.msk [vmem:[#allocation3 + $0x2b0] sm:$0xff] %vm717_vm5, %v20606_v4 }
 0x40c   : > { %807 = vst.msk [vmem:[#allocation3 + $0x2c0] sm:$0xff] %vm717_vm5, %v20606_v4  ;;  %808 = vst.msk [vmem:[#allocation3 + $0x2c8] sm:$0xff] %vm717_vm5, %v20606_v4 }
 0x40d   : > { %809 = vst.msk [vmem:[#allocation3 + $0x2d0] sm:$0xff] %vm717_vm5, %v20606_v4  ;;  %811 = vst.msk [vmem:[#allocation3 + $0x2e0] sm:$0xff] %vm717_vm5, %v20606_v4 }
 0x40e   : > { %812 = vst.msk [vmem:[#allocation3 + $0x2e8] sm:$0xff] %vm717_vm5, %v20606_v4  ;;  %813 = vst.msk [vmem:[#allocation3 + $0x2f0] sm:$0xff] %vm717_vm5, %v20606_v4 }
 0x40f   : > { %815 = vst.msk [vmem:[#allocation3 + $0x300] sm:$0xff] %vm717_vm5, %v20606_v4  ;;  %816 = vst.msk [vmem:[#allocation3 + $0x308] sm:$0xff] %vm717_vm5, %v20606_v4 }
 0x410   : > { %817 = vst.msk [vmem:[#allocation3 + $0x310] sm:$0xff] %vm717_vm5, %v20606_v4  ;;  %819 = vst.msk [vmem:[#allocation3 + $0x320] sm:$0xff] %vm717_vm5, %v20606_v4 }
 0x411   : > { %820 = vst.msk [vmem:[#allocation3 + $0x328] sm:$0xff] %vm717_vm5, %v20606_v4  ;;  %821 = vst.msk [vmem:[#allocation3 + $0x330] sm:$0xff] %vm717_vm5, %v20606_v4 }
 0x412   : > { %13006 = vmatmul.mubr.msk.bf16.gmra.mrb[52].mxu0 %vm571_vm1, %v16581_v63  ;;  %823 = vst.msk [vmem:[#allocation3 + $0x340] sm:$0xff] %vm717_vm5, %v20606_v4  ;;  %824 = vst.msk [vmem:[#allocation3 + $0x348] sm:$0xff] %vm717_vm5, %v20606_v4 }
 0x413   : > { %13009 = vmatprep.mubr.msk.bf16.mxu0 %vm571_vm1, %v16589_v12  ;;  %825 = vst.msk [vmem:[#allocation3 + $0x350] sm:$0xff] %vm717_vm5, %v20606_v4  ;;  %827 = vst.msk [vmem:[#allocation3 + $0x360] sm:$0xff] %vm717_vm5, %v20606_v4 }
 0x414   : > { %828 = vst.msk [vmem:[#allocation3 + $0x368] sm:$0xff] %vm717_vm5, %v20606_v4  ;;  %829 = vst.msk [vmem:[#allocation3 + $0x370] sm:$0xff] %vm717_vm5, %v20606_v4 }
 0x415   : > { %831 = vst.msk [vmem:[#allocation3 + $0x380] sm:$0xff] %vm717_vm5, %v20606_v4  ;;  %832 = vst.msk [vmem:[#allocation3 + $0x388] sm:$0xff] %vm717_vm5, %v20606_v4 }
 0x416   : > { %833 = vst.msk [vmem:[#allocation3 + $0x390] sm:$0xff] %vm717_vm5, %v20606_v4  ;;  %835 = vst.msk [vmem:[#allocation3 + $0x3a0] sm:$0xff] %vm717_vm5, %v20606_v4 }
 0x417   : > { %836 = vst.msk [vmem:[#allocation3 + $0x3a8] sm:$0xff] %vm717_vm5, %v20606_v4  ;;  %837 = vst.msk [vmem:[#allocation3 + $0x3b0] sm:$0xff] %vm717_vm5, %v20606_v4 }
 0x418   : > { %839 = vst.msk [vmem:[#allocation3 + $0x3c0] sm:$0xff] %vm717_vm5, %v20606_v4  ;;  %840 = vst.msk [vmem:[#allocation3 + $0x3c8] sm:$0xff] %vm717_vm5, %v20606_v4 }
 0x419   : > { %841 = vst.msk [vmem:[#allocation3 + $0x3d0] sm:$0xff] %vm717_vm5, %v20606_v4  ;;  %843 = vst.msk [vmem:[#allocation3 + $0x3e0] sm:$0xff] %vm717_vm5, %v20606_v4 }
 0x41a   : > { %13010 = vmatmul.mubr.msk.bf16.gmra.mrb[56].mxu0 %vm571_vm1, %v16593_v40  ;;  %844 = vst.msk [vmem:[#allocation3 + $0x3e8] sm:$0xff] %vm717_vm5, %v20606_v4  ;;  %845 = vst.msk [vmem:[#allocation3 + $0x3f0] sm:$0xff] %vm717_vm5, %v20606_v4 }
 0x41b   : > { %13013 = vmatprep.mubr.msk.bf16.mxu0 %vm571_vm1, %v16601_v17  ;;  %847 = vst.msk [vmem:[#allocation3 + $0x400] sm:$0xff] %vm717_vm5, %v20606_v4  ;;  %848 = vst.msk [vmem:[#allocation3 + $0x408] sm:$0xff] %vm717_vm5, %v20606_v4 }
 0x41c   : > { %849 = vst.msk [vmem:[#allocation3 + $0x410] sm:$0xff] %vm717_vm5, %v20606_v4  ;;  %851 = vst.msk [vmem:[#allocation3 + $0x420] sm:$0xff] %vm717_vm5, %v20606_v4 }
 0x41d   : > { %852 = vst.msk [vmem:[#allocation3 + $0x428] sm:$0xff] %vm717_vm5, %v20606_v4  ;;  %853 = vst.msk [vmem:[#allocation3 + $0x430] sm:$0xff] %vm717_vm5, %v20606_v4 }
 0x41e   : > { %855 = vst.msk [vmem:[#allocation3 + $0x440] sm:$0xff] %vm717_vm5, %v20606_v4  ;;  %856 = vst.msk [vmem:[#allocation3 + $0x448] sm:$0xff] %vm717_vm5, %v20606_v4 }
 0x41f   : > { %857 = vst.msk [vmem:[#allocation3 + $0x450] sm:$0xff] %vm717_vm5, %v20606_v4  ;;  %859 = vst.msk [vmem:[#allocation3 + $0x460] sm:$0xff] %vm717_vm5, %v20606_v4 }
 0x420   : > { %860 = vst.msk [vmem:[#allocation3 + $0x468] sm:$0xff] %vm717_vm5, %v20606_v4  ;;  %861 = vst.msk [vmem:[#allocation3 + $0x470] sm:$0xff] %vm717_vm5, %v20606_v4 }
 0x421   : > { %20609 = vst [vmem:[#allocation24_spill] sm:$0xff] %v17149_v7  ;;  %722 = vst.msk [vmem:[#allocation3 + $0x18] sm:$0x1] %vm721_vm6, %v20606_v4 }
 0x422   : > { %13014 = vmatmul.mubr.msk.bf16.gmra.mrb[60].mxu0 %vm571_vm1, %v4643_v35  ;;  %726 = vst.msk [vmem:[#allocation3 + $0x38] sm:$0x1] %vm721_vm6, %v20606_v4  ;;  %730 = vst.msk [vmem:[#allocation3 + $0x58] sm:$0x1] %vm721_vm6, %v20606_v4 }
 0x423   : > { %13019 = vmatprep.mubr.msk.bf16.mxu0 %vm571_vm1, %v15849_v5  ;;  %v1141_v5 = vld [vmem:[#allocation2 + $0x238] sm:$0x1]  ;;  %734 = vst.msk [vmem:[#allocation3 + $0x78] sm:$0x1] %vm721_vm6, %v20606_v4  ;;  %738 = vst.msk [vmem:[#allocation3 + $0x98] sm:$0x1] %vm721_vm6, %v20606_v4 }
 0x424   : > { %742 = vst.msk [vmem:[#allocation3 + $0xb8] sm:$0x1] %vm721_vm6, %v20606_v4  ;;  %746 = vst.msk [vmem:[#allocation3 + $0xd8] sm:$0x1] %vm721_vm6, %v20606_v4 }
 0x425   : > { %750 = vst.msk [vmem:[#allocation3 + $0xf8] sm:$0x1] %vm721_vm6, %v20606_v4  ;;  %754 = vst.msk [vmem:[#allocation3 + $0x118] sm:$0x1] %vm721_vm6, %v20606_v4 }
 0x426   : > { %758 = vst.msk [vmem:[#allocation3 + $0x138] sm:$0x1] %vm721_vm6, %v20606_v4  ;;  %762 = vst.msk [vmem:[#allocation3 + $0x158] sm:$0x1] %vm721_vm6, %v20606_v4 }
 0x427   : > { %766 = vst.msk [vmem:[#allocation3 + $0x178] sm:$0x1] %vm721_vm6, %v20606_v4  ;;  %770 = vst.msk [vmem:[#allocation3 + $0x198] sm:$0x1] %vm721_vm6, %v20606_v4 }
 0x428   : > { %774 = vst.msk [vmem:[#allocation3 + $0x1b8] sm:$0x1] %vm721_vm6, %v20606_v4  ;;  %778 = vst.msk [vmem:[#allocation3 + $0x1d8] sm:$0x1] %vm721_vm6, %v20606_v4 }
 0x429   : > { %782 = vst.msk [vmem:[#allocation3 + $0x1f8] sm:$0x1] %vm721_vm6, %v20606_v4  ;;  %786 = vst.msk [vmem:[#allocation3 + $0x218] sm:$0x1] %vm721_vm6, %v20606_v4 }
 0x42a   : > { %13020 = vmatmul.mubr.msk.bf16.vlgmr.msra.gmra.mrb[0].mxu0 %vm571_vm1, %v15851_v14  ;;  %v5010_v14 = vrot.slane %v16717_v10, 1  ;;  %790 = vst.msk [vmem:[#allocation3 + $0x238] sm:$0x1] %vm721_vm6, %v20606_v4  ;;  %794 = vst.msk [vmem:[#allocation3 + $0x258] sm:$0x1] %vm721_vm6, %v20606_v4 }
 0x42b   : > { %13023 = vmatprep.mubr.msk.bf16.mxu0 %vm571_vm1, %v15873_v19  ;;  %v5011_v19 = vrot.slane %v16719_v11, 1  ;;  %798 = vst.msk [vmem:[#allocation3 + $0x278] sm:$0x1] %vm721_vm6, %v20606_v4  ;;  %802 = vst.msk [vmem:[#allocation3 + $0x298] sm:$0x1] %vm721_vm6, %v20606_v4 }
 0x42c   : > { %806 = vst.msk [vmem:[#allocation3 + $0x2b8] sm:$0x1] %vm721_vm6, %v20606_v4  ;;  %810 = vst.msk [vmem:[#allocation3 + $0x2d8] sm:$0x1] %vm721_vm6, %v20606_v4 }
 0x42d   : > { %814 = vst.msk [vmem:[#allocation3 + $0x2f8] sm:$0x1] %vm721_vm6, %v20606_v4  ;;  %818 = vst.msk [vmem:[#allocation3 + $0x318] sm:$0x1] %vm721_vm6, %v20606_v4 }
 0x42e   : > { %822 = vst.msk [vmem:[#allocation3 + $0x338] sm:$0x1] %vm721_vm6, %v20606_v4  ;;  %826 = vst.msk [vmem:[#allocation3 + $0x358] sm:$0x1] %vm721_vm6, %v20606_v4 }
 0x42f   : > { %830 = vst.msk [vmem:[#allocation3 + $0x378] sm:$0x1] %vm721_vm6, %v20606_v4  ;;  %834 = vst.msk [vmem:[#allocation3 + $0x398] sm:$0x1] %vm721_vm6, %v20606_v4 }
 0x430   : > { %838 = vst.msk [vmem:[#allocation3 + $0x3b8] sm:$0x1] %vm721_vm6, %v20606_v4  ;;  %842 = vst.msk [vmem:[#allocation3 + $0x3d8] sm:$0x1] %vm721_vm6, %v20606_v4 }
 0x431   : > { %846 = vst.msk [vmem:[#allocation3 + $0x3f8] sm:$0x1] %vm721_vm6, %v20606_v4  ;;  %850 = vst.msk [vmem:[#allocation3 + $0x418] sm:$0x1] %vm721_vm6, %v20606_v4 }
 0x432   : > { %13024 = vmatmul.mubr.msk.bf16.gmra.mrb[4].mxu0 %vm571_vm1, %v15879_v0  ;;  %v5013_v0 = vrot.slane %v1141_v5, 1  ;;  %854 = vst.msk [vmem:[#allocation3 + $0x438] sm:$0x1] %vm721_vm6, %v20606_v4  ;;  %858 = vst.msk [vmem:[#allocation3 + $0x458] sm:$0x1] %vm721_vm6, %v20606_v4  ;;  %v17342_v5 = vld [vmem:[#allocation3 + $0x60] sm:$0xff] }
 0x433   : > { %13027 = vmatprep.mubr.msk.bf16.mxu0 %vm571_vm1, %v15901_v33  ;;  %v5012_v33 = vsel %vm2411_vm3, %v5010_v14, %v5011_v19  ;;  %862 = vst.msk [vmem:[#allocation3 + $0x478] sm:$0x1] %vm721_vm6, %v20606_v4  ;;  %v17344_v14 = vld [vmem:[#allocation3 + $0xc0] sm:$0xff]  ;;  %v17390_v4 = vld [vmem:[#allocation3 + $0x250] sm:$0xff] }
 0x43a   : > { %13028 = vmatmul.mubr.msk.bf16.gmra.mrb[8].mxu0 %vm571_vm1, %v15907_v1  ;;  %v5014_v1 = vsel %vm2411_vm3, %v5011_v19, %v5013_v0 }
 0x43b   : > { %13031 = vmatprep.mubr.msk.bf16.mxu0 %vm571_vm1, %v15929_v38  ;;  %v5024_v38 = vpack.c.bf16 %v5014_v1, %v5012_v33  ;;  %v17383_v1 = vld [vmem:[#allocation3 + $0x1a0] sm:$0xff] }
 0x442   : > { %13032 = vmatmul.mubr.msk.bf16.gmra.mrb[12].mxu0 %vm571_vm1, %v15935_v58  ;;  %v20607_v58 = vld [vmem:[#allocation66_spill] sm:$0xff] }
 0x443   : > { %13035 = vmatprep.mubr.msk.bf16.mxu0 %vm571_vm1, %v15957_v49  ;;  %v20608_v49 = vld [vmem:[#allocation67_spill] sm:$0xff] }
 0x44a   : > { %13036 = vmatmul.mubr.msk.bf16.gmra.mrb[16].mxu0 %vm571_vm1, %v15963_v62  ;;  %v17147_v62 = vld [vmem:[#allocation3 + $0x8] sm:$0xff] }
 0x44b   : > { %13039 = vmatprep.mubr.msk.bf16.mxu0 %vm571_vm1, %v20556_v42  ;;  %v6251_v44 = vpack.c.bf16 %v17149_v7, %v17147_v62 }
 0x44d   : > { %13085 = vmatprep.mubr.msk.bf16.mxu1 %vm717_vm5, %v6251_v44 }
 0x452   : > { %13040 = vmatmul.mubr.msk.bf16.gmra.mrb[20].mxu0 %vm571_vm1, %v20557_v52 }
 0x453   : > { %13043 = vmatprep.mubr.msk.bf16.mxu0 %vm571_vm1, %v20558_v8 }
 0x45a   : > { %13044 = vmatmul.mubr.msk.bf16.gmra.mrb[24].mxu0 %vm571_vm1, %v20559_v32 }
 0x45b   : > { %13047 = vmatprep.mubr.msk.bf16.mxu0 %vm571_vm1, %v16644_v37 }
 0x462   : > { %13048 = vmatmul.mubr.msk.bf16.gmra.mrb[28].mxu0 %vm571_vm1, %v5024_v38 }
 0x463   : > { %13051 = vmatprep.mubr.msk.bf16.mxu0 %vm571_vm1, %v20561_v39 }
 0x46a   : > { %13052 = vmatmul.mubr.msk.bf16.gmra.mrb[32].mxu0 %vm571_vm1, %v20562_v51 }
 0x46b   : > { %13055 = vmatprep.mubr.msk.bf16.mxu0 %vm571_vm1, %v20563_v60 }
 0x472   : > { %13056 = vmatmul.mubr.msk.bf16.gmra.mrb[36].mxu0 %vm571_vm1, %v20564_v25 }
 0x473   : > { %13059 = vmatprep.mubr.msk.bf16.mxu0 %vm571_vm1, %v20565_v24 }
 0x47a   : > { %13060 = vmatmul.mubr.msk.bf16.gmra.mrb[40].mxu0 %vm571_vm1, %v20566_v18 }
 0x47b   : > { %13063 = vmatprep.mubr.msk.bf16.mxu0 %vm571_vm1, %v20567_v20 }
 0x482   : > { %13064 = vmatmul.mubr.msk.bf16.gmra.mrb[44].mxu0 %vm571_vm1, %v20568_v54 }
 0x483   : > { %13067 = vmatprep.mubr.msk.bf16.mxu0 %vm571_vm1, %v20569_v26 }
 0x48a   : > { %13068 = vmatmul.mubr.msk.bf16.gmra.mrb[48].mxu0 %vm571_vm1, %v20607_v58  ;;  %v17350_v58 = vld [vmem:[#allocation3 + $0xa0] sm:$0xff] }
 0x48b   : > { %13071 = vmatprep.mubr.msk.bf16.mxu0 %vm571_vm1, %v20608_v49  ;;  %v17352_v49 = vld [vmem:[#allocation3 + $0x100] sm:$0xff] }
 0x492   : > { %13072 = vmatmul.mubr.msk.bf16.gmra.mrb[52].mxu0 %vm571_vm1, %v16362_v2  ;;  %v20611_v2 = vld [vmem:[#allocation23_spill] sm:$0xff] }
 0x493   : > { %13075 = vmatprep.mubr.msk.bf16.mxu0 %vm571_vm1, %v16364_v43  ;;  %v5019_v43 = vsel %vm2411_vm3, %v5016_v30, %v5018_v59 }
 0x494   : > { %v5025_v16 = vpack.c.bf16 %v5019_v43, %v5017_v61  ;;  %v17363_v61 = vld [vmem:[%s17337_s18] ss:$0 sm:$0xff] }
 0x49a   : > { %13076 = vmatmul.mubr.msk.bf16.gmra.mrb[56].mxu0 %vm571_vm1, %v20610_v31  ;;  %v17358_v31 = vld [vmem:[#allocation3 + $0xe0] sm:$0xff] }
 0x49b   : > { %13079 = vmatprep.mubr.msk.bf16.mxu0 %vm571_vm1, %v20611_v2  ;;  %v17360_v2 = vld [vmem:[#allocation3 + $0x140] sm:$0xff] }
 0x4a1   : > { %v17245_v15 = vpop.f32.mrb[0].mxu1 }
 0x4a2   : > { %13080 = vmatmul.mubr.msk.bf16.gmra.mrb[60].mxu0 %vm571_vm1, %v5025_v16  ;;  %v17247_v63 = vpop.f32.mrb[1].mxu1 }
 0x4a3   : > { %v17249_v12 = vpop.f32.mrb[2].mxu1 }
 0x4a4   : > { %v17251_v40 = vpop.f32.mrb[3].mxu1 }
 0x4a9   : > { %v17253_v17 = vpop.f32.mrb[4].mxu1 }
 0x4aa   : > { %v17255_v42 = vpop.f32.mrb[5].mxu1 }
 0x4ab   : > { %v17257_v52 = vpop.f32.mrb[6].mxu1 }
 0x4ac   : > { %v17259_v8 = vpop.f32.mrb[7].mxu1 }
 0x4b1   : > { %v17261_v32 = vpop.f32.mrb[8].mxu1 }
 0x4b2   : > { %v17263_v37 = vpop.f32.mrb[9].mxu1 }
 0x4b3   : > { %v17265_v39 = vpop.f32.mrb[10].mxu1 }
 0x4b4   : > { %v17267_v51 = vpop.f32.mrb[11].mxu1 }
 0x4b9   : > { %v17269_v60 = vpop.f32.mrb[12].mxu1 }
 0x4ba   : > { %v17271_v25 = vpop.f32.mrb[13].mxu1 }
 0x4bb   : > { %v17273_v24 = vpop.f32.mrb[14].mxu1 }
 0x4bc   : > { %v17275_v18 = vpop.f32.mrb[15].mxu1 }
 0x4c1   : > { %v17277_v20 = vpop.f32.mrb[16].mxu1 }
 0x4c2   : > { %v17279_v54 = vpop.f32.mrb[17].mxu1 }
 0x4c3   : > { %20612 = vst [vmem:[#allocation38_spill] sm:$0xff] %v17279_v54  ;;  %v17281_v26 = vpop.f32.mrb[18].mxu1 }
 0x4c4   : > { %20613 = vst [vmem:[#allocation41_spill] sm:$0xff] %v17281_v26  ;;  %v17283_v10 = vpop.f32.mrb[19].mxu1  ;;  %v17439_v26 = vld [vmem:[#allocation3 + $0x340] sm:$0xff] }
 0x4c5   : > { %20614 = vst [vmem:[#allocation7_spill] sm:$0xff] %v17283_v10  ;;  %20634 = vst [vmem:[#allocation25_spill] sm:$0xff] %v17439_v26 }
 0x4c9   : > { %v17285_v11 = vpop.f32.mrb[20].mxu1 }
 0x4ca   : > { %20615 = vst [vmem:[#allocation8_spill] sm:$0xff] %v17285_v11  ;;  %v17287_v47 = vpop.f32.mrb[21].mxu1  ;;  %v17435_v11 = vld [vmem:[#allocation3 + $0x58] sm:$0x1] }
 0x4cb   : > { %20616 = vst [vmem:[#allocation14_spill] sm:$0xff] %v17287_v47  ;;  %v17289_v46 = vpop.f32.mrb[22].mxu1  ;;  %20633 = vst [vmem:[#allocation65_spill] sm:$0xff] %v17435_v11 }
 0x4cc   : > { %20617 = vst [vmem:[#allocation17_spill] sm:$0xff] %v17289_v46  ;;  %v17291_v36 = vpop.f32.mrb[23].mxu1 }
 0x4cd   : > { %20618 = vst [vmem:[#allocation18_spill] sm:$0xff] %v17291_v36  ;;  %v17423_v36 = vld [vmem:[#allocation3 + $0x2e0] sm:$0xff] }
 0x4ce   : > { %20631 = vst [vmem:[#allocation63_spill] sm:$0xff] %v17423_v36  ;;  %v20638_v36 = vrot.slane %v17147_v62, 7 }
 0x4d1   : > { %v17293_v13 = vpop.f32.mrb[24].mxu1 }
 0x4d2   : > { %20619 = vst [vmem:[#allocation19_spill] sm:$0xff] %v17293_v13  ;;  %v17295_v29 = vpop.f32.mrb[25].mxu1 }
 0x4d3   : > { %20620 = vst [vmem:[#allocation35_spill] sm:$0xff] %v17295_v29  ;;  %v17297_v55 = vpop.f32.mrb[26].mxu1  ;;  %v17404_v29 = vld [vmem:[#allocation3 + $0x280] sm:$0xff] }
 0x4d4   : > { %20621 = vst [vmem:[#allocation37_spill] sm:$0xff] %v17297_v55  ;;  %v17299_v21 = vpop.f32.mrb[27].mxu1  ;;  %20627 = vst [vmem:[#allocation59_spill] sm:$0xff] %v17404_v29 }
 0x4d5   : > { %20622 = vst [vmem:[#allocation39_spill] sm:$0xff] %v17299_v21 }
 0x4d9   : > { %v17301_v27 = vpop.f32.mrb[28].mxu1 }
 0x4da   : > { %20623 = vst [vmem:[#allocation40_spill] sm:$0xff] %v17301_v27  ;;  %v17309_v23 = vpop.f32.mrb[29].mxu1  ;;  %v17414_v27 = vld [vmem:[#allocation3 + $0x2c0] sm:$0xff] }
 0x4db   : > { %20624 = vst [vmem:[#allocation56_spill] sm:$0xff] %v17309_v23  ;;  %v17311_v41 = vpop.f32.mrb[30].mxu1  ;;  %20629 = vst [vmem:[#allocation61_spill] sm:$0xff] %v17414_v27 }
 0x4dc   : > { %20625 = vst [vmem:[#allocation57_spill] sm:$0xff] %v17311_v41  ;;  %v17319_v9 = vpop.f32.mrb[31].mxu1  ;;  %v17416_v41 = vld [vmem:[#allocation3 + $0x300] sm:$0xff] }
 0x4dd   : > { %20626 = vst [vmem:[#allocation58_spill] sm:$0xff] %v17319_v9  ;;  %v17388_v9 = vld [vmem:[#allocation3 + $0x248] sm:$0xff]  ;;  %20630 = vst [vmem:[#allocation62_spill] sm:$0xff] %v17416_v41 }
 0x4fd   : > { %v13021_v48 = vpop.f32.mrb[0].mxu0 }
 0x4fe   : > { %v5406_v6 = vmul.f32 %v13021_v48, %v17322_v3  ;;  %v5071_v35 = vpop.f32.mrb[1].mxu0 }
 0x4ff   : > { %v5404_v19 = vmul.f32 %v17322_v3, %v5071_v35  ;;  %v13022_v0 = vpop.f32.mrb[2].mxu0  ;;  %v17369_v35 = vld [vmem:[#allocation3 + $0x120] sm:$0xff] }
 0x500   : > { %v5484_v44 = vadd.f32 %v17329_v34, %v5406_v6  ;;  %v5407_v22 = vmul.f32 %v13022_v0, %v17322_v3  ;;  %v5074_v57 = vpop.f32.mrb[3].mxu0  ;;  %v17371_v0 = vld [vmem:[#allocation3 + $0x180] sm:$0xff] }
 0x501   : > { %v5482_v43 = vadd.f32 %v17329_v34, %v5404_v19  ;;  %v5405_v16 = vmul.f32 %v17322_v3, %v5074_v57  ;;  %v17378_v19 = vld [vmem:[#allocation3 + $0x1c0] sm:$0xff] }
 0x502   : > { %v5548_v38 = vmax.f32 %v5484_v44, 0.0  ;;  %v5485_v30 = vadd.f32 %v17329_v34, %v5407_v22  ;;  %v17385_v44 = vld [vmem:[#allocation3 + $0x1e0] sm:$0xff] }
 0x503   : > { %v5546_v57 = vmax.f32 %v5482_v43, 0.0  ;;  %v5483_v48 = vadd.f32 %v17329_v34, %v5405_v16  ;;  %v17394_v16 = vld [vmem:[#allocation3 + $0x260] sm:$0xff] }
 0x504   : > { %v5626_v22 = vmul.f32 %v17363_v61, %v5548_v38  ;;  %v5549_v59 = vmax.f32 %v5485_v30, 0.0 }
 0x505   : > { %v5624_v6 = vmul.f32 %v17363_v61, %v5546_v57  ;;  %v5547_v33 = vmax.f32 %v5483_v48, 0.0  ;;  %v13025_v23 = vpop.f32.mrb[4].mxu0  ;;  %v17406_v57 = vld [vmem:[#allocation3 + $0x2a0] sm:$0xff] }
 0x506   : > { %5691 = vst.msk [vmem:[#allocation3 + $0x48] sm:$0xff] %vm717_vm5, %v5626_v22  ;;  %v5627_v38 = vmul.f32 %v17363_v61, %v5549_v59  ;;  %v5410_v30 = vmul.f32 %v13025_v23, %v17322_v3  ;;  %v5087_v55 = vpop.f32.mrb[5].mxu0  ;;  %20628 = vst [vmem:[#allocation60_spill] sm:$0xff] %v17406_v57  ;;  %v17425_v59 = vld [vmem:[#allocation3 + $0x38] sm:$0x1] }
 0x507   : > { %5689 = vst.msk [vmem:[#allocation3 + $0x28] sm:$0xff] %vm717_vm5, %v5624_v6  ;;  %v5625_v48 = vmul.f32 %v17363_v61, %v5547_v33  ;;  %v5408_v21 = vmul.f32 %v17322_v3, %v5087_v55  ;;  %v13026_v22 = vpop.f32.mrb[6].mxu0  ;;  %20632 = vst [vmem:[#allocation64_spill] sm:$0xff] %v17425_v59 }
 0x508   : > { %5692 = vst.msk [vmem:[#allocation3 + $0x50] sm:$0xff] %vm717_vm5, %v5627_v38  ;;  %v5488_v43 = vadd.f32 %v17329_v34, %v5410_v30  ;;  %v5411_v6 = vmul.f32 %v13026_v22, %v17322_v3  ;;  %v5090_v13 = vpop.f32.mrb[7].mxu0  ;;  %v17443_v38 = vld [vmem:[#allocation3 + $0x320] sm:$0xff] }
 0x509   : > { %5690 = vst.msk [vmem:[#allocation3 + $0x30] sm:$0xff] %vm717_vm5, %v5625_v48  ;;  %v5486_v23 = vadd.f32 %v17329_v34, %v5408_v21  ;;  %v5409_v46 = vmul.f32 %v17322_v3, %v5090_v13  ;;  %20635 = vst [vmem:[#allocation26_spill] sm:$0xff] %v17443_v38  ;;  %v20637_v21 = vrot.slane %v17149_v7, 7 }
 0x50a   : > { %v5552_v22 = vmax.f32 %v5488_v43, 0.0  ;;  %v5489_v47 = vadd.f32 %v17329_v34, %v5411_v6 }
 0x50b   : > { %v5550_v10 = vmax.f32 %v5486_v23, 0.0  ;;  %v5487_v48 = vadd.f32 %v17329_v34, %v5409_v46  ;;  %v17455_v13 = vsel %vm1310_vm4, %v20638_v36, %v20637_v21 }
 0x50c   : > { %v5630_v30 = vmul.f32 %v17363_v61, %v5552_v22  ;;  %v5553_v43 = vmax.f32 %v5489_v47, 0.0 }
 0x50d   : > { %v5628_v33 = vmul.f32 %v17363_v61, %v5550_v10  ;;  %v5551_v23 = vmax.f32 %v5487_v48, 0.0  ;;  %v13029_v41 = vpop.f32.mrb[8].mxu0  ;;  %v17448_v46 = vld [vmem:[#allocation3 + $0x48] sm:$0xff] }
 0x50e   : > { %20636 = vst [vmem:[#allocation27_spill] sm:$0xff] %v17448_v46  ;;  %5695 = vst.msk [vmem:[#allocation3 + $0x88] sm:$0xff] %vm717_vm5, %v5630_v30  ;;  %v5631_v22 = vmul.f32 %v17363_v61, %v5553_v43  ;;  %v5414_v55 = vmul.f32 %v13029_v41, %v17322_v3  ;;  %v5103_v10 = vpop.f32.mrb[9].mxu0  ;;  %v17461_v48 = vld [vmem:[#allocation3 + $0x28] sm:$0xff] }
 0x50f   : > { %20639 = vst [vmem:[#allocation28_spill] sm:$0xff] %v17461_v48  ;;  %5693 = vst.msk [vmem:[#allocation3 + $0x68] sm:$0xff] %vm717_vm5, %v5628_v33  ;;  %v5629_v36 = vmul.f32 %v17363_v61, %v5551_v23  ;;  %v5412_v21 = vmul.f32 %v17322_v3, %v5103_v10  ;;  %v13030_v47 = vpop.f32.mrb[10].mxu0  ;;  %v5999_v30 = vrot.slane %v17461_v48, 7  ;;  %v17470_v59 = vld [vmem:[#allocation3 + $0x50] sm:$0xff]  ;;  %v5753_v10 = vld [vmem:[#allocation3] sm:$0xff] }
 0x510   : > { %20640 = vst [vmem:[#allocation29_spill] sm:$0xff] %v17470_v59  ;;  %5696 = vst.msk [vmem:[#allocation3 + $0x90] sm:$0xff] %vm717_vm5, %v5631_v22  ;;  %v5492_v41 = vadd.f32 %v17329_v34, %v5414_v55  ;;  %v5415_v6 = vmul.f32 %v13030_v47, %v17322_v3  ;;  %v5106_v11 = vpop.f32.mrb[11].mxu0  ;;  %v17475_v7 = vld [vmem:[#allocation3 + $0x30] sm:$0xff]  ;;  %v17480_v23 = vpack.c.bf16 %v17470_v59, %v17448_v46  ;;  %v5993_v57 = vrot.slane %v5753_v10, 7 }
 0x511   : > { %5694 = vst.msk [vmem:[#allocation3 + $0x70] sm:$0xff] %vm717_vm5, %v5629_v36  ;;  %v5490_v43 = vadd.f32 %v17329_v34, %v5412_v21  ;;  %v5413_v22 = vmul.f32 %v17322_v3, %v5106_v11  ;;  %v6001_v55 = vrot.slane %v17475_v7, 7  ;;  %v17488_v47 = vpack.c.bf16 %v17475_v7, %v17461_v48  ;;  %v14824_v33 = vld [vmem:[%s20175_s10 + $0x10] sm:$0xff]  }
 0x512   : > { %20641 = vst [vmem:[#allocation30_spill] sm:$0xff] %v17480_v23  ;;  %v5556_v26 = vmax.f32 %v5492_v41, 0.0  ;;  %v5493_v38 = vadd.f32 %v17329_v34, %v5415_v6  ;;  %v20643_v48 = vrot.slane %v17324_v56, 7 }
 0x513   : > { %20642 = vst [vmem:[#allocation31_spill] sm:$0xff] %v17488_v47  ;;  %v5554_v21 = vmax.f32 %v5490_v43, 0.0  ;;  %v5491_v11 = vadd.f32 %v17329_v34, %v5413_v22  ;;  %13086 = vmatmul.mubr.msk.bf16.vlgmr.msra.gmra.mrb[32].mxu1 %vm717_vm5, %v17488_v47  ;;  %v6002_v6 = vsel %vm1310_vm4, %v5999_v30, %v6001_v55  ;;  %v20644_v43 = vrot.slane %v17448_v46, 7 }
 0x514   : > { %v6000_v29 = vsel %vm1310_vm4, %v20643_v48, %v5999_v30  ;;  %v5634_v54 = vmul.f32 %v17363_v61, %v5556_v26  ;;  %v5557_v41 = vmax.f32 %v5493_v38, 0.0  ;;  %13089 = vmatprep.mubr.msk.bf16.mxu1 %vm717_vm5, %v17480_v23  ;;  %13150 = vmatpush3.bf16.msra.mxu1 %v17163_v28  ;;  %v20645_v22 = vrot.slane %v17326_v45, 7 }
 0x515   : > { %v5632_v56 = vmul.f32 %v17363_v61, %v5554_v21  ;;  %v5555_v36 = vmax.f32 %v5491_v11, 0.0  ;;  %v13033_v48 = vpop.f32.mrb[12].mxu0  ;;  %v17513_v27 = vld [vmem:[#allocation3 + $0x88] sm:$0xff]  ;;  %v20646_v26 = vrot.slane %v17147_v62, 7  ;;  %13215 = vmatprep.subr.bf16.mxu1 %v14824_v33  ;;  %v17520_v28 = vpack.c.bf16 %v6002_v6, %v6000_v29 }
 0x516   : > { %v6005_v10 = vsel %vm1310_vm4, %v20645_v22, %v20644_v43  ;;  %5699 = vst.msk [vmem:[#allocation3 + $0xc8] sm:$0xff] %vm717_vm5, %v5634_v54  ;;  %v5635_v45 = vmul.f32 %v17363_v61, %v5557_v41  ;;  %v5418_v30 = vmul.f32 %v13033_v48, %v17322_v3  ;;  %v5119_v55 = vpop.f32.mrb[13].mxu0  ;;  %v17525_v21 = vld [vmem:[#allocation3 + $0x68] sm:$0xff] }
 0x517   : > { %v17518_v38 = vsel %vm1310_vm4, %v5993_v57, %v20646_v26  ;;  %20648 = vst [vmem:[#allocation33_spill] sm:$0xff] %v17520_v28  ;;  %20649 = vst [vmem:[#allocation34_spill] sm:$0xff] %v17525_v21  ;;  %v5633_v57 = vmul.f32 %v17363_v61, %v5555_v36  ;;  %v5416_v29 = vmul.f32 %v17322_v3, %v5119_v55  ;;  %v13034_v33 = vpop.f32.mrb[14].mxu0  ;;  %v6009_v54 = vrot.slane %v17525_v21, 7  ;;  %v17534_v6 = vld [vmem:[#allocation3 + $0x90] sm:$0xff] }
 0x518   : > { %20647 = vst [vmem:[#allocation32_spill] sm:$0xff] %v17518_v38  ;;  %5697 = vst.msk [vmem:[#allocation3 + $0xa8] sm:$0xff] %vm717_vm5, %v5632_v56  ;;  %v5496_v22 = vadd.f32 %v17329_v34, %v5418_v30  ;;  %v5419_v48 = vmul.f32 %v13034_v33, %v17322_v3  ;;  %v5122_v26 = vpop.f32.mrb[15].mxu0  ;;  %v17539_v43 = vld [vmem:[#allocation3 + $0x70] sm:$0xff]  ;;  %v6016_v36 = vrot.slane %v17534_v6, 7  ;;  %v17544_v56 = vpack.c.bf16 %v17534_v6, %v17513_v27 }
 0x519   : > { %20650 = vst [vmem:[#allocation36_spill] sm:$0xff] %v17534_v6  ;;  %5700 = vst.msk [vmem:[#allocation3 + $0xd0] sm:$0xff] %vm717_vm5, %v5635_v45  ;;  %v5494_v55 = vadd.f32 %v17329_v34, %v5416_v29  ;;  %v5417_v41 = vmul.f32 %v17322_v3, %v5122_v26  ;;  %v6011_v45 = vrot.slane %v17539_v43, 7  ;;  %v17552_v30 = vpack.c.bf16 %v17539_v43, %v17525_v21 }
 0x51a   : > { %20651 = vst [vmem:[#allocation22_spill] sm:$0xff] %v17539_v43  ;;  %20652 = vst [vmem:[#allocation42_spill] sm:$0xff] %v17544_v56  ;;  %v5560_v33 = vmax.f32 %v5496_v22, 0.0  ;;  %v5497_v11 = vadd.f32 %v17329_v34, %v5419_v48  ;;  %v20654_v26 = vrot.slane %v17470_v59, 7  ;;  %v20655_v21 = vrot.slane %v17448_v46, 7 }
 0x51b   : > { %5698 = vst.msk [vmem:[#allocation3 + $0xb0] sm:$0xff] %vm717_vm5, %v5633_v57  ;;  %20653 = vst [vmem:[#allocation43_spill] sm:$0xff] %v17552_v30  ;;  %v5558_v28 = vmax.f32 %v5494_v55, 0.0  ;;  %v5495_v57 = vadd.f32 %v17329_v34, %v5417_v41  ;;  %13090 = vmatmul.mubr.msk.bf16.gmra.mrb[36].mxu1 %vm717_vm5, %v17552_v30  ;;  %v20657_v41 = vrot.slane %v17342_v5, 7 }
 0x51c   : > { %v6007_v22 = vsel %vm1310_vm4, %v20655_v21, %v20654_v26  ;;  %v5638_v48 = vmul.f32 %v17363_v61, %v5560_v33  ;;  %v5561_v23 = vmax.f32 %v5497_v11, 0.0  ;;  %13093 = vmatprep.mubr.msk.bf16.mxu1 %vm717_vm5, %v17544_v56  ;;  %v6012_v21 = vsel %vm1310_vm4, %v6009_v54, %v6011_v45 }
 0x51d   : > { %v17570_v55 = vpack.c.bf16 %v6007_v22, %v6005_v10  ;;  %v6010_v47 = vsel %vm1310_vm4, %v20657_v41, %v6009_v54  ;;  %v5636_v29 = vmul.f32 %v17363_v61, %v5558_v28  ;;  %v5559_v30 = vmax.f32 %v5495_v57, 0.0  ;;  %v13037_v6 = vpop.f32.mrb[16].mxu0  ;;  %v17576_v43 = vld [vmem:[#allocation3 + $0xc8] sm:$0xff] }
 0x51e   : > { %v20658_v33 = vrot.slane %v17513_v27, 7  ;;  %v20659_v11 = vrot.slane %v17331_v53, 7  ;;  %5703 = vst.msk [vmem:[#allocation3 + $0x108] sm:$0xff] %vm717_vm5, %v5638_v48  ;;  %v5639_v5 = vmul.f32 %v17363_v61, %v5561_v23  ;;  %v5422_v10 = vmul.f32 %v13037_v6, %v17322_v3  ;;  %v5135_v22 = vpop.f32.mrb[17].mxu0 }
 0x51f   : > { %20656 = vst [vmem:[#allocation44_spill] sm:$0xff] %v17570_v55  ;;  %v17587_v28 = vld [vmem:[#allocation3 + $0xa8] sm:$0xff]  ;;  %5701 = vst.msk [vmem:[#allocation3 + $0xe8] sm:$0xff] %vm717_vm5, %v5636_v29  ;;  %v5637_v54 = vmul.f32 %v17363_v61, %v5559_v30  ;;  %v5420_v53 = vmul.f32 %v17322_v3, %v5135_v22  ;;  %v13038_v45 = vpop.f32.mrb[18].mxu0 }
 0x520   : > { %v6015_v26 = vsel %vm1310_vm4, %v20659_v11, %v20658_v33  ;;  %20660 = vst [vmem:[#allocation45_spill] sm:$0xff] %v17587_v28  ;;  %v6019_v48 = vrot.slane %v17587_v28, 7  ;;  %v17596_v33 = vld [vmem:[#allocation3 + $0xd0] sm:$0xff]  ;;  %5704 = vst.msk [vmem:[#allocation3 + $0x110] sm:$0xff] %vm717_vm5, %v5639_v5  ;;  %v5500_v6 = vadd.f32 %v17329_v34, %v5422_v10  ;;  %v5423_v11 = vmul.f32 %v13038_v45, %v17322_v3  ;;  %v5138_v41 = vpop.f32.mrb[19].mxu0 }
 0x521   : > { %20661 = vst [vmem:[#allocation46_spill] sm:$0xff] %v17596_v33  ;;  %v6026_v30 = vrot.slane %v17596_v33, 7  ;;  %v17606_v29 = vpack.c.bf16 %v17596_v33, %v17576_v43  ;;  %5702 = vst.msk [vmem:[#allocation3 + $0xf0] sm:$0xff] %vm717_vm5, %v5637_v54  ;;  %v5498_v22 = vadd.f32 %v17329_v34, %v5420_v53  ;;  %v5421_v23 = vmul.f32 %v17322_v3, %v5138_v41 }
 0x522   : > { %v17601_v57 = vld [vmem:[#allocation3 + $0xb0] sm:$0xff]  ;;  %v5564_v45 = vmax.f32 %v5500_v6, 0.0  ;;  %v5501_v56 = vadd.f32 %v17329_v34, %v5423_v11  ;;  %v17622_v41 = vpack.c.bf16 %v6012_v21, %v6010_v47  ;;  %v20665_v53 = vrot.slane %v17513_v27, 7 }
 0x523   : > { %20662 = vst [vmem:[#allocation47_spill] sm:$0xff] %v17606_v29  ;;  %v6021_v5 = vrot.slane %v17601_v57, 7  ;;  %v17614_v10 = vpack.c.bf16 %v17601_v57, %v17587_v28  ;;  %v5562_v59 = vmax.f32 %v5498_v22, 0.0  ;;  %v5499_v54 = vadd.f32 %v17329_v34, %v5421_v23 }
 0x524   : > { %20664 = vst [vmem:[#allocation49_spill] sm:$0xff] %v17622_v41  ;;  %v6017_v28 = vsel %vm1310_vm4, %v20665_v53, %v6016_v36  ;;  %v5642_v6 = vmul.f32 %v17363_v61, %v5564_v45  ;;  %v5565_v38 = vmax.f32 %v5501_v56, 0.0  ;;  %v20667_v22 = vrot.slane %v17350_v58, 7 }
 0x525   : > { %20663 = vst [vmem:[#allocation48_spill] sm:$0xff] %v17614_v10  ;;  %13094 = vmatmul.mubr.msk.bf16.gmra.mrb[40].mxu1 %vm717_vm5, %v17614_v10  ;;  %v17630_v11 = vpack.c.bf16 %v6017_v28, %v6015_v26  ;;  %v5640_v46 = vmul.f32 %v17363_v61, %v5562_v59  ;;  %v5563_v47 = vmax.f32 %v5499_v54, 0.0  ;;  %v13041_v21 = vpop.f32.mrb[20].mxu0  ;;  %v17636_v55 = vld [vmem:[#allocation3 + $0x108] sm:$0xff]  ;;  %v6022_v36 = vsel %vm1310_vm4, %v6019_v48, %v6021_v5 }
 0x526   : > { %13097 = vmatprep.mubr.msk.bf16.mxu1 %vm717_vm5, %v17606_v29  ;;  %v6020_v23 = vsel %vm1310_vm4, %v20667_v22, %v6019_v48  ;;  %v20668_v45 = vrot.slane %v17576_v43, 7  ;;  %v20669_v56 = vrot.slane %v17344_v14, 7  ;;  %5707 = vst.msk [vmem:[#allocation3 + $0x148] sm:$0xff] %vm717_vm5, %v5642_v6  ;;  %v5643_v58 = vmul.f32 %v17363_v61, %v5565_v38  ;;  %v5151_v28 = vpop.f32.mrb[21].mxu0  ;;  %v17647_v59 = vld [vmem:[#allocation3 + $0xe8] sm:$0xff] }
 0x527   : > { %20666 = vst [vmem:[#allocation50_spill] sm:$0xff] %v17630_v11  ;;  %v5426_v26 = vmul.f32 %v13041_v21, %v17322_v3  ;;  %20670 = vst [vmem:[#allocation52_spill] sm:$0xff] %v17647_v59  ;;  %v5641_v48 = vmul.f32 %v17363_v61, %v5563_v47  ;;  %v5424_v14 = vmul.f32 %v17322_v3, %v5151_v28  ;;  %v13042_v5 = vpop.f32.mrb[22].mxu0  ;;  %v6029_v6 = vrot.slane %v17647_v59, 7 }
 0x528   : > { %v6025_v53 = vsel %vm1310_vm4, %v20669_v56, %v20668_v45  ;;  %5705 = vst.msk [vmem:[#allocation3 + $0x128] sm:$0xff] %vm717_vm5, %v5640_v46  ;;  %v17656_v45 = vld [vmem:[#allocation3 + $0x110] sm:$0xff]  ;;  %5708 = vst.msk [vmem:[#allocation3 + $0x150] sm:$0xff] %vm717_vm5, %v5643_v58  ;;  %v5427_v56 = vmul.f32 %v13042_v5, %v17322_v3  ;;  %v5154_v22 = vpop.f32.mrb[23].mxu0 }
 0x529   : > { %20671 = vst [vmem:[#allocation53_spill] sm:$0xff] %v17656_v45  ;;  %v5504_v21 = vadd.f32 %v17329_v34, %v5426_v26  ;;  %v17661_v54 = vld [vmem:[#allocation3 + $0xf0] sm:$0xff]  ;;  %v6036_v46 = vrot.slane %v17656_v45, 7  ;;  %v17666_v47 = vpack.c.bf16 %v17656_v45, %v17636_v55  ;;  %5706 = vst.msk [vmem:[#allocation3 + $0x130] sm:$0xff] %vm717_vm5, %v5641_v48  ;;  %v5502_v28 = vadd.f32 %v17329_v34, %v5424_v14 }
 0x52a   : > { %v5425_v38 = vmul.f32 %v17322_v3, %v5154_v22  ;;  %v6031_v58 = vrot.slane %v17661_v54, 7  ;;  %v17674_v26 = vpack.c.bf16 %v17661_v54, %v17647_v59  ;;  %v5505_v29 = vadd.f32 %v17329_v34, %v5427_v56 }
 0x52b   : > { %20672 = vst [vmem:[#allocation54_spill] sm:$0xff] %v17666_v47  ;;  %v5568_v5 = vmax.f32 %v5504_v21, 0.0  ;;  %v5566_v41 = vmax.f32 %v5502_v28, 0.0  ;;  %v17682_v22 = vpack.c.bf16 %v6022_v36, %v6020_v23  ;;  %v20675_v14 = vrot.slane %v17576_v43, 7 }
 0x52c   : > { %20673 = vst [vmem:[#allocation55_spill] sm:$0xff] %v17674_v26  ;;  %v5503_v48 = vadd.f32 %v17329_v34, %v5425_v38  ;;  %v5569_v33 = vmax.f32 %v5505_v29, 0.0  ;;  %v20677_v28 = vrot.slane %v17358_v31, 7  ;;  %v20679_v29 = vrot.slane %v17352_v49, 7 }
 0x52d   : > { %13098 = vmatmul.mubr.msk.bf16.gmra.mrb[44].mxu1 %vm717_vm5, %v17674_v26  ;;  %20674 = vst [vmem:[#allocation9_spill] sm:$0xff] %v17682_v22  ;;  %v6027_v59 = vsel %vm1310_vm4, %v20675_v14, %v6026_v30  ;;  %v5646_v21 = vmul.f32 %v17363_v61, %v5568_v5  ;;  %v5644_v11 = vmul.f32 %v17363_v61, %v5566_v41  ;;  %v13045_v36 = vpop.f32.mrb[24].mxu0  ;;  %v17696_v10 = vld [vmem:[#allocation3 + $0x148] sm:$0xff]  ;;  %v20678_v5 = vrot.slane %v17636_v55, 7 }
 0x52e   : > { %13101 = vmatprep.mubr.msk.bf16.mxu1 %vm717_vm5, %v17666_v47  ;;  %v17690_v56 = vpack.c.bf16 %v6027_v59, %v6025_v53  ;;  %v6030_v38 = vsel %vm1310_vm4, %v20677_v28, %v6029_v6  ;;  %v5567_v23 = vmax.f32 %v5503_v48, 0.0  ;;  %v6032_v30 = vsel %vm1310_vm4, %v6029_v6, %v6031_v58  ;;  %v5167_v59 = vpop.f32.mrb[25].mxu0 }
 0x52f   : > { %v6035_v14 = vsel %vm1310_vm4, %v20679_v29, %v20678_v5  ;;  %5711 = vst.msk [vmem:[#allocation3 + $0x188] sm:$0xff] %vm717_vm5, %v5646_v21  ;;  %v5647_v31 = vmul.f32 %v17363_v61, %v5569_v33  ;;  %v5430_v53 = vmul.f32 %v13045_v36, %v17322_v3  ;;  %v17707_v41 = vld [vmem:[#allocation3 + $0x128] sm:$0xff]  ;;  %5709 = vst.msk [vmem:[#allocation3 + $0x168] sm:$0xff] %vm717_vm5, %v5644_v11  ;;  %v13046_v58 = vpop.f32.mrb[26].mxu0  ;;  %v17716_v5 = vld [vmem:[#allocation3 + $0x150] sm:$0xff] }
 0x530   : > { %20676 = vst [vmem:[#allocation10_spill] sm:$0xff] %v17690_v56  ;;  %20680 = vst [vmem:[#allocation11_spill] sm:$0xff] %v17707_v41  ;;  %v5645_v6 = vmul.f32 %v17363_v61, %v5567_v23  ;;  %v5428_v49 = vmul.f32 %v17322_v3, %v5167_v59  ;;  %v6039_v21 = vrot.slane %v17707_v41, 7  ;;  %v5431_v29 = vmul.f32 %v13046_v58, %v17322_v3  ;;  %v5170_v28 = vpop.f32.mrb[27].mxu0  ;;  %v17721_v48 = vld [vmem:[#allocation3 + $0x130] sm:$0xff] }
 0x531   : > { %5712 = vst.msk [vmem:[#allocation3 + $0x190] sm:$0xff] %vm717_vm5, %v5647_v31  ;;  %v5508_v36 = vadd.f32 %v17329_v34, %v5430_v53  ;;  %v6046_v11 = vrot.slane %v17716_v5, 7  ;;  %v17726_v23 = vpack.c.bf16 %v17716_v5, %v17696_v10  ;;  %v5429_v33 = vmul.f32 %v17322_v3, %v5170_v28 }
 0x532   : > { %5710 = vst.msk [vmem:[#allocation3 + $0x170] sm:$0xff] %vm717_vm5, %v5645_v6  ;;  %v5506_v59 = vadd.f32 %v17329_v34, %v5428_v49  ;;  %v6041_v31 = vrot.slane %v17721_v48, 7  ;;  %v17734_v53 = vpack.c.bf16 %v17721_v48, %v17707_v41  ;;  %v5509_v47 = vadd.f32 %v17329_v34, %v5431_v29 }
 0x533   : > { %20681 = vst [vmem:[#allocation12_spill] sm:$0xff] %v17726_v23  ;;  %v5572_v58 = vmax.f32 %v5508_v36, 0.0  ;;  %v5507_v6 = vadd.f32 %v17329_v34, %v5429_v33  ;;  %v17742_v28 = vpack.c.bf16 %v6032_v30, %v6030_v38  ;;  %v20684_v49 = vrot.slane %v17636_v55, 7 }
 0x534   : > { %20682 = vst [vmem:[#allocation13_spill] sm:$0xff] %v17734_v53  ;;  %v5570_v22 = vmax.f32 %v5506_v59, 0.0  ;;  %v5573_v45 = vmax.f32 %v5509_v47, 0.0  ;;  %v20686_v59 = vrot.slane %v17369_v35, 7  ;;  %v20688_v47 = vrot.slane %v17360_v2, 7 }
 0x535   : > { %13102 = vmatmul.mubr.msk.bf16.gmra.mrb[48].mxu1 %vm717_vm5, %v17734_v53  ;;  %20683 = vst [vmem:[#allocation15_spill] sm:$0xff] %v17742_v28  ;;  %v6037_v41 = vsel %vm1310_vm4, %v20684_v49, %v6036_v46  ;;  %v5650_v36 = vmul.f32 %v17363_v61, %v5572_v58  ;;  %v5571_v38 = vmax.f32 %v5507_v6, 0.0  ;;  %v13049_v30 = vpop.f32.mrb[28].mxu0  ;;  %v6042_v46 = vsel %vm1310_vm4, %v6039_v21, %v6041_v31  ;;  %v17817_v53 = vld [vmem:[%s17307_s15 + $0x1] ss:$0 sm:$0xff]  ;;  %v20757_v28 = vld [vmem:[#allocation56_spill] sm:$0xff] }
 0x536   : > { %13105 = vmatprep.mubr.msk.bf16.mxu1 %vm717_vm5, %v17726_v23  ;;  %v17750_v29 = vpack.c.bf16 %v6037_v41, %v6035_v14  ;;  %v6040_v33 = vsel %vm1310_vm4, %v20686_v59, %v6039_v21  ;;  %v5648_v56 = vmul.f32 %v17363_v61, %v5570_v22  ;;  %v17756_v26 = vld [vmem:[#allocation3 + $0x188] sm:$0xff]  ;;  %v20687_v58 = vrot.slane %v17696_v10, 7  ;;  %v5183_v41 = vpop.f32.mrb[29].mxu0  ;;  %s11861_s15 = sshll.u32 %s15056_s25, 13  ;;  %s20124_s25 = scalar_lea.sflag [#allocation5], %s519_s20 }
 0x537   : > { %5715 = vst.msk [vmem:[#allocation3 + $0x1c8] sm:$0xff] %vm717_vm5, %v5650_v36  ;;  %v5651_v35 = vmul.f32 %v17363_v61, %v5573_v45  ;;  %v5434_v14 = vmul.f32 %v13049_v30, %v17322_v3  ;;  %v17767_v22 = vld [vmem:[#allocation3 + $0x168] sm:$0xff]  ;;  %v5649_v21 = vmul.f32 %v17363_v61, %v5571_v38  ;;  %v5432_v2 = vmul.f32 %v17322_v3, %v5183_v41  ;;  %v13050_v31 = vpop.f32.mrb[30].mxu0 }
 0x538   : > { %20685 = vst [vmem:[#allocation16_spill] sm:$0xff] %v17750_v29  ;;  %v6045_v49 = vsel %vm1310_vm4, %v20688_v47, %v20687_v58  ;;  %5713 = vst.msk [vmem:[#allocation3 + $0x1a8] sm:$0xff] %vm717_vm5, %v5648_v56  ;;  %v6049_v36 = vrot.slane %v17767_v22, 7  ;;  %v17776_v58 = vld [vmem:[#allocation3 + $0x190] sm:$0xff]  ;;  %v5435_v47 = vmul.f32 %v13050_v31, %v17322_v3  ;;  %v5186_v59 = vpop.f32.mrb[31].mxu0 }
 0x539   : > { %5716 = vst.msk [vmem:[#allocation3 + $0x1d0] sm:$0xff] %vm717_vm5, %v5651_v35  ;;  %v5512_v30 = vadd.f32 %v17329_v34, %v5434_v14  ;;  %v17781_v6 = vld [vmem:[#allocation3 + $0x170] sm:$0xff]  ;;  %v17786_v38 = vpack.c.bf16 %v17776_v58, %v17756_v26  ;;  %5714 = vst.msk [vmem:[#allocation3 + $0x1b0] sm:$0xff] %vm717_vm5, %v5649_v21  ;;  %v5510_v41 = vadd.f32 %v17329_v34, %v5432_v2 }
 0x53a   : > { %v5433_v45 = vmul.f32 %v17322_v3, %v5186_v59  ;;  %v6051_v35 = vrot.slane %v17781_v6, 7  ;;  %v17794_v14 = vpack.c.bf16 %v17781_v6, %v17767_v22  ;;  %v5513_v23 = vadd.f32 %v17329_v34, %v5435_v47 }
 0x53b   : > { %20689 = vst [vmem:[#allocation20_spill] sm:$0xff] %v17786_v38  ;;  %v5576_v31 = vmax.f32 %v5512_v30, 0.0  ;;  %v5574_v29 = vmax.f32 %v5510_v41, 0.0  ;;  %v17802_v3 = vpack.c.bf16 %v6042_v46, %v6040_v33  ;;  %v20692_v59 = vrot.slane %v17696_v10, 7 }
 0x53c   : > { %20690 = vst [vmem:[#allocation21_spill] sm:$0xff] %v17794_v14  ;;  %v5511_v21 = vadd.f32 %v17329_v34, %v5433_v45  ;;  %v5577_v47 = vmax.f32 %v5513_v23, 0.0  ;;  %v20694_v41 = vrot.slane %v17376_v50, 7  ;;  %v6052_v23 = vsel %vm1310_vm4, %v6049_v36, %v6051_v35 }
 0x53d   : > { %13106 = vmatmul.mubr.msk.bf16.gmra.mrb[52].mxu1 %vm717_vm5, %v17794_v14  ;;  %20691 = vst [vmem:[#allocation66_spill] sm:$0xff] %v17802_v3  ;;  %v6047_v2 = vsel %vm1310_vm4, %v20692_v59, %v6046_v11  ;;  %v5654_v30 = vmul.f32 %v17363_v61, %v5576_v31  ;;  %v5652_v45 = vmul.f32 %v17363_v61, %v5574_v29  ;;  %v13053_v46 = vpop.f32.mrb[32].mxu0  ;;  %v20695_v31 = vrot.slane %v17756_v26, 7  ;;  %v17867_v14 = vld [vmem:[%s17337_s18 + $0x1] ss:$0 sm:$0xff]  ;;  %s19257_s18 = scalar_lea.vmem %s20171_s6, %s21100_s17 }
 0x53e   : > { %13109 = vmatprep.mubr.msk.bf16.mxu1 %vm717_vm5, %v17786_v38  ;;  %v17810_v56 = vpack.c.bf16 %v6047_v2, %v6045_v49  ;;  %v6050_v34 = vsel %vm1310_vm4, %v20694_v41, %v6049_v36  ;;  %v5575_v33 = vmax.f32 %v5511_v21, 0.0  ;;  %v17819_v11 = vld [vmem:[#allocation3 + $0x1c8] sm:$0xff]  ;;  %v20696_v49 = vrot.slane %v17371_v0, 7  ;;  %v5199_v21 = vpop.f32.mrb[33].mxu0  ;;  %v17837_v0 = vld [vmem:[%s17317_s28 + $0x1] ss:$0 sm:$0xff] }
 0x53f   : > { %5719 = vst.msk [vmem:[#allocation3 + $0x208] sm:$0xff] %vm717_vm5, %v5654_v30  ;;  %v5655_v50 = vmul.f32 %v17363_v61, %v5577_v47  ;;  %v13745_v29 = vadd.f32 %v13053_v46, %v17245_v15  ;;  %v17830_v2 = vld [vmem:[#allocation3 + $0x1a8] sm:$0xff]  ;;  %5717 = vst.msk [vmem:[#allocation3 + $0x1e8] sm:$0xff] %vm717_vm5, %v5652_v45  ;;  %v13746_v35 = vadd.f32 %v5199_v21, %v17247_v63  ;;  %v13054_v30 = vpop.f32.mrb[34].mxu0 }
 0x540   : > { %20693 = vst [vmem:[#allocation67_spill] sm:$0xff] %v17810_v56  ;;  %v6055_v59 = vsel %vm1310_vm4, %v20696_v49, %v20695_v31  ;;  %v5653_v36 = vmul.f32 %v17363_v61, %v5575_v33  ;;  %v6059_v47 = vrot.slane %v17830_v2, 7  ;;  %v17842_v46 = vld [vmem:[#allocation3 + $0x1d0] sm:$0xff]  ;;  %v13747_v45 = vadd.f32 %v13054_v30, %v17249_v12  ;;  %v5202_v49 = vpop.f32.mrb[35].mxu0 }
 0x541   : > { %5720 = vst.msk [vmem:[#allocation3 + $0x210] sm:$0xff] %vm717_vm5, %v5655_v50  ;;  %v5438_v31 = vmul.f32 %v13745_v29, %v17817_v53  ;;  %v17847_v61 = vld [vmem:[#allocation3 + $0x1b0] sm:$0xff]  ;;  %v6066_v33 = vrot.slane %v17842_v46, 7  ;;  %v17852_v63 = vpack.c.bf16 %v17842_v46, %v17819_v11  ;;  %v5436_v21 = vmul.f32 %v13746_v35, %v17817_v53 }
 0x542   : > { %5718 = vst.msk [vmem:[#allocation3 + $0x1f0] sm:$0xff] %vm717_vm5, %v5653_v36  ;;  %v13748_v50 = vadd.f32 %v5202_v49, %v17251_v40  ;;  %v6061_v38 = vrot.slane %v17847_v61, 7  ;;  %v17860_v12 = vpack.c.bf16 %v17847_v61, %v17830_v2  ;;  %v5439_v30 = vmul.f32 %v13747_v45, %v17817_v53 }
 0x543   : > { %20697 = vst [vmem:[#allocation51_spill] sm:$0xff] %v17852_v63  ;;  %v5516_v29 = vadd.f32 %v17837_v0, %v5438_v31  ;;  %v5514_v36 = vadd.f32 %v17837_v0, %v5436_v21  ;;  %v17873_v35 = vpack.c.bf16 %v6052_v23, %v6050_v34  ;;  %v20700_v49 = vrot.slane %v17776_v58, 7 }
 0x544   : > { %20698 = vst [vmem:[#allocation23_spill] sm:$0xff] %v17860_v12  ;;  %v5437_v40 = vmul.f32 %v13748_v50, %v17817_v53  ;;  %v20701_v31 = vrot.slane %v17756_v26, 7  ;;  %v5517_v41 = vadd.f32 %v17837_v0, %v5439_v30  ;;  %v20703_v50 = vrot.slane %v17383_v1, 7 }
 0x545   : > { %13110 = vmatmul.mubr.msk.bf16.gmra.mrb[56].mxu1 %vm717_vm5, %v17860_v12  ;;  %20699 = vst [vmem:[#allocation68_spill] sm:$0xff] %v17873_v35  ;;  %v5580_v15 = vmax.f32 %v5516_v29, 0.0  ;;  %v5578_v34 = vmax.f32 %v5514_v36, 0.0  ;;  %v13057_v35 = vpop.f32.mrb[36].mxu0  ;;  %v6062_v56 = vsel %vm1310_vm4, %v6059_v47, %v6061_v38  ;;  %v20705_v29 = vrot.slane %v17378_v19, 7 }
 0x546   : > { %v6057_v45 = vsel %vm1310_vm4, %v20701_v31, %v20700_v49  ;;  %13113 = vmatprep.mubr.msk.bf16.mxu1 %vm717_vm5, %v17852_v63  ;;  %v6060_v12 = vsel %vm1310_vm4, %v20703_v50, %v6059_v47  ;;  %v5515_v23 = vadd.f32 %v17837_v0, %v5437_v40  ;;  %v20704_v49 = vrot.slane %v17819_v11, 7  ;;  %v5215_v1 = vpop.f32.mrb[37].mxu0  ;;  %v17897_v63 = vld [vmem:[#allocation3 + $0x1e8] sm:$0xff] }
 0x547   : > { %v17883_v21 = vpack.c.bf16 %v6057_v45, %v6055_v59  ;;  %v5658_v31 = vmul.f32 %v17867_v14, %v5580_v15  ;;  %v5581_v59 = vmax.f32 %v5517_v41, 0.0  ;;  %v13749_v45 = vadd.f32 %v13057_v35, %v17253_v17  ;;  %v13058_v47 = vpop.f32.mrb[38].mxu0 }
 0x548   : > { %v6065_v30 = vsel %vm1310_vm4, %v20705_v29, %v20704_v49  ;;  %v17899_v36 = vpack.c.bf16 %v6062_v56, %v6060_v12  ;;  %v5656_v40 = vmul.f32 %v17867_v14, %v5578_v34  ;;  %v5579_v50 = vmax.f32 %v5515_v23, 0.0  ;;  %v5218_v35 = vpop.f32.mrb[39].mxu0 }
 0x549   : > { %20702 = vst [vmem:[#allocation69_spill] sm:$0xff] %v17883_v21  ;;  %v13750_v38 = vadd.f32 %v5215_v1, %v17255_v42  ;;  %v6069_v19 = vrot.slane %v17897_v63, 7  ;;  %5723 = vst.msk [vmem:[#allocation3 + $0x288] sm:$0xff] %vm717_vm5, %v5658_v31  ;;  %v5659_v15 = vmul.f32 %v17867_v14, %v5581_v59  ;;  %v5442_v41 = vmul.f32 %v13749_v45, %v17817_v53  ;;  %v17908_v49 = vld [vmem:[#allocation3 + $0x1f0] sm:$0xff] }
 0x54a   : > { %20706 = vst [vmem:[#allocation70_spill] sm:$0xff] %v17899_v36  ;;  %v13751_v17 = vadd.f32 %v13058_v47, %v17257_v52  ;;  %5721 = vst.msk [vmem:[#allocation3 + $0x268] sm:$0xff] %vm717_vm5, %v5656_v40  ;;  %v5657_v42 = vmul.f32 %v17867_v14, %v5579_v50  ;;  %v13752_v34 = vadd.f32 %v5218_v35, %v17259_v8  ;;  %v6071_v23 = vrot.slane %v17908_v49, 7  ;;  %v17939_v35 = vld [vmem:[#allocation3 + $0x360] sm:$0xff] }
 0x54b   : > { %v5440_v12 = vmul.f32 %v13750_v38, %v17817_v53  ;;  %5724 = vst.msk [vmem:[#allocation3 + $0x290] sm:$0xff] %vm717_vm5, %v5659_v15  ;;  %v5520_v29 = vadd.f32 %v17837_v0, %v5442_v41  ;;  %v17921_v31 = vpack.c.bf16 %v17908_v49, %v17897_v63  ;;  %v20708_v1 = vrot.slane %v17819_v11, 7 }
 0x54c   : > { %v5443_v52 = vmul.f32 %v13751_v17, %v17817_v53  ;;  %5722 = vst.msk [vmem:[#allocation3 + $0x270] sm:$0xff] %vm717_vm5, %v5657_v42  ;;  %v5441_v8 = vmul.f32 %v13752_v34, %v17817_v53  ;;  %v20709_v50 = vrot.slane %v17385_v44, 7  ;;  %v6072_v17 = vsel %vm1310_vm4, %v6069_v19, %v6071_v23 }
 0x54d   : > { %20707 = vst [vmem:[#allocation71_spill] sm:$0xff] %v17921_v31  ;;  %v5518_v45 = vadd.f32 %v17837_v0, %v5440_v12  ;;  %v6067_v40 = vsel %vm1310_vm4, %v20708_v1, %v6066_v33  ;;  %v5584_v47 = vmax.f32 %v5520_v29, 0.0  ;;  %13114 = vmatmul.mubr.msk.bf16.gmra.mrb[60].mxu1 %vm717_vm5, %v17921_v31  ;;  %v13061_v33 = vpop.f32.mrb[40].mxu0  ;;  %v20711_v44 = vpack.c.bf16 %v17390_v4, %v17388_v9  ;;  %v5825_v29 = vld [vmem:[#allocation3 + $0x240] sm:$0xff] }
 0x54e   : > { %v6070_v38 = vsel %vm1310_vm4, %v20709_v50, %v6069_v19  ;;  %v5521_v15 = vadd.f32 %v17837_v0, %v5443_v52  ;;  %v17936_v41 = vpack.c.bf16 %v6067_v40, %v6065_v30  ;;  %v5519_v12 = vadd.f32 %v17837_v0, %v5441_v8  ;;  %v5231_v1 = vpop.f32.mrb[41].mxu0 }
 0x54f   : > { %v5582_v42 = vmax.f32 %v5518_v45, 0.0  ;;  %13117 = vmatprep.mubr.msk.bf16.mxu1 %vm717_vm5, %v20711_v44  ;;  %v17946_v34 = vpack.c.bf16 %v6072_v17, %v6070_v38  ;;  %v20713_v52 = vrot.slane %v17390_v4, 7  ;;  %v20714_v30 = vrot.slane %v17388_v9, 7  ;;  %v13062_v17 = vpop.f32.mrb[42].mxu0 }
 0x550   : > { %20710 = vst [vmem:[#allocation72_spill] sm:$0xff] %v17936_v41  ;;  %v5662_v23 = vmul.f32 %v17867_v14, %v5584_v47  ;;  %v5585_v45 = vmax.f32 %v5521_v15, 0.0  ;;  %v13753_v8 = vadd.f32 %v13061_v33, %v17261_v32  ;;  %v6073_v40 = vrot.slane %v5825_v29, 7  ;;  %v17959_v56 = vld [vmem:[#allocation3 + $0x288] sm:$0xff]  ;;  %v5234_v15 = vpop.f32.mrb[43].mxu0  ;;  %v20747_v41 = vld [vmem:[#allocation35_spill] sm:$0xff] }
 0x551   : > { %20712 = vst [vmem:[#allocation73_spill] sm:$0xff] %v17946_v34  ;;  %v17953_v19 = vsel %vm1310_vm4, %v20714_v30, %v20713_v52  ;;  %v5660_v50 = vmul.f32 %v17867_v14, %v5582_v42  ;;  %v5583_v44 = vmax.f32 %v5519_v12, 0.0  ;;  %v13754_v38 = vadd.f32 %v5231_v1, %v17263_v37  ;;  %20716 = vst [vmem:[#allocation75_spill] sm:$0xff] %v17959_v56  ;;  %v17966_v33 = vld [vmem:[#allocation3 + $0x268] sm:$0xff] }
 0x552   : > { %20715 = vst [vmem:[#allocation74_spill] sm:$0xff] %v17953_v19  ;;  %5727 = vst.msk [vmem:[#allocation3 + $0x2c8] sm:$0xff] %vm717_vm5, %v5662_v23  ;;  %v5663_v52 = vmul.f32 %v17867_v14, %v5585_v45  ;;  %v5446_v47 = vmul.f32 %v13753_v8, %v17817_v53  ;;  %v13755_v32 = vadd.f32 %v13062_v17, %v17265_v39  ;;  %v6079_v30 = vrot.slane %v17966_v33, 7  ;;  %v17974_v23 = vld [vmem:[#allocation3 + $0x290] sm:$0xff] }
 0x553   : > { %5725 = vst.msk [vmem:[#allocation3 + $0x2a8] sm:$0xff] %vm717_vm5, %v5660_v50  ;;  %v5661_v37 = vmul.f32 %v17867_v14, %v5583_v44  ;;  %v5444_v12 = vmul.f32 %v13754_v38, %v17817_v53  ;;  %v13756_v29 = vadd.f32 %v5234_v15, %v17267_v51  ;;  %v17979_v8 = vld [vmem:[#allocation3 + $0x270] sm:$0xff]  ;;  %v17995_v15 = vpack.c.bf16 %v17974_v23, %v17959_v56 }
 0x554   : > { %5728 = vst.msk [vmem:[#allocation3 + $0x2d0] sm:$0xff] %vm717_vm5, %v5663_v52  ;;  %v5524_v39 = vadd.f32 %v17837_v0, %v5446_v47  ;;  %v5447_v45 = vmul.f32 %v13755_v32, %v17817_v53  ;;  %v17989_v17 = vpack.c.bf16 %v17979_v8, %v17966_v33 }
 0x555   : > { %5726 = vst.msk [vmem:[#allocation3 + $0x2b0] sm:$0xff] %vm717_vm5, %v5661_v37  ;;  %v5522_v51 = vadd.f32 %v17837_v0, %v5444_v12  ;;  %v5445_v44 = vmul.f32 %v13756_v29, %v17817_v53  ;;  %20718 = vst [vmem:[#allocation77_spill] sm:$0xff] %v17995_v15  ;;  %v13065_v1 = vpop.f32.mrb[44].mxu0 }
 0x556   : > { %20717 = vst [vmem:[#allocation76_spill] sm:$0xff] %v17989_v17  ;;  %v5588_v52 = vmax.f32 %v5524_v39, 0.0  ;;  %v5525_v47 = vadd.f32 %v17837_v0, %v5447_v45  ;;  %13118 = vmatmul.mubr.msk.bf16.gmra.mrb[64].mxu1 %vm717_vm5, %v17989_v17  ;;  %v13757_v32 = vadd.f32 %v13065_v1, %v17269_v60  ;;  %v5247_v4 = vpop.f32.mrb[45].mxu0 }
 0x557   : > { %v5586_v37 = vmax.f32 %v5522_v51, 0.0  ;;  %v5523_v12 = vadd.f32 %v17837_v0, %v5445_v44  ;;  %13121 = vmatprep.mubr.msk.bf16.mxu1 %vm717_vm5, %v17995_v15  ;;  %v20719_v51 = vrot.slane %v17388_v9, 7  ;;  %v13758_v29 = vadd.f32 %v5247_v4, %v17271_v25  ;;  %v13066_v59 = vpop.f32.mrb[46].mxu0 }
 0x558   : > { %v5666_v39 = vmul.f32 %v17867_v14, %v5588_v52  ;;  %v5589_v45 = vmax.f32 %v5525_v47, 0.0  ;;  %v5450_v9 = vmul.f32 %v13757_v32, %v17817_v53  ;;  %v5250_v52 = vpop.f32.mrb[47].mxu0 }
 0x559   : > { %v18009_v44 = vsel %vm1310_vm4, %v6073_v40, %v20719_v51  ;;  %v5664_v50 = vmul.f32 %v17867_v14, %v5586_v37  ;;  %v5587_v42 = vmax.f32 %v5523_v12, 0.0  ;;  %v18013_v38 = vld [vmem:[#allocation3 + $0x2c8] sm:$0xff]  ;;  %v13759_v40 = vadd.f32 %v13066_v59, %v17273_v24 }
 0x55a   : > { %20720 = vst [vmem:[#allocation78_spill] sm:$0xff] %v18009_v44  ;;  %5731 = vst.msk [vmem:[#allocation3 + $0x308] sm:$0xff] %vm717_vm5, %v5666_v39  ;;  %v5667_v1 = vmul.f32 %v17867_v14, %v5589_v45  ;;  %v18021_v47 = vld [vmem:[#allocation3 + $0x2a8] sm:$0xff]  ;;  %v5448_v4 = vmul.f32 %v13758_v29, %v17817_v53  ;;  %v13760_v12 = vadd.f32 %v5250_v52, %v17275_v18  ;;  %v20725_v39 = vld [vmem:[#allocation38_spill] sm:$0xff] }
 0x55b   : > { %20721 = vst [vmem:[#allocation79_spill] sm:$0xff] %v18021_v47  ;;  %5729 = vst.msk [vmem:[#allocation3 + $0x2e8] sm:$0xff] %vm717_vm5, %v5664_v50  ;;  %v5665_v25 = vmul.f32 %v17867_v14, %v5587_v42  ;;  %v18029_v45 = vld [vmem:[#allocation3 + $0x2d0] sm:$0xff]  ;;  %v5528_v24 = vadd.f32 %v17837_v0, %v5450_v9  ;;  %v5451_v59 = vmul.f32 %v13759_v40, %v17817_v53  ;;  %v20736_v44 = vld [vmem:[#allocation14_spill] sm:$0xff] }
 0x55c   : > { %5732 = vst.msk [vmem:[#allocation3 + $0x310] sm:$0xff] %vm717_vm5, %v5667_v1  ;;  %v18034_v32 = vld [vmem:[#allocation3 + $0x2b0] sm:$0xff]  ;;  %v5526_v18 = vadd.f32 %v17837_v0, %v5448_v4  ;;  %v5449_v29 = vmul.f32 %v13760_v12, %v17817_v53  ;;  %v18050_v60 = vpack.c.bf16 %v18029_v45, %v18013_v38 }
 0x55d   : > { %5730 = vst.msk [vmem:[#allocation3 + $0x2f0] sm:$0xff] %vm717_vm5, %v5665_v25  ;;  %v18044_v1 = vpack.c.bf16 %v18034_v32, %v18021_v47  ;;  %v5592_v9 = vmax.f32 %v5528_v24, 0.0  ;;  %v5529_v40 = vadd.f32 %v17837_v0, %v5451_v59  ;;  %v13069_v50 = vpop.f32.mrb[48].mxu0 }
 0x55e   : > { %20723 = vst [vmem:[#allocation81_spill] sm:$0xff] %v18050_v60  ;;  %v5590_v25 = vmax.f32 %v5526_v18, 0.0  ;;  %v5527_v4 = vadd.f32 %v17837_v0, %v5449_v29  ;;  %v13761_v52 = vadd.f32 %v13069_v50, %v17277_v20  ;;  %v5263_v37 = vpop.f32.mrb[49].mxu0  ;;  %v20724_v18 = vrot.slane %v17394_v16, 7 }
 0x55f   : > { %20722 = vst [vmem:[#allocation80_spill] sm:$0xff] %v18044_v1  ;;  %13122 = vmatmul.mubr.msk.bf16.gmra.mrb[68].mxu1 %vm717_vm5, %v18044_v1  ;;  %v5670_v24 = vmul.f32 %v17867_v14, %v5592_v9  ;;  %v5593_v59 = vmax.f32 %v5529_v40, 0.0  ;;  %v13762_v42 = vadd.f32 %v5263_v37, %v20725_v39  ;;  %v13070_v1 = vpop.f32.mrb[50].mxu0  ;;  %v20727_v20 = vrot.slane %v17979_v8, 7 }
 0x560   : > { %13125 = vmatprep.mubr.msk.bf16.mxu1 %vm717_vm5, %v18050_v60  ;;  %v6080_v29 = vsel %vm1310_vm4, %v20724_v18, %v6079_v30  ;;  %v5668_v51 = vmul.f32 %v17867_v14, %v5590_v25  ;;  %v5591_v12 = vmax.f32 %v5527_v4, 0.0  ;;  %v5454_v40 = vmul.f32 %v13761_v52, %v17817_v53  ;;  %v20728_v18 = vld [vmem:[#allocation41_spill] sm:$0xff]  ;;  %v5266_v4 = vpop.f32.mrb[51].mxu0 }
 0x561   : > { %v18068_v9 = vld [vmem:[#allocation3 + $0x308] sm:$0xff]  ;;  %v6082_v50 = vsel %vm1310_vm4, %v6079_v30, %v20727_v20  ;;  %5735 = vst.msk [vmem:[#allocation3 + $0x348] sm:$0xff] %vm717_vm5, %v5670_v24  ;;  %v5671_v16 = vmul.f32 %v17867_v14, %v5593_v59  ;;  %v13763_v25 = vadd.f32 %v13070_v1, %v20728_v18  ;;  %v5452_v15 = vmul.f32 %v13762_v42, %v17817_v53  ;;  %v20730_v30 = vld [vmem:[#allocation7_spill] sm:$0xff] }
 0x562   : > { %20726 = vst [vmem:[#allocation38_spill] sm:$0xff] %v18068_v9  ;;  %v18079_v60 = vld [vmem:[#allocation3 + $0x2e8] sm:$0xff]  ;;  %5733 = vst.msk [vmem:[#allocation3 + $0x328] sm:$0xff] %vm717_vm5, %v5668_v51  ;;  %v5669_v39 = vmul.f32 %v17867_v14, %v5591_v12  ;;  %v13764_v20 = vadd.f32 %v5266_v4, %v20730_v30  ;;  %v5532_v1 = vadd.f32 %v17837_v0, %v5454_v40  ;;  %v20737_v30 = vrot.slane %v17959_v56, 7 }
 0x563   : > { %20729 = vst [vmem:[#allocation41_spill] sm:$0xff] %v18079_v60  ;;  %v18087_v59 = vld [vmem:[#allocation3 + $0x310] sm:$0xff]  ;;  %5736 = vst.msk [vmem:[#allocation3 + $0x350] sm:$0xff] %vm717_vm5, %v5671_v16  ;;  %v5455_v52 = vmul.f32 %v13763_v25, %v17817_v53  ;;  %v5530_v42 = vadd.f32 %v17837_v0, %v5452_v15  ;;  %v20734_v24 = vld [vmem:[#allocation8_spill] sm:$0xff] }
 0x564   : > { %20731 = vst [vmem:[#allocation7_spill] sm:$0xff] %v18087_v59  ;;  %v18092_v18 = vld [vmem:[#allocation3 + $0x2f0] sm:$0xff]  ;;  %5734 = vst.msk [vmem:[#allocation3 + $0x330] sm:$0xff] %vm717_vm5, %v5669_v39  ;;  %v5453_v4 = vmul.f32 %v13764_v20, %v17817_v53  ;;  %v5596_v40 = vmax.f32 %v5532_v1, 0.0  ;;  %v18108_v51 = vpack.c.bf16 %v18087_v59, %v18068_v9 }
 0x565   : > { %v18102_v16 = vpack.c.bf16 %v18092_v18, %v18079_v60  ;;  %v5533_v25 = vadd.f32 %v17837_v0, %v5455_v52  ;;  %v5594_v39 = vmax.f32 %v5530_v42, 0.0  ;;  %v13073_v12 = vpop.f32.mrb[52].mxu0  ;;  %v18119_v42 = vpack.c.bf16 %v6082_v50, %v6080_v29  ;;  %v20740_v50 = vld [vmem:[#allocation17_spill] sm:$0xff] }
 0x566   : > { %20733 = vst [vmem:[#allocation83_spill] sm:$0xff] %v18108_v51  ;;  %v5531_v15 = vadd.f32 %v17837_v0, %v5453_v4  ;;  %v5674_v1 = vmul.f32 %v17867_v14, %v5596_v40  ;;  %v13765_v37 = vadd.f32 %v13073_v12, %v20734_v24  ;;  %v5279_v17 = vpop.f32.mrb[53].mxu0  ;;  %v20738_v40 = vld [vmem:[#allocation59_spill] sm:$0xff] }
 0x567   : > { %20732 = vst [vmem:[#allocation82_spill] sm:$0xff] %v18102_v16  ;;  %13126 = vmatmul.mubr.msk.bf16.gmra.mrb[72].mxu1 %vm717_vm5, %v18102_v16  ;;  %v5597_v52 = vmax.f32 %v5533_v25, 0.0  ;;  %20735 = vst [vmem:[#allocation8_spill] sm:$0xff] %v18119_v42  ;;  %v5672_v4 = vmul.f32 %v17867_v14, %v5594_v39  ;;  %v13766_v16 = vadd.f32 %v5279_v17, %v20736_v44  ;;  %v13074_v19 = vpop.f32.mrb[54].mxu0  ;;  %v20739_v25 = vrot.slane %v20738_v40, 7 }
 0x568   : > { %13129 = vmatprep.mubr.msk.bf16.mxu1 %vm717_vm5, %v18108_v51  ;;  %v5595_v31 = vmax.f32 %v5531_v15, 0.0  ;;  %v18123_v20 = vld [vmem:[#allocation3 + $0x348] sm:$0xff]  ;;  %5739 = vst.msk [vmem:[#allocation3 + $0x388] sm:$0xff] %vm717_vm5, %v5674_v1  ;;  %v5458_v29 = vmul.f32 %v13765_v37, %v17817_v53  ;;  %v13767_v39 = vadd.f32 %v13074_v19, %v20740_v50  ;;  %v5282_v15 = vpop.f32.mrb[55].mxu0  ;;  %v20744_v1 = vld [vmem:[#allocation19_spill] sm:$0xff] }
 0x569   : > { %v6085_v24 = vsel %vm1310_vm4, %v20739_v25, %v20737_v30  ;;  %v5675_v12 = vmul.f32 %v17867_v14, %v5597_v52  ;;  %v18134_v51 = vld [vmem:[#allocation3 + $0x328] sm:$0xff]  ;;  %5737 = vst.msk [vmem:[#allocation3 + $0x368] sm:$0xff] %vm717_vm5, %v5672_v4  ;;  %v5456_v40 = vmul.f32 %v13766_v16, %v17817_v53  ;;  %v20741_v30 = vld [vmem:[#allocation18_spill] sm:$0xff] }
 0x56a   : > { %v5673_v44 = vmul.f32 %v17867_v14, %v5595_v31  ;;  %v13768_v25 = vadd.f32 %v5282_v15, %v20741_v30  ;;  %v18142_v52 = vld [vmem:[#allocation3 + $0x350] sm:$0xff]  ;;  %v5536_v19 = vadd.f32 %v17837_v0, %v5458_v29  ;;  %v5459_v37 = vmul.f32 %v13767_v39, %v17817_v53 }
 0x56b   : > { %5740 = vst.msk [vmem:[#allocation3 + $0x390] sm:$0xff] %vm717_vm5, %v5675_v12  ;;  %v18147_v50 = vld [vmem:[#allocation3 + $0x330] sm:$0xff]  ;;  %v5534_v16 = vadd.f32 %v17837_v0, %v5456_v40  ;;  %v18163_v4 = vpack.c.bf16 %v18142_v52, %v18123_v20 }
 0x56c   : > { %5738 = vst.msk [vmem:[#allocation3 + $0x370] sm:$0xff] %vm717_vm5, %v5673_v44  ;;  %v5457_v15 = vmul.f32 %v13768_v25, %v17817_v53  ;;  %v18157_v12 = vpack.c.bf16 %v18147_v50, %v18134_v51  ;;  %v5600_v29 = vmax.f32 %v5536_v19, 0.0  ;;  %v5537_v39 = vadd.f32 %v17837_v0, %v5459_v37 }
 0x56d   : > { %20743 = vst [vmem:[#allocation59_spill] sm:$0xff] %v18163_v4  ;;  %v5598_v44 = vmax.f32 %v5534_v16, 0.0  ;;  %v13077_v31 = vpop.f32.mrb[56].mxu0  ;;  %v20745_v16 = vrot.slane %v17974_v23, 7 }
 0x56e   : > { %20742 = vst [vmem:[#allocation14_spill] sm:$0xff] %v18157_v12  ;;  %v5535_v40 = vadd.f32 %v17837_v0, %v5457_v15  ;;  %v5678_v19 = vmul.f32 %v17867_v14, %v5600_v29  ;;  %v5601_v37 = vmax.f32 %v5537_v39, 0.0  ;;  %v13769_v17 = vadd.f32 %v13077_v31, %v20744_v1  ;;  %v5295_v42 = vpop.f32.mrb[57].mxu0 }
 0x56f   : > { %13130 = vmatmul.mubr.msk.bf16.gmra.mrb[76].mxu1 %vm717_vm5, %v18157_v12  ;;  %v20746_v15 = vrot.slane %v17959_v56, 7  ;;  %v5676_v12 = vmul.f32 %v17867_v14, %v5598_v44  ;;  %v13770_v30 = vadd.f32 %v5295_v42, %v20747_v41  ;;  %v13078_v36 = vpop.f32.mrb[58].mxu0  ;;  %v18181_v29 = vld [vmem:[#allocation3 + $0x388] sm:$0xff]  ;;  %v20750_v42 = vld [vmem:[#allocation39_spill] sm:$0xff] }
 0x570   : > { %13133 = vmatprep.mubr.msk.bf16.mxu1 %vm717_vm5, %v18163_v4  ;;  %v5599_v25 = vmax.f32 %v5535_v40, 0.0  ;;  %5743 = vst.msk [vmem:[#allocation3 + $0x3c8] sm:$0xff] %vm717_vm5, %v5678_v19  ;;  %v5679_v1 = vmul.f32 %v17867_v14, %v5601_v37  ;;  %v5462_v31 = vmul.f32 %v13769_v17, %v17817_v53  ;;  %v20749_v4 = vld [vmem:[#allocation37_spill] sm:$0xff]  ;;  %v5298_v3 = vpop.f32.mrb[59].mxu0 }
 0x571   : > { %v6087_v34 = vsel %vm1310_vm4, %v20746_v15, %v20745_v16  ;;  %v13771_v21 = vadd.f32 %v13078_v36, %v20749_v4  ;;  %v18189_v16 = vld [vmem:[#allocation3 + $0x368] sm:$0xff]  ;;  %5741 = vst.msk [vmem:[#allocation3 + $0x3a8] sm:$0xff] %vm717_vm5, %v5676_v12 }
 0x572   : > { %v18183_v39 = vpack.c.bf16 %v6087_v34, %v6085_v24  ;;  %v5677_v41 = vmul.f32 %v17867_v14, %v5599_v25  ;;  %v5460_v34 = vmul.f32 %v13770_v30, %v17817_v53  ;;  %v13772_v24 = vadd.f32 %v5298_v3, %v20750_v42  ;;  %v18197_v19 = vld [vmem:[#allocation3 + $0x390] sm:$0xff]  ;;  %5744 = vst.msk [vmem:[#allocation3 + $0x3d0] sm:$0xff] %vm717_vm5, %v5679_v1  ;;  %v20753_v25 = vld [vmem:[#allocation40_spill] sm:$0xff] }
 0x573   : > { %v5540_v36 = vadd.f32 %v17837_v0, %v5462_v31  ;;  %v5463_v17 = vmul.f32 %v13771_v21, %v17817_v53  ;;  %v18202_v4 = vld [vmem:[#allocation3 + $0x370] sm:$0xff]  ;;  %v18218_v42 = vpack.c.bf16 %v18197_v19, %v18181_v29 }
 0x574   : > { %20748 = vst [vmem:[#allocation17_spill] sm:$0xff] %v18183_v39  ;;  %5742 = vst.msk [vmem:[#allocation3 + $0x3b0] sm:$0xff] %vm717_vm5, %v5677_v41  ;;  %v5538_v3 = vadd.f32 %v17837_v0, %v5460_v34  ;;  %v5461_v30 = vmul.f32 %v13772_v24, %v17817_v53  ;;  %v18212_v15 = vpack.c.bf16 %v18202_v4, %v18189_v16 }
 0x575   : > { %v5604_v1 = vmax.f32 %v5540_v36, 0.0  ;;  %v5541_v21 = vadd.f32 %v17837_v0, %v5463_v17  ;;  %20752 = vst [vmem:[#allocation19_spill] sm:$0xff] %v18218_v42  ;;  %v13081_v12 = vpop.f32.mrb[60].mxu0 }
 0x576   : > { %20751 = vst [vmem:[#allocation18_spill] sm:$0xff] %v18212_v15  ;;  %v5602_v41 = vmax.f32 %v5538_v3, 0.0  ;;  %v5539_v34 = vadd.f32 %v17837_v0, %v5461_v30  ;;  %v13773_v31 = vadd.f32 %v13081_v12, %v20753_v25  ;;  %v5311_v37 = vpop.f32.mrb[61].mxu0  ;;  %v20754_v3 = vrot.slane %v18021_v47, 7  ;;  %v20755_v30 = vld [vmem:[#allocation60_spill] sm:$0xff] }
 0x577   : > { %13134 = vmatmul.mubr.msk.bf16.gmra.mrb[80].mxu1 %vm717_vm5, %v18212_v15  ;;  %v5682_v36 = vmul.f32 %v17867_v14, %v5604_v1  ;;  %v5605_v17 = vmax.f32 %v5541_v21, 0.0  ;;  %v20756_v40 = vrot.slane %v20755_v30, 7  ;;  %v13774_v44 = vadd.f32 %v5311_v37, %v20757_v28  ;;  %v13082_v56 = vpop.f32.mrb[62].mxu0  ;;  %v18236_v1 = vld [vmem:[#allocation3 + $0x3c8] sm:$0xff] }
 0x578   : > { %13137 = vmatprep.mubr.msk.bf16.mxu1 %vm717_vm5, %v18218_v42  ;;  %v5680_v15 = vmul.f32 %v17867_v14, %v5602_v41  ;;  %v5603_v24 = vmax.f32 %v5539_v34, 0.0  ;;  %v20758_v12 = vrot.slane %v18034_v32, 7  ;;  %v20759_v25 = vmov %v20754_v3  ;;  %v5314_v34 = vpop.f32.mrb[63].mxu0  ;;  %v18247_v42 = vld [vmem:[#allocation3 + $0x3a8] sm:$0xff] }
 0x579   : > { %v6090_v39 = vsel %vm1310_vm4, %v20756_v40, %v20754_v3  ;;  %5747 = vst.msk [vmem:[#allocation3 + $0x408] sm:$0xff] %vm717_vm5, %v5682_v36  ;;  %v5683_v30 = vmul.f32 %v17867_v14, %v5605_v17  ;;  %v5466_v40 = vmul.f32 %v13773_v31, %v17817_v53  ;;  %v20760_v3 = vld [vmem:[#allocation57_spill] sm:$0xff]  ;;  %v5464_v47 = vmul.f32 %v13774_v44, %v17817_v53 }
 0x57a   : > { %v6092_v21 = vsel %vm1310_vm4, %v20759_v25, %v20758_v12  ;;  %v13775_v41 = vadd.f32 %v13082_v56, %v20760_v3  ;;  %5745 = vst.msk [vmem:[#allocation3 + $0x3e8] sm:$0xff] %vm717_vm5, %v5680_v15  ;;  %v5681_v37 = vmul.f32 %v17867_v14, %v5603_v24  ;;  %v20761_v12 = vld [vmem:[#allocation58_spill] sm:$0xff]  ;;  %v18255_v17 = vld [vmem:[#allocation3 + $0x3d0] sm:$0xff]  ;;  %v20766_v28 = vrot.slane %v18013_v38, 7 }
 0x57b   : > { %v13776_v25 = vadd.f32 %v5314_v34, %v20761_v12  ;;  %20762 = vst [vmem:[#allocation35_spill] sm:$0xff] %v18255_v17  ;;  %5748 = vst.msk [vmem:[#allocation3 + $0x410] sm:$0xff] %vm717_vm5, %v5683_v30  ;;  %v5544_v56 = vadd.f32 %v17837_v0, %v5466_v40  ;;  %v18260_v3 = vld [vmem:[#allocation3 + $0x3b0] sm:$0xff]  ;;  %v5542_v44 = vadd.f32 %v17837_v0, %v5464_v47 }
 0x57c   : > { %v5467_v31 = vmul.f32 %v13775_v41, %v17817_v53  ;;  %5746 = vst.msk [vmem:[#allocation3 + $0x3f0] sm:$0xff] %vm717_vm5, %v5681_v37  ;;  %v18270_v30 = vpack.c.bf16 %v18260_v3, %v18247_v42  ;;  %v18276_v15 = vpack.c.bf16 %v18255_v17, %v18236_v1 }
 0x57d   : > { %v5465_v34 = vmul.f32 %v13776_v25, %v17817_v53  ;;  %v5608_v40 = vmax.f32 %v5544_v56, 0.0  ;;  %v5606_v37 = vmax.f32 %v5542_v44, 0.0  ;;  %v20767_v44 = vld [vmem:[#allocation61_spill] sm:$0xff]  ;;  %v20769_v25 = vrot.slane %v18029_v45, 7 }
 0x57e   : > { %20763 = vst [vmem:[#allocation37_spill] sm:$0xff] %v18270_v30  ;;  %v5545_v41 = vadd.f32 %v17837_v0, %v5467_v31  ;;  %20764 = vst [vmem:[#allocation39_spill] sm:$0xff] %v18276_v15  ;;  %v18286_v31 = vpack.c.bf16 %v6092_v21, %v6090_v39  ;;  %v20768_v36 = vrot.slane %v20767_v44, 7  ;;  %v20771_v39 = vrot.slane %v18079_v60, 7  ;;  %v20772_v21 = vld [vmem:[#allocation63_spill] sm:$0xff] }
 0x57f   : > { %v5543_v47 = vadd.f32 %v17837_v0, %v5465_v34  ;;  %13138 = vmatmul.mubr.msk.bf16.gmra.mrb[84].mxu1 %vm717_vm5, %v18270_v30  ;;  %v5686_v56 = vmul.f32 %v17867_v14, %v5608_v40  ;;  %v5684_v34 = vmul.f32 %v17867_v14, %v5606_v37  ;;  %v20770_v40 = vmov %v20766_v28 }
 0x580   : > { %v5609_v24 = vmax.f32 %v5545_v41, 0.0  ;;  %13141 = vmatprep.mubr.msk.bf16.mxu1 %vm717_vm5, %v18276_v15  ;;  %20765 = vst [vmem:[#allocation40_spill] sm:$0xff] %v18286_v31  ;;  %v6095_v0 = vsel %vm1310_vm4, %v20768_v36, %v20766_v28  ;;  %v18294_v53 = vld [vmem:[#allocation3 + $0x408] sm:$0xff]  ;;  %v6097_v41 = vsel %vm1310_vm4, %v20770_v40, %v20769_v25  ;;  %v20773_v15 = vrot.slane %v20772_v21, 7  ;;  %v5865_v31 = vld [vmem:[#allocation3 + $0x380] sm:$0xff] }
 0x581   : > { %v5607_v12 = vmax.f32 %v5543_v47, 0.0  ;;  %5751 = vst.msk [vmem:[#allocation3 + $0x448] sm:$0xff] %vm717_vm5, %v5686_v56  ;;  %v18308_v36 = vld [vmem:[#allocation3 + $0x3e8] sm:$0xff]  ;;  %v18312_v44 = vpack.c.bf16 %v6097_v41, %v6095_v0  ;;  %5749 = vst.msk [vmem:[#allocation3 + $0x428] sm:$0xff] %vm717_vm5, %v5684_v34  ;;  %v20778_v56 = vrot.slane %v18079_v60, 7  ;;  %v5869_v60 = vld [vmem:[#allocation3 + $0x3a0] sm:$0xff] }
 0x582   : > { %v6100_v30 = vsel %vm1310_vm4, %v20773_v15, %v20771_v39  ;;  %v5687_v28 = vmul.f32 %v17867_v14, %v5609_v24  ;;  %20774 = vst [vmem:[#allocation60_spill] sm:$0xff] %v18308_v36  ;;  %v6139_v40 = vrot.slane %v18308_v36, 7  ;;  %v18318_v39 = vld [vmem:[#allocation3 + $0x410] sm:$0xff]  ;;  %v20777_v24 = vrot.slane %v18092_v18, 7  ;;  %v20784_v15 = vld [vmem:[#allocation62_spill] sm:$0xff] }
 0x583   : > { %20775 = vst [vmem:[#allocation56_spill] sm:$0xff] %v18312_v44  ;;  %v5685_v25 = vmul.f32 %v17867_v14, %v5607_v12  ;;  %20776 = vst [vmem:[#allocation57_spill] sm:$0xff] %v18318_v39  ;;  %v18326_v0 = vld [vmem:[#allocation3 + $0x3f0] sm:$0xff]  ;;  %v6146_v34 = vrot.slane %v18318_v39, 7  ;;  %v18331_v14 = vpack.c.bf16 %v18318_v39, %v18294_v53  ;;  %v20785_v37 = vrot.slane %v20784_v15, 7 }
 0x584   : > { %v6102_v21 = vsel %vm1310_vm4, %v20778_v56, %v20777_v24  ;;  %5752 = vst.msk [vmem:[#allocation3 + $0x450] sm:$0xff] %vm717_vm5, %v5687_v28  ;;  %20779 = vst [vmem:[#allocation58_spill] sm:$0xff] %v18326_v0  ;;  %v6141_v47 = vrot.slane %v18326_v0, 7  ;;  %v18340_v24 = vpack.c.bf16 %v18326_v0, %v18308_v36  ;;  %v20783_v56 = vrot.slane %v18068_v9, 7 }
 0x585   : > { %20780 = vst [vmem:[#allocation61_spill] sm:$0xff] %v18331_v14  ;;  %v18334_v41 = vpack.c.bf16 %v6102_v21, %v6100_v30  ;;  %5750 = vst.msk [vmem:[#allocation3 + $0x430] sm:$0xff] %vm717_vm5, %v5685_v25  ;;  %v20786_v30 = vrot.slane %v18087_v59, 7  ;;  %v20788_v12 = vrot.slane %v18134_v51, 7  ;;  %v20791_v28 = vrot.slane %v18147_v50, 7 }
 0x586   : > { %20782 = vst [vmem:[#allocation84_spill] sm:$0xff] %v18340_v24  ;;  %v6105_v44 = vsel %vm1310_vm4, %v20785_v37, %v20783_v56  ;;  %v20787_v21 = vmov %v20783_v56  ;;  %v20793_v37 = vrot.slane %v18123_v20, 7  ;;  %v20794_v56 = vld [vmem:[#allocation25_spill] sm:$0xff] }
 0x587   : > { %20781 = vst [vmem:[#allocation63_spill] sm:$0xff] %v18334_v41  ;;  %v6107_v25 = vsel %vm1310_vm4, %v20787_v21, %v20786_v30  ;;  %v20789_v41 = vld [vmem:[#allocation26_spill] sm:$0xff]  ;;  %v20792_v0 = vmov %v20788_v12  ;;  %v20795_v59 = vrot.slane %v20794_v56, 7  ;;  %v5873_v30 = vld [vmem:[#allocation3 + $0x3c0] sm:$0xff]  ;;  %13142 = vmatmul.mubr.msk.bf16.gmra.mrb[88].mxu1 %vm717_vm5, %v18340_v24  ;;  %v20801_v56 = vrot.slane %v17939_v35, 7 }
 0x588   : > { %v20790_v39 = vrot.slane %v20789_v41, 7  ;;  %v6112_v15 = vsel %vm1310_vm4, %v20792_v0, %v20791_v28  ;;  %v18370_v41 = vpack.c.bf16 %v6107_v25, %v6105_v44  ;;  %v20799_v21 = vmov %v20793_v37  ;;  %13145 = vmatprep.mubr.msk.bf16.mxu1 %vm717_vm5, %v18331_v14 }
 0x589   : > { %v6115_v9 = vsel %vm1310_vm4, %v20795_v59, %v20793_v37  ;;  %v20800_v28 = vrot.slane %v18189_v16, 7  ;;  %v5877_v37 = vld [vmem:[#allocation3 + $0x3e0] sm:$0xff]  ;;  %v6123_v24 = vrot.slane %v5865_v31, 7  ;;  %v20808_v14 = vrot.slane %v18260_v3, 7 }
 0x58a   : > { %v6110_v36 = vsel %vm1310_vm4, %v20790_v39, %v20788_v12  ;;  %20796 = vst [vmem:[#allocation62_spill] sm:$0xff] %v18370_v41  ;;  %v20798_v12 = vrot.slane %v18142_v52, 7  ;;  %v18405_v41 = vld [vmem:[#allocation3 + $0x428] sm:$0xff] }
 0x58b   : > { %v18372_v39 = vpack.c.bf16 %v6112_v15, %v6110_v36  ;;  %v6120_v59 = vsel %vm1310_vm4, %v20801_v56, %v20800_v28  ;;  %v20803_v36 = vrot.slane %v18202_v4, 7  ;;  %v20804_v25 = vmov %v20800_v28  ;;  %20810 = vst [vmem:[#allocation86_spill] sm:$0xff] %v18405_v41 }
 0x58c   : > { %v6117_v0 = vsel %vm1310_vm4, %v20799_v21, %v20798_v12  ;;  %v20805_v12 = vrot.slane %v18197_v19, 7  ;;  %v20806_v21 = vrot.slane %v18181_v29, 7  ;;  %v6128_v56 = vrot.slane %v5869_v60, 7 }
 0x58d   : > { %20797 = vst [vmem:[#allocation26_spill] sm:$0xff] %v18372_v39  ;;  %v18386_v44 = vpack.c.bf16 %v6117_v0, %v6115_v9  ;;  %v6122_v15 = vsel %vm1310_vm4, %v20804_v25, %v20803_v36  ;;  %v20809_v9 = vrot.slane %v18247_v42, 7  ;;  %v5881_v39 = vld [vmem:[#allocation3 + $0x400] sm:$0xff]  ;;  %v20812_v25 = vrot.slane %v18255_v17, 7 }
 0x58e   : > { %v6127_v35 = vsel %vm1310_vm4, %v20806_v21, %v20805_v12  ;;  %v18398_v28 = vpack.c.bf16 %v6122_v15, %v6120_v59  ;;  %v20811_v31 = vmov %v20806_v21  ;;  %v20813_v59 = vrot.slane %v18236_v1, 7 }
 0x58f   : > { %20802 = vst [vmem:[#allocation25_spill] sm:$0xff] %v18386_v44  ;;  %v6132_v0 = vsel %vm1310_vm4, %v20809_v9, %v20808_v14  ;;  %v6133_v44 = vrot.slane %v5873_v30, 7  ;;  %v6125_v36 = vsel %vm1310_vm4, %v6123_v24, %v20811_v31  ;;  %v6138_v15 = vrot.slane %v5877_v37, 7  ;;  %v5885_v24 = vld [vmem:[#allocation3 + $0x420] sm:$0xff]  ;;  %v18423_v31 = vld [vmem:[#allocation3 + $0x430] sm:$0xff] }
 0x590   : > { %20807 = vst [vmem:[#allocation85_spill] sm:$0xff] %v18398_v28  ;;  %v6137_v60 = vsel %vm1310_vm4, %v20813_v59, %v20812_v25  ;;  %v6142_v12 = vsel %vm1310_vm4, %v6139_v40, %v6141_v47  ;;  %v6149_v21 = vrot.slane %v18405_v41, 7  ;;  %v18418_v30 = vpack.c.bf16 %v6127_v35, %v6125_v36 }
 0x591   : > { %v6130_v28 = vsel %vm1310_vm4, %v6128_v56, %v20809_v9  ;;  %v20816_v25 = vmov %v20813_v59  ;;  %v6140_v47 = vsel %vm1310_vm4, %v6138_v15, %v6139_v40  ;;  %v6143_v59 = vrot.slane %v5881_v39, 7 }
 0x592   : > { %20814 = vst [vmem:[#allocation87_spill] sm:$0xff] %v18418_v30  ;;  %v18425_v17 = vpack.c.bf16 %v6132_v0, %v6130_v28  ;;  %v6135_v37 = vsel %vm1310_vm4, %v6133_v44, %v20816_v25  ;;  %v6151_v14 = vrot.slane %v18423_v31, 7  ;;  %v18434_v35 = vpack.c.bf16 %v18423_v31, %v18405_v41  ;;  %v5776_v30 = vld [vmem:[#allocation3 + $0xb8] sm:$0x1] }
 0x593   : > { %v18437_v36 = vpack.c.bf16 %v6137_v60, %v6135_v37  ;;  %v18439_v9 = vpack.c.bf16 %v6142_v12, %v6140_v47  ;;  %v20820_v28 = vrot.slane %v18294_v53, 7  ;;  %v6148_v39 = vrot.slane %v5885_v24, 7  ;;  %v5756_v60 = vld [vmem:[#allocation3 + $0x18] sm:$0x1]  ;;  %v20823_v37 = vld [vmem:[#allocation24_spill] sm:$0xff] }
 0x594   : > { %20815 = vst [vmem:[#allocation88_spill] sm:$0xff] %v18425_v17  ;;  %20817 = vst [vmem:[#allocation89_spill] sm:$0xff] %v18434_v35  ;;  %13146 = vmatmul.mubr.msk.bf16.gmra.mrb[92].mxu1 %vm717_vm5, %v18434_v35  ;;  %v6152_v25 = vsel %vm1310_vm4, %v6149_v21, %v6151_v14  ;;  %v20824_v12 = vrot.slane %v20823_v37, 1  ;;  %v20825_v47 = vrot.slane %v17147_v62, 1  ;;  %v7103_v35 = vrot.slane %v5756_v60, 1  ;;  %v20844_v60 = vld [vmem:[#allocation22_spill] sm:$0xff] }
 0x595   : > { %20818 = vst [vmem:[#allocation90_spill] sm:$0xff] %v18437_v36  ;;  %20819 = vst [vmem:[#allocation91_spill] sm:$0xff] %v18439_v9  ;;  %v6145_v0 = vsel %vm1310_vm4, %v6143_v59, %v20820_v28  ;;  %v20821_v44 = vmov %v20820_v28  ;;  %v20827_v59 = vrot.slane %v17475_v7, 1  ;;  %v20828_v28 = vld [vmem:[#allocation28_spill] sm:$0xff]  ;;  %v6150_v14 = vsel %vm1310_vm4, %v6148_v39, %v6149_v21  ;;  %v20835_v9 = vld [vmem:[#allocation29_spill] sm:$0xff] }
 0x596   : > { %v6147_v40 = vsel %vm1310_vm4, %v20821_v44, %v6146_v34  ;;  %v18457_v56 = vsel %vm2411_vm3, %v20825_v47, %v20824_v12  ;;  %v20829_v34 = vrot.slane %v20828_v28, 1  ;;  %v5768_v44 = vld [vmem:[#allocation3 + $0x78] sm:$0x1]  ;;  %v20836_v36 = vrot.slane %v20835_v9, 1  ;;  %v20837_v28 = vld [vmem:[#allocation27_spill] sm:$0xff]  ;;  %v20841_v21 = vld [vmem:[#allocation65_spill] sm:$0xff] }
 0x597   : > { %v18449_v15 = vpack.c.bf16 %v6147_v40, %v6145_v0  ;;  %20826 = vst [vmem:[#allocation24_spill] sm:$0xff] %v18457_v56  ;;  %v20830_v0 = vld [vmem:[#allocation32_spill] sm:$0xff]  ;;  %v20834_v12 = vmov %v20827_v59  ;;  %v20838_v17 = vrot.slane %v20837_v28, 1  ;;  %v20842_v39 = vrot.slane %v20841_v21, 1  ;;  %v5780_v41 = vld [vmem:[#allocation3 + $0xd8] sm:$0x1] }
 0x598   : > { %v7107_v24 = vsel %vm2411_vm3, %v20829_v34, %v20827_v59  ;;  %v20831_v40 = vpack.c.bf16 %v17455_v13, %v20830_v0  ;;  %v5772_v34 = vld [vmem:[#allocation3 + $0x98] sm:$0x1]  ;;  %v18479_v13 = vpack.c.bf16 %v6152_v25, %v6150_v14  ;;  %v20850_v14 = vld [vmem:[#allocation36_spill] sm:$0xff]  ;;  %v20852_v9 = vrot.slane %v17513_v27, 1 }
 0x599   : > { %20822 = vst [vmem:[#allocation92_spill] sm:$0xff] %v18449_v15  ;;  %v20832_v15 = vld [vmem:[#allocation64_spill] sm:$0xff]  ;;  %v7112_v59 = vsel %vm2411_vm3, %v20838_v17, %v20836_v36  ;;  %v20848_v17 = vrot.slane %v20823_v37, 1  ;;  %v20854_v37 = vld [vmem:[#allocation45_spill] sm:$0xff]  ;;  %v5788_v56 = vld [vmem:[#allocation3 + $0x118] sm:$0x1] }
 0x59a   : > { %13151 = vmatprep.mubr.msk.bf16.mxu1 %vm717_vm5, %v20831_v40  ;;  %v20833_v62 = vrot.slane %v20832_v15, 1  ;;  %20839 = vst [vmem:[#allocation28_spill] sm:$0xff] %v18479_v13  ;;  %v20843_v15 = vmov %v20836_v36  ;;  %v20845_v40 = vrot.slane %v20844_v60, 1 }
 0x59b   : > { %v7114_v7 = vsel %vm2411_vm3, %v20843_v15, %v20842_v39  ;;  %v18496_v36 = vsel %vm2411_vm3, %v20848_v17, %v7103_v35  ;;  %v5784_v39 = vld [vmem:[#allocation3 + $0xf8] sm:$0x1]  ;;  %v20861_v15 = vld [vmem:[#allocation52_spill] sm:$0xff] }
 0x59c   : > { %v7109_v47 = vsel %vm2411_vm3, %v20834_v12, %v20833_v62  ;;  %v20846_v62 = vld [vmem:[#allocation34_spill] sm:$0xff]  ;;  %v18498_v25 = vpack.c.bf16 %v7114_v7, %v7112_v59  ;;  %v7128_v59 = vrot.slane %v5776_v30, 1 }
 0x59d   : > { %v18481_v0 = vpack.c.bf16 %v7109_v47, %v7107_v24  ;;  %v20847_v12 = vrot.slane %v20846_v62, 1  ;;  %v7118_v24 = vrot.slane %v5768_v44, 1  ;;  %v20851_v47 = vrot.slane %v20850_v14, 1  ;;  %v20857_v17 = vld [vmem:[#allocation46_spill] sm:$0xff] }
 0x59e   : > { %20849 = vst [vmem:[#allocation64_spill] sm:$0xff] %v18498_v25  ;;  %v20853_v62 = vrot.slane %v17601_v57, 1  ;;  %v20856_v44 = vrot.slane %v20844_v60, 1  ;;  %v20858_v27 = vrot.slane %v20857_v17, 1  ;;  %v7133_v25 = vrot.slane %v5780_v41, 1  ;;  %v18528_v30 = vld [vmem:[%s20175_s10 + $0x18] sm:$0xff]  }
 0x59f   : > { %20840 = vst [vmem:[#allocation32_spill] sm:$0xff] %v18481_v0  ;;  %v7117_v28 = vsel %vm2411_vm3, %v20847_v12, %v20845_v40  ;;  %v7122_v21 = vsel %vm2411_vm3, %v20852_v9, %v20851_v47  ;;  %v7123_v40 = vrot.slane %v5772_v34, 1  ;;  %v20855_v12 = vrot.slane %v20854_v37, 1  ;;  %v5800_v57 = vld [vmem:[#allocation3 + $0x178] sm:$0x1] }
 0x5a0   : > { %v7119_v7 = vsel %vm2411_vm3, %v20856_v44, %v7118_v24  ;;  %v20859_v47 = vrot.slane %v17576_v43, 1  ;;  %v20860_v34 = vrot.slane %v17661_v54, 1  ;;  %v20862_v0 = vrot.slane %v20861_v15, 1  ;;  %v5792_v15 = vld [vmem:[#allocation3 + $0x138] sm:$0x1] }
 0x5a1   : > { %v7127_v35 = vsel %vm2411_vm3, %v20855_v12, %v20853_v62  ;;  %v18530_v60 = vpack.c.bf16 %v7119_v7, %v7117_v28  ;;  %v20863_v24 = vrot.slane %v20850_v14, 1  ;;  %v20864_v41 = vmov %v20853_v62  ;;  %v5796_v44 = vld [vmem:[#allocation3 + $0x158] sm:$0x1]  ;;  %v20866_v7 = vld [vmem:[#allocation53_spill] sm:$0xff] }
 0x5a2   : > { %v7132_v9 = vsel %vm2411_vm3, %v20859_v47, %v20858_v27  ;;  %v7137_v37 = vsel %vm2411_vm3, %v20862_v0, %v20860_v34  ;;  %v7129_v62 = vsel %vm2411_vm3, %v20864_v41, %v7128_v59  ;;  %v7138_v12 = vrot.slane %v5784_v39, 1 }
 0x5a3   : > { %v7124_v43 = vsel %vm2411_vm3, %v20863_v24, %v7123_v40  ;;  %v18540_v27 = vpack.c.bf16 %v7129_v62, %v7127_v35  ;;  %v20865_v47 = vrot.slane %v20857_v17, 1  ;;  %v20867_v34 = vrot.slane %v20866_v7, 1  ;;  %v20869_v24 = vld [vmem:[#allocation33_spill] sm:$0xff] }
 0x5a4   : > { %v18538_v0 = vpack.c.bf16 %v7124_v43, %v7122_v21  ;;  %v20868_v14 = vrot.slane %v17636_v55, 1  ;;  %13152 = vmatmul.mubr.msk.bf16.vlgmr.msra.gmra.mrb[32].mxu1 %vm717_vm5, %v20869_v24  ;;  %v20870_v21 = vrot.slane %v17661_v54, 1  ;;  %v7143_v59 = vrot.slane %v5788_v56, 1  ;;  %v5804_v55 = vld [vmem:[#allocation3 + $0x198] sm:$0x1]  ;;  %v14835_v62 = vld [vmem:[%s20175_s10 + $0x10] sm:$0xff]  }
 0x5a5   : > { %v7134_v28 = vsel %vm2411_vm3, %v20865_v47, %v7133_v25  ;;  %v20871_v17 = vrot.slane %v17721_v48, 1  ;;  %v20872_v25 = vld [vmem:[#allocation11_spill] sm:$0xff]  ;;  %13216 = vmatpush3.bf16.msra.mxu1 %v14835_v62  ;;  %v20874_v47 = vld [vmem:[#allocation44_spill] sm:$0xff]  ;;  %v7148_v54 = vrot.slane %v5792_v15, 1  ;;  %v20875_v56 = vrot.slane %v17716_v5, 1 }
 0x5a6   : > { %v7142_v40 = vsel %vm2411_vm3, %v20868_v14, %v20867_v34  ;;  %v18552_v39 = vpack.c.bf16 %v7134_v28, %v7132_v9  ;;  %v7139_v35 = vsel %vm2411_vm3, %v20870_v21, %v7138_v12  ;;  %v20873_v43 = vrot.slane %v20872_v25, 1  ;;  %13155 = vmatprep.mubr.msk.bf16.mxu1 %vm717_vm5, %v20874_v47  ;;  %13281 = vmatprep.subr.bf16.mxu1 %v18528_v30  ;;  %v5832_v5 = vld [vmem:[#allocation3 + $0x278] sm:$0x1] }
 0x5a7   : > { %v18567_v9 = vpack.c.bf16 %v7139_v35, %v7137_v37  ;;  %v20876_v12 = vrot.slane %v17696_v10, 1  ;;  %v7153_v34 = vrot.slane %v5796_v44, 1  ;;  %v20877_v14 = vrot.slane %v20866_v7, 1  ;;  %v5808_v44 = vld [vmem:[#allocation3 + $0x1b8] sm:$0x1] }
 0x5a8   : > { %v7147_v41 = vsel %vm2411_vm3, %v20873_v43, %v20871_v17  ;;  %v20878_v17 = vrot.slane %v17781_v6, 1  ;;  %v20879_v25 = vrot.slane %v17767_v22, 1  ;;  %v7158_v15 = vrot.slane %v5800_v57, 1  ;;  %v5816_v57 = vld [vmem:[#allocation3 + $0x1f8] sm:$0x1] }
 0x5a9   : > { %v7152_v28 = vsel %vm2411_vm3, %v20876_v12, %v20875_v56  ;;  %v7144_v21 = vsel %vm2411_vm3, %v20877_v14, %v7143_v59  ;;  %v20880_v35 = vrot.slane %v17776_v58, 1  ;;  %v20881_v10 = vrot.slane %v17756_v26, 1  ;;  %v5812_v14 = vld [vmem:[#allocation3 + $0x1d8] sm:$0x1] }
 0x5aa   : > { %v7157_v37 = vsel %vm2411_vm3, %v20879_v25, %v20878_v17  ;;  %v18588_v62 = vpack.c.bf16 %v7144_v21, %v7142_v40  ;;  %v20882_v7 = vrot.slane %v17721_v48, 1  ;;  %v7154_v22 = vsel %vm2411_vm3, %v20875_v56, %v7153_v34 }
 0x5ab   : > { %v7162_v43 = vsel %vm2411_vm3, %v20881_v10, %v20880_v35  ;;  %v7163_v12 = vrot.slane %v5804_v55, 1  ;;  %v18598_v25 = vpack.c.bf16 %v7154_v22, %v7152_v28  ;;  %v20883_v26 = vrot.slane %v17781_v6, 1  ;;  %v5836_v10 = vld [vmem:[#allocation3 + $0x298] sm:$0x1] }
 0x5ac   : > { %v7149_v59 = vsel %vm2411_vm3, %v20882_v7, %v7148_v54  ;;  %v20884_v21 = vrot.slane %v17847_v61, 1  ;;  %v20885_v48 = vrot.slane %v17830_v2, 1  ;;  %v20886_v55 = vrot.slane %v17776_v58, 1 }
 0x5ad   : > { %v18596_v17 = vpack.c.bf16 %v7149_v59, %v7147_v41  ;;  %v7159_v40 = vsel %vm2411_vm3, %v20883_v26, %v7158_v15  ;;  %v7168_v34 = vrot.slane %v5808_v44, 1  ;;  %v20887_v28 = vrot.slane %v17842_v46, 1 }
 0x5ae   : > { %v7167_v54 = vsel %vm2411_vm3, %v20885_v48, %v20884_v21  ;;  %v18608_v35 = vpack.c.bf16 %v7159_v40, %v7157_v37  ;;  %v7164_v41 = vsel %vm2411_vm3, %v20886_v55, %v7163_v12  ;;  %v20888_v6 = vrot.slane %v17819_v11, 1  ;;  %v20895_v40 = vld [vmem:[#allocation75_spill] sm:$0xff]  ;;  %v5840_v48 = vld [vmem:[#allocation3 + $0x2b8] sm:$0x1]  ;;  %v20897_v55 = vld [vmem:[#allocation49_spill] sm:$0xff] }
 0x5af   : > { %v18618_v7 = vpack.c.bf16 %v7164_v41, %v7162_v43  ;;  %v7173_v2 = vrot.slane %v5812_v14, 1  ;;  %v20889_v59 = vrot.slane %v17908_v49, 1  ;;  %v20890_v37 = vrot.slane %v17897_v63, 1  ;;  %13156 = vmatmul.mubr.msk.bf16.gmra.mrb[36].mxu1 %vm717_vm5, %v20897_v55 }
 0x5b0   : > { %v7172_v15 = vsel %vm2411_vm3, %v20888_v6, %v20887_v28  ;;  %v7178_v58 = vrot.slane %v5816_v57, 1  ;;  %v20891_v22 = vmov %v20884_v21  ;;  %v20892_v12 = vrot.slane %v17979_v8, 1  ;;  %v5848_v6 = vld [vmem:[#allocation3 + $0x2f8] sm:$0x1] }
 0x5b1   : > { %v7177_v56 = vsel %vm2411_vm3, %v20890_v37, %v20889_v59  ;;  %v7169_v44 = vsel %vm2411_vm3, %v20891_v22, %v7168_v34  ;;  %v20893_v11 = vrot.slane %v17966_v33, 1  ;;  %v7188_v43 = vrot.slane %v5832_v5, 1 }
 0x5b2   : > { %v20894_v14 = vrot.slane %v17974_v23, 1  ;;  %v20896_v21 = vrot.slane %v20895_v40, 1  ;;  %v18640_v61 = vpack.c.bf16 %v7169_v44, %v7167_v54  ;;  %v20898_v57 = vmov %v20887_v28  ;;  %v5844_v28 = vld [vmem:[#allocation3 + $0x2d8] sm:$0x1]  ;;  %v20903_v44 = vld [vmem:[#allocation79_spill] sm:$0xff] }
 0x5b3   : > { %v7187_v26 = vsel %vm2411_vm3, %v20893_v11, %v20892_v12  ;;  %v7174_v41 = vsel %vm2411_vm3, %v20898_v57, %v7173_v2  ;;  %v20899_v33 = vmov %v20889_v59  ;;  %v7193_v34 = vrot.slane %v5836_v10, 1  ;;  %v20900_v59 = vld [vmem:[#allocation50_spill] sm:$0xff] }
 0x5b4   : > { %v7192_v63 = vsel %vm2411_vm3, %v20896_v21, %v20894_v14  ;;  %v7179_v5 = vsel %vm2411_vm3, %v20899_v33, %v7178_v58  ;;  %13159 = vmatprep.mubr.msk.bf16.mxu1 %vm717_vm5, %v20900_v59  ;;  %v18650_v37 = vpack.c.bf16 %v7174_v41, %v7172_v15  ;;  %v20901_v54 = vmov %v20892_v12  ;;  %v5852_v10 = vld [vmem:[#allocation3 + $0x318] sm:$0x1]  ;;  %v20909_v33 = vld [vmem:[#allocation41_spill] sm:$0xff] }
 0x5b5   : > { %v18652_v22 = vpack.c.bf16 %v7179_v5, %v7177_v56  ;;  %v7189_v46 = vsel %vm2411_vm3, %v20901_v54, %v7188_v43  ;;  %v20902_v2 = vrot.slane %v18034_v32, 1  ;;  %v20904_v49 = vrot.slane %v20903_v44, 1  ;;  %v5856_v40 = vld [vmem:[#allocation3 + $0x338] sm:$0x1]  ;;  %v20912_v54 = vld [vmem:[#allocation7_spill] sm:$0xff] }
 0x5b6   : > { %v18662_v12 = vpack.c.bf16 %v7189_v46, %v7187_v26  ;;  %v20905_v11 = vmov %v20894_v14  ;;  %v7198_v14 = vrot.slane %v5840_v48, 1  ;;  %v20906_v56 = vrot.slane %v18029_v45, 1 }
 0x5b7   : > { %v7197_v58 = vsel %vm2411_vm3, %v20904_v49, %v20902_v2  ;;  %v7194_v15 = vsel %vm2411_vm3, %v20905_v11, %v7193_v34  ;;  %v20907_v8 = vrot.slane %v18013_v38, 1  ;;  %v7203_v57 = vrot.slane %v5844_v28, 1  ;;  %v20914_v38 = vld [vmem:[#allocation38_spill] sm:$0xff] }
 0x5b8   : > { %v18672_v21 = vpack.c.bf16 %v7194_v15, %v7192_v63  ;;  %v20908_v41 = vrot.slane %v18092_v18, 1  ;;  %v20910_v26 = vrot.slane %v20909_v33, 1  ;;  %v7208_v23 = vrot.slane %v5848_v6, 1  ;;  %v5860_v15 = vld [vmem:[#allocation3 + $0x358] sm:$0x1] }
 0x5b9   : > { %v7202_v43 = vsel %vm2411_vm3, %v20907_v8, %v20906_v56  ;;  %v20911_v34 = vmov %v20902_v2  ;;  %v20913_v46 = vrot.slane %v20912_v54, 1  ;;  %v20915_v2 = vrot.slane %v20914_v38, 1  ;;  %v5864_v33 = vld [vmem:[#allocation3 + $0x378] sm:$0x1] }
 0x5ba   : > { %v7207_v5 = vsel %vm2411_vm3, %v20910_v26, %v20908_v41  ;;  %v7199_v48 = vsel %vm2411_vm3, %v20911_v34, %v7198_v14  ;;  %v7213_v63 = vrot.slane %v5852_v10, 1  ;;  %v20916_v28 = vrot.slane %v18147_v50, 1  ;;  %v5868_v10 = vld [vmem:[#allocation3 + $0x398] sm:$0x1] }
 0x5bb   : > { %v7212_v44 = vsel %vm2411_vm3, %v20915_v2, %v20913_v46  ;;  %v20917_v49 = vrot.slane %v18134_v51, 1  ;;  %v18692_v56 = vpack.c.bf16 %v7199_v48, %v7197_v58  ;;  %v20918_v32 = vrot.slane %v18029_v45, 1  ;;  %v5872_v18 = vld [vmem:[#allocation3 + $0x3b8] sm:$0x1] }
 0x5bc   : > { %v20919_v14 = vmov %v20908_v41  ;;  %v7218_v41 = vrot.slane %v5856_v40, 1  ;;  %v20920_v51 = vmov %v20913_v46  ;;  %v20921_v48 = vrot.slane %v18142_v52, 1  ;;  %v5876_v2 = vld [vmem:[#allocation3 + $0x3d8] sm:$0x1] }
 0x5bd   : > { %v7217_v11 = vsel %vm2411_vm3, %v20917_v49, %v20916_v28  ;;  %v7204_v6 = vsel %vm2411_vm3, %v20918_v32, %v7203_v57  ;;  %v7209_v8 = vsel %vm2411_vm3, %v20919_v14, %v7208_v23  ;;  %v7214_v58 = vsel %vm2411_vm3, %v20920_v51, %v7213_v63  ;;  %v20926_v63 = vld [vmem:[#allocation9_spill] sm:$0xff]  ;;  %v20929_v32 = vld [vmem:[#allocation10_spill] sm:$0xff] }
 0x5be   : > { %v18700_v26 = vpack.c.bf16 %v7204_v6, %v7202_v43  ;;  %v18702_v34 = vpack.c.bf16 %v7209_v8, %v7207_v5  ;;  %v20922_v45 = vrot.slane %v18123_v20, 1  ;;  %v18712_v46 = vpack.c.bf16 %v7214_v58, %v7212_v44  ;;  %13160 = vmatmul.mubr.msk.bf16.gmra.mrb[40].mxu1 %vm717_vm5, %v20926_v63  ;;  %v5880_v58 = vld [vmem:[#allocation3 + $0x3f8] sm:$0x1] }
 0x5bf   : > { %v20923_v40 = vmov %v20916_v28  ;;  %v7223_v23 = vrot.slane %v5860_v15, 1  ;;  %v20924_v5 = vrot.slane %v18202_v4, 1  ;;  %v20925_v54 = vrot.slane %v18189_v16, 1  ;;  %13163 = vmatprep.mubr.msk.bf16.mxu1 %vm717_vm5, %v20929_v32  ;;  %v20941_v4 = vld [vmem:[#allocation60_spill] sm:$0xff] }
 0x5c0   : > { %v7222_v57 = vsel %vm2411_vm3, %v20922_v45, %v20921_v48  ;;  %v7219_v43 = vsel %vm2411_vm3, %v20923_v40, %v7218_v41  ;;  %v7228_v28 = vrot.slane %v5864_v33, 1  ;;  %v20927_v44 = vrot.slane %v18197_v19, 1  ;;  %v20933_v33 = vld [vmem:[#allocation35_spill] sm:$0xff] }
 0x5c1   : > { %v7227_v38 = vsel %vm2411_vm3, %v20925_v54, %v20924_v5  ;;  %v18724_v20 = vpack.c.bf16 %v7219_v43, %v7217_v11  ;;  %v20928_v50 = vrot.slane %v18181_v29, 1  ;;  %v7233_v15 = vrot.slane %v5868_v10, 1 }
 0x5c2   : > { %v20930_v16 = vmov %v20921_v48  ;;  %v20931_v14 = vrot.slane %v18260_v3, 1  ;;  %v20932_v11 = vrot.slane %v18247_v42, 1  ;;  %v7238_v41 = vrot.slane %v5872_v18, 1  ;;  %v5888_v18 = vld [vmem:[#allocation3 + $0x438] sm:$0x1] }
 0x5c3   : > { %v7232_v49 = vsel %vm2411_vm3, %v20928_v50, %v20927_v44  ;;  %v7224_v6 = vsel %vm2411_vm3, %v20930_v16, %v7223_v23  ;;  %v20934_v51 = vrot.slane %v20933_v33, 1  ;;  %v20935_v29 = vrot.slane %v18236_v1, 1  ;;  %v5884_v23 = vld [vmem:[#allocation3 + $0x418] sm:$0x1] }
 0x5c4   : > { %v7237_v8 = vsel %vm2411_vm3, %v20932_v11, %v20931_v14  ;;  %v18746_v48 = vpack.c.bf16 %v7224_v6, %v7222_v57  ;;  %v20936_v52 = vmov %v20924_v5  ;;  %v20937_v40 = vmov %v20927_v44  ;;  %v20939_v44 = vld [vmem:[#allocation58_spill] sm:$0xff]  ;;  %v20944_v6 = vld [vmem:[#allocation57_spill] sm:$0xff] }
 0x5c5   : > { %v7242_v10 = vsel %vm2411_vm3, %v20935_v29, %v20934_v51  ;;  %v7229_v45 = vsel %vm2411_vm3, %v20936_v52, %v7228_v28  ;;  %v7234_v42 = vsel %vm2411_vm3, %v20937_v40, %v7233_v15  ;;  %v7243_v43 = vrot.slane %v5876_v2, 1  ;;  %v20948_v29 = vld [vmem:[#allocation86_spill] sm:$0xff]  ;;  %v18786_v40 = vld [vmem:[#allocation3 + $0x210] sm:$0xff] }
 0x5c6   : > { %v18754_v5 = vpack.c.bf16 %v7229_v45, %v7227_v38  ;;  %v18756_v54 = vpack.c.bf16 %v7234_v42, %v7232_v49  ;;  %v20938_v1 = vmov %v20931_v14  ;;  %v20940_v50 = vrot.slane %v20939_v44, 1  ;;  %v20955_v44 = vld [vmem:[#allocation15_spill] sm:$0xff] }
 0x5c7   : > { %v7239_v57 = vsel %vm2411_vm3, %v20938_v1, %v7238_v41  ;;  %v20942_v16 = vrot.slane %v20941_v4, 1  ;;  %v20943_v2 = vmov %v20934_v51  ;;  %v7248_v38 = vrot.slane %v5880_v58, 1  ;;  %v18796_v1 = vld [vmem:[#allocation3 + $0x208] sm:$0xff]  ;;  %13164 = vmatmul.mubr.msk.bf16.gmra.mrb[44].mxu1 %vm717_vm5, %v20955_v44 }
 0x5c8   : > { %v18766_v19 = vpack.c.bf16 %v7239_v57, %v7237_v8  ;;  %v7244_v15 = vsel %vm2411_vm3, %v20943_v2, %v7243_v43  ;;  %v20945_v49 = vrot.slane %v20944_v6, 1  ;;  %v20946_v14 = vrot.slane %v18294_v53, 1  ;;  %v18798_v57 = vld [vmem:[#allocation3 + $0x450] sm:$0xff]  ;;  %v5892_v2 = vld [vmem:[#allocation3 + $0x458] sm:$0x1] }
 0x5c9   : > { %v7247_v28 = vsel %vm2411_vm3, %v20942_v16, %v20940_v50  ;;  %v18776_v11 = vpack.c.bf16 %v7244_v15, %v7242_v10  ;;  %v7253_v41 = vrot.slane %v5884_v23, 1  ;;  %v20947_v51 = vrot.slane %v18423_v31, 1  ;;  %20954 = vst [vmem:[#allocation27_spill] sm:$0xff] %v18798_v57  ;;  %v18806_v16 = vld [vmem:[#allocation3 + $0x448] sm:$0xff] }
 0x5ca   : > { %v7252_v3 = vsel %vm2411_vm3, %v20946_v14, %v20945_v49  ;;  %v20949_v52 = vrot.slane %v20948_v29, 1  ;;  %v7258_v45 = vrot.slane %v5888_v18, 1  ;;  %v20950_v33 = vmov %v20940_v50  ;;  %v5820_v18 = vld [vmem:[#allocation3 + $0x218] sm:$0x1]  ;;  %20956 = vst [vmem:[#allocation65_spill] sm:$0xff] %v18806_v16 }
 0x5cb   : > { %v7249_v58 = vsel %vm2411_vm3, %v20950_v33, %v7248_v38  ;;  %v20952_v53 = vmov %v20945_v49  ;;  %v20953_v43 = vmov %v20947_v51  ;;  %v18812_v31 = vpack.c.bf16 %v18786_v40, %v18796_v1 }
 0x5cc   : > { %v7257_v8 = vsel %vm2411_vm3, %v20949_v52, %v20947_v51  ;;  %v18788_v42 = vpack.c.bf16 %v7249_v58, %v7247_v28  ;;  %v7254_v10 = vsel %vm2411_vm3, %v20952_v53, %v7253_v41  ;;  %v7259_v23 = vsel %vm2411_vm3, %v20953_v43, %v7258_v45  ;;  %v20957_v28 = vld [vmem:[#allocation16_spill] sm:$0xff]  ;;  %v20962_v58 = vld [vmem:[#allocation66_spill] sm:$0xff]  ;;  %v20963_v53 = vld [vmem:[#allocation67_spill] sm:$0xff] }
 0x5cd   : > { %v18802_v50 = vpack.c.bf16 %v7254_v10, %v7252_v3  ;;  %v18804_v4 = vpack.c.bf16 %v7259_v23, %v7257_v8  ;;  %13167 = vmatprep.mubr.msk.bf16.mxu1 %vm717_vm5, %v20957_v28  ;;  %20958 = vst [vmem:[#allocation22_spill] sm:$0xff] %v18812_v31  ;;  %v18816_v15 = vpack.c.bf16 %v18798_v57, %v18806_v16  ;;  %v8576_v38 = vrot.slane %v18796_v1, 1  ;;  %v20964_v10 = vld [vmem:[#allocation68_spill] sm:$0xff]  ;;  %v20965_v43 = vld [vmem:[#allocation69_spill] sm:$0xff]  ;;  %v20966_v23 = vld [vmem:[#allocation70_spill] sm:$0xff] }
 0x5ce   : > { %20951 = vst [vmem:[#allocation29_spill] sm:$0xff] %v18788_v42  ;;  %v8577_v6 = vrot.slane %v18786_v40, 1  ;;  %v8579_v49 = vrot.slane %v5820_v18, 1  ;;  %v8581_v14 = vrot.slane %v18806_v16, 1  ;;  %v8582_v3 = vrot.slane %v18798_v57, 1  ;;  %v20967_v18 = vld [vmem:[#allocation72_spill] sm:$0xff] }
 0x5cf   : > { %20959 = vst [vmem:[#allocation34_spill] sm:$0xff] %v18816_v15  ;;  %v8584_v29 = vrot.slane %v5892_v2, 1  ;;  %13168 = vmatmul.mubr.msk.bf16.gmra.mrb[48].mxu1 %vm717_vm5, %v20962_v58  ;;  %v14836_v2 = vld [vmem:[#allocation3 + $0x248] sm:$0xff] }
 0x5d0   : > { %v8578_v41 = vsel %vm2411_vm3, %v8576_v38, %v8577_v6  ;;  %v8580_v51 = vsel %vm2411_vm3, %v8577_v6, %v8579_v49  ;;  %v8583_v8 = vsel %vm2411_vm3, %v8581_v14, %v8582_v3  ;;  %13171 = vmatprep.mubr.msk.bf16.mxu1 %vm717_vm5, %v20963_v53  ;;  %v7180_v38 = vrot.slane %v14836_v2, 1  ;;  %v14837_v6 = vld [vmem:[#allocation3 + $0x250] sm:$0xff]  ;;  %v20972_v15 = vld [vmem:[#allocation8_spill] sm:$0xff] }
 0x5d1   : > { %v18824_v52 = vpack.c.bf16 %v8580_v51, %v8578_v41  ;;  %v8585_v45 = vsel %vm2411_vm3, %v8582_v3, %v8584_v29  ;;  %v7181_v49 = vrot.slane %v14837_v6, 1  ;;  %v20968_v14 = vld [vmem:[#allocation73_spill] sm:$0xff]  ;;  %v5828_v3 = vld [vmem:[#allocation3 + $0x258] sm:$0x1]  ;;  %v20974_v6 = vld [vmem:[#allocation40_spill] sm:$0xff] }
 0x5d2   : > { %v18828_v33 = vpack.c.bf16 %v8585_v45, %v8583_v8  ;;  %v20969_v51 = vld [vmem:[#allocation74_spill] sm:$0xff]  ;;  %v7183_v45 = vrot.slane %v5828_v3, 1  ;;  %v20973_v2 = vld [vmem:[#allocation17_spill] sm:$0xff]  ;;  %v20975_v31 = vld [vmem:[#allocation56_spill] sm:$0xff] }
 0x5d3   : > { %20960 = vst [vmem:[#allocation36_spill] sm:$0xff] %v18824_v52  ;;  %v7182_v41 = vsel %vm2411_vm3, %v7180_v38, %v7181_v49  ;;  %v20970_v29 = vld [vmem:[#allocation78_spill] sm:$0xff]  ;;  %v20976_v38 = vld [vmem:[#allocation63_spill] sm:$0xff]  ;;  %v20980_v3 = vld [vmem:[#allocation85_spill] sm:$0xff] }
 0x5d4   : > { %20961 = vst [vmem:[#allocation45_spill] sm:$0xff] %v18828_v33  ;;  %v20971_v8 = vpack.c.bf16 %v20969_v51, %v20970_v29  ;;  %v7184_v33 = vsel %vm2411_vm3, %v7181_v49, %v7183_v45  ;;  %v20977_v51 = vld [vmem:[#allocation62_spill] sm:$0xff]  ;;  %v20982_v29 = vld [vmem:[#allocation88_spill] sm:$0xff]  ;;  %v20984_v45 = vld [vmem:[#allocation91_spill] sm:$0xff] }
 0x5d5   : > { %v7340_v52 = vpack.c.bf16 %v7184_v33, %v7182_v41  ;;  %v20978_v49 = vld [vmem:[#allocation26_spill] sm:$0xff]  ;;  %v20979_v33 = vld [vmem:[#allocation25_spill] sm:$0xff]  ;;  %v20981_v41 = vld [vmem:[#allocation87_spill] sm:$0xff] }
 0x5d6   : > { %v20985_v16 = vld [vmem:[#allocation92_spill] sm:$0xff] }
 0x5d7   : > { %13172 = vmatmul.mubr.msk.bf16.gmra.mrb[52].mxu1 %vm717_vm5, %v20964_v10  ;;  %v20986_v57 = vld [vmem:[#allocation24_spill] sm:$0xff] }
 0x5d8   : > { %13175 = vmatprep.mubr.msk.bf16.mxu1 %vm717_vm5, %v20965_v43 }
 0x5df   : > { %13176 = vmatmul.mubr.msk.bf16.gmra.mrb[56].mxu1 %vm717_vm5, %v20966_v23 }
 0x5e0   : > { %13179 = vmatprep.mubr.msk.bf16.mxu1 %vm717_vm5, %v20967_v18 }
 0x5e7   : > { %13180 = vmatmul.mubr.msk.bf16.gmra.mrb[60].mxu1 %vm717_vm5, %v20968_v14 }
 0x5e8   : > { %13183 = vmatprep.mubr.msk.bf16.mxu1 %vm717_vm5, %v20971_v8  ;;  %v20983_v8 = vld [vmem:[#allocation90_spill] sm:$0xff] }
 0x5ef   : > { %13184 = vmatmul.mubr.msk.bf16.gmra.mrb[64].mxu1 %vm717_vm5, %v20972_v15 }
 0x5f0   : > { %13187 = vmatprep.mubr.msk.bf16.mxu1 %vm717_vm5, %v20973_v2 }
 0x5f7   : > { %13188 = vmatmul.mubr.msk.bf16.gmra.mrb[68].mxu1 %vm717_vm5, %v20974_v6 }
 0x5f8   : > { %13191 = vmatprep.mubr.msk.bf16.mxu1 %vm717_vm5, %v20975_v31 }
 0x5ff   : > { %13192 = vmatmul.mubr.msk.bf16.gmra.mrb[72].mxu1 %vm717_vm5, %v20976_v38 }
 0x600   : > { %13195 = vmatprep.mubr.msk.bf16.mxu1 %vm717_vm5, %v20977_v51 }
 0x607   : > { %13196 = vmatmul.mubr.msk.bf16.gmra.mrb[76].mxu1 %vm717_vm5, %v20978_v49 }
 0x608   : > { %13199 = vmatprep.mubr.msk.bf16.mxu1 %vm717_vm5, %v20979_v33 }
 0x60f   : > { %13200 = vmatmul.mubr.msk.bf16.gmra.mrb[80].mxu1 %vm717_vm5, %v20980_v3  ;;  %v20987_v3 = vpack.c.bf16 %v18496_v36, %v20986_v57  ;;  %v14827_v36 = vld [vmem:[%s20175_s10 + $0x28] sm:$0xff]  }
 0x610   : > { %13203 = vmatprep.mubr.msk.bf16.mxu1 %vm717_vm5, %v20981_v41  ;;  %v20988_v41 = vld [vmem:[#allocation32_spill] sm:$0xff] }
 0x617   : > { %13204 = vmatmul.mubr.msk.bf16.gmra.mrb[84].mxu1 %vm717_vm5, %v20982_v29  ;;  %v14826_v29 = vld [vmem:[%s20175_s10 + $0x20] sm:$0xff]  }
 0x618   : > { %13207 = vmatprep.mubr.msk.bf16.mxu1 %vm717_vm5, %v20983_v8 }
 0x61f   : > { %13208 = vmatmul.mubr.msk.bf16.gmra.mrb[88].mxu1 %vm717_vm5, %v20984_v45  ;;  %v20989_v45 = vld [vmem:[#allocation64_spill] sm:$0xff] }
 0x620   : > { %13211 = vmatprep.mubr.msk.bf16.mxu1 %vm717_vm5, %v20985_v16 }
 0x627   : > { %13212 = vmatmul.mubr.msk.bf16.gmra.mrb[92].mxu1 %vm717_vm5, %v18479_v13 }
 0x628   : > { %13217 = vmatprep.mubr.msk.bf16.mxu1 %vm717_vm5, %v20987_v3 }
 0x62f   : > { %13218 = vmatmul.mubr.msk.bf16.vlgmr.msra.gmra.mrb[32].mxu1 %vm717_vm5, %v20988_v41 }
 0x630   : > { %13282 = vmatpush3.bf16.msra.mxu1 %v18528_v30  ;;  %13221 = vmatprep.mubr.msk.bf16.mxu1 %vm717_vm5, %v20989_v45  ;;  %v5817_v30 = vld [vmem:[#allocation3 + $0x200] sm:$0xff] }
 0x631   : > { %13347 = vmatprep.subr.bf16.mxu1 %v14826_v29  ;;  %v7820_v57 = vrot.slane %v5817_v30, 7  ;;  %v20993_v30 = vld [vmem:[#allocation91_spill] sm:$0xff] }
 0x637   : > { %13222 = vmatmul.mubr.msk.bf16.gmra.mrb[36].mxu1 %vm717_vm5, %v18530_v60 }
 0x638   : > { %13225 = vmatprep.mubr.msk.bf16.mxu1 %vm717_vm5, %v18538_v0 }
 0x63f   : > { %13226 = vmatmul.mubr.msk.bf16.gmra.mrb[40].mxu1 %vm717_vm5, %v18540_v27 }
 0x640   : > { %13229 = vmatprep.mubr.msk.bf16.mxu1 %vm717_vm5, %v18552_v39 }
 0x647   : > { %13230 = vmatmul.mubr.msk.bf16.gmra.mrb[44].mxu1 %vm717_vm5, %v18567_v9 }
 0x648   : > { %13233 = vmatprep.mubr.msk.bf16.mxu1 %vm717_vm5, %v18588_v62 }
 0x64f   : > { %13234 = vmatmul.mubr.msk.bf16.gmra.mrb[48].mxu1 %vm717_vm5, %v18596_v17 }
 0x650   : > { %13237 = vmatprep.mubr.msk.bf16.mxu1 %vm717_vm5, %v18598_v25 }
 0x657   : > { %13238 = vmatmul.mubr.msk.bf16.gmra.mrb[52].mxu1 %vm717_vm5, %v18608_v35 }
 0x658   : > { %13241 = vmatprep.mubr.msk.bf16.mxu1 %vm717_vm5, %v18618_v7 }
 0x65f   : > { %13242 = vmatmul.mubr.msk.bf16.gmra.mrb[56].mxu1 %vm717_vm5, %v18640_v61 }
 0x660   : > { %13245 = vmatprep.mubr.msk.bf16.mxu1 %vm717_vm5, %v18650_v37 }
 0x667   : > { %13246 = vmatmul.mubr.msk.bf16.gmra.mrb[60].mxu1 %vm717_vm5, %v18652_v22 }
 0x668   : > { %13249 = vmatprep.mubr.msk.bf16.mxu1 %vm717_vm5, %v7340_v52  ;;  %v7821_v52 = vrot.slane %v18796_v1, 7  ;;  %v20991_v1 = vld [vmem:[#allocation87_spill] sm:$0xff] }
 0x66f   : > { %13250 = vmatmul.mubr.msk.bf16.gmra.mrb[64].mxu1 %vm717_vm5, %v18662_v12 }
 0x670   : > { %13253 = vmatprep.mubr.msk.bf16.mxu1 %vm717_vm5, %v18672_v21 }
 0x677   : > { %13254 = vmatmul.mubr.msk.bf16.gmra.mrb[68].mxu1 %vm717_vm5, %v18692_v56 }
 0x678   : > { %13257 = vmatprep.mubr.msk.bf16.mxu1 %vm717_vm5, %v18700_v26 }
 0x67f   : > { %13258 = vmatmul.mubr.msk.bf16.gmra.mrb[72].mxu1 %vm717_vm5, %v18702_v34 }
 0x680   : > { %13261 = vmatprep.mubr.msk.bf16.mxu1 %vm717_vm5, %v18712_v46 }
 0x687   : > { %13262 = vmatmul.mubr.msk.bf16.gmra.mrb[76].mxu1 %vm717_vm5, %v18724_v20 }
 0x688   : > { %13265 = vmatprep.mubr.msk.bf16.mxu1 %vm717_vm5, %v18746_v48 }
 0x68f   : > { %13266 = vmatmul.mubr.msk.bf16.gmra.mrb[80].mxu1 %vm717_vm5, %v18754_v5 }
 0x690   : > { %13269 = vmatprep.mubr.msk.bf16.mxu1 %vm717_vm5, %v18756_v54 }
 0x697   : > { %13270 = vmatmul.mubr.msk.bf16.gmra.mrb[84].mxu1 %vm717_vm5, %v18766_v19 }
 0x698   : > { %13273 = vmatprep.mubr.msk.bf16.mxu1 %vm717_vm5, %v18776_v11 }
 0x69f   : > { %13274 = vmatmul.mubr.msk.bf16.gmra.mrb[88].mxu1 %vm717_vm5, %v18788_v42 }
 0x6a0   : > { %13277 = vmatprep.mubr.msk.bf16.mxu1 %vm717_vm5, %v18802_v50 }
 0x6a7   : > { %13278 = vmatmul.mubr.msk.bf16.gmra.mrb[92].mxu1 %vm717_vm5, %v18804_v4 }
 0x6a8   : > { %13283 = vmatprep.mubr.msk.bf16.mxu1 %vm717_vm5, %v20869_v24  ;;  %v7823_v24 = vrot.slane %v18786_v40, 7  ;;  %v20990_v40 = vld [vmem:[#allocation85_spill] sm:$0xff] }
 0x6aa   : > { %v7824_v3 = vsel %vm1310_vm4, %v7821_v52, %v7823_v24  ;;  %v5889_v24 = vld [vmem:[#allocation3 + $0x440] sm:$0xff] }
 0x6af   : > { %13284 = vmatmul.mubr.msk.bf16.vlgmr.msra.gmra.mrb[32].mxu1 %vm717_vm5, %v20874_v47 }
 0x6b0   : > { %13348 = vmatpush3.bf16.msra.mxu1 %v14826_v29  ;;  %13287 = vmatprep.mubr.msk.bf16.mxu1 %vm717_vm5, %v20897_v55  ;;  %v7822_v29 = vsel %vm1310_vm4, %v7820_v57, %v7821_v52  ;;  %v20994_v57 = vld [vmem:[#allocation27_spill] sm:$0xff] }
 0x6b1   : > { %13413 = vmatprep.subr.bf16.mxu1 %v14827_v36  ;;  %v7828_v52 = vrot.slane %v20994_v57, 7  ;;  %v14828_v57 = vld [vmem:[%s20175_s10 + $0x30] sm:$0xff]  }
 0x6b7   : > { %13288 = vmatmul.mubr.msk.bf16.gmra.mrb[36].mxu1 %vm717_vm5, %v20900_v59 }
 0x6b8   : > { %13291 = vmatprep.mubr.msk.bf16.mxu1 %vm717_vm5, %v20926_v63 }
 0x6bf   : > { %13292 = vmatmul.mubr.msk.bf16.gmra.mrb[40].mxu1 %vm717_vm5, %v20929_v32 }
 0x6c0   : > { %13295 = vmatprep.mubr.msk.bf16.mxu1 %vm717_vm5, %v20955_v44 }
 0x6c7   : > { %13296 = vmatmul.mubr.msk.bf16.gmra.mrb[44].mxu1 %vm717_vm5, %v20957_v28 }
 0x6c8   : > { %13299 = vmatprep.mubr.msk.bf16.mxu1 %vm717_vm5, %v20962_v58 }
 0x6cf   : > { %13300 = vmatmul.mubr.msk.bf16.gmra.mrb[48].mxu1 %vm717_vm5, %v20963_v53 }
 0x6d0   : > { %13303 = vmatprep.mubr.msk.bf16.mxu1 %vm717_vm5, %v20964_v10 }
 0x6d7   : > { %13304 = vmatmul.mubr.msk.bf16.gmra.mrb[52].mxu1 %vm717_vm5, %v20965_v43  ;;  %v18986_v43 = vpack.c.bf16 %v7824_v3, %v7822_v29  ;;  %v7825_v3 = vrot.slane %v5889_v24, 7  ;;  %v20995_v29 = vld [vmem:[#allocation65_spill] sm:$0xff]  ;;  %v20998_v24 = vld [vmem:[#allocation43_spill] sm:$0xff] }
 0x6d8   : > { %13307 = vmatprep.mubr.msk.bf16.mxu1 %vm717_vm5, %v20966_v23 }
 0x6df   : > { %13308 = vmatmul.mubr.msk.bf16.gmra.mrb[56].mxu1 %vm717_vm5, %v20967_v18 }
 0x6e0   : > { %13311 = vmatprep.mubr.msk.bf16.mxu1 %vm717_vm5, %v20968_v14 }
 0x6e7   : > { %13312 = vmatmul.mubr.msk.bf16.gmra.mrb[60].mxu1 %vm717_vm5, %v18986_v43 }
 0x6e8   : > { %13315 = vmatprep.mubr.msk.bf16.mxu1 %vm717_vm5, %v20972_v15  ;;  %v20992_v15 = vld [vmem:[#allocation88_spill] sm:$0xff] }
 0x6ef   : > { %13316 = vmatmul.mubr.msk.bf16.gmra.mrb[64].mxu1 %vm717_vm5, %v20973_v2 }
 0x6f0   : > { %13319 = vmatprep.mubr.msk.bf16.mxu1 %vm717_vm5, %v20974_v6 }
 0x6f7   : > { %13320 = vmatmul.mubr.msk.bf16.gmra.mrb[68].mxu1 %vm717_vm5, %v20975_v31 }
 0x6f8   : > { %13323 = vmatprep.mubr.msk.bf16.mxu1 %vm717_vm5, %v20976_v38 }
 0x6ff   : > { %13324 = vmatmul.mubr.msk.bf16.gmra.mrb[72].mxu1 %vm717_vm5, %v20977_v51 }
 0x700   : > { %13327 = vmatprep.mubr.msk.bf16.mxu1 %vm717_vm5, %v20978_v49 }
 0x707   : > { %13328 = vmatmul.mubr.msk.bf16.gmra.mrb[76].mxu1 %vm717_vm5, %v20979_v33 }
 0x708   : > { %13331 = vmatprep.mubr.msk.bf16.mxu1 %vm717_vm5, %v20990_v40 }
 0x70f   : > { %13332 = vmatmul.mubr.msk.bf16.gmra.mrb[80].mxu1 %vm717_vm5, %v20991_v1  ;;  %v7826_v1 = vrot.slane %v20995_v29, 7  ;;  %v21006_v29 = vld [vmem:[#allocation21_spill] sm:$0xff] }
 0x710   : > { %13335 = vmatprep.mubr.msk.bf16.mxu1 %vm717_vm5, %v20992_v15 }
 0x711   : > { %v7829_v15 = vsel %vm1310_vm4, %v7826_v1, %v7828_v52  ;;  %v7827_v40 = vsel %vm1310_vm4, %v7825_v3, %v7826_v1  ;;  %v21000_v1 = vld [vmem:[#allocation48_spill] sm:$0xff]  ;;  %v21003_v52 = vld [vmem:[#allocation54_spill] sm:$0xff] }
 0x712   : > { %v21005_v3 = vld [vmem:[#allocation12_spill] sm:$0xff] }
 0x717   : > { %13336 = vmatmul.mubr.msk.bf16.gmra.mrb[84].mxu1 %vm717_vm5, %v20983_v8  ;;  %v19024_v8 = vpack.c.bf16 %v7829_v15, %v7827_v40  ;;  %v20999_v40 = vld [vmem:[#allocation42_spill] sm:$0xff]  ;;  %v21001_v15 = vld [vmem:[#allocation47_spill] sm:$0xff] }
 0x718   : > { %13339 = vmatprep.mubr.msk.bf16.mxu1 %vm717_vm5, %v20993_v30  ;;  %v20996_v30 = vld [vmem:[#allocation31_spill] sm:$0xff] }
 0x71f   : > { %13340 = vmatmul.mubr.msk.bf16.gmra.mrb[88].mxu1 %vm717_vm5, %v20985_v16 }
 0x720   : > { %13343 = vmatprep.mubr.msk.bf16.mxu1 %vm717_vm5, %v18479_v13  ;;  %v20997_v13 = vld [vmem:[#allocation30_spill] sm:$0xff] }
 0x727   : > { %13344 = vmatmul.mubr.msk.bf16.gmra.mrb[92].mxu1 %vm717_vm5, %v19024_v8 }
 0x728   : > { %13349 = vmatprep.mubr.msk.bf16.mxu1 %vm717_vm5, %v20996_v30  ;;  %v21002_v30 = vld [vmem:[#allocation55_spill] sm:$0xff] }
 0x72f   : > { %13350 = vmatmul.mubr.msk.bf16.vlgmr.msra.gmra.mrb[32].mxu1 %vm717_vm5, %v20997_v13 }
 0x730   : > { %13414 = vmatpush3.bf16.msra.mxu1 %v14827_v36  ;;  %13353 = vmatprep.mubr.msk.bf16.mxu1 %vm717_vm5, %v20998_v24  ;;  %v21004_v36 = vld [vmem:[#allocation13_spill] sm:$0xff] }
 0x731   : > { %13479 = vmatprep.subr.bf16.mxu1 %v14828_v57 }
 0x737   : > { %13354 = vmatmul.mubr.msk.bf16.gmra.mrb[36].mxu1 %vm717_vm5, %v20999_v40  ;;  %v21007_v40 = vld [vmem:[#allocation20_spill] sm:$0xff] }
 0x738   : > { %13357 = vmatprep.mubr.msk.bf16.mxu1 %vm717_vm5, %v21000_v1  ;;  %v21008_v1 = vld [vmem:[#allocation23_spill] sm:$0xff] }
 0x73f   : > { %13358 = vmatmul.mubr.msk.bf16.gmra.mrb[40].mxu1 %vm717_vm5, %v21001_v15  ;;  %v21009_v15 = vld [vmem:[#allocation51_spill] sm:$0xff] }
 0x740   : > { %13361 = vmatprep.mubr.msk.bf16.mxu1 %vm717_vm5, %v21002_v30  ;;  %v21010_v30 = vld [vmem:[#allocation71_spill] sm:$0xff] }
 0x747   : > { %13362 = vmatmul.mubr.msk.bf16.gmra.mrb[44].mxu1 %vm717_vm5, %v21003_v52  ;;  %v21011_v52 = vld [vmem:[#allocation22_spill] sm:$0xff] }
 0x748   : > { %13365 = vmatprep.mubr.msk.bf16.mxu1 %vm717_vm5, %v21004_v36  ;;  %v21012_v36 = vld [vmem:[#allocation76_spill] sm:$0xff] }
 0x74f   : > { %13366 = vmatmul.mubr.msk.bf16.gmra.mrb[48].mxu1 %vm717_vm5, %v21005_v3  ;;  %v21013_v3 = vld [vmem:[#allocation77_spill] sm:$0xff] }
 0x750   : > { %13369 = vmatprep.mubr.msk.bf16.mxu1 %vm717_vm5, %v21006_v29  ;;  %v21014_v29 = vld [vmem:[#allocation80_spill] sm:$0xff] }
 0x757   : > { %13370 = vmatmul.mubr.msk.bf16.gmra.mrb[52].mxu1 %vm717_vm5, %v21007_v40  ;;  %v21015_v40 = vld [vmem:[#allocation81_spill] sm:$0xff] }
 0x758   : > { %13373 = vmatprep.mubr.msk.bf16.mxu1 %vm717_vm5, %v21008_v1  ;;  %v21016_v1 = vld [vmem:[#allocation82_spill] sm:$0xff] }
 0x75f   : > { %13374 = vmatmul.mubr.msk.bf16.gmra.mrb[56].mxu1 %vm717_vm5, %v21009_v15  ;;  %v21017_v15 = vld [vmem:[#allocation83_spill] sm:$0xff] }
 0x760   : > { %13377 = vmatprep.mubr.msk.bf16.mxu1 %vm717_vm5, %v21010_v30  ;;  %v21018_v30 = vld [vmem:[#allocation14_spill] sm:$0xff] }
 0x767   : > { %13378 = vmatmul.mubr.msk.bf16.gmra.mrb[60].mxu1 %vm717_vm5, %v21011_v52  ;;  %v21019_v52 = vld [vmem:[#allocation59_spill] sm:$0xff] }
 0x768   : > { %13381 = vmatprep.mubr.msk.bf16.mxu1 %vm717_vm5, %v21012_v36  ;;  %v21020_v36 = vld [vmem:[#allocation18_spill] sm:$0xff] }
 0x76f   : > { %13382 = vmatmul.mubr.msk.bf16.gmra.mrb[64].mxu1 %vm717_vm5, %v21013_v3  ;;  %v21021_v3 = vld [vmem:[#allocation19_spill] sm:$0xff] }
 0x770   : > { %13385 = vmatprep.mubr.msk.bf16.mxu1 %vm717_vm5, %v21014_v29  ;;  %v21022_v29 = vld [vmem:[#allocation37_spill] sm:$0xff] }
 0x777   : > { %13386 = vmatmul.mubr.msk.bf16.gmra.mrb[68].mxu1 %vm717_vm5, %v21015_v40  ;;  %v21023_v40 = vld [vmem:[#allocation39_spill] sm:$0xff] }
 0x778   : > { %13389 = vmatprep.mubr.msk.bf16.mxu1 %vm717_vm5, %v21016_v1  ;;  %v21024_v1 = vld [vmem:[#allocation84_spill] sm:$0xff] }
 0x77f   : > { %13390 = vmatmul.mubr.msk.bf16.gmra.mrb[72].mxu1 %vm717_vm5, %v21017_v15  ;;  %v21025_v15 = vld [vmem:[#allocation61_spill] sm:$0xff] }
 0x780   : > { %13393 = vmatprep.mubr.msk.bf16.mxu1 %vm717_vm5, %v21018_v30  ;;  %v21026_v30 = vld [vmem:[#allocation89_spill] sm:$0xff] }
 0x787   : > { %13394 = vmatmul.mubr.msk.bf16.gmra.mrb[76].mxu1 %vm717_vm5, %v21019_v52  ;;  %v21027_v52 = vld [vmem:[#allocation34_spill] sm:$0xff] }
 0x788   : > { %13397 = vmatprep.mubr.msk.bf16.mxu1 %vm717_vm5, %v21020_v36 }
 0x78f   : > { %13398 = vmatmul.mubr.msk.bf16.gmra.mrb[80].mxu1 %vm717_vm5, %v21021_v3 }
 0x790   : > { %13401 = vmatprep.mubr.msk.bf16.mxu1 %vm717_vm5, %v21022_v29  ;;  %v14829_v29 = vld [vmem:[%s20175_s10 + $0x38] sm:$0xff]  }
 0x797   : > { %13402 = vmatmul.mubr.msk.bf16.gmra.mrb[84].mxu1 %vm717_vm5, %v21023_v40 }
 0x798   : > { %13405 = vmatprep.mubr.msk.bf16.mxu1 %vm717_vm5, %v21024_v1 }
 0x79f   : > { %13406 = vmatmul.mubr.msk.bf16.gmra.mrb[88].mxu1 %vm717_vm5, %v21025_v15 }
 0x7a0   : > { %13409 = vmatprep.mubr.msk.bf16.mxu1 %vm717_vm5, %v21026_v30 }
 0x7a7   : > { %13410 = vmatmul.mubr.msk.bf16.gmra.mrb[92].mxu1 %vm717_vm5, %v21027_v52 }
 0x7a8   : > { %13415 = vmatprep.mubr.msk.bf16.mxu1 %vm717_vm5, %v20988_v41  ;;  %v21028_v41 = vld [vmem:[#allocation36_spill] sm:$0xff] }
 0x7af   : > { %13416 = vmatmul.mubr.msk.bf16.vlgmr.msra.gmra.mrb[32].mxu1 %vm717_vm5, %v20989_v45 }
 0x7b0   : > { %13480 = vmatpush3.bf16.msra.mxu1 %v14828_v57  ;;  %13419 = vmatprep.mubr.msk.bf16.mxu1 %vm717_vm5, %v18530_v60  ;;  %v10294_v57 = vld [vmem:[%s20176_s11] sm:$0xf] }
 0x7b1   : > { %13545 = vmatprep.subr.bf16.mxu1 %v14829_v29  ;;  %14779 = vmatprep.subr.msk.bf16.mxu0 %vm1698_vm0, %v10294_v57 }
 0x7b7   : > { %13420 = vmatmul.mubr.msk.bf16.gmra.mrb[36].mxu1 %vm717_vm5, %v18538_v0 }
 0x7b8   : > { %13423 = vmatprep.mubr.msk.bf16.mxu1 %vm717_vm5, %v18540_v27 }
 0x7bf   : > { %13424 = vmatmul.mubr.msk.bf16.gmra.mrb[40].mxu1 %vm717_vm5, %v18552_v39 }
 0x7c0   : > { %13427 = vmatprep.mubr.msk.bf16.mxu1 %vm717_vm5, %v18567_v9 }
 0x7c7   : > { %13428 = vmatmul.mubr.msk.bf16.gmra.mrb[44].mxu1 %vm717_vm5, %v18588_v62 }
 0x7c8   : > { %13431 = vmatprep.mubr.msk.bf16.mxu1 %vm717_vm5, %v18596_v17 }
 0x7cf   : > { %13432 = vmatmul.mubr.msk.bf16.gmra.mrb[48].mxu1 %vm717_vm5, %v18598_v25 }
 0x7d0   : > { %13435 = vmatprep.mubr.msk.bf16.mxu1 %vm717_vm5, %v18608_v35 }
 0x7d7   : > { %13436 = vmatmul.mubr.msk.bf16.gmra.mrb[52].mxu1 %vm717_vm5, %v18618_v7 }
 0x7d8   : > { %13439 = vmatprep.mubr.msk.bf16.mxu1 %vm717_vm5, %v18640_v61 }
 0x7df   : > { %13440 = vmatmul.mubr.msk.bf16.gmra.mrb[56].mxu1 %vm717_vm5, %v18650_v37 }
 0x7e0   : > { %13443 = vmatprep.mubr.msk.bf16.mxu1 %vm717_vm5, %v18652_v22 }
 0x7e7   : > { %13444 = vmatmul.mubr.msk.bf16.gmra.mrb[60].mxu1 %vm717_vm5, %v21028_v41 }
 0x7e8   : > { %13447 = vmatprep.mubr.msk.bf16.mxu1 %vm717_vm5, %v18662_v12  ;;  %v21029_v12 = vld [vmem:[#allocation45_spill] sm:$0xff] }
 0x7ef   : > { %13448 = vmatmul.mubr.msk.bf16.gmra.mrb[64].mxu1 %vm717_vm5, %v18672_v21 }
 0x7f0   : > { %13451 = vmatprep.mubr.msk.bf16.mxu1 %vm717_vm5, %v18692_v56 }
 0x7f7   : > { %13452 = vmatmul.mubr.msk.bf16.gmra.mrb[68].mxu1 %vm717_vm5, %v18700_v26 }
 0x7f8   : > { %13455 = vmatprep.mubr.msk.bf16.mxu1 %vm717_vm5, %v18702_v34 }
 0x7ff   : > { %13456 = vmatmul.mubr.msk.bf16.gmra.mrb[72].mxu1 %vm717_vm5, %v18712_v46 }
 0x800   : > { %13459 = vmatprep.mubr.msk.bf16.mxu1 %vm717_vm5, %v18724_v20 }
 0x807   : > { %13460 = vmatmul.mubr.msk.bf16.gmra.mrb[76].mxu1 %vm717_vm5, %v18746_v48 }
 0x808   : > { %13463 = vmatprep.mubr.msk.bf16.mxu1 %vm717_vm5, %v18754_v5 }
 0x80f   : > { %13464 = vmatmul.mubr.msk.bf16.gmra.mrb[80].mxu1 %vm717_vm5, %v18756_v54 }
 0x810   : > { %13467 = vmatprep.mubr.msk.bf16.mxu1 %vm717_vm5, %v18766_v19 }
 0x817   : > { %13468 = vmatmul.mubr.msk.bf16.gmra.mrb[84].mxu1 %vm717_vm5, %v18776_v11 }
 0x818   : > { %13471 = vmatprep.mubr.msk.bf16.mxu1 %vm717_vm5, %v18788_v42  ;;  %v19171_v42 = vld [vmem:[%s20175_s10 + $0x40] sm:$0xff]  }
 0x81f   : > { %13472 = vmatmul.mubr.msk.bf16.gmra.mrb[88].mxu1 %vm717_vm5, %v18802_v50 }
 0x820   : > { %13475 = vmatprep.mubr.msk.bf16.mxu1 %vm717_vm5, %v18804_v4 }
 0x827   : > { %13476 = vmatmul.mubr.msk.bf16.gmra.mrb[92].mxu1 %vm717_vm5, %v21029_v12 }
 0x828   : > { %13481 = vmatprep.mubr.msk.bf16.mxu1 %vm717_vm5, %v20874_v47  ;;  %v10392_v47 = vsel %vm1698_vm0, %v10294_v57, 0  ;;  %v21036_v57 = vld [vmem:[#allocation28_spill] sm:$0xff] }
 0x829   : > { %13678 = vmatpush3.bf16.msra.mxu0 %v10392_v47 }
 0x82f   : > { %13482 = vmatmul.mubr.msk.bf16.vlgmr.msra.gmra.mrb[32].mxu1 %vm717_vm5, %v20897_v55  ;;  %v21030_v55 = vld [vmem:[#allocation69_spill] sm:$0xff] }
 0x830   : > { %13546 = vmatpush3.bf16.msra.mxu1 %v14829_v29  ;;  %13485 = vmatprep.mubr.msk.bf16.mxu1 %vm717_vm5, %v20900_v59  ;;  %v5821_v59 = vld [vmem:[#allocation3 + $0x220] sm:$0xff] }
 0x831   : > { %13611 = vmatprep.subr.bf16.mxu1 %v19171_v42 }
 0x837   : > { %13486 = vmatmul.mubr.msk.bf16.gmra.mrb[36].mxu1 %vm717_vm5, %v20926_v63  ;;  %v19199_v63 = vld [vmem:[#allocation3 + $0x228] sm:$0xff] }
 0x838   : > { %13489 = vmatprep.mubr.msk.bf16.mxu1 %vm717_vm5, %v20929_v32  ;;  %v19201_v32 = vld [vmem:[#allocation3 + $0x230] sm:$0xff] }
 0x83f   : > { %13490 = vmatmul.mubr.msk.bf16.gmra.mrb[40].mxu1 %vm717_vm5, %v20955_v44  ;;  %v8966_v44 = vrot.slane %v5821_v59, 7  ;;  %v19260_v59 = vld [vmem:[%s19257_s18] ss:$0 sm:$0xff] }
 0x840   : > { %13493 = vmatprep.mubr.msk.bf16.mxu1 %vm717_vm5, %v20957_v28  ;;  %v8967_v28 = vrot.slane %v19199_v63, 7 }
 0x847   : > { %13494 = vmatmul.mubr.msk.bf16.gmra.mrb[44].mxu1 %vm717_vm5, %v20962_v58  ;;  %v8969_v58 = vrot.slane %v19201_v32, 7 }
 0x848   : > { %13497 = vmatprep.mubr.msk.bf16.mxu1 %vm717_vm5, %v20963_v53  ;;  %v8968_v53 = vsel %vm1310_vm4, %v8966_v44, %v8967_v28 }
 0x84f   : > { %13498 = vmatmul.mubr.msk.bf16.gmra.mrb[48].mxu1 %vm717_vm5, %v20964_v10  ;;  %v8970_v10 = vsel %vm1310_vm4, %v8967_v28, %v8969_v58  ;;  %v14839_v28 = vld [vmem:[%s15416_s19 + $0x8] sm:$0xff] }
 0x850   : > { %13501 = vmatprep.mubr.msk.bf16.mxu1 %vm717_vm5, %v21030_v55  ;;  %v10199_v58 = vmul.f32 %v14839_v28, %v19260_v59  ;;  %v14847_v28 = vld [vmem:[%s15416_s19 + $0x48] sm:$0xff] }
 0x857   : > { %13502 = vmatmul.mubr.msk.bf16.gmra.mrb[52].mxu1 %vm717_vm5, %v20966_v23  ;;  %v8980_v23 = vpack.c.bf16 %v8970_v10, %v8968_v53  ;;  %v14840_v53 = vld [vmem:[%s15416_s19 + $0x10] sm:$0xff]  ;;  %v14841_v10 = vld [vmem:[%s15416_s19 + $0x18] sm:$0xff] }
 0x858   : > { %13505 = vmatprep.mubr.msk.bf16.mxu1 %vm717_vm5, %v20967_v18  ;;  %v21032_v18 = vld [vmem:[#allocation87_spill] sm:$0xff] }
 0x85f   : > { %13506 = vmatmul.mubr.msk.bf16.gmra.mrb[56].mxu1 %vm717_vm5, %v20968_v14  ;;  %v21033_v14 = vld [vmem:[#allocation88_spill] sm:$0xff] }
 0x860   : > { %13509 = vmatprep.mubr.msk.bf16.mxu1 %vm717_vm5, %v18986_v43  ;;  %v21031_v43 = vld [vmem:[#allocation85_spill] sm:$0xff] }
 0x867   : > { %13510 = vmatmul.mubr.msk.bf16.gmra.mrb[60].mxu1 %vm717_vm5, %v8980_v23  ;;  %v10201_v23 = vmul.f32 %v14841_v10, %v19260_v59  ;;  %v14849_v10 = vld [vmem:[%s15416_s19 + $0x58] sm:$0xff] }
 0x868   : > { %13513 = vmatprep.mubr.msk.bf16.mxu1 %vm717_vm5, %v20973_v2  ;;  %v21035_v2 = vld [vmem:[#allocation91_spill] sm:$0xff] }
 0x86f   : > { %13514 = vmatmul.mubr.msk.bf16.gmra.mrb[64].mxu1 %vm717_vm5, %v20974_v6  ;;  %v5893_v6 = vld [vmem:[#allocation3 + $0x460] sm:$0xff] }
 0x870   : > { %13517 = vmatprep.mubr.msk.bf16.mxu1 %vm717_vm5, %v20975_v31  ;;  %v21034_v31 = vld [vmem:[#allocation90_spill] sm:$0xff] }
 0x877   : > { %13518 = vmatmul.mubr.msk.bf16.gmra.mrb[68].mxu1 %vm717_vm5, %v20976_v38  ;;  %v19238_v38 = vld [vmem:[#allocation3 + $0x468] sm:$0xff] }
 0x878   : > { %13521 = vmatprep.mubr.msk.bf16.mxu1 %vm717_vm5, %v20977_v51  ;;  %v19240_v51 = vld [vmem:[#allocation3 + $0x470] sm:$0xff] }
 0x879   : > { %v8974_v29 = vrot.slane %v19240_v51, 7 }
 0x87f   : > { %13522 = vmatmul.mubr.msk.bf16.gmra.mrb[72].mxu1 %vm717_vm5, %v20978_v49  ;;  %v8971_v49 = vrot.slane %v5893_v6, 7  ;;  %v14843_v6 = vld [vmem:[%s15416_s19 + $0x28] sm:$0xff] }
 0x880   : > { %13525 = vmatprep.mubr.msk.bf16.mxu1 %vm717_vm5, %v20979_v33  ;;  %v8972_v33 = vrot.slane %v19238_v38, 7 }
 0x882   : > { %v8975_v47 = vsel %vm1310_vm4, %v8972_v33, %v8974_v29  ;;  %v14845_v29 = vld [vmem:[%s15416_s19 + $0x38] sm:$0xff] }
 0x887   : > { %13526 = vmatmul.mubr.msk.bf16.gmra.mrb[76].mxu1 %vm717_vm5, %v21031_v43 }
 0x888   : > { %13529 = vmatprep.mubr.msk.bf16.mxu1 %vm717_vm5, %v21032_v18 }
 0x88f   : > { %13530 = vmatmul.mubr.msk.bf16.gmra.mrb[80].mxu1 %vm717_vm5, %v21033_v14  ;;  %v21037_v14 = vld [vmem:[#allocation42_spill] sm:$0xff] }
 0x890   : > { %13533 = vmatprep.mubr.msk.bf16.mxu1 %vm717_vm5, %v21034_v31  ;;  %v14842_v31 = vld [vmem:[%s15416_s19 + $0x20] sm:$0xff] }
 0x897   : > { %13534 = vmatmul.mubr.msk.bf16.gmra.mrb[84].mxu1 %vm717_vm5, %v21035_v2  ;;  %v10202_v2 = vmul.f32 %v14842_v31, %v19260_v59  ;;  %v21041_v31 = vld [vmem:[#allocation54_spill] sm:$0xff] }
 0x898   : > { %13537 = vmatprep.mubr.msk.bf16.mxu1 %vm717_vm5, %v20985_v16  ;;  %v8973_v16 = vsel %vm1310_vm4, %v8971_v49, %v8972_v33  ;;  %v10203_v49 = vmul.f32 %v14843_v6, %v19260_v59  ;;  %v14844_v33 = vld [vmem:[%s15416_s19 + $0x30] sm:$0xff] }
 0x899   : > { %v8981_v55 = vpack.c.bf16 %v8975_v47, %v8973_v16  ;;  %v21038_v47 = vld [vmem:[#allocation48_spill] sm:$0xff] }
 0x89f   : > { %13538 = vmatmul.mubr.msk.bf16.gmra.mrb[88].mxu1 %vm717_vm5, %v21036_v57  ;;  %v10205_v57 = vmul.f32 %v14845_v29, %v19260_v59 }
 0x8a0   : > { %13541 = vmatprep.mubr.msk.bf16.mxu1 %vm717_vm5, %v19024_v8  ;;  %v14838_v8 = vld [vmem:[%s15416_s19] sm:$0xff] }
 0x8a1   : > { %v10198_v44 = vmul.f32 %v14838_v8, %v19260_v59  ;;  %v14846_v8 = vld [vmem:[%s15416_s19 + $0x40] sm:$0xff] }
 0x8a3   : > { %v10262_v43 = vpack.c.bf16 %v10199_v58, %v10198_v44  ;;  %v10206_v44 = vmul.f32 %v14846_v8, %v19260_v59  ;;  %v10207_v58 = vmul.f32 %v14847_v28, %v19260_v59  ;;  %v21043_v8 = vld [vmem:[#allocation12_spill] sm:$0xff] }
 0x8a5   : > { %13679 = vmatprep.mubr.msk.bf16.mxu0 %vm571_vm1, %v10262_v43  ;;  %v10266_v43 = vpack.c.bf16 %v10207_v58, %v10206_v44  ;;  %v14854_v44 = vld [vmem:[%s15416_s19 + $0x80] sm:$0xff]  ;;  %v14855_v58 = vld [vmem:[%s15416_s19 + $0x88] sm:$0xff] }
 0x8a6   : > { %v10214_v28 = vmul.f32 %v14854_v44, %v19260_v59  ;;  %v21047_v44 = vld [vmem:[#allocation51_spill] sm:$0xff] }
 0x8a7   : > { %13542 = vmatmul.mubr.msk.bf16.gmra.mrb[92].mxu1 %vm717_vm5, %v8981_v55  ;;  %v21039_v55 = vld [vmem:[#allocation47_spill] sm:$0xff] }
 0x8a8   : > { %13547 = vmatprep.mubr.msk.bf16.mxu1 %vm717_vm5, %v20997_v13  ;;  %v10200_v13 = vmul.f32 %v14840_v53, %v19260_v59  ;;  %v14848_v53 = vld [vmem:[%s15416_s19 + $0x50] sm:$0xff] }
 0x8aa   : > { %v10263_v18 = vpack.c.bf16 %v10201_v23, %v10200_v13  ;;  %v10208_v13 = vmul.f32 %v14848_v53, %v19260_v59  ;;  %v10209_v23 = vmul.f32 %v14849_v10, %v19260_v59  ;;  %v10215_v53 = vmul.f32 %v14855_v58, %v19260_v59 }
 0x8ac   : > { %13680 = vmatmul.mubr.msk.bf16.vlgmr.msra.gmra.mrb[64].mxu0 %vm571_vm1, %v10263_v18  ;;  %v10267_v18 = vpack.c.bf16 %v10209_v23, %v10208_v13  ;;  %v14856_v13 = vld [vmem:[%s15416_s19 + $0x90] sm:$0xff]  ;;  %v14857_v23 = vld [vmem:[%s15416_s19 + $0x98] sm:$0xff] }
 0x8ad   : > { %v10216_v10 = vmul.f32 %v14856_v13, %v19260_v59 }
 0x8af   : > { %13548 = vmatmul.mubr.msk.bf16.vlgmr.msra.gmra.mrb[32].mxu1 %vm717_vm5, %v20998_v24  ;;  %v10204_v24 = vmul.f32 %v14844_v33, %v19260_v59 }
 0x8b0   : > { %13612 = vmatpush3.bf16.msra.mxu1 %v19171_v42  ;;  %13551 = vmatprep.mubr.msk.bf16.mxu1 %vm717_vm5, %v21037_v14  ;;  %v10264_v42 = vpack.c.bf16 %v10203_v49, %v10202_v2  ;;  %v21040_v14 = vld [vmem:[#allocation55_spill] sm:$0xff]  ;;  %v14851_v49 = vld [vmem:[%s15416_s19 + $0x68] sm:$0xff] }
 0x8b1   : > { %v10265_v16 = vpack.c.bf16 %v10205_v57, %v10204_v24  ;;  %v14850_v2 = vld [vmem:[%s15416_s19 + $0x60] sm:$0xff]  ;;  %v10211_v33 = vmul.f32 %v14851_v49, %v19260_v59  ;;  %v14852_v24 = vld [vmem:[%s15416_s19 + $0x70] sm:$0xff]  ;;  %v14853_v57 = vld [vmem:[%s15416_s19 + $0x78] sm:$0xff] }
 0x8b2   : > { %13683 = vmatprep.mubr.msk.bf16.mxu0 %vm571_vm1, %v10264_v42  ;;  %v10210_v6 = vmul.f32 %v14850_v2, %v19260_v59  ;;  %v10212_v29 = vmul.f32 %v14852_v24, %v19260_v59  ;;  %v10213_v42 = vmul.f32 %v14853_v57, %v19260_v59  ;;  %v21045_v2 = vld [vmem:[#allocation20_spill] sm:$0xff] }
 0x8b4   : > { %13684 = vmatmul.mubr.msk.bf16.gmra.mrb[68].mxu0 %vm571_vm1, %v10265_v16  ;;  %v10268_v16 = vpack.c.bf16 %v10211_v33, %v10210_v6  ;;  %v14858_v6 = vld [vmem:[%s15416_s19 + $0xa0] sm:$0xff]  ;;  %v14859_v33 = vld [vmem:[%s15416_s19 + $0xa8] sm:$0xff] }
 0x8b5   : > { %13687 = vmatprep.mubr.msk.bf16.mxu0 %vm571_vm1, %v10266_v43  ;;  %v10217_v43 = vmul.f32 %v14857_v23, %v19260_v59  ;;  %v10218_v49 = vmul.f32 %v14858_v6, %v19260_v59  ;;  %v10219_v24 = vmul.f32 %v14859_v33, %v19260_v59  ;;  %v21049_v6 = vld [vmem:[#allocation22_spill] sm:$0xff] }
 0x8b7   : > { %13552 = vmatmul.mubr.msk.bf16.gmra.mrb[36].mxu1 %vm717_vm5, %v21038_v47  ;;  %v10269_v47 = vpack.c.bf16 %v10213_v42, %v10212_v29  ;;  %v14860_v29 = vld [vmem:[%s15416_s19 + $0xb0] sm:$0xff]  ;;  %v14861_v42 = vld [vmem:[%s15416_s19 + $0xb8] sm:$0xff] }
 0x8b8   : > { %13555 = vmatprep.mubr.msk.bf16.mxu1 %vm717_vm5, %v21039_v55  ;;  %v21042_v55 = vld [vmem:[#allocation13_spill] sm:$0xff]  ;;  %v10220_v57 = vmul.f32 %v14860_v29, %v19260_v59 }
 0x8bc   : > { %13688 = vmatmul.mubr.msk.bf16.gmra.mrb[72].mxu0 %vm571_vm1, %v10267_v18  ;;  %v10270_v18 = vpack.c.bf16 %v10215_v53, %v10214_v28  ;;  %v14862_v28 = vld [vmem:[%s15416_s19 + $0xc0] sm:$0xff]  ;;  %v14863_v53 = vld [vmem:[%s15416_s19 + $0xc8] sm:$0xff] }
 0x8bd   : > { %13691 = vmatprep.mubr.msk.bf16.mxu0 %vm571_vm1, %v10268_v16  ;;  %v10221_v16 = vmul.f32 %v14861_v42, %v19260_v59  ;;  %v10222_v58 = vmul.f32 %v14862_v28, %v19260_v59  ;;  %v10223_v13 = vmul.f32 %v14863_v53, %v19260_v59  ;;  %v21050_v28 = vld [vmem:[#allocation77_spill] sm:$0xff]  ;;  %v14870_v53 = vld [vmem:[%s15416_s19 + $0x100] sm:$0xff] }
 0x8bf   : > { %13556 = vmatmul.mubr.msk.bf16.gmra.mrb[40].mxu1 %vm717_vm5, %v21040_v14  ;;  %v10271_v14 = vpack.c.bf16 %v10217_v43, %v10216_v10  ;;  %v14864_v10 = vld [vmem:[%s15416_s19 + $0xd0] sm:$0xff]  ;;  %v14865_v43 = vld [vmem:[%s15416_s19 + $0xd8] sm:$0xff] }
 0x8c0   : > { %13559 = vmatprep.mubr.msk.bf16.mxu1 %vm717_vm5, %v21041_v31  ;;  %v21044_v31 = vld [vmem:[#allocation21_spill] sm:$0xff]  ;;  %v10224_v23 = vmul.f32 %v14864_v10, %v19260_v59 }
 0x8c4   : > { %13692 = vmatmul.mubr.msk.bf16.gmra.mrb[76].mxu0 %vm571_vm1, %v10269_v47  ;;  %v10272_v47 = vpack.c.bf16 %v10219_v24, %v10218_v49  ;;  %v14866_v49 = vld [vmem:[%s15416_s19 + $0xe0] sm:$0xff]  ;;  %v14867_v24 = vld [vmem:[%s15416_s19 + $0xe8] sm:$0xff] }
 0x8c5   : > { %13695 = vmatprep.mubr.msk.bf16.mxu0 %vm571_vm1, %v10270_v18  ;;  %v10225_v18 = vmul.f32 %v14865_v43, %v19260_v59  ;;  %v10226_v33 = vmul.f32 %v14866_v49, %v19260_v59  ;;  %v10227_v29 = vmul.f32 %v14867_v24, %v19260_v59  ;;  %v21052_v49 = vld [vmem:[#allocation81_spill] sm:$0xff] }
 0x8c7   : > { %13560 = vmatmul.mubr.msk.bf16.gmra.mrb[44].mxu1 %vm717_vm5, %v21042_v55  ;;  %v10273_v55 = vpack.c.bf16 %v10221_v16, %v10220_v57  ;;  %v14868_v57 = vld [vmem:[%s15416_s19 + $0xf0] sm:$0xff]  ;;  %v14869_v16 = vld [vmem:[%s15416_s19 + $0xf8] sm:$0xff] }
 0x8c8   : > { %13563 = vmatprep.mubr.msk.bf16.mxu1 %vm717_vm5, %v21043_v8  ;;  %v21046_v8 = vld [vmem:[#allocation23_spill] sm:$0xff]  ;;  %v10228_v42 = vmul.f32 %v14868_v57, %v19260_v59 }
 0x8cc   : > { %13696 = vmatmul.mubr.msk.bf16.gmra.mrb[80].mxu0 %vm571_vm1, %v10271_v14  ;;  %v10274_v14 = vpack.c.bf16 %v10223_v13, %v10222_v58  ;;  %v19377_v58 = vld [vmem:[%s19257_s18 + $0x1] ss:$0 sm:$0xff]  ;;  %v14871_v13 = vld [vmem:[%s15416_s19 + $0x108] sm:$0xff]  ;;  %s20112_s18 = scalar_lea.hbm %s20177_s12, %s11861_s15 }
 0x8cd   : > { %13699 = vmatprep.mubr.msk.bf16.mxu0 %vm571_vm1, %v10272_v47  ;;  %v10229_v47 = vmul.f32 %v14869_v16, %v19260_v59  ;;  %v10230_v59 = vmul.f32 %v14870_v53, %v19377_v58  ;;  %v10231_v10 = vmul.f32 %v14871_v13, %v19377_v58  ;;  %v21054_v53 = vld [vmem:[#allocation83_spill] sm:$0xff] }
 0x8cf   : > { %13564 = vmatmul.mubr.msk.bf16.gmra.mrb[48].mxu1 %vm717_vm5, %v21044_v31  ;;  %v10275_v31 = vpack.c.bf16 %v10225_v18, %v10224_v23  ;;  %v14872_v23 = vld [vmem:[%s15416_s19 + $0x110] sm:$0xff]  ;;  %v14873_v18 = vld [vmem:[%s15416_s19 + $0x118] sm:$0xff] }
 0x8d0   : > { %13567 = vmatprep.mubr.msk.bf16.mxu1 %vm717_vm5, %v21045_v2  ;;  %v21048_v2 = vld [vmem:[#allocation71_spill] sm:$0xff]  ;;  %v10232_v43 = vmul.f32 %v14872_v23, %v19377_v58 }
 0x8d4   : > { %13700 = vmatmul.mubr.msk.bf16.gmra.mrb[84].mxu0 %vm571_vm1, %v10273_v55  ;;  %v10276_v55 = vpack.c.bf16 %v10227_v29, %v10226_v33  ;;  %v14874_v33 = vld [vmem:[%s15416_s19 + $0x120] sm:$0xff]  ;;  %v14875_v29 = vld [vmem:[%s15416_s19 + $0x128] sm:$0xff] }
 0x8d5   : > { %13703 = vmatprep.mubr.msk.bf16.mxu0 %vm571_vm1, %v10274_v14  ;;  %v10233_v14 = vmul.f32 %v14873_v18, %v19377_v58  ;;  %v10234_v24 = vmul.f32 %v14874_v33, %v19377_v58  ;;  %v10235_v57 = vmul.f32 %v14875_v29, %v19377_v58  ;;  %v21056_v33 = vld [vmem:[#allocation59_spill] sm:$0xff] }
 0x8d7   : > { %13568 = vmatmul.mubr.msk.bf16.gmra.mrb[52].mxu1 %vm717_vm5, %v21046_v8  ;;  %v9350_v8 = vpack.c.bf16 %v19201_v32, %v19199_v63 }
 0x8d8   : > { %13571 = vmatprep.mubr.msk.bf16.mxu1 %vm717_vm5, %v21047_v44  ;;  %v10277_v44 = vpack.c.bf16 %v10229_v47, %v10228_v42  ;;  %v14876_v42 = vld [vmem:[%s15416_s19 + $0x130] sm:$0xff]  ;;  %v14877_v47 = vld [vmem:[%s15416_s19 + $0x138] sm:$0xff] }
 0x8d9   : > { %v10236_v16 = vmul.f32 %v14876_v42, %v19377_v58 }
 0x8dc   : > { %13704 = vmatmul.mubr.msk.bf16.gmra.mrb[88].mxu0 %vm571_vm1, %v10275_v31  ;;  %v10278_v31 = vpack.c.bf16 %v10231_v10, %v10230_v59  ;;  %v14878_v59 = vld [vmem:[%s15416_s19 + $0x140] sm:$0xff]  ;;  %v14879_v10 = vld [vmem:[%s15416_s19 + $0x148] sm:$0xff] }
 0x8dd   : > { %13707 = vmatprep.mubr.msk.bf16.mxu0 %vm571_vm1, %v10276_v55  ;;  %v10237_v55 = vmul.f32 %v14877_v47, %v19377_v58  ;;  %v10238_v13 = vmul.f32 %v14878_v59, %v19377_v58  ;;  %v10239_v23 = vmul.f32 %v14879_v10, %v19377_v58 }
 0x8df   : > { %13572 = vmatmul.mubr.msk.bf16.gmra.mrb[56].mxu1 %vm717_vm5, %v21048_v2  ;;  %v10279_v2 = vpack.c.bf16 %v10233_v14, %v10232_v43  ;;  %v14880_v43 = vld [vmem:[%s15416_s19 + $0x150] sm:$0xff]  ;;  %v14881_v14 = vld [vmem:[%s15416_s19 + $0x158] sm:$0xff] }
 0x8e0   : > { %13575 = vmatprep.mubr.msk.bf16.mxu1 %vm717_vm5, %v21049_v6  ;;  %v21051_v6 = vld [vmem:[#allocation80_spill] sm:$0xff]  ;;  %v10240_v18 = vmul.f32 %v14880_v43, %v19377_v58 }
 0x8e4   : > { %13708 = vmatmul.mubr.msk.bf16.gmra.mrb[92].mxu0 %vm571_vm1, %v10277_v44  ;;  %v10281_v44 = vpack.c.bf16 %v10237_v55, %v10236_v16  ;;  %v14884_v16 = vld [vmem:[%s15416_s19 + $0x170] sm:$0xff]  ;;  %v14885_v55 = vld [vmem:[%s15416_s19 + $0x178] sm:$0xff] }
 0x8e5   : > { %13711 = vmatprep.mubr.msk.bf16.mxu0 %vm571_vm1, %v10278_v31  ;;  %v10241_v31 = vmul.f32 %v14881_v14, %v19377_v58  ;;  %v10244_v47 = vmul.f32 %v14884_v16, %v19377_v58 }
 0x8e7   : > { %13576 = vmatmul.mubr.msk.bf16.gmra.mrb[60].mxu1 %vm717_vm5, %v9350_v8  ;;  %v10280_v8 = vpack.c.bf16 %v10235_v57, %v10234_v24  ;;  %v14882_v24 = vld [vmem:[%s15416_s19 + $0x160] sm:$0xff]  ;;  %v14883_v57 = vld [vmem:[%s15416_s19 + $0x168] sm:$0xff] }
 0x8e8   : > { %13579 = vmatprep.mubr.msk.bf16.mxu1 %vm717_vm5, %v21050_v28  ;;  %v21053_v28 = vld [vmem:[#allocation82_spill] sm:$0xff]  ;;  %v10242_v29 = vmul.f32 %v14882_v24, %v19377_v58  ;;  %v10243_v42 = vmul.f32 %v14883_v57, %v19377_v58  ;;  %v14892_v24 = vld [vmem:[%s15416_s19 + $0x1b0] sm:$0xff] }
 0x8e9   : > { %v14893_v57 = vld [vmem:[%s15416_s19 + $0x1b8] sm:$0xff] }
 0x8ec   : > { %13712 = vmatmul.mubr.msk.bf16.gmra.mrb[96].mxu0 %vm571_vm1, %v10279_v2  ;;  %v10282_v2 = vpack.c.bf16 %v10239_v23, %v10238_v13  ;;  %v14887_v13 = vld [vmem:[%s15416_s19 + $0x188] sm:$0xff]  ;;  %v14888_v23 = vld [vmem:[%s15416_s19 + $0x190] sm:$0xff] }
 0x8ed   : > { %13715 = vmatprep.mubr.msk.bf16.mxu0 %vm571_vm1, %v10280_v8  ;;  %v10245_v8 = vmul.f32 %v14885_v55, %v19377_v58  ;;  %v10247_v10 = vmul.f32 %v14887_v13, %v19377_v58  ;;  %v10248_v43 = vmul.f32 %v14888_v23, %v19377_v58 }
 0x8ef   : > { %13580 = vmatmul.mubr.msk.bf16.gmra.mrb[64].mxu1 %vm717_vm5, %v21051_v6  ;;  %v10283_v6 = vpack.c.bf16 %v10241_v31, %v10240_v18  ;;  %v14889_v18 = vld [vmem:[%s15416_s19 + $0x198] sm:$0xff] }
 0x8f0   : > { %13583 = vmatprep.mubr.msk.bf16.mxu1 %vm717_vm5, %v21052_v49  ;;  %v21055_v49 = vld [vmem:[#allocation14_spill] sm:$0xff] }
 0x8f4   : > { %13716 = vmatmul.mubr.msk.bf16.gmra.mrb[100].mxu0 %vm571_vm1, %v10281_v44  ;;  %v10284_v44 = vpack.c.bf16 %v10243_v42, %v10242_v29  ;;  %v10252_v29 = vmul.f32 %v14892_v24, %v19377_v58  ;;  %v10253_v42 = vmul.f32 %v14893_v57, %v19377_v58 }
 0x8f5   : > { %13719 = vmatprep.mubr.msk.bf16.mxu0 %vm571_vm1, %v10282_v2  ;;  %v14890_v2 = vld [vmem:[%s15416_s19 + $0x1a0] sm:$0xff] }
 0x8f7   : > { %13584 = vmatmul.mubr.msk.bf16.gmra.mrb[68].mxu1 %vm717_vm5, %v21053_v28  ;;  %v10285_v28 = vpack.c.bf16 %v10245_v8, %v10244_v47  ;;  %v10289_v47 = vpack.c.bf16 %v10253_v42, %v10252_v29  ;;  %v14895_v8 = vld [vmem:[%s15416_s19 + $0x1c8] sm:$0xff] }
 0x8f8   : > { %13587 = vmatprep.mubr.msk.bf16.mxu1 %vm717_vm5, %v21054_v53  ;;  %v14886_v53 = vld [vmem:[%s15416_s19 + $0x180] sm:$0xff] }
 0x8f9   : > { %v10246_v59 = vmul.f32 %v14886_v53, %v19377_v58 }
 0x8fb   : > { %v10286_v14 = vpack.c.bf16 %v10247_v10, %v10246_v59  ;;  %v14897_v59 = vld [vmem:[%s15416_s19 + $0x1d8] sm:$0xff] }
 0x8fc   : > { %13720 = vmatmul.mubr.msk.bf16.gmra.mrb[104].mxu0 %vm571_vm1, %v10283_v6  ;;  %v10250_v6 = vmul.f32 %v14890_v2, %v19377_v58 }
 0x8fd   : > { %13723 = vmatprep.mubr.msk.bf16.mxu0 %vm571_vm1, %v10284_v44  ;;  %v10255_v44 = vmul.f32 %v14895_v8, %v19377_v58 }
 0x8ff   : > { %13588 = vmatmul.mubr.msk.bf16.gmra.mrb[72].mxu1 %vm717_vm5, %v21055_v49  ;;  %v14891_v49 = vld [vmem:[%s15416_s19 + $0x1a8] sm:$0xff] }
 0x900   : > { %13591 = vmatprep.mubr.msk.bf16.mxu1 %vm717_vm5, %v21056_v33  ;;  %v10251_v33 = vmul.f32 %v14891_v49, %v19377_v58 }
 0x902   : > { %v10288_v16 = vpack.c.bf16 %v10251_v33, %v10250_v6 }
 0x904   : > { %13724 = vmatmul.mubr.msk.bf16.gmra.mrb[108].mxu0 %vm571_vm1, %v10285_v28  ;;  %v14896_v28 = vld [vmem:[%s15416_s19 + $0x1d0] sm:$0xff] }
 0x905   : > { %13727 = vmatprep.mubr.msk.bf16.mxu0 %vm571_vm1, %v10286_v14  ;;  %v10256_v53 = vmul.f32 %v14896_v28, %v19377_v58 }
 0x907   : > { %13592 = vmatmul.mubr.msk.bf16.gmra.mrb[76].mxu1 %vm717_vm5, %v21020_v36  ;;  %v10249_v36 = vmul.f32 %v14889_v18, %v19377_v58 }
 0x908   : > { %13595 = vmatprep.mubr.msk.bf16.mxu1 %vm717_vm5, %v21021_v3  ;;  %v21057_v3 = vld [vmem:[#allocation37_spill] sm:$0xff] }
 0x909   : > { %v10287_v31 = vpack.c.bf16 %v10249_v36, %v10248_v43  ;;  %v14899_v43 = vld [vmem:[%s15416_s19 + $0x1e8] sm:$0xff]  ;;  %v14900_v36 = vld [vmem:[%s15416_s19 + $0x1f0] sm:$0xff] }
 0x90a   : > { %v10259_v18 = vmul.f32 %v14899_v43, %v19377_v58  ;;  %v10260_v14 = vmul.f32 %v14900_v36, %v19377_v58 }
 0x90c   : > { %13728 = vmatmul.mubr.msk.bf16.gmra.mrb[112].mxu0 %vm571_vm1, %v10287_v31  ;;  %v14901_v31 = vld [vmem:[%s15416_s19 + $0x1f8] sm:$0xff] }
 0x90d   : > { %13731 = vmatprep.mubr.msk.bf16.mxu0 %vm571_vm1, %v10288_v16 }
 0x90f   : > { %13596 = vmatmul.mubr.msk.bf16.gmra.mrb[80].mxu1 %vm717_vm5, %v21057_v3  ;;  %v10261_v3 = vmul.f32 %v14901_v31, %v19377_v58 }
 0x910   : > { %13599 = vmatprep.mubr.msk.bf16.mxu1 %vm717_vm5, %v21023_v40  ;;  %v14894_v40 = vld [vmem:[%s15416_s19 + $0x1c0] sm:$0xff] }
 0x911   : > { %v10254_v55 = vmul.f32 %v14894_v40, %v19377_v58  ;;  %v10293_v6 = vpack.c.bf16 %v10261_v3, %v10260_v14 }
 0x913   : > { %v10290_v13 = vpack.c.bf16 %v10255_v44, %v10254_v55 }
 0x914   : > { %13732 = vmatmul.mubr.msk.bf16.gmra.mrb[116].mxu0 %vm571_vm1, %v10289_v47 }
 0x915   : > { %13735 = vmatprep.mubr.msk.bf16.mxu0 %vm571_vm1, %v10290_v13 }
 0x917   : > { %13600 = vmatmul.mubr.msk.bf16.gmra.mrb[84].mxu1 %vm717_vm5, %v21024_v1  ;;  %v10257_v1 = vmul.f32 %v14897_v59, %v19377_v58 }
 0x918   : > { %13603 = vmatprep.mubr.msk.bf16.mxu1 %vm717_vm5, %v21025_v15  ;;  %v14898_v15 = vld [vmem:[%s15416_s19 + $0x1e0] sm:$0xff]  ;;  %s19739_s19 = scalar_lea.vmem %s20173_s8, %s21100_s17  ;;  %s11184_s17 = sshll.u32 %s519_s20, 9 }
 0x919   : > { %v10291_v10 = vpack.c.bf16 %v10257_v1, %v10256_v53  ;;  %v10258_v23 = vmul.f32 %v14898_v15, %v19377_v58  ;;  %v19631_v53 = vld [vmem:[%s19628_s26 + $0x1] ss:$0 sm:$0xff] }
 0x91b   : > { %v10292_v2 = vpack.c.bf16 %v10259_v18, %v10258_v23 }
 0x91c   : > { %13736 = vmatmul.mubr.msk.bf16.gmra.mrb[120].mxu0 %vm571_vm1, %v10291_v10 }
 0x91d   : > { %13739 = vmatprep.mubr.msk.bf16.mxu0 %vm571_vm1, %v10292_v2 }
 0x91f   : > { %13604 = vmatmul.mubr.msk.bf16.gmra.mrb[88].mxu1 %vm717_vm5, %v21026_v30  ;;  %v9351_v30 = vpack.c.bf16 %v19240_v51, %v19238_v38 }
 0x920   : > { %13607 = vmatprep.mubr.msk.bf16.mxu1 %vm717_vm5, %v21027_v52 }
 0x924   : > { %13740 = vmatmul.mubr.msk.bf16.gmra.mrb[124].mxu0 %vm571_vm1, %v10293_v6 }
 0x927   : > { %13608 = vmatmul.mubr.msk.bf16.gmra.mrb[92].mxu1 %vm717_vm5, %v9351_v30 }
 0x928   : > { %13613 = vmatprep.mubr.msk.bf16.mxu1 %vm717_vm5, %v20989_v45 }
 0x92f   : > { %13614 = vmatmul.mubr.msk.bf16.vlgmr.msra.gmra.mrb[32].mxu1 %vm717_vm5, %v18530_v60  ;;  %v5824_v60 = vld [vmem:[#allocation3 + $0x238] sm:$0x1] }
 0x930   : > { %13617 = vmatprep.mubr.msk.bf16.mxu1 %vm717_vm5, %v18538_v0  ;;  %v9722_v0 = vrot.slane %v19199_v63, 1 }
 0x937   : > { %13618 = vmatmul.mubr.msk.bf16.gmra.mrb[36].mxu1 %vm717_vm5, %v18540_v27  ;;  %v9723_v27 = vrot.slane %v19201_v32, 1 }
 0x938   : > { %13621 = vmatprep.mubr.msk.bf16.mxu1 %vm717_vm5, %v18552_v39  ;;  %v9725_v39 = vrot.slane %v5824_v60, 1 }
 0x93f   : > { %13622 = vmatmul.mubr.msk.bf16.gmra.mrb[40].mxu1 %vm717_vm5, %v18567_v9  ;;  %v9724_v9 = vsel %vm2411_vm3, %v9722_v0, %v9723_v27 }
 0x940   : > { %13625 = vmatprep.mubr.msk.bf16.mxu1 %vm717_vm5, %v18588_v62  ;;  %v9726_v62 = vsel %vm2411_vm3, %v9723_v27, %v9725_v39 }
 0x947   : > { %13626 = vmatmul.mubr.msk.bf16.gmra.mrb[44].mxu1 %vm717_vm5, %v18596_v17  ;;  %v9736_v17 = vpack.c.bf16 %v9726_v62, %v9724_v9 }
 0x948   : > { %13629 = vmatprep.mubr.msk.bf16.mxu1 %vm717_vm5, %v18598_v25 }
 0x94f   : > { %13630 = vmatmul.mubr.msk.bf16.gmra.mrb[48].mxu1 %vm717_vm5, %v18608_v35 }
 0x950   : > { %13633 = vmatprep.mubr.msk.bf16.mxu1 %vm717_vm5, %v18618_v7 }
 0x957   : > { %13634 = vmatmul.mubr.msk.bf16.gmra.mrb[52].mxu1 %vm717_vm5, %v18640_v61 }
 0x958   : > { %13637 = vmatprep.mubr.msk.bf16.mxu1 %vm717_vm5, %v18650_v37 }
 0x95f   : > { %13638 = vmatmul.mubr.msk.bf16.gmra.mrb[56].mxu1 %vm717_vm5, %v18652_v22 }
 0x960   : > { %13641 = vmatprep.mubr.msk.bf16.mxu1 %vm717_vm5, %v21028_v41 }
 0x967   : > { %13642 = vmatmul.mubr.msk.bf16.gmra.mrb[60].mxu1 %vm717_vm5, %v9736_v17 }
 0x968   : > { %13645 = vmatprep.mubr.msk.bf16.mxu1 %vm717_vm5, %v18672_v21 }
 0x96f   : > { %13646 = vmatmul.mubr.msk.bf16.gmra.mrb[64].mxu1 %vm717_vm5, %v18692_v56 }
 0x970   : > { %13649 = vmatprep.mubr.msk.bf16.mxu1 %vm717_vm5, %v18700_v26 }
 0x977   : > { %13650 = vmatmul.mubr.msk.bf16.gmra.mrb[68].mxu1 %vm717_vm5, %v18702_v34  ;;  %v21058_v34 = vld [vmem:[#allocation29_spill] sm:$0xff] }
 0x978   : > { %13653 = vmatprep.mubr.msk.bf16.mxu1 %vm717_vm5, %v18712_v46 }
 0x97f   : > { %13654 = vmatmul.mubr.msk.bf16.gmra.mrb[72].mxu1 %vm717_vm5, %v18724_v20  ;;  %v19539_v25 = vpop.f32.mrb[64].mxu0 }
 0x980   : > { %13657 = vmatprep.mubr.msk.bf16.mxu1 %vm717_vm5, %v18746_v48  ;;  %v19541_v35 = vpop.f32.mrb[65].mxu0  ;;  %v5896_v48 = vld [vmem:[#allocation3 + $0x478] sm:$0x1] }
 0x981   : > { %v19543_v7 = vpop.f32.mrb[66].mxu0 }
 0x982   : > { %v19549_v61 = vpop.f32.mrb[67].mxu0 }
 0x987   : > { %13658 = vmatmul.mubr.msk.bf16.gmra.mrb[76].mxu1 %vm717_vm5, %v18754_v5  ;;  %v19551_v37 = vpop.f32.mrb[68].mxu0 }
 0x988   : > { %13661 = vmatprep.mubr.msk.bf16.mxu1 %vm717_vm5, %v18756_v54  ;;  %v19555_v22 = vpop.f32.mrb[69].mxu0  ;;  %v9727_v54 = vrot.slane %v19238_v38, 1 }
 0x989   : > { %v19559_v21 = vpop.f32.mrb[70].mxu0 }
 0x98a   : > { %v19561_v56 = vpop.f32.mrb[71].mxu0 }
 0x98f   : > { %13662 = vmatmul.mubr.msk.bf16.gmra.mrb[80].mxu1 %vm717_vm5, %v18766_v19  ;;  %v19563_v26 = vpop.f32.mrb[72].mxu0  ;;  %v9728_v19 = vrot.slane %v19240_v51, 1 }
 0x990   : > { %13665 = vmatprep.mubr.msk.bf16.mxu1 %vm717_vm5, %v18776_v11  ;;  %v19567_v46 = vpop.f32.mrb[73].mxu0  ;;  %v9730_v11 = vrot.slane %v5896_v48, 1 }
 0x991   : > { %v19571_v20 = vpop.f32.mrb[74].mxu0 }
 0x992   : > { %v19573_v5 = vpop.f32.mrb[75].mxu0  ;;  %v9731_v41 = vsel %vm2411_vm3, %v9728_v19, %v9730_v11 }
 0x997   : > { %13666 = vmatmul.mubr.msk.bf16.gmra.mrb[84].mxu1 %vm717_vm5, %v21058_v34  ;;  %v19577_v45 = vpop.f32.mrb[76].mxu0 }
 0x998   : > { %13669 = vmatprep.mubr.msk.bf16.mxu1 %vm717_vm5, %v18802_v50  ;;  %v19581_v52 = vpop.f32.mrb[77].mxu0  ;;  %v9729_v50 = vsel %vm2411_vm3, %v9727_v54, %v9728_v19 }
 0x999   : > { %v19587_v63 = vpop.f32.mrb[78].mxu0  ;;  %v9737_v32 = vpack.c.bf16 %v9731_v41, %v9729_v50 }
 0x99a   : > { %v19589_v38 = vpop.f32.mrb[79].mxu0 }
 0x99f   : > { %13670 = vmatmul.mubr.msk.bf16.gmra.mrb[88].mxu1 %vm717_vm5, %v18804_v4  ;;  %v19591_v51 = vpop.f32.mrb[80].mxu0 }
 0x9a0   : > { %13673 = vmatprep.mubr.msk.bf16.mxu1 %vm717_vm5, %v21029_v12  ;;  %v19594_v4 = vpop.f32.mrb[81].mxu0 }
 0x9a1   : > { %v19596_v58 = vpop.f32.mrb[82].mxu0 }
 0x9a2   : > { %v19598_v49 = vpop.f32.mrb[83].mxu0 }
 0x9a7   : > { %13674 = vmatmul.mubr.msk.bf16.gmra.mrb[92].mxu1 %vm717_vm5, %v9737_v32  ;;  %v19600_v12 = vpop.f32.mrb[84].mxu0 }
 0x9a8   : > { %v19602_v33 = vpop.f32.mrb[85].mxu0 }
 0x9a9   : > { %v19604_v24 = vpop.f32.mrb[86].mxu0 }
 0x9aa   : > { %v19606_v29 = vpop.f32.mrb[87].mxu0 }
 0x9af   : > { %v19608_v57 = vpop.f32.mrb[88].mxu0 }
 0x9b0   : > { %v19610_v42 = vpop.f32.mrb[89].mxu0 }
 0x9b1   : > { %v19612_v16 = vpop.f32.mrb[90].mxu0 }
 0x9b2   : > { %v19614_v47 = vpop.f32.mrb[91].mxu0 }
 0x9b7   : > { %v19616_v40 = vpop.f32.mrb[92].mxu0 }
 0x9b8   : > { %v19618_v55 = vpop.f32.mrb[93].mxu0 }
 0x9b9   : > { %v19620_v8 = vpop.f32.mrb[94].mxu0 }
 0x9ba   : > { %v19622_v44 = vpop.f32.mrb[95].mxu0 }
 0x9bf   : > { %v13713_v28 = vpop.f32.mrb[96].mxu0 }
 0x9c0   : > { %v19634_v59 = vmul.f32 %v13713_v28, %v19631_v53  ;;  %v10556_v1 = vpop.f32.mrb[97].mxu0 }
 0x9c1   : > { %v19637_v13 = vmul.f32 %v19631_v53, %v10556_v1  ;;  %v13714_v10 = vpop.f32.mrb[98].mxu0 }
 0x9c2   : > { %v19640_v15 = vmul.f32 %v13714_v10, %v19631_v53  ;;  %v10559_v23 = vpop.f32.mrb[99].mxu0 }
 0x9c3   : > { %v19643_v43 = vmul.f32 %v19631_v53, %v10559_v23 }
 0x9c7   : > { %v13717_v18 = vpop.f32.mrb[100].mxu0 }
 0x9c8   : > { %v19646_v36 = vmul.f32 %v13717_v18, %v19631_v53  ;;  %v10572_v14 = vpop.f32.mrb[101].mxu0 }
 0x9c9   : > { %v19649_v31 = vmul.f32 %v19631_v53, %v10572_v14  ;;  %v13718_v3 = vpop.f32.mrb[102].mxu0 }
 0x9ca   : > { %v19652_v2 = vmul.f32 %v13718_v3, %v19631_v53  ;;  %v10575_v30 = vpop.f32.mrb[103].mxu0 }
 0x9cb   : > { %v19655_v6 = vmul.f32 %v19631_v53, %v10575_v30 }
 0x9cf   : > { %v13721_v60 = vpop.f32.mrb[104].mxu0 }
 0x9d0   : > { %v19658_v0 = vmul.f32 %v13721_v60, %v19631_v53  ;;  %v10588_v27 = vpop.f32.mrb[105].mxu0 }
 0x9d1   : > { %v19661_v39 = vmul.f32 %v19631_v53, %v10588_v27  ;;  %v13722_v9 = vpop.f32.mrb[106].mxu0 }
 0x9d2   : > { %v19664_v62 = vmul.f32 %v13722_v9, %v19631_v53  ;;  %v10591_v17 = vpop.f32.mrb[107].mxu0 }
 0x9d3   : > { %v19667_v34 = vmul.f32 %v19631_v53, %v10591_v17 }
 0x9d7   : > { %v13725_v48 = vpop.f32.mrb[108].mxu0 }
 0x9d8   : > { %v19670_v54 = vmul.f32 %v13725_v48, %v19631_v53  ;;  %v10604_v19 = vpop.f32.mrb[109].mxu0 }
 0x9d9   : > { %v19673_v11 = vmul.f32 %v19631_v53, %v10604_v19  ;;  %v13726_v50 = vpop.f32.mrb[110].mxu0 }
 0x9da   : > { %v19676_v41 = vmul.f32 %v13726_v50, %v19631_v53  ;;  %v10607_v32 = vpop.f32.mrb[111].mxu0 }
 0x9db   : > { %v19679_v28 = vmul.f32 %v19631_v53, %v10607_v32 }
 0x9dc   : > { %21059 = vst [vmem:[#allocation46_spill] sm:$0xff] %v19676_v41 }
 0x9dd   : > { %21060 = vst [vmem:[#allocation52_spill] sm:$0xff] %v19679_v28 }
 0x9df   : > { %v13729_v1 = vpop.f32.mrb[112].mxu0 }
 0x9e0   : > { %v19682_v10 = vmul.f32 %v13729_v1, %v19631_v53  ;;  %v10620_v23 = vpop.f32.mrb[113].mxu0 }
 0x9e1   : > { %v19685_v18 = vmul.f32 %v19631_v53, %v10620_v23  ;;  %v13730_v14 = vpop.f32.mrb[114].mxu0 }
 0x9e2   : > { %21061 = vst [vmem:[#allocation53_spill] sm:$0xff] %v19682_v10  ;;  %v19688_v3 = vmul.f32 %v13730_v14, %v19631_v53  ;;  %v10623_v30 = vpop.f32.mrb[115].mxu0 }
 0x9e3   : > { %21062 = vst [vmem:[#allocation33_spill] sm:$0xff] %v19685_v18  ;;  %v19691_v60 = vmul.f32 %v19631_v53, %v10623_v30 }
 0x9e4   : > { %21063 = vst [vmem:[#allocation11_spill] sm:$0xff] %v19688_v3 }
 0x9e5   : > { %21064 = vst [vmem:[#allocation44_spill] sm:$0xff] %v19691_v60 }
 0x9e7   : > { %v13733_v27 = vpop.f32.mrb[116].mxu0 }
 0x9e8   : > { %v19694_v9 = vmul.f32 %v13733_v27, %v19631_v53  ;;  %v10636_v17 = vpop.f32.mrb[117].mxu0 }
 0x9e9   : > { %v19697_v48 = vmul.f32 %v19631_v53, %v10636_v17  ;;  %v13734_v19 = vpop.f32.mrb[118].mxu0 }
 0x9ea   : > { %21065 = vst [vmem:[#allocation75_spill] sm:$0xff] %v19694_v9  ;;  %v19700_v50 = vmul.f32 %v13734_v19, %v19631_v53  ;;  %v10639_v32 = vpop.f32.mrb[119].mxu0 }
 0x9eb   : > { %21066 = vst [vmem:[#allocation49_spill] sm:$0xff] %v19697_v48  ;;  %v19703_v1 = vmul.f32 %v19631_v53, %v10639_v32  ;;  %v19724_v32 = vld [vmem:[%s19628_s26] ss:$0 sm:$0xff]  ;;  %s19773_s26 = scalar_lea.vmem [#allocation4], %s11184_s17  ;;  %s14967_s17 = smov [#allocation4]  }
 0x9ec   : > { %21067 = vst [vmem:[#allocation50_spill] sm:$0xff] %v19700_v50  ;;  %v19751_v48 = vld [vmem:[%s19739_s19] ss:$0 sm:$0xff]  ;;  %s11046_s28 = sshll.u32 %s19773_s26, 4  ;;  %s14906_s15 = sshll.u32 %s14967_s17, 4  ;;  %s20114_s28 = int_to_ptr.vmem [resolvable:$true] %s11046_s28  ;;  %s14907_s15 = int_to_ptr.vmem [resolvable:$false] %s14906_s15 }
 0x9ed   : > { %21068 = vst [vmem:[#allocation79_spill] sm:$0xff] %v19703_v1  ;;  %p14909_p0 = scmp.lt.s32.totalorder %s20114_s28, %s14907_s15 }
 0x9ef   : > { %v13737_v23 = vpop.f32.mrb[120].mxu0 }
 0x9f0   : > { %v19706_v14 = vmul.f32 %v13737_v23, %v19631_v53  ;;  %v10652_v30 = vpop.f32.mrb[121].mxu0 }
 0x9f1   : > { %v19709_v27 = vmul.f32 %v19631_v53, %v10652_v30  ;;  %v13738_v9 = vpop.f32.mrb[122].mxu0 }
 0x9f2   : > { %21069 = vst [vmem:[#allocation41_spill] sm:$0xff] %v19706_v14  ;;  %v19712_v17 = vmul.f32 %v13738_v9, %v19631_v53  ;;  %v10655_v19 = vpop.f32.mrb[123].mxu0  ;;  %v19730_v14 = vld [vmem:[%s19721_s29] ss:$0 sm:$0xff] }
 0x9f3   : > { %21070 = vst [vmem:[#allocation7_spill] sm:$0xff] %v19709_v27  ;;  %v19715_v50 = vmul.f32 %v19631_v53, %v10655_v19 }
 0x9f4   : > { %21071 = vst [vmem:[#allocation38_spill] sm:$0xff] %v19712_v17 }
 0x9f5   : > { %21072 = vst [vmem:[#allocation9_spill] sm:$0xff] %v19715_v50  ;;  %v10699_v50 = vmul.f32 %v19539_v25, %v19724_v32  ;;  %v10700_v25 = vmul.f32 %v19543_v7, %v19724_v32 }
 0x9f7   : > { %v13741_v23 = vpop.f32.mrb[124].mxu0 }
 0x9f8   : > { %v19727_v30 = vmul.f32 %v13741_v23, %v19631_v53  ;;  %v10668_v27 = vpop.f32.mrb[125].mxu0 }
 0x9f9   : > { %v19733_v9 = vmul.f32 %v19631_v53, %v10668_v27  ;;  %v13742_v19 = vpop.f32.mrb[126].mxu0 }
 0x9fa   : > { %21073 = vst [vmem:[#allocation10_spill] sm:$0xff] %v19727_v30  ;;  %v19744_v23 = vmul.f32 %v13742_v19, %v19631_v53  ;;  %v10697_v30 = vmul.f32 %v19724_v32, %v19541_v35  ;;  %v10671_v1 = vpop.f32.mrb[127].mxu0 }
 0x9fb   : > { %21074 = vst [vmem:[#allocation35_spill] sm:$0xff] %v19733_v9  ;;  %v19755_v18 = vmul.f32 %v19631_v53, %v10671_v1 }
 0x9fc   : > { %21075 = vst [vmem:[#allocation58_spill] sm:$0xff] %v19744_v23 }
 0x9fd   : > { %21076 = vst [vmem:[#allocation60_spill] sm:$0xff] %v19755_v18 }
 0xa02   : > { %v13615_v27 = vpop.f32.mrb[32].mxu1 }
 0xa03   : > { %v10122_v9 = vmul.f32 %v13615_v27, %v19730_v14  ;;  %v9787_v17 = vpop.f32.mrb[33].mxu1  ;;  %v10698_v27 = vmul.f32 %v19724_v32, %v19549_v61  ;;  %v10701_v61 = vmul.f32 %v19724_v32, %v19555_v22  ;;  %v10704_v22 = vmul.f32 %v19559_v21, %v19724_v32 }
 0xa04   : > { %v10120_v60 = vmul.f32 %v19730_v14, %v9787_v17  ;;  %v13616_v3 = vpop.f32.mrb[34].mxu1 }
 0xa05   : > { %v10763_v35 = vadd.f32 %v10699_v50, %v10122_v9  ;;  %v10123_v19 = vmul.f32 %v13616_v3, %v19730_v14  ;;  %v9790_v23 = vpop.f32.mrb[35].mxu1  ;;  %v10703_v50 = vmul.f32 %v19551_v37, %v19724_v32 }
 0xa06   : > { %v10761_v10 = vadd.f32 %v10697_v30, %v10120_v60  ;;  %v10121_v28 = vmul.f32 %v19730_v14, %v9790_v23 }
 0xa07   : > { %v10841_v17 = vadd.f32 %v19751_v48, %v10763_v35  ;;  %v10764_v41 = vadd.f32 %v10700_v25, %v10123_v19 }
 0xa08   : > { %v10839_v53 = vadd.f32 %v19751_v48, %v10761_v10  ;;  %v10762_v1 = vadd.f32 %v10698_v27, %v10121_v28 }
 0xa09   : > { %v10905_v18 = vmax.f32 %v10841_v17, 0.0  ;;  %v10842_v7 = vadd.f32 %v19751_v48, %v10764_v41 }
 0xa0a   : > { %v10903_v3 = vmax.f32 %v10839_v53, 0.0  ;;  %v10840_v9 = vadd.f32 %v19751_v48, %v10762_v1  ;;  %v13619_v60 = vpop.f32.mrb[36].mxu1 }
 0xa0b   : > { %10969 = vst.msk [vmem:[%s19773_s26 + $0x10] sm:$0xff] %vm717_vm5, %v10905_v18  ;;  %v10906_v28 = vmax.f32 %v10842_v7, 0.0  ;;  %v10126_v41 = vmul.f32 %v13619_v60, %v19730_v14  ;;  %v9803_v10 = vpop.f32.mrb[37].mxu1  ;;  %v10702_v18 = vmul.f32 %v19724_v32, %v19561_v56 }
 0xa0c   : > { %10967 = vst.msk [vmem:[%s19773_s26] sm:$0xff] %vm717_vm5, %v10903_v3  ;;  %v10904_v37 = vmax.f32 %v10840_v9, 0.0  ;;  %v10124_v30 = vmul.f32 %v19730_v14, %v9803_v10  ;;  %v13620_v23 = vpop.f32.mrb[38].mxu1  ;;  %v10707_v9 = vmul.f32 %v19563_v26, %v19724_v32 }
 0xa0d   : > { %10970 = vst.msk [vmem:[%s19773_s26 + $0x18] sm:$0xff] %vm717_vm5, %v10906_v28  ;;  %v10767_v25 = vadd.f32 %v10703_v50, %v10126_v41  ;;  %v10127_v35 = vmul.f32 %v13620_v23, %v19730_v14  ;;  %v9806_v19 = vpop.f32.mrb[39].mxu1 }
 0xa0e   : > { %10968 = vst.msk [vmem:[%s19773_s26 + $0x8] sm:$0xff] %vm717_vm5, %v10904_v37  ;;  %v10765_v27 = vadd.f32 %v10701_v61, %v10124_v30  ;;  %v10125_v17 = vmul.f32 %v19730_v14, %v9806_v19  ;;  %v10705_v61 = vmul.f32 %v19724_v32, %v19567_v46  ;;  %v10706_v19 = vmul.f32 %v19724_v32, %v19573_v5 }
 0xa0f   : > { %v10845_v53 = vadd.f32 %v19751_v48, %v10767_v25  ;;  %v10768_v1 = vadd.f32 %v10704_v22, %v10127_v35  ;;  %v10708_v22 = vmul.f32 %v19571_v20, %v19724_v32 }
 0xa10   : > { %v10843_v7 = vadd.f32 %v19751_v48, %v10765_v27  ;;  %v10766_v21 = vadd.f32 %v10702_v18, %v10125_v17 }
 0xa11   : > { %v10909_v50 = vmax.f32 %v10845_v53, 0.0  ;;  %v10846_v3 = vadd.f32 %v19751_v48, %v10768_v1 }
 0xa12   : > { %v10907_v60 = vmax.f32 %v10843_v7, 0.0  ;;  %v10844_v56 = vadd.f32 %v19751_v48, %v10766_v21  ;;  %v13623_v28 = vpop.f32.mrb[40].mxu1 }
 0xa13   : > { %10973 = vst.msk [vmem:[%s19773_s26 + $0x30] sm:$0xff] %vm717_vm5, %v10909_v50  ;;  %v10910_v41 = vmax.f32 %v10846_v3, 0.0  ;;  %v10130_v10 = vmul.f32 %v13623_v28, %v19730_v14  ;;  %v9819_v37 = vpop.f32.mrb[41].mxu1  ;;  %v10711_v50 = vmul.f32 %v19577_v45, %v19724_v32 }
 0xa14   : > { %10971 = vst.msk [vmem:[%s19773_s26 + $0x20] sm:$0xff] %vm717_vm5, %v10907_v60  ;;  %v10908_v30 = vmax.f32 %v10844_v56, 0.0  ;;  %v10128_v23 = vmul.f32 %v19730_v14, %v9819_v37  ;;  %v13624_v26 = vpop.f32.mrb[42].mxu1  ;;  %v10712_v37 = vmul.f32 %v19587_v63, %v19724_v32 }
 0xa15   : > { %10974 = vst.msk [vmem:[%s19773_s26 + $0x38] sm:$0xff] %vm717_vm5, %v10910_v41  ;;  %v10771_v25 = vadd.f32 %v10707_v9, %v10130_v10  ;;  %v10131_v46 = vmul.f32 %v13624_v26, %v19730_v14  ;;  %v9822_v35 = vpop.f32.mrb[43].mxu1  ;;  %v10709_v9 = vmul.f32 %v19724_v32, %v19581_v52  ;;  %v10710_v26 = vmul.f32 %v19724_v32, %v19589_v38 }
 0xa16   : > { %10972 = vst.msk [vmem:[%s19773_s26 + $0x28] sm:$0xff] %vm717_vm5, %v10908_v30  ;;  %v10769_v18 = vadd.f32 %v10705_v61, %v10128_v23  ;;  %v10129_v27 = vmul.f32 %v19730_v14, %v9822_v35 }
 0xa17   : > { %v10849_v17 = vadd.f32 %v19751_v48, %v10771_v25  ;;  %v10772_v53 = vadd.f32 %v10708_v22, %v10131_v46 }
 0xa18   : > { %v10847_v1 = vadd.f32 %v19751_v48, %v10769_v18  ;;  %v10770_v20 = vadd.f32 %v10706_v19, %v10129_v27 }
 0xa19   : > { %v10913_v7 = vmax.f32 %v10849_v17, 0.0  ;;  %v10850_v21 = vadd.f32 %v19751_v48, %v10772_v53  ;;  %v10715_v17 = vmul.f32 %v19591_v51, %v19724_v32 }
 0xa1a   : > { %v10911_v3 = vmax.f32 %v10847_v1, 0.0  ;;  %v10848_v5 = vadd.f32 %v19751_v48, %v10770_v20  ;;  %v13627_v60 = vpop.f32.mrb[44].mxu1  ;;  %v10713_v1 = vmul.f32 %v19724_v32, %v19594_v4 }
 0xa1b   : > { %10977 = vst.msk [vmem:[%s19773_s26 + $0x50] sm:$0xff] %vm717_vm5, %v10913_v7  ;;  %v10914_v56 = vmax.f32 %v10850_v21, 0.0  ;;  %v10134_v61 = vmul.f32 %v13627_v60, %v19730_v14  ;;  %v9835_v28 = vpop.f32.mrb[45].mxu1 }
 0xa1c   : > { %10975 = vst.msk [vmem:[%s19773_s26 + $0x40] sm:$0xff] %vm717_vm5, %v10911_v3  ;;  %v10912_v41 = vmax.f32 %v10848_v5, 0.0  ;;  %v10132_v10 = vmul.f32 %v19730_v14, %v9835_v28  ;;  %v13628_v45 = vpop.f32.mrb[46].mxu1 }
 0xa1d   : > { %10978 = vst.msk [vmem:[%s19773_s26 + $0x58] sm:$0xff] %vm717_vm5, %v10914_v56  ;;  %v10775_v30 = vadd.f32 %v10711_v50, %v10134_v61  ;;  %v10135_v52 = vmul.f32 %v13628_v45, %v19730_v14  ;;  %v9838_v23 = vpop.f32.mrb[47].mxu1  ;;  %v10714_v61 = vmul.f32 %v19724_v32, %v19598_v49 }
 0xa1e   : > { %10976 = vst.msk [vmem:[%s19773_s26 + $0x48] sm:$0xff] %vm717_vm5, %v10912_v41  ;;  %v10773_v22 = vadd.f32 %v10709_v9, %v10132_v10  ;;  %v10133_v25 = vmul.f32 %v19730_v14, %v9838_v23  ;;  %v10716_v9 = vmul.f32 %v19596_v58, %v19724_v32  ;;  %v10719_v23 = vmul.f32 %v19600_v12, %v19724_v32 }
 0xa1f   : > { %v10853_v46 = vadd.f32 %v19751_v48, %v10775_v30  ;;  %v10776_v35 = vadd.f32 %v10712_v37, %v10135_v52 }
 0xa20   : > { %v10851_v19 = vadd.f32 %v19751_v48, %v10773_v22  ;;  %v10774_v63 = vadd.f32 %v10710_v26, %v10133_v25  ;;  %v10717_v22 = vmul.f32 %v19724_v32, %v19602_v33 }
 0xa21   : > { %v10917_v18 = vmax.f32 %v10853_v46, 0.0  ;;  %v10854_v27 = vadd.f32 %v19751_v48, %v10776_v35 }
 0xa22   : > { %v10915_v53 = vmax.f32 %v10851_v19, 0.0  ;;  %v10852_v38 = vadd.f32 %v19751_v48, %v10774_v63  ;;  %v13631_v20 = vpop.f32.mrb[48].mxu1 }
 0xa23   : > { %10981 = vst.msk [vmem:[%s19773_s26 + $0x70] sm:$0xff] %vm717_vm5, %v10917_v18  ;;  %v10918_v7 = vmax.f32 %v10854_v27, 0.0  ;;  %v10138_v21 = vmul.f32 %v13631_v20, %v19730_v14  ;;  %v9851_v50 = vpop.f32.mrb[49].mxu1  ;;  %v10720_v27 = vmul.f32 %v19604_v24, %v19724_v32 }
 0xa24   : > { %10979 = vst.msk [vmem:[%s19773_s26 + $0x60] sm:$0xff] %vm717_vm5, %v10915_v53  ;;  %v10916_v3 = vmax.f32 %v10852_v38, 0.0  ;;  %v10136_v5 = vmul.f32 %v19730_v14, %v9851_v50  ;;  %v13632_v51 = vpop.f32.mrb[50].mxu1  ;;  %v10718_v38 = vmul.f32 %v19724_v32, %v19606_v29 }
 0xa25   : > { %10982 = vst.msk [vmem:[%s19773_s26 + $0x78] sm:$0xff] %vm717_vm5, %v10918_v7  ;;  %v10779_v60 = vadd.f32 %v10715_v17, %v10138_v21  ;;  %v10139_v4 = vmul.f32 %v13632_v51, %v19730_v14  ;;  %v9854_v56 = vpop.f32.mrb[51].mxu1  ;;  %v10723_v51 = vmul.f32 %v19608_v57, %v19724_v32 }
 0xa26   : > { %10980 = vst.msk [vmem:[%s19773_s26 + $0x68] sm:$0xff] %vm717_vm5, %v10916_v3  ;;  %v10777_v28 = vadd.f32 %v10713_v1, %v10136_v5  ;;  %v10137_v41 = vmul.f32 %v19730_v14, %v9854_v56 }
 0xa27   : > { %v10857_v10 = vadd.f32 %v19751_v48, %v10779_v60  ;;  %v10780_v45 = vadd.f32 %v10716_v9, %v10139_v4  ;;  %v10721_v60 = vmul.f32 %v19724_v32, %v19610_v42 }
 0xa28   : > { %v10855_v37 = vadd.f32 %v19751_v48, %v10777_v28  ;;  %v10778_v58 = vadd.f32 %v10714_v61, %v10137_v41 }
 0xa29   : > { %v10921_v30 = vmax.f32 %v10857_v10, 0.0  ;;  %v10858_v52 = vadd.f32 %v19751_v48, %v10780_v45  ;;  %v10724_v45 = vmul.f32 %v19612_v16, %v19724_v32 }
 0xa2a   : > { %v10919_v26 = vmax.f32 %v10855_v37, 0.0  ;;  %v10856_v49 = vadd.f32 %v19751_v48, %v10778_v58  ;;  %v13635_v25 = vpop.f32.mrb[52].mxu1 }
 0xa2b   : > { %10985 = vst.msk [vmem:[%s19773_s26 + $0x90] sm:$0xff] %vm717_vm5, %v10921_v30  ;;  %v10922_v46 = vmax.f32 %v10858_v52, 0.0  ;;  %v10142_v35 = vmul.f32 %v13635_v25, %v19730_v14  ;;  %v9867_v19 = vpop.f32.mrb[53].mxu1  ;;  %v10722_v30 = vmul.f32 %v19724_v32, %v19614_v47 }
 0xa2c   : > { %10983 = vst.msk [vmem:[%s19773_s26 + $0x80] sm:$0xff] %vm717_vm5, %v10919_v26  ;;  %v10920_v63 = vmax.f32 %v10856_v49, 0.0  ;;  %v10140_v18 = vmul.f32 %v19730_v14, %v9867_v19  ;;  %v13636_v12 = vpop.f32.mrb[54].mxu1 }
 0xa2d   : > { %10986 = vst.msk [vmem:[%s19773_s26 + $0x98] sm:$0xff] %vm717_vm5, %v10922_v46  ;;  %v10783_v17 = vadd.f32 %v10719_v23, %v10142_v35  ;;  %v10143_v33 = vmul.f32 %v13636_v12, %v19730_v14  ;;  %v9870_v53 = vpop.f32.mrb[55].mxu1  ;;  %v10727_v35 = vmul.f32 %v19616_v40, %v19724_v32 }
 0xa2e   : > { %10984 = vst.msk [vmem:[%s19773_s26 + $0x88] sm:$0xff] %vm717_vm5, %v10920_v63  ;;  %v10781_v1 = vadd.f32 %v10717_v22, %v10140_v18  ;;  %v10141_v20 = vmul.f32 %v19730_v14, %v9870_v53  ;;  %v10725_v63 = vmul.f32 %v19724_v32, %v19618_v55 }
 0xa2f   : > { %v10861_v7 = vadd.f32 %v19751_v48, %v10783_v17  ;;  %v10784_v21 = vadd.f32 %v10720_v27, %v10143_v33 }
 0xa30   : > { %v10859_v50 = vadd.f32 %v19751_v48, %v10781_v1  ;;  %v10782_v24 = vadd.f32 %v10718_v38, %v10141_v20  ;;  %v10728_v38 = vmul.f32 %v19620_v8, %v19724_v32 }
 0xa31   : > { %v10925_v3 = vmax.f32 %v10861_v7, 0.0  ;;  %v10862_v5 = vadd.f32 %v19751_v48, %v10784_v21  ;;  %v10726_v7 = vmul.f32 %v19724_v32, %v19622_v44 }
 0xa32   : > { %v10923_v9 = vmax.f32 %v10859_v50, 0.0  ;;  %v10860_v29 = vadd.f32 %v19751_v48, %v10782_v24  ;;  %v13639_v4 = vpop.f32.mrb[56].mxu1 }
 0xa33   : > { %10989 = vst.msk [vmem:[%s19773_s26 + $0xb0] sm:$0xff] %vm717_vm5, %v10925_v3  ;;  %v10926_v56 = vmax.f32 %v10862_v5, 0.0  ;;  %v10146_v61 = vmul.f32 %v13639_v4, %v19730_v14  ;;  %v9883_v28 = vpop.f32.mrb[57].mxu1 }
 0xa34   : > { %10987 = vst.msk [vmem:[%s19773_s26 + $0xa0] sm:$0xff] %vm717_vm5, %v10923_v9  ;;  %v10924_v41 = vmax.f32 %v10860_v29, 0.0  ;;  %v10144_v10 = vmul.f32 %v19730_v14, %v9883_v28  ;;  %v13640_v57 = vpop.f32.mrb[58].mxu1  ;;  %v19948_v28 = vld [vmem:[%s19739_s19 + $0x1] ss:$0 sm:$0xff]  ;;  %s14902_s19 = scalar_lea.vmem %s20114_s28, 8192 }
 0xa35   : > { %10990 = vst.msk [vmem:[%s19773_s26 + $0xb8] sm:$0xff] %vm717_vm5, %v10926_v56  ;;  %v10787_v37 = vadd.f32 %v10723_v51, %v10146_v61  ;;  %v10147_v42 = vmul.f32 %v13640_v57, %v19730_v14  ;;  %v9886_v58 = vpop.f32.mrb[59].mxu1  ;;  %v19938_v51 = vld [vmem:[%s19721_s29 + $0x1] ss:$0 sm:$0xff]  ;;  %p14903_p11 = scmp.ne.s32.totalorder %s20114_s28, %s14902_s19  ;;  %s14908_s29 = scalar_lea.vmem %s14907_s15, 16384 }
 0xa36   : > { %10988 = vst.msk [vmem:[%s19773_s26 + $0xa8] sm:$0xff] %vm717_vm5, %v10924_v41  ;;  %v10785_v52 = vadd.f32 %v10721_v60, %v10144_v10  ;;  %v10145_v23 = vmul.f32 %v19730_v14, %v9886_v58  ;;  %p14910_p1 = scmp.lt.s32.totalorder %s14908_s29, %s14902_s19 }
 0xa37   : > { %v10865_v26 = vadd.f32 %v19751_v48, %v10787_v37  ;;  %v10788_v49 = vadd.f32 %v10724_v45, %v10147_v42  ;;  %p14904_p12 = pnand %p14903_p11, %p15073_p5 }
 0xa38   : > { %v10863_v22 = vadd.f32 %v19751_v48, %v10785_v52  ;;  %v10786_v16 = vadd.f32 %v10722_v30, %v10145_v23  ;;  %p14911_p2 = por %p14910_p1, %p14909_p0 }
 0xa39   : > { %v10929_v25 = vmax.f32 %v10865_v26, 0.0  ;;  %v10866_v46 = vadd.f32 %v19751_v48, %v10788_v49  ;;  %p14905_p13 = pneg %p14904_p12 }
 0xa3a   : > { %v10927_v19 = vmax.f32 %v10863_v22, 0.0  ;;  %v10864_v47 = vadd.f32 %v19751_v48, %v10786_v16  ;;  %v13643_v18 = vpop.f32.mrb[60].mxu1 }
 0xa3b   : > { %10993 = vst.msk [vmem:[%s19773_s26 + $0xd0] sm:$0xff] %vm717_vm5, %v10929_v25  ;;  %v10930_v12 = vmax.f32 %v10866_v46, 0.0  ;;  %v10150_v27 = vmul.f32 %v13643_v18, %v19730_v14  ;;  %v9899_v17 = vpop.f32.mrb[61].mxu1  ;;  %p14912_p3 = pnand %p14911_p2, %p14905_p13 }
 0xa3c   : > { %10991 = vst.msk [vmem:[%s19773_s26 + $0xc0] sm:$0xff] %vm717_vm5, %v10927_v19  ;;  %v10928_v33 = vmax.f32 %v10864_v47, 0.0  ;;  %v10148_v40 = vmul.f32 %v19730_v14, %v9899_v17  ;;  %v13644_v53 = vpop.f32.mrb[62].mxu1 }
 0xa3d   : > { %10994 = vst.msk [vmem:[%s19773_s26 + $0xd8] sm:$0xff] %vm717_vm5, %v10930_v12  ;;  %v10791_v55 = vadd.f32 %v10727_v35, %v10150_v27  ;;  %v10151_v1 = vmul.f32 %v13644_v53, %v19730_v14  ;;  %v9902_v20 = vpop.f32.mrb[63].mxu1 }
 0xa3e   : > { %10992 = vst.msk [vmem:[%s19773_s26 + $0xc8] sm:$0xff] %vm717_vm5, %v10928_v33  ;;  %v10789_v21 = vadd.f32 %v10725_v63, %v10148_v40  ;;  %v10149_v50 = vmul.f32 %v19730_v14, %v9902_v20 }
 0xa3f   : > { %v10869_v24 = vadd.f32 %v19751_v48, %v10791_v55  ;;  %v10792_v3 = vadd.f32 %v10728_v38, %v10151_v1 }
 0xa40   : > { %v10867_v8 = vadd.f32 %v19751_v48, %v10789_v21  ;;  %v10790_v5 = vadd.f32 %v10726_v7, %v10149_v50 }
 0xa41   : > { %v10933_v9 = vmax.f32 %v10869_v24, 0.0  ;;  %v10870_v29 = vadd.f32 %v19751_v48, %v10792_v3 }
 0xa42   : > { %v10931_v60 = vmax.f32 %v10867_v8, 0.0  ;;  %v10868_v44 = vadd.f32 %v19751_v48, %v10790_v5  ;;  %v13647_v32 = vpop.f32.mrb[64].mxu1 }
 0xa43   : > { %10997 = vst.msk [vmem:[%s19773_s26 + $0xf0] sm:$0xff] %vm717_vm5, %v10933_v9  ;;  %v10934_v14 = vmax.f32 %v10870_v29, 0.0  ;;  %v10154_v4 = vmul.f32 %v13647_v32, %v19938_v51  ;;  %v9915_v56 = vpop.f32.mrb[65].mxu1 }
 0xa44   : > { %10995 = vst.msk [vmem:[%s19773_s26 + $0xe0] sm:$0xff] %vm717_vm5, %v10931_v60  ;;  %v10932_v61 = vmax.f32 %v10868_v44, 0.0  ;;  %v10152_v41 = vmul.f32 %v19938_v51, %v9915_v56  ;;  %v13648_v10 = vpop.f32.mrb[66].mxu1 }
 0xa45   : > { %10998 = vst.msk [vmem:[%s19773_s26 + $0xf8] sm:$0xff] %vm717_vm5, %v10934_v14  ;;  %v10795_v48 = vadd.f32 %v19634_v59, %v10154_v4  ;;  %v10155_v57 = vmul.f32 %v13648_v10, %v19938_v51  ;;  %v9918_v45 = vpop.f32.mrb[67].mxu1 }
 0xa46   : > { %10996 = vst.msk [vmem:[%s19773_s26 + $0xe8] sm:$0xff] %vm717_vm5, %v10932_v61  ;;  %v10793_v37 = vadd.f32 %v19637_v13, %v10152_v41  ;;  %v10153_v42 = vmul.f32 %v19938_v51, %v9918_v45 }
 0xa47   : > { %v10873_v58 = vadd.f32 %v19948_v28, %v10795_v48  ;;  %v10796_v30 = vadd.f32 %v19640_v15, %v10155_v57 }
 0xa48   : > { %v10871_v52 = vadd.f32 %v19948_v28, %v10793_v37  ;;  %v10794_v23 = vadd.f32 %v19643_v43, %v10153_v42 }
 0xa49   : > { %v10937_v59 = vmax.f32 %v10873_v58, 0.0  ;;  %v10874_v26 = vadd.f32 %v19948_v28, %v10796_v30  ;;  %v21077_v30 = vld [vmem:[#allocation46_spill] sm:$0xff] }
 0xa4a   : > { %v10935_v49 = vmax.f32 %v10871_v52, 0.0  ;;  %v10872_v22 = vadd.f32 %v19948_v28, %v10794_v23  ;;  %v13651_v16 = vpop.f32.mrb[68].mxu1 }
 0xa4b   : > { %11001 = vst.msk [vmem:[%s19773_s26 + $0x110] sm:$0xff] %vm717_vm5, %v10937_v59  ;;  %v10938_v13 = vmax.f32 %v10874_v26, 0.0  ;;  %v10158_v25 = vmul.f32 %v13651_v16, %v19938_v51  ;;  %v9931_v46 = vpop.f32.mrb[69].mxu1  ;;  %v21078_v59 = vld [vmem:[#allocation52_spill] sm:$0xff] }
 0xa4c   : > { %10999 = vst.msk [vmem:[%s19773_s26 + $0x100] sm:$0xff] %vm717_vm5, %v10935_v49  ;;  %v10936_v15 = vmax.f32 %v10872_v22, 0.0  ;;  %v10156_v35 = vmul.f32 %v19938_v51, %v9931_v46  ;;  %v13652_v43 = vpop.f32.mrb[70].mxu1 }
 0xa4d   : > { %11002 = vst.msk [vmem:[%s19773_s26 + $0x118] sm:$0xff] %vm717_vm5, %v10938_v13  ;;  %v10799_v19 = vadd.f32 %v19646_v36, %v10158_v25  ;;  %v10159_v47 = vmul.f32 %v13652_v43, %v19938_v51  ;;  %v9934_v63 = vpop.f32.mrb[71].mxu1 }
 0xa4e   : > { %11000 = vst.msk [vmem:[%s19773_s26 + $0x108] sm:$0xff] %vm717_vm5, %v10936_v15  ;;  %v10797_v18 = vadd.f32 %v19649_v31, %v10156_v35  ;;  %v10157_v12 = vmul.f32 %v19938_v51, %v9934_v63 }
 0xa4f   : > { %v10877_v27 = vadd.f32 %v19948_v28, %v10799_v19  ;;  %v10800_v17 = vadd.f32 %v19652_v2, %v10159_v47  ;;  %v21079_v19 = vld [vmem:[#allocation53_spill] sm:$0xff] }
 0xa50   : > { %v10875_v33 = vadd.f32 %v19948_v28, %v10797_v18  ;;  %v10798_v40 = vadd.f32 %v19655_v6, %v10157_v12  ;;  %v21080_v12 = vld [vmem:[#allocation33_spill] sm:$0xff] }
 0xa51   : > { %v10941_v36 = vmax.f32 %v10877_v27, 0.0  ;;  %v10878_v53 = vadd.f32 %v19948_v28, %v10800_v17 }
 0xa52   : > { %v10939_v38 = vmax.f32 %v10875_v33, 0.0  ;;  %v10876_v55 = vadd.f32 %v19948_v28, %v10798_v40  ;;  %v13655_v1 = vpop.f32.mrb[72].mxu1  ;;  %v21081_v40 = vld [vmem:[#allocation11_spill] sm:$0xff] }
 0xa53   : > { %11005 = vst.msk [vmem:[%s19773_s26 + $0x130] sm:$0xff] %vm717_vm5, %v10941_v36  ;;  %v10942_v31 = vmax.f32 %v10878_v53, 0.0  ;;  %v10162_v20 = vmul.f32 %v13655_v1, %v19938_v51  ;;  %v9947_v7 = vpop.f32.mrb[73].mxu1 }
 0xa54   : > { %11003 = vst.msk [vmem:[%s19773_s26 + $0x120] sm:$0xff] %vm717_vm5, %v10939_v38  ;;  %v10940_v2 = vmax.f32 %v10876_v55, 0.0  ;;  %v10160_v21 = vmul.f32 %v19938_v51, %v9947_v7  ;;  %v13656_v6 = vpop.f32.mrb[74].mxu1  ;;  %v21082_v38 = vld [vmem:[#allocation44_spill] sm:$0xff] }
 0xa55   : > { %11006 = vst.msk [vmem:[%s19773_s26 + $0x138] sm:$0xff] %vm717_vm5, %v10942_v31  ;;  %v10803_v50 = vadd.f32 %v19658_v0, %v10162_v20  ;;  %v10163_v24 = vmul.f32 %v13656_v6, %v19938_v51  ;;  %v9950_v3 = vpop.f32.mrb[75].mxu1 }
 0xa56   : > { %11004 = vst.msk [vmem:[%s19773_s26 + $0x128] sm:$0xff] %vm717_vm5, %v10940_v2  ;;  %v10801_v8 = vadd.f32 %v19661_v39, %v10160_v21  ;;  %v10161_v5 = vmul.f32 %v19938_v51, %v9950_v3 }
 0xa57   : > { %v10881_v9 = vadd.f32 %v19948_v28, %v10803_v50  ;;  %v10804_v29 = vadd.f32 %v19664_v62, %v10163_v24 }
 0xa58   : > { %v10879_v60 = vadd.f32 %v19948_v28, %v10801_v8  ;;  %v10802_v44 = vadd.f32 %v19667_v34, %v10161_v5  ;;  %v21083_v5 = vld [vmem:[#allocation75_spill] sm:$0xff] }
 0xa59   : > { %v10945_v0 = vmax.f32 %v10881_v9, 0.0  ;;  %v10882_v32 = vadd.f32 %v19948_v28, %v10804_v29 }
 0xa5a   : > { %v10943_v14 = vmax.f32 %v10879_v60, 0.0  ;;  %v10880_v4 = vadd.f32 %v19948_v28, %v10802_v44  ;;  %v13659_v56 = vpop.f32.mrb[76].mxu1  ;;  %v21084_v44 = vld [vmem:[#allocation49_spill] sm:$0xff] }
 0xa5b   : > { %11009 = vst.msk [vmem:[%s19773_s26 + $0x150] sm:$0xff] %vm717_vm5, %v10945_v0  ;;  %v10946_v39 = vmax.f32 %v10882_v32, 0.0  ;;  %v10166_v61 = vmul.f32 %v13659_v56, %v19938_v51  ;;  %v9963_v41 = vpop.f32.mrb[77].mxu1 }
 0xa5c   : > { %11007 = vst.msk [vmem:[%s19773_s26 + $0x140] sm:$0xff] %vm717_vm5, %v10943_v14  ;;  %v10944_v62 = vmax.f32 %v10880_v4, 0.0  ;;  %v10164_v10 = vmul.f32 %v19938_v51, %v9963_v41  ;;  %v13660_v34 = vpop.f32.mrb[78].mxu1  ;;  %v21085_v4 = vld [vmem:[#allocation50_spill] sm:$0xff] }
 0xa5d   : > { %11010 = vst.msk [vmem:[%s19773_s26 + $0x158] sm:$0xff] %vm717_vm5, %v10946_v39  ;;  %v10807_v48 = vadd.f32 %v19670_v54, %v10166_v61  ;;  %v10167_v57 = vmul.f32 %v13660_v34, %v19938_v51  ;;  %v9966_v45 = vpop.f32.mrb[79].mxu1  ;;  %v21086_v61 = vld [vmem:[#allocation79_spill] sm:$0xff] }
 0xa5e   : > { %11008 = vst.msk [vmem:[%s19773_s26 + $0x148] sm:$0xff] %vm717_vm5, %v10944_v62  ;;  %v10805_v37 = vadd.f32 %v19673_v11, %v10164_v10  ;;  %v10165_v42 = vmul.f32 %v19938_v51, %v9966_v45 }
 0xa5f   : > { %v10885_v58 = vadd.f32 %v19948_v28, %v10807_v48  ;;  %v10808_v52 = vadd.f32 %v21077_v30, %v10167_v57 }
 0xa60   : > { %v10883_v23 = vadd.f32 %v19948_v28, %v10805_v37  ;;  %v10806_v26 = vadd.f32 %v21078_v59, %v10165_v42 }
 0xa61   : > { %v10949_v54 = vmax.f32 %v10885_v58, 0.0  ;;  %v10886_v49 = vadd.f32 %v19948_v28, %v10808_v52 }
 0xa62   : > { %v10947_v22 = vmax.f32 %v10883_v23, 0.0  ;;  %v10884_v16 = vadd.f32 %v19948_v28, %v10806_v26  ;;  %v13663_v13 = vpop.f32.mrb[80].mxu1  ;;  %v21087_v23 = vld [vmem:[#allocation41_spill] sm:$0xff] }
 0xa63   : > { %11013 = vst.msk [vmem:[%s19773_s26 + $0x170] sm:$0xff] %vm717_vm5, %v10949_v54  ;;  %v10950_v11 = vmax.f32 %v10886_v49, 0.0  ;;  %v10170_v25 = vmul.f32 %v13663_v13, %v19938_v51  ;;  %v9979_v46 = vpop.f32.mrb[81].mxu1  ;;  %v21088_v49 = vld [vmem:[#allocation7_spill] sm:$0xff] }
 0xa64   : > { %11011 = vst.msk [vmem:[%s19773_s26 + $0x160] sm:$0xff] %vm717_vm5, %v10947_v22  ;;  %v10948_v15 = vmax.f32 %v10884_v16, 0.0  ;;  %v10168_v35 = vmul.f32 %v19938_v51, %v9979_v46  ;;  %v13664_v43 = vpop.f32.mrb[82].mxu1 }
 0xa65   : > { %11014 = vst.msk [vmem:[%s19773_s26 + $0x178] sm:$0xff] %vm717_vm5, %v10950_v11  ;;  %v10811_v47 = vadd.f32 %v21079_v19, %v10170_v25  ;;  %v10171_v63 = vmul.f32 %v13664_v43, %v19938_v51  ;;  %v9982_v18 = vpop.f32.mrb[83].mxu1  ;;  %v21089_v11 = vld [vmem:[#allocation38_spill] sm:$0xff] }
 0xa66   : > { %11012 = vst.msk [vmem:[%s19773_s26 + $0x168] sm:$0xff] %vm717_vm5, %v10948_v15  ;;  %v10809_v27 = vadd.f32 %v21080_v12, %v10168_v35  ;;  %v10169_v17 = vmul.f32 %v19938_v51, %v9982_v18  ;;  %v21090_v15 = vld [vmem:[#allocation9_spill] sm:$0xff] }
 0xa67   : > { %v10889_v33 = vadd.f32 %v19948_v28, %v10811_v47  ;;  %v10812_v36 = vadd.f32 %v21081_v40, %v10171_v63 }
 0xa68   : > { %v10887_v53 = vadd.f32 %v19948_v28, %v10809_v27  ;;  %v10810_v55 = vadd.f32 %v21082_v38, %v10169_v17 }
 0xa69   : > { %v10953_v1 = vmax.f32 %v10889_v33, 0.0  ;;  %v10890_v31 = vadd.f32 %v19948_v28, %v10812_v36 }
 0xa6a   : > { %v10951_v20 = vmax.f32 %v10887_v53, 0.0  ;;  %v10888_v7 = vadd.f32 %v19948_v28, %v10810_v55  ;;  %v13667_v2 = vpop.f32.mrb[84].mxu1  ;;  %v21091_v53 = vld [vmem:[#allocation10_spill] sm:$0xff] }
 0xa6b   : > { %11017 = vst.msk [vmem:[%s19773_s26 + $0x190] sm:$0xff] %vm717_vm5, %v10953_v1  ;;  %v10954_v21 = vmax.f32 %v10890_v31, 0.0  ;;  %v10174_v6 = vmul.f32 %v13667_v2, %v19938_v51  ;;  %v9995_v50 = vpop.f32.mrb[85].mxu1  ;;  %v21092_v31 = vld [vmem:[#allocation35_spill] sm:$0xff] }
 0xa6c   : > { %11015 = vst.msk [vmem:[%s19773_s26 + $0x180] sm:$0xff] %vm717_vm5, %v10951_v20  ;;  %v10952_v24 = vmax.f32 %v10888_v7, 0.0  ;;  %v10172_v3 = vmul.f32 %v19938_v51, %v9995_v50  ;;  %v13668_v8 = vpop.f32.mrb[86].mxu1 }
 0xa6d   : > { %11018 = vst.msk [vmem:[%s19773_s26 + $0x198] sm:$0xff] %vm717_vm5, %v10954_v21  ;;  %v10815_v9 = vadd.f32 %v21083_v5, %v10174_v6  ;;  %v10175_v29 = vmul.f32 %v13668_v8, %v19938_v51  ;;  %v9998_v60 = vpop.f32.mrb[87].mxu1  ;;  %v21093_v21 = vld [vmem:[#allocation58_spill] sm:$0xff] }
 0xa6e   : > { %11016 = vst.msk [vmem:[%s19773_s26 + $0x188] sm:$0xff] %vm717_vm5, %v10952_v24  ;;  %v10813_v0 = vadd.f32 %v21084_v44, %v10172_v3  ;;  %v10173_v32 = vmul.f32 %v19938_v51, %v9998_v60  ;;  %v21094_v24 = vld [vmem:[#allocation60_spill] sm:$0xff] }
 0xa6f   : > { %v10893_v14 = vadd.f32 %v19948_v28, %v10815_v9  ;;  %v10816_v56 = vadd.f32 %v21085_v4, %v10175_v29 }
 0xa70   : > { %v10891_v39 = vadd.f32 %v19948_v28, %v10813_v0  ;;  %v10814_v41 = vadd.f32 %v21086_v61, %v10173_v32 }
 0xa71   : > { %v10957_v62 = vmax.f32 %v10893_v14, 0.0  ;;  %v10894_v10 = vadd.f32 %v19948_v28, %v10816_v56 }
 0xa72   : > { %v10955_v34 = vmax.f32 %v10891_v39, 0.0  ;;  %v10892_v48 = vadd.f32 %v19948_v28, %v10814_v41  ;;  %v13671_v57 = vpop.f32.mrb[88].mxu1 }
 0xa73   : > { %11021 = vst.msk [vmem:[%s19773_s26 + $0x1b0] sm:$0xff] %vm717_vm5, %v10957_v62  ;;  %v10958_v45 = vmax.f32 %v10894_v10, 0.0  ;;  %v10178_v37 = vmul.f32 %v13671_v57, %v19938_v51  ;;  %v10011_v42 = vpop.f32.mrb[89].mxu1 }
 0xa74   : > { %11019 = vst.msk [vmem:[%s19773_s26 + $0x1a0] sm:$0xff] %vm717_vm5, %v10955_v34  ;;  %v10956_v58 = vmax.f32 %v10892_v48, 0.0  ;;  %v10176_v30 = vmul.f32 %v19938_v51, %v10011_v42  ;;  %v13672_v52 = vpop.f32.mrb[90].mxu1 }
 0xa75   : > { %11022 = vst.msk [vmem:[%s19773_s26 + $0x1b8] sm:$0xff] %vm717_vm5, %v10958_v45  ;;  %v10819_v59 = vadd.f32 %v21087_v23, %v10178_v37  ;;  %v10179_v26 = vmul.f32 %v13672_v52, %v19938_v51  ;;  %v10014_v54 = vpop.f32.mrb[91].mxu1 }
 0xa76   : > { %11020 = vst.msk [vmem:[%s19773_s26 + $0x1a8] sm:$0xff] %vm717_vm5, %v10956_v58  ;;  %v10817_v22 = vadd.f32 %v21088_v49, %v10176_v30  ;;  %v10177_v16 = vmul.f32 %v19938_v51, %v10014_v54 }
 0xa77   : > { %v10897_v13 = vadd.f32 %v19948_v28, %v10819_v59  ;;  %v10820_v25 = vadd.f32 %v21089_v11, %v10179_v26 }
 0xa78   : > { %v10895_v46 = vadd.f32 %v19948_v28, %v10817_v22  ;;  %v10818_v35 = vadd.f32 %v21090_v15, %v10177_v16 }
 0xa79   : > { %v10961_v43 = vmax.f32 %v10897_v13, 0.0  ;;  %v10898_v19 = vadd.f32 %v19948_v28, %v10820_v25 }
 0xa7a   : > { %v10959_v47 = vmax.f32 %v10895_v46, 0.0  ;;  %v10896_v63 = vadd.f32 %v19948_v28, %v10818_v35  ;;  %v13675_v18 = vpop.f32.mrb[92].mxu1 }
 0xa7b   : > { %11025 = vst.msk [vmem:[%s19773_s26 + $0x1d0] sm:$0xff] %vm717_vm5, %v10961_v43  ;;  %v10962_v12 = vmax.f32 %v10898_v19, 0.0  ;;  %v10182_v27 = vmul.f32 %v13675_v18, %v19938_v51  ;;  %v10027_v17 = vpop.f32.mrb[93].mxu1 }
 0xa7c   : > { %11023 = vst.msk [vmem:[%s19773_s26 + $0x1c0] sm:$0xff] %vm717_vm5, %v10959_v47  ;;  %v10960_v33 = vmax.f32 %v10896_v63, 0.0  ;;  %v10180_v40 = vmul.f32 %v19938_v51, %v10027_v17  ;;  %v13676_v36 = vpop.f32.mrb[94].mxu1 }
 0xa7d   : > { %11026 = vst.msk [vmem:[%s19773_s26 + $0x1d8] sm:$0xff] %vm717_vm5, %v10962_v12  ;;  %v10823_v38 = vadd.f32 %v21091_v53, %v10182_v27  ;;  %v10183_v55 = vmul.f32 %v13676_v36, %v19938_v51  ;;  %v10030_v1 = vpop.f32.mrb[95].mxu1 }
 0xa7e   : > { %11024 = vst.msk [vmem:[%s19773_s26 + $0x1c8] sm:$0xff] %vm717_vm5, %v10960_v33  ;;  %v10821_v20 = vadd.f32 %v21092_v31, %v10180_v40  ;;  %v10181_v7 = vmul.f32 %v19938_v51, %v10030_v1 }
 0xa7f   : > { %v10901_v2 = vadd.f32 %v19948_v28, %v10823_v38  ;;  %v10824_v6 = vadd.f32 %v21093_v21, %v10183_v55 }
 0xa80   : > { %v10899_v50 = vadd.f32 %v19948_v28, %v10821_v20  ;;  %v10822_v3 = vadd.f32 %v21094_v24, %v10181_v7 }
 0xa81   : > { %v10965_v8 = vmax.f32 %v10901_v2, 0.0  ;;  %v10902_v5 = vadd.f32 %v19948_v28, %v10824_v6 }
 0xa82   : > { %v10963_v9 = vmax.f32 %v10899_v50, 0.0  ;;  %v10900_v51 = vadd.f32 %v19948_v28, %v10822_v3 }
 0xa83   : > { %11029 = vst.msk [vmem:[%s19773_s26 + $0x1f0] sm:$0xff] %vm717_vm5, %v10965_v8  ;;  %v10966_v29 = vmax.f32 %v10902_v5, 0.0 }
 0xa84   : > { %11027 = vst.msk [vmem:[%s19773_s26 + $0x1e0] sm:$0xff] %vm717_vm5, %v10963_v9  ;;  %v10964_v60 = vmax.f32 %v10900_v51, 0.0 }
 0xa85   : > { %11030 = vst.msk [vmem:[%s19773_s26 + $0x1f8] sm:$0xff] %vm717_vm5, %v10966_v29 }
 0xa86   : > { %11028 = vst.msk [vmem:[%s19773_s26 + $0x1e8] sm:$0xff] %vm717_vm5, %v10964_v60 }
 0xa87   : > { %14915 = shalt.err (!%p14912_p3)
}
 0xa88   : > { %s14916_s20 = scalar_lea.hbm %s20112_s18, 8192  ;;  %s14920_s17 = scalar_lea.hbm %s20177_s12, 32768 }
 0xa89   : > { %p14917_p4 = scmp.ne.s32.totalorder %s20112_s18, %s14916_s20  ;;  %p14921_p9 = scmp.lt.u32.totalorder %s20112_s18, %s20177_s12 }
 0xa8a   : > { %p14922_p10 = scmp.lt.u32.totalorder %s14920_s17, %s14916_s20  ;;  %p14924_p12 = scmp.lt.u32.totalorder %s14916_s20, %s20112_s18 }
 0xa8b   : > { %p14918_p7 = pnand %p14917_p4, %p15073_p5 }
 0xa8c   : > { %p14923_p11 = por %p14922_p10, %p14921_p9 }
 0xa8d   : > { %p14919_p8 = pneg %p14918_p7 }
 0xa8e   : > { %p14925_p13 = por %p14924_p12, %p14923_p11 }
 0xa90   : > { %p14926_p0 = pnand %p14925_p13, %p14919_p8 }
 0xa92   : > { %14929 = shalt.err (!%p14926_p0)
}
 0xa93   : > { %s14968_s19 = smov 128   ;;  %s14969_s29 = smov 8  }
 0xa94   : > { %14780 = dma.vmem_to_hbm [thread:$0]  (%p15073_p5), %s20114_s28, 8192, %s20112_s18, %s20124_s25, %s14968_s19, %s14968_s19, %s14969_s29  }
 0xa95 PF: > { %p14786_p1 = scmp.ge.s32.totalorder %s14964_s24, 2  ;;  %s11061_s0 = sand.u32 1, %s14952_s21  }
 0xa96   : > { %s11062_s20 = scalar_lea.sflag [#allocation5], %s11061_s0 }
 0xa97   : > { %p14783_p2 = pnand %p14786_p1, %p15077_p6 }
 0xa99   : > { %14947 = dma.done.wait (!%p14783_p2), %s11062_s20, 8192  }
 0xa9a   : > { %14949 = vsyncadd (!%p14783_p2), %s11062_s20, 4294959104  ;;  %p22_p3 = scmp.ge.s32.totalorder %s15060_s27, 6   ;;  %s21095_s21 = smov %s14956_s22 }
 0xa9b   : > { %s21096_s22 = smov %s14960_s23  ;;  %s21097_s23 = smov %s15071_s30 }
 0xa9c   : > { %s21098_s24 = smov %s15060_s27  ;;  %24 = sbr.rel (!%p22_p3) target bundleno = 5 (0x5), region = 145 }
 0xaa3   :  { %11067 = vsyncpa [#allocation5], 1 }
 0xaa4   :  { %11069 = vsyncpa [#allocation5 + $0x1], 1 }

</bundles_post_ra>
